<compile_context>
chip_gen: v6e
topology: v6e:2x2x1
jax: 0.10.0
libtpu: 0.0.40
codegen_flags: <defaults>
</compile_context>

<pallas_src>
import math

import jax
import jax.numpy as jnp
from jax.experimental import pallas as pl
from jax.experimental.pallas import tpu as pltpu

H = 128              # LSTM hidden size (fixed by the module)
MLP_ROWS = 1664      # rows of the consolidated tail-MLP weight slab
N_PARAMS = 7         # parameter slabs passed to the kernel


def make_kernel(T, BP):
    G4 = 4 * H
    f32 = jnp.float32
    bf16 = jnp.bfloat16

    def kernel(past_ref, dtdb_ref,
               w_in0_ref, w_in1_ref, u0_ref, u1_ref, lstm_b_ref,
               mlp_hbm_ref, vec_ref,
               out_ref,
               gx0_ref, gx1_ref, h0_ref, mlp_ref, dma_sem):
        # ---- Start the tail-MLP weight DMA now; it is only needed after the
        # ---- serial LSTM recurrence, so the copy is fully hidden behind it.
        mlp_cp = pltpu.make_async_copy(mlp_hbm_ref, mlp_ref, dma_sem)
        mlp_cp.start()

        def gates(g, c):
            # g: (BP, 4H) gate pre-activations in PyTorch order i, f, g, o.
            i = jax.nn.sigmoid(g[:, 0:H])
            f = jax.nn.sigmoid(g[:, H:2 * H])
            gg = jnp.tanh(g[:, 2 * H:3 * H])
            o = jax.nn.sigmoid(g[:, 3 * H:4 * H])
            c_new = f * c + i * gg
            return o * jnp.tanh(c_new), c_new

        zeros = jnp.zeros((BP, H), f32)

        # ---- Hoisted layer-0 input projections (both directions, biases
        # ---- folded): ONE (T*BP, F) x (F, 8H) matmul.
        x_all = past_ref[...].astype(bf16)
        gx0_ref[...] = (jnp.dot(x_all, w_in0_ref[...], preferred_element_type=f32)
                        + lstm_b_ref[0:1, :])

        # ---- Layer 0: fwd + bwd chains, one block-diagonal recurrent dot
        # ---- per step (fully unrolled, static slices).
        u0 = u0_ref[...]                                   # (2H, 8H) bf16
        hf = hb = zeros
        cf = cb = zeros
        for t in range(T):
            tb = T - 1 - t
            rf, rb = t * BP, tb * BP
            if t == 0:
                gf = gx0_ref[rf:rf + BP, 0:G4]
                gb = gx0_ref[rb:rb + BP, G4:2 * G4]
            else:
                hfb = jnp.concatenate([hf, hb], axis=-1).astype(bf16)
                rec = jnp.dot(hfb, u0, preferred_element_type=f32)     # (BP, 8H)
                gf = gx0_ref[rf:rf + BP, 0:G4] + rec[:, 0:G4]
                gb = gx0_ref[rb:rb + BP, G4:2 * G4] + rec[:, G4:2 * G4]
            hf, cf = gates(gf, cf)
            hb, cb = gates(gb, cb)
            h0_ref[rf:rf + BP, 0:H] = hf
            h0_ref[rb:rb + BP, H:2 * H] = hb

        # ---- Hoisted layer-1 forward input projection: single K=2H matmul
        # ---- over the bidirectional layer-0 output.
        h0_all = h0_ref[...].astype(bf16)
        gx1_ref[...] = (jnp.dot(h0_all, w_in1_ref[0], preferred_element_type=f32)
                        + lstm_b_ref[1:2, 0:G4])

        # ---- Layer 1 forward recurrence (fully unrolled).
        u1 = u1_ref[...]                                   # (H, 4H) bf16
        h1 = c1 = zeros
        for t in range(T):
            r = t * BP
            if t == 0:
                g = gx1_ref[r:r + BP, :]
            else:
                g = gx1_ref[r:r + BP, :] + jnp.dot(
                    h1.astype(bf16), u1, preferred_element_type=f32)
            h1, c1 = gates(g, c1)

        # ---- Layer-1 backward at the last position: lstm_out[:, -1, H:] is
        # ---- the reverse chain's FIRST step from a zero state -> no
        # ---- recurrent matmul needed.
        h0_last = h0_ref[(T - 1) * BP:T * BP, :].astype(bf16)          # (BP, 2H)
        g1b = (jnp.dot(h0_last, w_in1_ref[1], preferred_element_type=f32)
               + lstm_b_ref[1:2, G4:2 * G4])
        h1b, _ = gates(g1b, zeros)

        last_hidden = jnp.concatenate([h1, h1b], axis=-1).astype(bf16)  # (BP, 2H)

        # ---- Tail-MLP weights must have landed (DMA overlapped with LSTM).
        mlp_cp.wait()

        # ---- past_projection: Linear + ReLU + BatchNorm(eval) -------------
        y = jnp.maximum(
            jnp.dot(last_hidden, mlp_ref[0:256, :], preferred_element_type=f32)
            + vec_ref[0:1, :], 0.0)
        y = y * vec_ref[1:2, :] + vec_ref[2:3, :]

        # ---- attention (L == 1 -> softmax == 1 -> out = gamma*V(y) + y).
        xa = (jnp.dot(y.astype(bf16), mlp_ref[256:512, :], preferred_element_type=f32)
              + vec_ref[3:4, :] + y)

        # ---- datetime + dayback encoders fused into two block-diagonal
        # ---- matmuls; their BatchNorms are folded into the following weights.
        e1 = jnp.maximum(
            jnp.dot(dtdb_ref[...].astype(bf16), mlp_ref[512:768, 0:128],
                    preferred_element_type=f32)
            + vec_ref[4:5, 0:128], 0.0)                                 # (BP, 128)
        e2 = jnp.maximum(
            jnp.dot(e1.astype(bf16), mlp_ref[768:896, :], preferred_element_type=f32)
            + vec_ref[5:6, :], 0.0)                                     # (BP, 256)

        # ---- fusion: concat -> single K=512 matmul (encoder BN2 folded in).
        comb = jnp.concatenate([xa, e2], axis=-1).astype(bf16)          # (BP, 512)
        fused = jnp.maximum(
            jnp.dot(comb, mlp_ref[896:1408, :], preferred_element_type=f32)
            + vec_ref[6:7, :], 0.0)                                     # (BP, 256)

        # ---- predictor (fusion BN folded into W1, predictor BN into W2 row).
        hq = jnp.maximum(
            jnp.dot(fused.astype(bf16), mlp_ref[1408:1664, 0:128],
                    preferred_element_type=f32)
            + vec_ref[7:8, 0:128], 0.0)                                 # (BP, 128)
        pred = jnp.maximum(
            jnp.sum(hq * vec_ref[9:10, 0:128], axis=-1, keepdims=True)
            + vec_ref[8:9, 0:1], 0.0)
        out_ref[...] = jnp.clip(pred, 0.0, 1000.0)

    return kernel


def make_params(key, F):
    """Build the 7 consolidated parameter slabs (PyTorch-style random init,
    eval-mode BatchNorm with default running stats folded where possible)."""
    ks = iter(jax.random.split(key, 64))

    def u(shape, fan_in):
        bound = 1.0 / math.sqrt(fan_in)
        return jax.random.uniform(next(ks), shape, jnp.float32, -bound, bound)

    def bn(n):
        scale = jnp.full((n,), 1.0 / math.sqrt(1.0 + 1e-5), jnp.float32)
        shift = jnp.zeros((n,), jnp.float32)
        return scale, shift

    # ---- LSTM (gate order i,f,g,o); weights transposed to (in, out);
    # ---- b_ih + b_hh folded into a single bias per direction.
    def lstm_dir(din):
        return u((din, 4 * H), H), u((H, 4 * H), H), u((4 * H,), H) + u((4 * H,), H)

    w0f, u0f, b0f = lstm_dir(F)
    w0b, u0b, b0b = lstm_dir(F)
    w1f, u1f, b1f = lstm_dir(2 * H)
    w1b, _u1b, b1b = lstm_dir(2 * H)   # layer-1 reverse recurrent weight unused

    w_in0 = jnp.concatenate([w0f, w0b], axis=1)              # (F, 1024)
    w_in1 = jnp.stack([w1f, w1b])                            # (2, 256, 512)
    u0_bd = jnp.zeros((2 * H, 8 * H), jnp.float32)           # blockdiag(u0f, u0b)
    u0_bd = u0_bd.at[0:H, 0:4 * H].set(u0f).at[H:2 * H, 4 * H:8 * H].set(u0b)
    lstm_b = jnp.stack([jnp.concatenate([b0f, b0b]),
                        jnp.concatenate([b1f, b1b])])        # (2, 1024)

    # ---- past_projection + attention value conv (gamma = 0 at init) ----
    Wp, bp = u((2 * H, 256), 2 * H), u((256,), 2 * H)
    sp, tp = bn(256)
    Wv, bv = u((256, 256), 256), u((256,), 256)
    gamma = 0.0                                              # module initialises gamma to 0
    bv_f = gamma * bv

    # ---- datetime (3->64->128) / dayback (4->64->128) encoders ----
    Wd1, bd1 = u((3, 64), 3), u((64,), 3)
    sd1, td1 = bn(64)
    Wd2, bd2 = u((64, 128), 64), u((128,), 64)
    sd2, td2 = bn(128)
    Wb1, bb1 = u((4, 64), 4), u((64,), 4)
    sb1, tb1 = bn(64)
    Wb2, bb2 = u((64, 128), 64), u((128,), 64)
    sb2, tb2 = bn(128)

    # Block-diagonal fused encoder layer 1: dt features at input lanes 0:3,
    # db features at lanes 128:132 of the padded (BP, 256) input.
    w_enc1 = jnp.zeros((256, 128), jnp.float32)
    w_enc1 = w_enc1.at[0:3, 0:64].set(Wd1).at[128:132, 64:128].set(Wb1)
    enc1_b = jnp.concatenate([bd1, bb1])                     # (128,)

    # Block-diagonal fused encoder layer 2, with BN1 scale/shift folded in.
    w_enc2 = jnp.zeros((128, 256), jnp.float32)
    w_enc2 = w_enc2.at[0:64, 0:128].set(sd1[:, None] * Wd2)
    w_enc2 = w_enc2.at[64:128, 128:256].set(sb1[:, None] * Wb2)
    enc2_b = jnp.concatenate([bd2 + td1 @ Wd2, bb2 + tb1 @ Wb2])   # (256,)

    # ---- fusion (512 -> 256); encoder BN2 folded into rows 256:512 + bias ----
    Wf, bf = u((512, 256), 512), u((256,), 512)
    sf, tf = bn(256)
    enc2_scale = jnp.concatenate([sd2, sb2])
    enc2_shift = jnp.concatenate([td2, tb2])
    w_fuse = jnp.concatenate([Wf[0:256], enc2_scale[:, None] * Wf[256:512]], axis=0)
    bf_f = bf + enc2_shift @ Wf[256:512]

    # ---- predictor (256 -> 128 -> 1); fusion BN folded into W1, predictor BN into W2.
    W1, b1 = u((256, 128), 256), u((128,), 256)
    s1, t1 = bn(128)
    W2, b2 = u((128, 1), 128), u((1,), 128)
    w_pred1 = sf[:, None] * W1
    b1_f = b1 + tf @ W1
    w_pred2_row = s1 * W2[:, 0]                              # (128,)
    b2_scalar = b2[0] + t1 @ W2[:, 0]

    # ---- consolidated tail-MLP weight slab (bf16, DMA-overlapped) ----
    mlp_w = jnp.zeros((MLP_ROWS, 256), jnp.float32)
    mlp_w = mlp_w.at[0:256, :].set(Wp)
    mlp_w = mlp_w.at[256:512, :].set(gamma * Wv)
    mlp_w = mlp_w.at[512:768, 0:128].set(w_enc1)
    mlp_w = mlp_w.at[768:896, :].set(w_enc2)
    mlp_w = mlp_w.at[896:1408, :].set(w_fuse)
    mlp_w = mlp_w.at[1408:1664, 0:128].set(w_pred1)

    # ---- bias / BN vector slab ----
    vec = jnp.zeros((10, 256), jnp.float32)
    vec = vec.at[0, :].set(bp)
    vec = vec.at[1, :].set(sp)
    vec = vec.at[2, :].set(tp)
    vec = vec.at[3, :].set(bv_f)
    vec = vec.at[4, 0:128].set(enc1_b)
    vec = vec.at[5, :].set(enc2_b)
    vec = vec.at[6, :].set(bf_f)
    vec = vec.at[7, 0:128].set(b1_f)
    vec = vec.at[8, 0].set(b2_scalar)
    vec = vec.at[9, 0:128].set(w_pred2_row)

    bf16 = jnp.bfloat16
    params = [w_in0.astype(bf16), w_in1.astype(bf16), u0_bd.astype(bf16),
              u1f.astype(bf16), lstm_b, mlp_w.astype(bf16), vec]
    assert len(params) == N_PARAMS
    return params


def node_predictor_forward(past_hour, cur_datetime, dayback, params):
    B, T, F = past_hour.shape
    BP = max(8, ((B + 7) // 8) * 8)   # pad batch to native sublane multiples

    # Time-major, batch-padded past input, flattened to (T*BP, F).
    past_tm = jnp.transpose(past_hour.astype(jnp.float32), (1, 0, 2))     # (T, B, F)
    past_p = jnp.zeros((T, BP, F), jnp.float32).at[:, :B, :].set(past_tm)
    past_p = past_p.reshape(T * BP, F)

    # cur_datetime at lanes 0:3, dayback at lanes 128:132 of one (BP, 256) slab.
    dtdb = jnp.zeros((BP, 2 * H), jnp.float32)
    dtdb = dtdb.at[:B, 0:cur_datetime.shape[1]].set(cur_datetime.astype(jnp.float32))
    dtdb = dtdb.at[:B, H:H + dayback.shape[1]].set(dayback.astype(jnp.float32))

    vmem = pl.BlockSpec(memory_space=pltpu.MemorySpace.VMEM)
    hbm = pl.BlockSpec(memory_space=pl.ANY)
    kernel = make_kernel(T, BP)
    out = pl.pallas_call(
        kernel,
        out_shape=jax.ShapeDtypeStruct((BP, 1), jnp.float32),
        in_specs=[vmem, vmem,                 # past, dtdb
                  vmem, vmem, vmem, vmem,     # w_in0, w_in1, u0_bd, u1f
                  vmem,                       # lstm_b
                  hbm,                        # mlp_w  (DMA'd manually, overlapped)
                  vmem],                      # vec
        out_specs=vmem,
        scratch_shapes=[
            pltpu.VMEM((T * BP, 8 * H), jnp.float32),     # layer-0 fwd|bwd gate pre-acts
            pltpu.VMEM((T * BP, 4 * H), jnp.float32),     # layer-1 fwd gate pre-acts
            pltpu.VMEM((T * BP, 2 * H), jnp.float32),     # layer-0 bidirectional hiddens
            pltpu.VMEM((MLP_ROWS, 2 * H), jnp.bfloat16),  # tail-MLP weights (DMA target)
            pltpu.SemaphoreType.DMA(()),
        ],
        compiler_params=pltpu.CompilerParams(vmem_limit_bytes=32 * 1024 * 1024),
    )(past_p, dtdb, *params)
    return out[:B]


if __name__ == "__main__":
    B, T, F = 2, 8, 16
    key = jax.random.PRNGKey(0)
    kx, kdt, kdb, kp = jax.random.split(key, 4)

    past_hour = jax.random.normal(kx, (B, T, F), jnp.float32)
    cur_datetime = jax.random.normal(kdt, (B, 3), jnp.float32)
    dayback = jax.random.normal(kdb, (B, 4), jnp.float32)
    params = make_params(kp, F)

    out = node_predictor_forward(past_hour, cur_datetime, dayback, params)
    out = jax.block_until_ready(out)

    assert out.shape == (B, 1), out.shape
    assert bool(jnp.all(jnp.isfinite(out)))
    assert bool(jnp.all(out >= 0.0)) and bool(jnp.all(out <= 1000.0))
    print("KERNEL_OK")
</pallas_src>

<mosaic_0001>
module attributes {stable_mosaic.version = 11 : i64} {
  func.func @kernel(%arg0: memref<64x16xf32, #tpu.memory_space<vmem>>, %arg1: memref<8x256xf32, #tpu.memory_space<vmem>>, %arg2: memref<16x1024xbf16, #tpu.memory_space<vmem>>, %arg3: memref<2x256x512xbf16, #tpu.memory_space<vmem>>, %arg4: memref<256x1024xbf16, #tpu.memory_space<vmem>>, %arg5: memref<128x512xbf16, #tpu.memory_space<vmem>>, %arg6: memref<2x1024xf32, #tpu.memory_space<vmem>>, %arg7: memref<1664x256xbf16, #tpu.memory_space<any>>, %arg8: memref<10x256xf32, #tpu.memory_space<vmem>>, %arg9: memref<8x1xf32, #tpu.memory_space<vmem>>, %arg10: memref<64x1024xf32, #tpu.memory_space<vmem>>, %arg11: memref<64x512xf32, #tpu.memory_space<vmem>>, %arg12: memref<64x256xf32, #tpu.memory_space<vmem>>, %arg13: memref<1664x256xbf16, #tpu.memory_space<vmem>>, %arg14: memref<!tpu.dma_semaphore, #tpu.memory_space<semaphore_mem>>) attributes {dimension_semantics = [], scalar_prefetch = 0 : i64, scratch_operands = 5 : i64, tpu.core_type = #tpu.core_type<tc>} {
    tpu.enqueue_dma source(%arg7 : memref<1664x256xbf16, #tpu.memory_space<any>>) target(%arg13 : memref<1664x256xbf16, #tpu.memory_space<vmem>>) target_semaphore(%arg14 : memref<!tpu.dma_semaphore, #tpu.memory_space<semaphore_mem>>)
    %cst = arith.constant 0.000000e+00 : f32
    %0 = vector.broadcast %cst : f32 to vector<8x128xf32>
    %c0 = arith.constant 0 : index
    %c0_0 = arith.constant 0 : index
    %1 = vector.load %arg0[%c0, %c0_0] : memref<64x16xf32, #tpu.memory_space<vmem>>, vector<64x16xf32>
    %2 = arith.truncf %1 : vector<64x16xf32> to vector<64x16xbf16>
    %c0_1 = arith.constant 0 : index
    %c0_2 = arith.constant 0 : index
    %3 = vector.load %arg2[%c0_1, %c0_2] : memref<16x1024xbf16, #tpu.memory_space<vmem>>, vector<16x1024xbf16>
    %cst_3 = arith.constant dense<0.000000e+00> : vector<64x1024xf32>
    %4 = tpu.matmul %2, %3, %cst_3 {dimension_numbers = #tpu.dot_dimension_numbers<[1], [0], [0], [1], [0, 0, 1, 1], [], []>} : vector<64x16xbf16>, vector<16x1024xbf16>, vector<64x1024xf32> -> vector<64x1024xf32>
    %c0_4 = arith.constant 0 : index
    %c0_5 = arith.constant 0 : index
    %5 = vector.load %arg6[%c0_4, %c0_5] : memref<2x1024xf32, #tpu.memory_space<vmem>>, vector<1x1024xf32>
    %6 = vector.broadcast %5 : vector<1x1024xf32> to vector<64x1024xf32>
    %7 = arith.addf %4, %6 : vector<64x1024xf32>
    %c0_6 = arith.constant 0 : index
    %c0_7 = arith.constant 0 : index
    %8 = vector.load %arg10[%c0_6, %c0_7] : memref<64x1024xf32, #tpu.memory_space<vmem>>, vector<64x1024xf32>
    tpu.vector_store %arg10[%c0_6, %c0_7], %7 {strides = array<i32>} : memref<64x1024xf32, #tpu.memory_space<vmem>>, vector<64x1024xf32>,
    %c0_8 = arith.constant 0 : index
    %c0_9 = arith.constant 0 : index
    %9 = vector.load %arg4[%c0_8, %c0_9] : memref<256x1024xbf16, #tpu.memory_space<vmem>>, vector<256x1024xbf16>
    %c0_10 = arith.constant 0 : index
    %c0_11 = arith.constant 0 : index
    %10 = vector.load %arg10[%c0_10, %c0_11] : memref<64x1024xf32, #tpu.memory_space<vmem>>, vector<8x512xf32>
    %c56 = arith.constant 56 : index
    %c512 = arith.constant 512 : index
    %11 = vector.load %arg10[%c56, %c512] : memref<64x1024xf32, #tpu.memory_space<vmem>>, vector<8x512xf32>
    %12 = vector.extract_strided_slice %10 {offsets = [0, 0], sizes = [8, 128], strides = [1, 1]} : vector<8x512xf32> to vector<8x128xf32>
    %13 = arith.negf %12 : vector<8x128xf32>
    %14 = math.exp %13 : vector<8x128xf32>
    %cst_12 = arith.constant 1.000000e+00 : f32
    %15 = vector.broadcast %cst_12 : f32 to vector<8x128xf32>
    %16 = arith.addf %15, %14 : vector<8x128xf32>
    %17 = arith.divf %15, %16 : vector<8x128xf32>
    %18 = vector.extract_strided_slice %10 {offsets = [0, 128], sizes = [8, 128], strides = [1, 1]} : vector<8x512xf32> to vector<8x128xf32>
    %19 = arith.negf %18 : vector<8x128xf32>
    %20 = math.exp %19 : vector<8x128xf32>
    %cst_13 = arith.constant 1.000000e+00 : f32
    %21 = vector.broadcast %cst_13 : f32 to vector<8x128xf32>
    %22 = arith.addf %21, %20 : vector<8x128xf32>
    %23 = arith.divf %21, %22 : vector<8x128xf32>
    %24 = vector.extract_strided_slice %10 {offsets = [0, 256], sizes = [8, 128], strides = [1, 1]} : vector<8x512xf32> to vector<8x128xf32>
    %25 = math.tanh %24 : vector<8x128xf32>
    %26 = vector.extract_strided_slice %10 {offsets = [0, 384], sizes = [8, 128], strides = [1, 1]} : vector<8x512xf32> to vector<8x128xf32>
    %27 = arith.negf %26 : vector<8x128xf32>
    %28 = math.exp %27 : vector<8x128xf32>
    %cst_14 = arith.constant 1.000000e+00 : f32
    %29 = vector.broadcast %cst_14 : f32 to vector<8x128xf32>
    %30 = arith.addf %29, %28 : vector<8x128xf32>
    %31 = arith.divf %29, %30 : vector<8x128xf32>
    %32 = arith.mulf %23, %0 : vector<8x128xf32>
    %33 = arith.mulf %17, %25 : vector<8x128xf32>
    %34 = arith.addf %32, %33 : vector<8x128xf32>
    %35 = math.tanh %34 : vector<8x128xf32>
    %36 = arith.mulf %31, %35 : vector<8x128xf32>
    %37 = vector.extract_strided_slice %11 {offsets = [0, 0], sizes = [8, 128], strides = [1, 1]} : vector<8x512xf32> to vector<8x128xf32>
    %38 = arith.negf %37 : vector<8x128xf32>
    %39 = math.exp %38 : vector<8x128xf32>
    %cst_15 = arith.constant 1.000000e+00 : f32
    %40 = vector.broadcast %cst_15 : f32 to vector<8x128xf32>
    %41 = arith.addf %40, %39 : vector<8x128xf32>
    %42 = arith.divf %40, %41 : vector<8x128xf32>
    %43 = vector.extract_strided_slice %11 {offsets = [0, 128], sizes = [8, 128], strides = [1, 1]} : vector<8x512xf32> to vector<8x128xf32>
    %44 = arith.negf %43 : vector<8x128xf32>
    %45 = math.exp %44 : vector<8x128xf32>
    %cst_16 = arith.constant 1.000000e+00 : f32
    %46 = vector.broadcast %cst_16 : f32 to vector<8x128xf32>
    %47 = arith.addf %46, %45 : vector<8x128xf32>
    %48 = arith.divf %46, %47 : vector<8x128xf32>
    %49 = vector.extract_strided_slice %11 {offsets = [0, 256], sizes = [8, 128], strides = [1, 1]} : vector<8x512xf32> to vector<8x128xf32>
    %50 = math.tanh %49 : vector<8x128xf32>
    %51 = vector.extract_strided_slice %11 {offsets = [0, 384], sizes = [8, 128], strides = [1, 1]} : vector<8x512xf32> to vector<8x128xf32>
    %52 = arith.negf %51 : vector<8x128xf32>
    %53 = math.exp %52 : vector<8x128xf32>
    %cst_17 = arith.constant 1.000000e+00 : f32
    %54 = vector.broadcast %cst_17 : f32 to vector<8x128xf32>
    %55 = arith.addf %54, %53 : vector<8x128xf32>
    %56 = arith.divf %54, %55 : vector<8x128xf32>
    %57 = arith.mulf %48, %0 : vector<8x128xf32>
    %58 = arith.mulf %42, %50 : vector<8x128xf32>
    %59 = arith.addf %57, %58 : vector<8x128xf32>
    %60 = math.tanh %59 : vector<8x128xf32>
    %61 = arith.mulf %56, %60 : vector<8x128xf32>
    %c0_18 = arith.constant 0 : index
    %c0_19 = arith.constant 0 : index
    %62 = vector.load %arg12[%c0_18, %c0_19] : memref<64x256xf32, #tpu.memory_space<vmem>>, vector<8x128xf32>
    tpu.vector_store %arg12[%c0_18, %c0_19], %36 {strides = array<i32>} : memref<64x256xf32, #tpu.memory_space<vmem>>, vector<8x128xf32>,
    %c56_20 = arith.constant 56 : index
    %c128 = arith.constant 128 : index
    %63 = vector.load %arg12[%c56_20, %c128] : memref<64x256xf32, #tpu.memory_space<vmem>>, vector<8x128xf32>
    tpu.vector_store %arg12[%c56_20, %c128], %61 {strides = array<i32>} : memref<64x256xf32, #tpu.memory_space<vmem>>, vector<8x128xf32>,
    %64 = tpu.concatenate %36, %61 in 1 : vector<8x128xf32>, vector<8x128xf32> -> vector<8x256xf32>
    %65 = arith.truncf %64 : vector<8x256xf32> to vector<8x256xbf16>
    %cst_21 = arith.constant dense<0.000000e+00> : vector<8x1024xf32>
    %66 = tpu.matmul %65, %9, %cst_21 {dimension_numbers = #tpu.dot_dimension_numbers<[1], [0], [0], [1], [0, 0, 1, 1], [], []>} : vector<8x256xbf16>, vector<256x1024xbf16>, vector<8x1024xf32> -> vector<8x1024xf32>
    %c8 = arith.constant 8 : index
    %c0_22 = arith.constant 0 : index
    %67 = vector.load %arg10[%c8, %c0_22] : memref<64x1024xf32, #tpu.memory_space<vmem>>, vector<8x512xf32>
    %68 = vector.extract_strided_slice %66 {offsets = [0, 0], sizes = [8, 512], strides = [1, 1]} : vector<8x1024xf32> to vector<8x512xf32>
    %69 = arith.addf %67, %68 : vector<8x512xf32>
    %c48 = arith.constant 48 : index
    %c512_23 = arith.constant 512 : index
    %70 = vector.load %arg10[%c48, %c512_23] : memref<64x1024xf32, #tpu.memory_space<vmem>>, vector<8x512xf32>
    %71 = vector.extract_strided_slice %66 {offsets = [0, 512], sizes = [8, 512], strides = [1, 1]} : vector<8x1024xf32> to vector<8x512xf32>
    %72 = arith.addf %70, %71 : vector<8x512xf32>
    %73 = vector.extract_strided_slice %69 {offsets = [0, 0], sizes = [8, 128], strides = [1, 1]} : vector<8x512xf32> to vector<8x128xf32>
    %74 = arith.negf %73 : vector<8x128xf32>
    %75 = math.exp %74 : vector<8x128xf32>
    %cst_24 = arith.constant 1.000000e+00 : f32
    %76 = vector.broadcast %cst_24 : f32 to vector<8x128xf32>
    %77 = arith.addf %76, %75 : vector<8x128xf32>
    %78 = arith.divf %76, %77 : vector<8x128xf32>
    %79 = vector.extract_strided_slice %69 {offsets = [0, 128], sizes = [8, 128], strides = [1, 1]} : vector<8x512xf32> to vector<8x128xf32>
    %80 = arith.negf %79 : vector<8x128xf32>
    %81 = math.exp %80 : vector<8x128xf32>
    %cst_25 = arith.constant 1.000000e+00 : f32
    %82 = vector.broadcast %cst_25 : f32 to vector<8x128xf32>
    %83 = arith.addf %82, %81 : vector<8x128xf32>
    %84 = arith.divf %82, %83 : vector<8x128xf32>
    %85 = vector.extract_strided_slice %69 {offsets = [0, 256], sizes = [8, 128], strides = [1, 1]} : vector<8x512xf32> to vector<8x128xf32>
    %86 = math.tanh %85 : vector<8x128xf32>
    %87 = vector.extract_strided_slice %69 {offsets = [0, 384], sizes = [8, 128], strides = [1, 1]} : vector<8x512xf32> to vector<8x128xf32>
    %88 = arith.negf %87 : vector<8x128xf32>
    %89 = math.exp %88 : vector<8x128xf32>
    %cst_26 = arith.constant 1.000000e+00 : f32
    %90 = vector.broadcast %cst_26 : f32 to vector<8x128xf32>
    %91 = arith.addf %90, %89 : vector<8x128xf32>
    %92 = arith.divf %90, %91 : vector<8x128xf32>
    %93 = arith.mulf %84, %34 : vector<8x128xf32>
    %94 = arith.mulf %78, %86 : vector<8x128xf32>
    %95 = arith.addf %93, %94 : vector<8x128xf32>
    %96 = math.tanh %95 : vector<8x128xf32>
    %97 = arith.mulf %92, %96 : vector<8x128xf32>
    %98 = vector.extract_strided_slice %72 {offsets = [0, 0], sizes = [8, 128], strides = [1, 1]} : vector<8x512xf32> to vector<8x128xf32>
    %99 = arith.negf %98 : vector<8x128xf32>
    %100 = math.exp %99 : vector<8x128xf32>
    %cst_27 = arith.constant 1.000000e+00 : f32
    %101 = vector.broadcast %cst_27 : f32 to vector<8x128xf32>
    %102 = arith.addf %101, %100 : vector<8x128xf32>
    %103 = arith.divf %101, %102 : vector<8x128xf32>
    %104 = vector.extract_strided_slice %72 {offsets = [0, 128], sizes = [8, 128], strides = [1, 1]} : vector<8x512xf32> to vector<8x128xf32>
    %105 = arith.negf %104 : vector<8x128xf32>
    %106 = math.exp %105 : vector<8x128xf32>
    %cst_28 = arith.constant 1.000000e+00 : f32
    %107 = vector.broadcast %cst_28 : f32 to vector<8x128xf32>
    %108 = arith.addf %107, %106 : vector<8x128xf32>
    %109 = arith.divf %107, %108 : vector<8x128xf32>
    %110 = vector.extract_strided_slice %72 {offsets = [0, 256], sizes = [8, 128], strides = [1, 1]} : vector<8x512xf32> to vector<8x128xf32>
    %111 = math.tanh %110 : vector<8x128xf32>
    %112 = vector.extract_strided_slice %72 {offsets = [0, 384], sizes = [8, 128], strides = [1, 1]} : vector<8x512xf32> to vector<8x128xf32>
    %113 = arith.negf %112 : vector<8x128xf32>
    %114 = math.exp %113 : vector<8x128xf32>
    %cst_29 = arith.constant 1.000000e+00 : f32
    %115 = vector.broadcast %cst_29 : f32 to vector<8x128xf32>
    %116 = arith.addf %115, %114 : vector<8x128xf32>
    %117 = arith.divf %115, %116 : vector<8x128xf32>
    %118 = arith.mulf %109, %59 : vector<8x128xf32>
    %119 = arith.mulf %103, %111 : vector<8x128xf32>
    %120 = arith.addf %118, %119 : vector<8x128xf32>
    %121 = math.tanh %120 : vector<8x128xf32>
    %122 = arith.mulf %117, %121 : vector<8x128xf32>
    %c8_30 = arith.constant 8 : index
    %c0_31 = arith.constant 0 : index
    %123 = vector.load %arg12[%c8_30, %c0_31] : memref<64x256xf32, #tpu.memory_space<vmem>>, vector<8x128xf32>
    tpu.vector_store %arg12[%c8_30, %c0_31], %97 {strides = array<i32>} : memref<64x256xf32, #tpu.memory_space<vmem>>, vector<8x128xf32>,
    %c48_32 = arith.constant 48 : index
    %c128_33 = arith.constant 128 : index
    %124 = vector.load %arg12[%c48_32, %c128_33] : memref<64x256xf32, #tpu.memory_space<vmem>>, vector<8x128xf32>
    tpu.vector_store %arg12[%c48_32, %c128_33], %122 {strides = array<i32>} : memref<64x256xf32, #tpu.memory_space<vmem>>, vector<8x128xf32>,
    %125 = tpu.concatenate %97, %122 in 1 : vector<8x128xf32>, vector<8x128xf32> -> vector<8x256xf32>
    %126 = arith.truncf %125 : vector<8x256xf32> to vector<8x256xbf16>
    %cst_34 = arith.constant dense<0.000000e+00> : vector<8x1024xf32>
    %127 = tpu.matmul %126, %9, %cst_34 {dimension_numbers = #tpu.dot_dimension_numbers<[1], [0], [0], [1], [0, 0, 1, 1], [], []>} : vector<8x256xbf16>, vector<256x1024xbf16>, vector<8x1024xf32> -> vector<8x1024xf32>
    %c16 = arith.constant 16 : index
    %c0_35 = arith.constant 0 : index
    %128 = vector.load %arg10[%c16, %c0_35] : memref<64x1024xf32, #tpu.memory_space<vmem>>, vector<8x512xf32>
    %129 = vector.extract_strided_slice %127 {offsets = [0, 0], sizes = [8, 512], strides = [1, 1]} : vector<8x1024xf32> to vector<8x512xf32>
    %130 = arith.addf %128, %129 : vector<8x512xf32>
    %c40 = arith.constant 40 : index
    %c512_36 = arith.constant 512 : index
    %131 = vector.load %arg10[%c40, %c512_36] : memref<64x1024xf32, #tpu.memory_space<vmem>>, vector<8x512xf32>
    %132 = vector.extract_strided_slice %127 {offsets = [0, 512], sizes = [8, 512], strides = [1, 1]} : vector<8x1024xf32> to vector<8x512xf32>
    %133 = arith.addf %131, %132 : vector<8x512xf32>
    %134 = vector.extract_strided_slice %130 {offsets = [0, 0], sizes = [8, 128], strides = [1, 1]} : vector<8x512xf32> to vector<8x128xf32>
    %135 = arith.negf %134 : vector<8x128xf32>
    %136 = math.exp %135 : vector<8x128xf32>
    %cst_37 = arith.constant 1.000000e+00 : f32
    %137 = vector.broadcast %cst_37 : f32 to vector<8x128xf32>
    %138 = arith.addf %137, %136 : vector<8x128xf32>
    %139 = arith.divf %137, %138 : vector<8x128xf32>
    %140 = vector.extract_strided_slice %130 {offsets = [0, 128], sizes = [8, 128], strides = [1, 1]} : vector<8x512xf32> to vector<8x128xf32>
    %141 = arith.negf %140 : vector<8x128xf32>
    %142 = math.exp %141 : vector<8x128xf32>
    %cst_38 = arith.constant 1.000000e+00 : f32
    %143 = vector.broadcast %cst_38 : f32 to vector<8x128xf32>
    %144 = arith.addf %143, %142 : vector<8x128xf32>
    %145 = arith.divf %143, %144 : vector<8x128xf32>
    %146 = vector.extract_strided_slice %130 {offsets = [0, 256], sizes = [8, 128], strides = [1, 1]} : vector<8x512xf32> to vector<8x128xf32>
    %147 = math.tanh %146 : vector<8x128xf32>
    %148 = vector.extract_strided_slice %130 {offsets = [0, 384], sizes = [8, 128], strides = [1, 1]} : vector<8x512xf32> to vector<8x128xf32>
    %149 = arith.negf %148 : vector<8x128xf32>
    %150 = math.exp %149 : vector<8x128xf32>
    %cst_39 = arith.constant 1.000000e+00 : f32
    %151 = vector.broadcast %cst_39 : f32 to vector<8x128xf32>
    %152 = arith.addf %151, %150 : vector<8x128xf32>
    %153 = arith.divf %151, %152 : vector<8x128xf32>
    %154 = arith.mulf %145, %95 : vector<8x128xf32>
    %155 = arith.mulf %139, %147 : vector<8x128xf32>
    %156 = arith.addf %154, %155 : vector<8x128xf32>
    %157 = math.tanh %156 : vector<8x128xf32>
    %158 = arith.mulf %153, %157 : vector<8x128xf32>
    %159 = vector.extract_strided_slice %133 {offsets = [0, 0], sizes = [8, 128], strides = [1, 1]} : vector<8x512xf32> to vector<8x128xf32>
    %160 = arith.negf %159 : vector<8x128xf32>
    %161 = math.exp %160 : vector<8x128xf32>
    %cst_40 = arith.constant 1.000000e+00 : f32
    %162 = vector.broadcast %cst_40 : f32 to vector<8x128xf32>
    %163 = arith.addf %162, %161 : vector<8x128xf32>
    %164 = arith.divf %162, %163 : vector<8x128xf32>
    %165 = vector.extract_strided_slice %133 {offsets = [0, 128], sizes = [8, 128], strides = [1, 1]} : vector<8x512xf32> to vector<8x128xf32>
    %166 = arith.negf %165 : vector<8x128xf32>
    %167 = math.exp %166 : vector<8x128xf32>
    %cst_41 = arith.constant 1.000000e+00 : f32
    %168 = vector.broadcast %cst_41 : f32 to vector<8x128xf32>
    %169 = arith.addf %168, %167 : vector<8x128xf32>
    %170 = arith.divf %168, %169 : vector<8x128xf32>
    %171 = vector.extract_strided_slice %133 {offsets = [0, 256], sizes = [8, 128], strides = [1, 1]} : vector<8x512xf32> to vector<8x128xf32>
    %172 = math.tanh %171 : vector<8x128xf32>
    %173 = vector.extract_strided_slice %133 {offsets = [0, 384], sizes = [8, 128], strides = [1, 1]} : vector<8x512xf32> to vector<8x128xf32>
    %174 = arith.negf %173 : vector<8x128xf32>
    %175 = math.exp %174 : vector<8x128xf32>
    %cst_42 = arith.constant 1.000000e+00 : f32
    %176 = vector.broadcast %cst_42 : f32 to vector<8x128xf32>
    %177 = arith.addf %176, %175 : vector<8x128xf32>
    %178 = arith.divf %176, %177 : vector<8x128xf32>
    %179 = arith.mulf %170, %120 : vector<8x128xf32>
    %180 = arith.mulf %164, %172 : vector<8x128xf32>
    %181 = arith.addf %179, %180 : vector<8x128xf32>
    %182 = math.tanh %181 : vector<8x128xf32>
    %183 = arith.mulf %178, %182 : vector<8x128xf32>
    %c16_43 = arith.constant 16 : index
    %c0_44 = arith.constant 0 : index
    %184 = vector.load %arg12[%c16_43, %c0_44] : memref<64x256xf32, #tpu.memory_space<vmem>>, vector<8x128xf32>
    tpu.vector_store %arg12[%c16_43, %c0_44], %158 {strides = array<i32>} : memref<64x256xf32, #tpu.memory_space<vmem>>, vector<8x128xf32>,
    %c40_45 = arith.constant 40 : index
    %c128_46 = arith.constant 128 : index
    %185 = vector.load %arg12[%c40_45, %c128_46] : memref<64x256xf32, #tpu.memory_space<vmem>>, vector<8x128xf32>
    tpu.vector_store %arg12[%c40_45, %c128_46], %183 {strides = array<i32>} : memref<64x256xf32, #tpu.memory_space<vmem>>, vector<8x128xf32>,
    %186 = tpu.concatenate %158, %183 in 1 : vector<8x128xf32>, vector<8x128xf32> -> vector<8x256xf32>
    %187 = arith.truncf %186 : vector<8x256xf32> to vector<8x256xbf16>
    %cst_47 = arith.constant dense<0.000000e+00> : vector<8x1024xf32>
    %188 = tpu.matmul %187, %9, %cst_47 {dimension_numbers = #tpu.dot_dimension_numbers<[1], [0], [0], [1], [0, 0, 1, 1], [], []>} : vector<8x256xbf16>, vector<256x1024xbf16>, vector<8x1024xf32> -> vector<8x1024xf32>
    %c24 = arith.constant 24 : index
    %c0_48 = arith.constant 0 : index
    %189 = vector.load %arg10[%c24, %c0_48] : memref<64x1024xf32, #tpu.memory_space<vmem>>, vector<8x512xf32>
    %190 = vector.extract_strided_slice %188 {offsets = [0, 0], sizes = [8, 512], strides = [1, 1]} : vector<8x1024xf32> to vector<8x512xf32>
    %191 = arith.addf %189, %190 : vector<8x512xf32>
    %c32 = arith.constant 32 : index
    %c512_49 = arith.constant 512 : index
    %192 = vector.load %arg10[%c32, %c512_49] : memref<64x1024xf32, #tpu.memory_space<vmem>>, vector<8x512xf32>
    %193 = vector.extract_strided_slice %188 {offsets = [0, 512], sizes = [8, 512], strides = [1, 1]} : vector<8x1024xf32> to vector<8x512xf32>
    %194 = arith.addf %192, %193 : vector<8x512xf32>
    %195 = vector.extract_strided_slice %191 {offsets = [0, 0], sizes = [8, 128], strides = [1, 1]} : vector<8x512xf32> to vector<8x128xf32>
    %196 = arith.negf %195 : vector<8x128xf32>
    %197 = math.exp %196 : vector<8x128xf32>
    %cst_50 = arith.constant 1.000000e+00 : f32
    %198 = vector.broadcast %cst_50 : f32 to vector<8x128xf32>
    %199 = arith.addf %198, %197 : vector<8x128xf32>
    %200 = arith.divf %198, %199 : vector<8x128xf32>
    %201 = vector.extract_strided_slice %191 {offsets = [0, 128], sizes = [8, 128], strides = [1, 1]} : vector<8x512xf32> to vector<8x128xf32>
    %202 = arith.negf %201 : vector<8x128xf32>
    %203 = math.exp %202 : vector<8x128xf32>
    %cst_51 = arith.constant 1.000000e+00 : f32
    %204 = vector.broadcast %cst_51 : f32 to vector<8x128xf32>
    %205 = arith.addf %204, %203 : vector<8x128xf32>
    %206 = arith.divf %204, %205 : vector<8x128xf32>
    %207 = vector.extract_strided_slice %191 {offsets = [0, 256], sizes = [8, 128], strides = [1, 1]} : vector<8x512xf32> to vector<8x128xf32>
    %208 = math.tanh %207 : vector<8x128xf32>
    %209 = vector.extract_strided_slice %191 {offsets = [0, 384], sizes = [8, 128], strides = [1, 1]} : vector<8x512xf32> to vector<8x128xf32>
    %210 = arith.negf %209 : vector<8x128xf32>
    %211 = math.exp %210 : vector<8x128xf32>
    %cst_52 = arith.constant 1.000000e+00 : f32
    %212 = vector.broadcast %cst_52 : f32 to vector<8x128xf32>
    %213 = arith.addf %212, %211 : vector<8x128xf32>
    %214 = arith.divf %212, %213 : vector<8x128xf32>
    %215 = arith.mulf %206, %156 : vector<8x128xf32>
    %216 = arith.mulf %200, %208 : vector<8x128xf32>
    %217 = arith.addf %215, %216 : vector<8x128xf32>
    %218 = math.tanh %217 : vector<8x128xf32>
    %219 = arith.mulf %214, %218 : vector<8x128xf32>
    %220 = vector.extract_strided_slice %194 {offsets = [0, 0], sizes = [8, 128], strides = [1, 1]} : vector<8x512xf32> to vector<8x128xf32>
    %221 = arith.negf %220 : vector<8x128xf32>
    %222 = math.exp %221 : vector<8x128xf32>
    %cst_53 = arith.constant 1.000000e+00 : f32
    %223 = vector.broadcast %cst_53 : f32 to vector<8x128xf32>
    %224 = arith.addf %223, %222 : vector<8x128xf32>
    %225 = arith.divf %223, %224 : vector<8x128xf32>
    %226 = vector.extract_strided_slice %194 {offsets = [0, 128], sizes = [8, 128], strides = [1, 1]} : vector<8x512xf32> to vector<8x128xf32>
    %227 = arith.negf %226 : vector<8x128xf32>
    %228 = math.exp %227 : vector<8x128xf32>
    %cst_54 = arith.constant 1.000000e+00 : f32
    %229 = vector.broadcast %cst_54 : f32 to vector<8x128xf32>
    %230 = arith.addf %229, %228 : vector<8x128xf32>
    %231 = arith.divf %229, %230 : vector<8x128xf32>
    %232 = vector.extract_strided_slice %194 {offsets = [0, 256], sizes = [8, 128], strides = [1, 1]} : vector<8x512xf32> to vector<8x128xf32>
    %233 = math.tanh %232 : vector<8x128xf32>
    %234 = vector.extract_strided_slice %194 {offsets = [0, 384], sizes = [8, 128], strides = [1, 1]} : vector<8x512xf32> to vector<8x128xf32>
    %235 = arith.negf %234 : vector<8x128xf32>
    %236 = math.exp %235 : vector<8x128xf32>
    %cst_55 = arith.constant 1.000000e+00 : f32
    %237 = vector.broadcast %cst_55 : f32 to vector<8x128xf32>
    %238 = arith.addf %237, %236 : vector<8x128xf32>
    %239 = arith.divf %237, %238 : vector<8x128xf32>
    %240 = arith.mulf %231, %181 : vector<8x128xf32>
    %241 = arith.mulf %225, %233 : vector<8x128xf32>
    %242 = arith.addf %240, %241 : vector<8x128xf32>
    %243 = math.tanh %242 : vector<8x128xf32>
    %244 = arith.mulf %239, %243 : vector<8x128xf32>
    %c24_56 = arith.constant 24 : index
    %c0_57 = arith.constant 0 : index
    %245 = vector.load %arg12[%c24_56, %c0_57] : memref<64x256xf32, #tpu.memory_space<vmem>>, vector<8x128xf32>
    tpu.vector_store %arg12[%c24_56, %c0_57], %219 {strides = array<i32>} : memref<64x256xf32, #tpu.memory_space<vmem>>, vector<8x128xf32>,
    %c32_58 = arith.constant 32 : index
    %c128_59 = arith.constant 128 : index
    %246 = vector.load %arg12[%c32_58, %c128_59] : memref<64x256xf32, #tpu.memory_space<vmem>>, vector<8x128xf32>
    tpu.vector_store %arg12[%c32_58, %c128_59], %244 {strides = array<i32>} : memref<64x256xf32, #tpu.memory_space<vmem>>, vector<8x128xf32>,
    %247 = tpu.concatenate %219, %244 in 1 : vector<8x128xf32>, vector<8x128xf32> -> vector<8x256xf32>
    %248 = arith.truncf %247 : vector<8x256xf32> to vector<8x256xbf16>
    %cst_60 = arith.constant dense<0.000000e+00> : vector<8x1024xf32>
    %249 = tpu.matmul %248, %9, %cst_60 {dimension_numbers = #tpu.dot_dimension_numbers<[1], [0], [0], [1], [0, 0, 1, 1], [], []>} : vector<8x256xbf16>, vector<256x1024xbf16>, vector<8x1024xf32> -> vector<8x1024xf32>
    %c32_61 = arith.constant 32 : index
    %c0_62 = arith.constant 0 : index
    %250 = vector.load %arg10[%c32_61, %c0_62] : memref<64x1024xf32, #tpu.memory_space<vmem>>, vector<8x512xf32>
    %251 = vector.extract_strided_slice %249 {offsets = [0, 0], sizes = [8, 512], strides = [1, 1]} : vector<8x1024xf32> to vector<8x512xf32>
    %252 = arith.addf %250, %251 : vector<8x512xf32>
    %c24_63 = arith.constant 24 : index
    %c512_64 = arith.constant 512 : index
    %253 = vector.load %arg10[%c24_63, %c512_64] : memref<64x1024xf32, #tpu.memory_space<vmem>>, vector<8x512xf32>
    %254 = vector.extract_strided_slice %249 {offsets = [0, 512], sizes = [8, 512], strides = [1, 1]} : vector<8x1024xf32> to vector<8x512xf32>
    %255 = arith.addf %253, %254 : vector<8x512xf32>
    %256 = vector.extract_strided_slice %252 {offsets = [0, 0], sizes = [8, 128], strides = [1, 1]} : vector<8x512xf32> to vector<8x128xf32>
    %257 = arith.negf %256 : vector<8x128xf32>
    %258 = math.exp %257 : vector<8x128xf32>
    %cst_65 = arith.constant 1.000000e+00 : f32
    %259 = vector.broadcast %cst_65 : f32 to vector<8x128xf32>
    %260 = arith.addf %259, %258 : vector<8x128xf32>
    %261 = arith.divf %259, %260 : vector<8x128xf32>
    %262 = vector.extract_strided_slice %252 {offsets = [0, 128], sizes = [8, 128], strides = [1, 1]} : vector<8x512xf32> to vector<8x128xf32>
    %263 = arith.negf %262 : vector<8x128xf32>
    %264 = math.exp %263 : vector<8x128xf32>
    %cst_66 = arith.constant 1.000000e+00 : f32
    %265 = vector.broadcast %cst_66 : f32 to vector<8x128xf32>
    %266 = arith.addf %265, %264 : vector<8x128xf32>
    %267 = arith.divf %265, %266 : vector<8x128xf32>
    %268 = vector.extract_strided_slice %252 {offsets = [0, 256], sizes = [8, 128], strides = [1, 1]} : vector<8x512xf32> to vector<8x128xf32>
    %269 = math.tanh %268 : vector<8x128xf32>
    %270 = vector.extract_strided_slice %252 {offsets = [0, 384], sizes = [8, 128], strides = [1, 1]} : vector<8x512xf32> to vector<8x128xf32>
    %271 = arith.negf %270 : vector<8x128xf32>
    %272 = math.exp %271 : vector<8x128xf32>
    %cst_67 = arith.constant 1.000000e+00 : f32
    %273 = vector.broadcast %cst_67 : f32 to vector<8x128xf32>
    %274 = arith.addf %273, %272 : vector<8x128xf32>
    %275 = arith.divf %273, %274 : vector<8x128xf32>
    %276 = arith.mulf %267, %217 : vector<8x128xf32>
    %277 = arith.mulf %261, %269 : vector<8x128xf32>
    %278 = arith.addf %276, %277 : vector<8x128xf32>
    %279 = math.tanh %278 : vector<8x128xf32>
    %280 = arith.mulf %275, %279 : vector<8x128xf32>
    %281 = vector.extract_strided_slice %255 {offsets = [0, 0], sizes = [8, 128], strides = [1, 1]} : vector<8x512xf32> to vector<8x128xf32>
    %282 = arith.negf %281 : vector<8x128xf32>
    %283 = math.exp %282 : vector<8x128xf32>
    %cst_68 = arith.constant 1.000000e+00 : f32
    %284 = vector.broadcast %cst_68 : f32 to vector<8x128xf32>
    %285 = arith.addf %284, %283 : vector<8x128xf32>
    %286 = arith.divf %284, %285 : vector<8x128xf32>
    %287 = vector.extract_strided_slice %255 {offsets = [0, 128], sizes = [8, 128], strides = [1, 1]} : vector<8x512xf32> to vector<8x128xf32>
    %288 = arith.negf %287 : vector<8x128xf32>
    %289 = math.exp %288 : vector<8x128xf32>
    %cst_69 = arith.constant 1.000000e+00 : f32
    %290 = vector.broadcast %cst_69 : f32 to vector<8x128xf32>
    %291 = arith.addf %290, %289 : vector<8x128xf32>
    %292 = arith.divf %290, %291 : vector<8x128xf32>
    %293 = vector.extract_strided_slice %255 {offsets = [0, 256], sizes = [8, 128], strides = [1, 1]} : vector<8x512xf32> to vector<8x128xf32>
    %294 = math.tanh %293 : vector<8x128xf32>
    %295 = vector.extract_strided_slice %255 {offsets = [0, 384], sizes = [8, 128], strides = [1, 1]} : vector<8x512xf32> to vector<8x128xf32>
    %296 = arith.negf %295 : vector<8x128xf32>
    %297 = math.exp %296 : vector<8x128xf32>
    %cst_70 = arith.constant 1.000000e+00 : f32
    %298 = vector.broadcast %cst_70 : f32 to vector<8x128xf32>
    %299 = arith.addf %298, %297 : vector<8x128xf32>
    %300 = arith.divf %298, %299 : vector<8x128xf32>
    %301 = arith.mulf %292, %242 : vector<8x128xf32>
    %302 = arith.mulf %286, %294 : vector<8x128xf32>
    %303 = arith.addf %301, %302 : vector<8x128xf32>
    %304 = math.tanh %303 : vector<8x128xf32>
    %305 = arith.mulf %300, %304 : vector<8x128xf32>
    %c32_71 = arith.constant 32 : index
    %c0_72 = arith.constant 0 : index
    %306 = vector.load %arg12[%c32_71, %c0_72] : memref<64x256xf32, #tpu.memory_space<vmem>>, vector<8x128xf32>
    tpu.vector_store %arg12[%c32_71, %c0_72], %280 {strides = array<i32>} : memref<64x256xf32, #tpu.memory_space<vmem>>, vector<8x128xf32>,
    %c24_73 = arith.constant 24 : index
    %c128_74 = arith.constant 128 : index
    %307 = vector.load %arg12[%c24_73, %c128_74] : memref<64x256xf32, #tpu.memory_space<vmem>>, vector<8x128xf32>
    tpu.vector_store %arg12[%c24_73, %c128_74], %305 {strides = array<i32>} : memref<64x256xf32, #tpu.memory_space<vmem>>, vector<8x128xf32>,
    %308 = tpu.concatenate %280, %305 in 1 : vector<8x128xf32>, vector<8x128xf32> -> vector<8x256xf32>
    %309 = arith.truncf %308 : vector<8x256xf32> to vector<8x256xbf16>
    %cst_75 = arith.constant dense<0.000000e+00> : vector<8x1024xf32>
    %310 = tpu.matmul %309, %9, %cst_75 {dimension_numbers = #tpu.dot_dimension_numbers<[1], [0], [0], [1], [0, 0, 1, 1], [], []>} : vector<8x256xbf16>, vector<256x1024xbf16>, vector<8x1024xf32> -> vector<8x1024xf32>
    %c40_76 = arith.constant 40 : index
    %c0_77 = arith.constant 0 : index
    %311 = vector.load %arg10[%c40_76, %c0_77] : memref<64x1024xf32, #tpu.memory_space<vmem>>, vector<8x512xf32>
    %312 = vector.extract_strided_slice %310 {offsets = [0, 0], sizes = [8, 512], strides = [1, 1]} : vector<8x1024xf32> to vector<8x512xf32>
    %313 = arith.addf %311, %312 : vector<8x512xf32>
    %c16_78 = arith.constant 16 : index
    %c512_79 = arith.constant 512 : index
    %314 = vector.load %arg10[%c16_78, %c512_79] : memref<64x1024xf32, #tpu.memory_space<vmem>>, vector<8x512xf32>
    %315 = vector.extract_strided_slice %310 {offsets = [0, 512], sizes = [8, 512], strides = [1, 1]} : vector<8x1024xf32> to vector<8x512xf32>
    %316 = arith.addf %314, %315 : vector<8x512xf32>
    %317 = vector.extract_strided_slice %313 {offsets = [0, 0], sizes = [8, 128], strides = [1, 1]} : vector<8x512xf32> to vector<8x128xf32>
    %318 = arith.negf %317 : vector<8x128xf32>
    %319 = math.exp %318 : vector<8x128xf32>
    %cst_80 = arith.constant 1.000000e+00 : f32
    %320 = vector.broadcast %cst_80 : f32 to vector<8x128xf32>
    %321 = arith.addf %320, %319 : vector<8x128xf32>
    %322 = arith.divf %320, %321 : vector<8x128xf32>
    %323 = vector.extract_strided_slice %313 {offsets = [0, 128], sizes = [8, 128], strides = [1, 1]} : vector<8x512xf32> to vector<8x128xf32>
    %324 = arith.negf %323 : vector<8x128xf32>
    %325 = math.exp %324 : vector<8x128xf32>
    %cst_81 = arith.constant 1.000000e+00 : f32
    %326 = vector.broadcast %cst_81 : f32 to vector<8x128xf32>
    %327 = arith.addf %326, %325 : vector<8x128xf32>
    %328 = arith.divf %326, %327 : vector<8x128xf32>
    %329 = vector.extract_strided_slice %313 {offsets = [0, 256], sizes = [8, 128], strides = [1, 1]} : vector<8x512xf32> to vector<8x128xf32>
    %330 = math.tanh %329 : vector<8x128xf32>
    %331 = vector.extract_strided_slice %313 {offsets = [0, 384], sizes = [8, 128], strides = [1, 1]} : vector<8x512xf32> to vector<8x128xf32>
    %332 = arith.negf %331 : vector<8x128xf32>
    %333 = math.exp %332 : vector<8x128xf32>
    %cst_82 = arith.constant 1.000000e+00 : f32
    %334 = vector.broadcast %cst_82 : f32 to vector<8x128xf32>
    %335 = arith.addf %334, %333 : vector<8x128xf32>
    %336 = arith.divf %334, %335 : vector<8x128xf32>
    %337 = arith.mulf %328, %278 : vector<8x128xf32>
    %338 = arith.mulf %322, %330 : vector<8x128xf32>
    %339 = arith.addf %337, %338 : vector<8x128xf32>
    %340 = math.tanh %339 : vector<8x128xf32>
    %341 = arith.mulf %336, %340 : vector<8x128xf32>
    %342 = vector.extract_strided_slice %316 {offsets = [0, 0], sizes = [8, 128], strides = [1, 1]} : vector<8x512xf32> to vector<8x128xf32>
    %343 = arith.negf %342 : vector<8x128xf32>
    %344 = math.exp %343 : vector<8x128xf32>
    %cst_83 = arith.constant 1.000000e+00 : f32
    %345 = vector.broadcast %cst_83 : f32 to vector<8x128xf32>
    %346 = arith.addf %345, %344 : vector<8x128xf32>
    %347 = arith.divf %345, %346 : vector<8x128xf32>
    %348 = vector.extract_strided_slice %316 {offsets = [0, 128], sizes = [8, 128], strides = [1, 1]} : vector<8x512xf32> to vector<8x128xf32>
    %349 = arith.negf %348 : vector<8x128xf32>
    %350 = math.exp %349 : vector<8x128xf32>
    %cst_84 = arith.constant 1.000000e+00 : f32
    %351 = vector.broadcast %cst_84 : f32 to vector<8x128xf32>
    %352 = arith.addf %351, %350 : vector<8x128xf32>
    %353 = arith.divf %351, %352 : vector<8x128xf32>
    %354 = vector.extract_strided_slice %316 {offsets = [0, 256], sizes = [8, 128], strides = [1, 1]} : vector<8x512xf32> to vector<8x128xf32>
    %355 = math.tanh %354 : vector<8x128xf32>
    %356 = vector.extract_strided_slice %316 {offsets = [0, 384], sizes = [8, 128], strides = [1, 1]} : vector<8x512xf32> to vector<8x128xf32>
    %357 = arith.negf %356 : vector<8x128xf32>
    %358 = math.exp %357 : vector<8x128xf32>
    %cst_85 = arith.constant 1.000000e+00 : f32
    %359 = vector.broadcast %cst_85 : f32 to vector<8x128xf32>
    %360 = arith.addf %359, %358 : vector<8x128xf32>
    %361 = arith.divf %359, %360 : vector<8x128xf32>
    %362 = arith.mulf %353, %303 : vector<8x128xf32>
    %363 = arith.mulf %347, %355 : vector<8x128xf32>
    %364 = arith.addf %362, %363 : vector<8x128xf32>
    %365 = math.tanh %364 : vector<8x128xf32>
    %366 = arith.mulf %361, %365 : vector<8x128xf32>
    %c40_86 = arith.constant 40 : index
    %c0_87 = arith.constant 0 : index
    %367 = vector.load %arg12[%c40_86, %c0_87] : memref<64x256xf32, #tpu.memory_space<vmem>>, vector<8x128xf32>
    tpu.vector_store %arg12[%c40_86, %c0_87], %341 {strides = array<i32>} : memref<64x256xf32, #tpu.memory_space<vmem>>, vector<8x128xf32>,
    %c16_88 = arith.constant 16 : index
    %c128_89 = arith.constant 128 : index
    %368 = vector.load %arg12[%c16_88, %c128_89] : memref<64x256xf32, #tpu.memory_space<vmem>>, vector<8x128xf32>
    tpu.vector_store %arg12[%c16_88, %c128_89], %366 {strides = array<i32>} : memref<64x256xf32, #tpu.memory_space<vmem>>, vector<8x128xf32>,
    %369 = tpu.concatenate %341, %366 in 1 : vector<8x128xf32>, vector<8x128xf32> -> vector<8x256xf32>
    %370 = arith.truncf %369 : vector<8x256xf32> to vector<8x256xbf16>
    %cst_90 = arith.constant dense<0.000000e+00> : vector<8x1024xf32>
    %371 = tpu.matmul %370, %9, %cst_90 {dimension_numbers = #tpu.dot_dimension_numbers<[1], [0], [0], [1], [0, 0, 1, 1], [], []>} : vector<8x256xbf16>, vector<256x1024xbf16>, vector<8x1024xf32> -> vector<8x1024xf32>
    %c48_91 = arith.constant 48 : index
    %c0_92 = arith.constant 0 : index
    %372 = vector.load %arg10[%c48_91, %c0_92] : memref<64x1024xf32, #tpu.memory_space<vmem>>, vector<8x512xf32>
    %373 = vector.extract_strided_slice %371 {offsets = [0, 0], sizes = [8, 512], strides = [1, 1]} : vector<8x1024xf32> to vector<8x512xf32>
    %374 = arith.addf %372, %373 : vector<8x512xf32>
    %c8_93 = arith.constant 8 : index
    %c512_94 = arith.constant 512 : index
    %375 = vector.load %arg10[%c8_93, %c512_94] : memref<64x1024xf32, #tpu.memory_space<vmem>>, vector<8x512xf32>
    %376 = vector.extract_strided_slice %371 {offsets = [0, 512], sizes = [8, 512], strides = [1, 1]} : vector<8x1024xf32> to vector<8x512xf32>
    %377 = arith.addf %375, %376 : vector<8x512xf32>
    %378 = vector.extract_strided_slice %374 {offsets = [0, 0], sizes = [8, 128], strides = [1, 1]} : vector<8x512xf32> to vector<8x128xf32>
    %379 = arith.negf %378 : vector<8x128xf32>
    %380 = math.exp %379 : vector<8x128xf32>
    %cst_95 = arith.constant 1.000000e+00 : f32
    %381 = vector.broadcast %cst_95 : f32 to vector<8x128xf32>
    %382 = arith.addf %381, %380 : vector<8x128xf32>
    %383 = arith.divf %381, %382 : vector<8x128xf32>
    %384 = vector.extract_strided_slice %374 {offsets = [0, 128], sizes = [8, 128], strides = [1, 1]} : vector<8x512xf32> to vector<8x128xf32>
    %385 = arith.negf %384 : vector<8x128xf32>
    %386 = math.exp %385 : vector<8x128xf32>
    %cst_96 = arith.constant 1.000000e+00 : f32
    %387 = vector.broadcast %cst_96 : f32 to vector<8x128xf32>
    %388 = arith.addf %387, %386 : vector<8x128xf32>
    %389 = arith.divf %387, %388 : vector<8x128xf32>
    %390 = vector.extract_strided_slice %374 {offsets = [0, 256], sizes = [8, 128], strides = [1, 1]} : vector<8x512xf32> to vector<8x128xf32>
    %391 = math.tanh %390 : vector<8x128xf32>
    %392 = vector.extract_strided_slice %374 {offsets = [0, 384], sizes = [8, 128], strides = [1, 1]} : vector<8x512xf32> to vector<8x128xf32>
    %393 = arith.negf %392 : vector<8x128xf32>
    %394 = math.exp %393 : vector<8x128xf32>
    %cst_97 = arith.constant 1.000000e+00 : f32
    %395 = vector.broadcast %cst_97 : f32 to vector<8x128xf32>
    %396 = arith.addf %395, %394 : vector<8x128xf32>
    %397 = arith.divf %395, %396 : vector<8x128xf32>
    %398 = arith.mulf %389, %339 : vector<8x128xf32>
    %399 = arith.mulf %383, %391 : vector<8x128xf32>
    %400 = arith.addf %398, %399 : vector<8x128xf32>
    %401 = math.tanh %400 : vector<8x128xf32>
    %402 = arith.mulf %397, %401 : vector<8x128xf32>
    %403 = vector.extract_strided_slice %377 {offsets = [0, 0], sizes = [8, 128], strides = [1, 1]} : vector<8x512xf32> to vector<8x128xf32>
    %404 = arith.negf %403 : vector<8x128xf32>
    %405 = math.exp %404 : vector<8x128xf32>
    %cst_98 = arith.constant 1.000000e+00 : f32
    %406 = vector.broadcast %cst_98 : f32 to vector<8x128xf32>
    %407 = arith.addf %406, %405 : vector<8x128xf32>
    %408 = arith.divf %406, %407 : vector<8x128xf32>
    %409 = vector.extract_strided_slice %377 {offsets = [0, 128], sizes = [8, 128], strides = [1, 1]} : vector<8x512xf32> to vector<8x128xf32>
    %410 = arith.negf %409 : vector<8x128xf32>
    %411 = math.exp %410 : vector<8x128xf32>
    %cst_99 = arith.constant 1.000000e+00 : f32
    %412 = vector.broadcast %cst_99 : f32 to vector<8x128xf32>
    %413 = arith.addf %412, %411 : vector<8x128xf32>
    %414 = arith.divf %412, %413 : vector<8x128xf32>
    %415 = vector.extract_strided_slice %377 {offsets = [0, 256], sizes = [8, 128], strides = [1, 1]} : vector<8x512xf32> to vector<8x128xf32>
    %416 = math.tanh %415 : vector<8x128xf32>
    %417 = vector.extract_strided_slice %377 {offsets = [0, 384], sizes = [8, 128], strides = [1, 1]} : vector<8x512xf32> to vector<8x128xf32>
    %418 = arith.negf %417 : vector<8x128xf32>
    %419 = math.exp %418 : vector<8x128xf32>
    %cst_100 = arith.constant 1.000000e+00 : f32
    %420 = vector.broadcast %cst_100 : f32 to vector<8x128xf32>
    %421 = arith.addf %420, %419 : vector<8x128xf32>
    %422 = arith.divf %420, %421 : vector<8x128xf32>
    %423 = arith.mulf %414, %364 : vector<8x128xf32>
    %424 = arith.mulf %408, %416 : vector<8x128xf32>
    %425 = arith.addf %423, %424 : vector<8x128xf32>
    %426 = math.tanh %425 : vector<8x128xf32>
    %427 = arith.mulf %422, %426 : vector<8x128xf32>
    %c48_101 = arith.constant 48 : index
    %c0_102 = arith.constant 0 : index
    %428 = vector.load %arg12[%c48_101, %c0_102] : memref<64x256xf32, #tpu.memory_space<vmem>>, vector<8x128xf32>
    tpu.vector_store %arg12[%c48_101, %c0_102], %402 {strides = array<i32>} : memref<64x256xf32, #tpu.memory_space<vmem>>, vector<8x128xf32>,
    %c8_103 = arith.constant 8 : index
    %c128_104 = arith.constant 128 : index
    %429 = vector.load %arg12[%c8_103, %c128_104] : memref<64x256xf32, #tpu.memory_space<vmem>>, vector<8x128xf32>
    tpu.vector_store %arg12[%c8_103, %c128_104], %427 {strides = array<i32>} : memref<64x256xf32, #tpu.memory_space<vmem>>, vector<8x128xf32>,
    %430 = tpu.concatenate %402, %427 in 1 : vector<8x128xf32>, vector<8x128xf32> -> vector<8x256xf32>
    %431 = arith.truncf %430 : vector<8x256xf32> to vector<8x256xbf16>
    %cst_105 = arith.constant dense<0.000000e+00> : vector<8x1024xf32>
    %432 = tpu.matmul %431, %9, %cst_105 {dimension_numbers = #tpu.dot_dimension_numbers<[1], [0], [0], [1], [0, 0, 1, 1], [], []>} : vector<8x256xbf16>, vector<256x1024xbf16>, vector<8x1024xf32> -> vector<8x1024xf32>
    %c56_106 = arith.constant 56 : index
    %c0_107 = arith.constant 0 : index
    %433 = vector.load %arg10[%c56_106, %c0_107] : memref<64x1024xf32, #tpu.memory_space<vmem>>, vector<8x512xf32>
    %434 = vector.extract_strided_slice %432 {offsets = [0, 0], sizes = [8, 512], strides = [1, 1]} : vector<8x1024xf32> to vector<8x512xf32>
    %435 = arith.addf %433, %434 : vector<8x512xf32>
    %c0_108 = arith.constant 0 : index
    %c512_109 = arith.constant 512 : index
    %436 = vector.load %arg10[%c0_108, %c512_109] : memref<64x1024xf32, #tpu.memory_space<vmem>>, vector<8x512xf32>
    %437 = vector.extract_strided_slice %432 {offsets = [0, 512], sizes = [8, 512], strides = [1, 1]} : vector<8x1024xf32> to vector<8x512xf32>
    %438 = arith.addf %436, %437 : vector<8x512xf32>
    %439 = vector.extract_strided_slice %435 {offsets = [0, 0], sizes = [8, 128], strides = [1, 1]} : vector<8x512xf32> to vector<8x128xf32>
    %440 = arith.negf %439 : vector<8x128xf32>
    %441 = math.exp %440 : vector<8x128xf32>
    %cst_110 = arith.constant 1.000000e+00 : f32
    %442 = vector.broadcast %cst_110 : f32 to vector<8x128xf32>
    %443 = arith.addf %442, %441 : vector<8x128xf32>
    %444 = arith.divf %442, %443 : vector<8x128xf32>
    %445 = vector.extract_strided_slice %435 {offsets = [0, 128], sizes = [8, 128], strides = [1, 1]} : vector<8x512xf32> to vector<8x128xf32>
    %446 = arith.negf %445 : vector<8x128xf32>
    %447 = math.exp %446 : vector<8x128xf32>
    %cst_111 = arith.constant 1.000000e+00 : f32
    %448 = vector.broadcast %cst_111 : f32 to vector<8x128xf32>
    %449 = arith.addf %448, %447 : vector<8x128xf32>
    %450 = arith.divf %448, %449 : vector<8x128xf32>
    %451 = vector.extract_strided_slice %435 {offsets = [0, 256], sizes = [8, 128], strides = [1, 1]} : vector<8x512xf32> to vector<8x128xf32>
    %452 = math.tanh %451 : vector<8x128xf32>
    %453 = vector.extract_strided_slice %435 {offsets = [0, 384], sizes = [8, 128], strides = [1, 1]} : vector<8x512xf32> to vector<8x128xf32>
    %454 = arith.negf %453 : vector<8x128xf32>
    %455 = math.exp %454 : vector<8x128xf32>
    %cst_112 = arith.constant 1.000000e+00 : f32
    %456 = vector.broadcast %cst_112 : f32 to vector<8x128xf32>
    %457 = arith.addf %456, %455 : vector<8x128xf32>
    %458 = arith.divf %456, %457 : vector<8x128xf32>
    %459 = arith.mulf %450, %400 : vector<8x128xf32>
    %460 = arith.mulf %444, %452 : vector<8x128xf32>
    %461 = arith.addf %459, %460 : vector<8x128xf32>
    %462 = math.tanh %461 : vector<8x128xf32>
    %463 = arith.mulf %458, %462 : vector<8x128xf32>
    %464 = vector.extract_strided_slice %438 {offsets = [0, 0], sizes = [8, 128], strides = [1, 1]} : vector<8x512xf32> to vector<8x128xf32>
    %465 = arith.negf %464 : vector<8x128xf32>
    %466 = math.exp %465 : vector<8x128xf32>
    %cst_113 = arith.constant 1.000000e+00 : f32
    %467 = vector.broadcast %cst_113 : f32 to vector<8x128xf32>
    %468 = arith.addf %467, %466 : vector<8x128xf32>
    %469 = arith.divf %467, %468 : vector<8x128xf32>
    %470 = vector.extract_strided_slice %438 {offsets = [0, 128], sizes = [8, 128], strides = [1, 1]} : vector<8x512xf32> to vector<8x128xf32>
    %471 = arith.negf %470 : vector<8x128xf32>
    %472 = math.exp %471 : vector<8x128xf32>
    %cst_114 = arith.constant 1.000000e+00 : f32
    %473 = vector.broadcast %cst_114 : f32 to vector<8x128xf32>
    %474 = arith.addf %473, %472 : vector<8x128xf32>
    %475 = arith.divf %473, %474 : vector<8x128xf32>
    %476 = vector.extract_strided_slice %438 {offsets = [0, 256], sizes = [8, 128], strides = [1, 1]} : vector<8x512xf32> to vector<8x128xf32>
    %477 = math.tanh %476 : vector<8x128xf32>
    %478 = vector.extract_strided_slice %438 {offsets = [0, 384], sizes = [8, 128], strides = [1, 1]} : vector<8x512xf32> to vector<8x128xf32>
    %479 = arith.negf %478 : vector<8x128xf32>
    %480 = math.exp %479 : vector<8x128xf32>
    %cst_115 = arith.constant 1.000000e+00 : f32
    %481 = vector.broadcast %cst_115 : f32 to vector<8x128xf32>
    %482 = arith.addf %481, %480 : vector<8x128xf32>
    %483 = arith.divf %481, %482 : vector<8x128xf32>
    %484 = arith.mulf %475, %425 : vector<8x128xf32>
    %485 = arith.mulf %469, %477 : vector<8x128xf32>
    %486 = arith.addf %484, %485 : vector<8x128xf32>
    %487 = math.tanh %486 : vector<8x128xf32>
    %488 = arith.mulf %483, %487 : vector<8x128xf32>
    %c56_116 = arith.constant 56 : index
    %c0_117 = arith.constant 0 : index
    %489 = vector.load %arg12[%c56_116, %c0_117] : memref<64x256xf32, #tpu.memory_space<vmem>>, vector<8x128xf32>
    tpu.vector_store %arg12[%c56_116, %c0_117], %463 {strides = array<i32>} : memref<64x256xf32, #tpu.memory_space<vmem>>, vector<8x128xf32>,
    %c0_118 = arith.constant 0 : index
    %c128_119 = arith.constant 128 : index
    %490 = vector.load %arg12[%c0_118, %c128_119] : memref<64x256xf32, #tpu.memory_space<vmem>>, vector<8x128xf32>
    tpu.vector_store %arg12[%c0_118, %c128_119], %488 {strides = array<i32>} : memref<64x256xf32, #tpu.memory_space<vmem>>, vector<8x128xf32>,
    %c0_120 = arith.constant 0 : index
    %c0_121 = arith.constant 0 : index
    %491 = vector.load %arg12[%c0_120, %c0_121] : memref<64x256xf32, #tpu.memory_space<vmem>>, vector<64x256xf32>
    %492 = arith.truncf %491 : vector<64x256xf32> to vector<64x256xbf16>
    %c0_122 = arith.constant 0 : index
    %c0_123 = arith.constant 0 : index
    %c0_124 = arith.constant 0 : index
    %493 = vector.load %arg3[%c0_122, %c0_123, %c0_124] : memref<2x256x512xbf16, #tpu.memory_space<vmem>>, vector<1x256x512xbf16>
    %494 = vector.shape_cast %493 : vector<1x256x512xbf16> to vector<256x512xbf16>
    %cst_125 = arith.constant dense<0.000000e+00> : vector<64x512xf32>
    %495 = tpu.matmul %492, %494, %cst_125 {dimension_numbers = #tpu.dot_dimension_numbers<[1], [0], [0], [1], [0, 0, 1, 1], [], []>} : vector<64x256xbf16>, vector<256x512xbf16>, vector<64x512xf32> -> vector<64x512xf32>
    %c1 = arith.constant 1 : index
    %c0_126 = arith.constant 0 : index
    %496 = vector.load %arg6[%c1, %c0_126] : memref<2x1024xf32, #tpu.memory_space<vmem>>, vector<1x512xf32>
    %497 = vector.broadcast %496 : vector<1x512xf32> to vector<64x512xf32>
    %498 = arith.addf %495, %497 : vector<64x512xf32>
    %c0_127 = arith.constant 0 : index
    %c0_128 = arith.constant 0 : index
    %499 = vector.load %arg11[%c0_127, %c0_128] : memref<64x512xf32, #tpu.memory_space<vmem>>, vector<64x512xf32>
    tpu.vector_store %arg11[%c0_127, %c0_128], %498 {strides = array<i32>} : memref<64x512xf32, #tpu.memory_space<vmem>>, vector<64x512xf32>,
    %c0_129 = arith.constant 0 : index
    %c0_130 = arith.constant 0 : index
    %500 = vector.load %arg5[%c0_129, %c0_130] : memref<128x512xbf16, #tpu.memory_space<vmem>>, vector<128x512xbf16>
    %c0_131 = arith.constant 0 : index
    %c0_132 = arith.constant 0 : index
    %501 = vector.load %arg11[%c0_131, %c0_132] : memref<64x512xf32, #tpu.memory_space<vmem>>, vector<8x512xf32>
    %502 = vector.extract_strided_slice %501 {offsets = [0, 0], sizes = [8, 128], strides = [1, 1]} : vector<8x512xf32> to vector<8x128xf32>
    %503 = arith.negf %502 : vector<8x128xf32>
    %504 = math.exp %503 : vector<8x128xf32>
    %cst_133 = arith.constant 1.000000e+00 : f32
    %505 = vector.broadcast %cst_133 : f32 to vector<8x128xf32>
    %506 = arith.addf %505, %504 : vector<8x128xf32>
    %507 = arith.divf %505, %506 : vector<8x128xf32>
    %508 = vector.extract_strided_slice %501 {offsets = [0, 128], sizes = [8, 128], strides = [1, 1]} : vector<8x512xf32> to vector<8x128xf32>
    %509 = arith.negf %508 : vector<8x128xf32>
    %510 = math.exp %509 : vector<8x128xf32>
    %cst_134 = arith.constant 1.000000e+00 : f32
    %511 = vector.broadcast %cst_134 : f32 to vector<8x128xf32>
    %512 = arith.addf %511, %510 : vector<8x128xf32>
    %513 = arith.divf %511, %512 : vector<8x128xf32>
    %514 = vector.extract_strided_slice %501 {offsets = [0, 256], sizes = [8, 128], strides = [1, 1]} : vector<8x512xf32> to vector<8x128xf32>
    %515 = math.tanh %514 : vector<8x128xf32>
    %516 = vector.extract_strided_slice %501 {offsets = [0, 384], sizes = [8, 128], strides = [1, 1]} : vector<8x512xf32> to vector<8x128xf32>
    %517 = arith.negf %516 : vector<8x128xf32>
    %518 = math.exp %517 : vector<8x128xf32>
    %cst_135 = arith.constant 1.000000e+00 : f32
    %519 = vector.broadcast %cst_135 : f32 to vector<8x128xf32>
    %520 = arith.addf %519, %518 : vector<8x128xf32>
    %521 = arith.divf %519, %520 : vector<8x128xf32>
    %522 = arith.mulf %513, %0 : vector<8x128xf32>
    %523 = arith.mulf %507, %515 : vector<8x128xf32>
    %524 = arith.addf %522, %523 : vector<8x128xf32>
    %525 = math.tanh %524 : vector<8x128xf32>
    %526 = arith.mulf %521, %525 : vector<8x128xf32>
    %c8_136 = arith.constant 8 : index
    %c0_137 = arith.constant 0 : index
    %527 = vector.load %arg11[%c8_136, %c0_137] : memref<64x512xf32, #tpu.memory_space<vmem>>, vector<8x512xf32>
    %528 = arith.truncf %526 : vector<8x128xf32> to vector<8x128xbf16>
    %cst_138 = arith.constant dense<0.000000e+00> : vector<8x512xf32>
    %529 = tpu.matmul %528, %500, %cst_138 {dimension_numbers = #tpu.dot_dimension_numbers<[1], [0], [0], [1], [0, 0, 1, 1], [], []>} : vector<8x128xbf16>, vector<128x512xbf16>, vector<8x512xf32> -> vector<8x512xf32>
    %530 = arith.addf %527, %529 : vector<8x512xf32>
    %531 = vector.extract_strided_slice %530 {offsets = [0, 0], sizes = [8, 128], strides = [1, 1]} : vector<8x512xf32> to vector<8x128xf32>
    %532 = arith.negf %531 : vector<8x128xf32>
    %533 = math.exp %532 : vector<8x128xf32>
    %cst_139 = arith.constant 1.000000e+00 : f32
    %534 = vector.broadcast %cst_139 : f32 to vector<8x128xf32>
    %535 = arith.addf %534, %533 : vector<8x128xf32>
    %536 = arith.divf %534, %535 : vector<8x128xf32>
    %537 = vector.extract_strided_slice %530 {offsets = [0, 128], sizes = [8, 128], strides = [1, 1]} : vector<8x512xf32> to vector<8x128xf32>
    %538 = arith.negf %537 : vector<8x128xf32>
    %539 = math.exp %538 : vector<8x128xf32>
    %cst_140 = arith.constant 1.000000e+00 : f32
    %540 = vector.broadcast %cst_140 : f32 to vector<8x128xf32>
    %541 = arith.addf %540, %539 : vector<8x128xf32>
    %542 = arith.divf %540, %541 : vector<8x128xf32>
    %543 = vector.extract_strided_slice %530 {offsets = [0, 256], sizes = [8, 128], strides = [1, 1]} : vector<8x512xf32> to vector<8x128xf32>
    %544 = math.tanh %543 : vector<8x128xf32>
    %545 = vector.extract_strided_slice %530 {offsets = [0, 384], sizes = [8, 128], strides = [1, 1]} : vector<8x512xf32> to vector<8x128xf32>
    %546 = arith.negf %545 : vector<8x128xf32>
    %547 = math.exp %546 : vector<8x128xf32>
    %cst_141 = arith.constant 1.000000e+00 : f32
    %548 = vector.broadcast %cst_141 : f32 to vector<8x128xf32>
    %549 = arith.addf %548, %547 : vector<8x128xf32>
    %550 = arith.divf %548, %549 : vector<8x128xf32>
    %551 = arith.mulf %542, %524 : vector<8x128xf32>
    %552 = arith.mulf %536, %544 : vector<8x128xf32>
    %553 = arith.addf %551, %552 : vector<8x128xf32>
    %554 = math.tanh %553 : vector<8x128xf32>
    %555 = arith.mulf %550, %554 : vector<8x128xf32>
    %c16_142 = arith.constant 16 : index
    %c0_143 = arith.constant 0 : index
    %556 = vector.load %arg11[%c16_142, %c0_143] : memref<64x512xf32, #tpu.memory_space<vmem>>, vector<8x512xf32>
    %557 = arith.truncf %555 : vector<8x128xf32> to vector<8x128xbf16>
    %cst_144 = arith.constant dense<0.000000e+00> : vector<8x512xf32>
    %558 = tpu.matmul %557, %500, %cst_144 {dimension_numbers = #tpu.dot_dimension_numbers<[1], [0], [0], [1], [0, 0, 1, 1], [], []>} : vector<8x128xbf16>, vector<128x512xbf16>, vector<8x512xf32> -> vector<8x512xf32>
    %559 = arith.addf %556, %558 : vector<8x512xf32>
    %560 = vector.extract_strided_slice %559 {offsets = [0, 0], sizes = [8, 128], strides = [1, 1]} : vector<8x512xf32> to vector<8x128xf32>
    %561 = arith.negf %560 : vector<8x128xf32>
    %562 = math.exp %561 : vector<8x128xf32>
    %cst_145 = arith.constant 1.000000e+00 : f32
    %563 = vector.broadcast %cst_145 : f32 to vector<8x128xf32>
    %564 = arith.addf %563, %562 : vector<8x128xf32>
    %565 = arith.divf %563, %564 : vector<8x128xf32>
    %566 = vector.extract_strided_slice %559 {offsets = [0, 128], sizes = [8, 128], strides = [1, 1]} : vector<8x512xf32> to vector<8x128xf32>
    %567 = arith.negf %566 : vector<8x128xf32>
    %568 = math.exp %567 : vector<8x128xf32>
    %cst_146 = arith.constant 1.000000e+00 : f32
    %569 = vector.broadcast %cst_146 : f32 to vector<8x128xf32>
    %570 = arith.addf %569, %568 : vector<8x128xf32>
    %571 = arith.divf %569, %570 : vector<8x128xf32>
    %572 = vector.extract_strided_slice %559 {offsets = [0, 256], sizes = [8, 128], strides = [1, 1]} : vector<8x512xf32> to vector<8x128xf32>
    %573 = math.tanh %572 : vector<8x128xf32>
    %574 = vector.extract_strided_slice %559 {offsets = [0, 384], sizes = [8, 128], strides = [1, 1]} : vector<8x512xf32> to vector<8x128xf32>
    %575 = arith.negf %574 : vector<8x128xf32>
    %576 = math.exp %575 : vector<8x128xf32>
    %cst_147 = arith.constant 1.000000e+00 : f32
    %577 = vector.broadcast %cst_147 : f32 to vector<8x128xf32>
    %578 = arith.addf %577, %576 : vector<8x128xf32>
    %579 = arith.divf %577, %578 : vector<8x128xf32>
    %580 = arith.mulf %571, %553 : vector<8x128xf32>
    %581 = arith.mulf %565, %573 : vector<8x128xf32>
    %582 = arith.addf %580, %581 : vector<8x128xf32>
    %583 = math.tanh %582 : vector<8x128xf32>
    %584 = arith.mulf %579, %583 : vector<8x128xf32>
    %c24_148 = arith.constant 24 : index
    %c0_149 = arith.constant 0 : index
    %585 = vector.load %arg11[%c24_148, %c0_149] : memref<64x512xf32, #tpu.memory_space<vmem>>, vector<8x512xf32>
    %586 = arith.truncf %584 : vector<8x128xf32> to vector<8x128xbf16>
    %cst_150 = arith.constant dense<0.000000e+00> : vector<8x512xf32>
    %587 = tpu.matmul %586, %500, %cst_150 {dimension_numbers = #tpu.dot_dimension_numbers<[1], [0], [0], [1], [0, 0, 1, 1], [], []>} : vector<8x128xbf16>, vector<128x512xbf16>, vector<8x512xf32> -> vector<8x512xf32>
    %588 = arith.addf %585, %587 : vector<8x512xf32>
    %589 = vector.extract_strided_slice %588 {offsets = [0, 0], sizes = [8, 128], strides = [1, 1]} : vector<8x512xf32> to vector<8x128xf32>
    %590 = arith.negf %589 : vector<8x128xf32>
    %591 = math.exp %590 : vector<8x128xf32>
    %cst_151 = arith.constant 1.000000e+00 : f32
    %592 = vector.broadcast %cst_151 : f32 to vector<8x128xf32>
    %593 = arith.addf %592, %591 : vector<8x128xf32>
    %594 = arith.divf %592, %593 : vector<8x128xf32>
    %595 = vector.extract_strided_slice %588 {offsets = [0, 128], sizes = [8, 128], strides = [1, 1]} : vector<8x512xf32> to vector<8x128xf32>
    %596 = arith.negf %595 : vector<8x128xf32>
    %597 = math.exp %596 : vector<8x128xf32>
    %cst_152 = arith.constant 1.000000e+00 : f32
    %598 = vector.broadcast %cst_152 : f32 to vector<8x128xf32>
    %599 = arith.addf %598, %597 : vector<8x128xf32>
    %600 = arith.divf %598, %599 : vector<8x128xf32>
    %601 = vector.extract_strided_slice %588 {offsets = [0, 256], sizes = [8, 128], strides = [1, 1]} : vector<8x512xf32> to vector<8x128xf32>
    %602 = math.tanh %601 : vector<8x128xf32>
    %603 = vector.extract_strided_slice %588 {offsets = [0, 384], sizes = [8, 128], strides = [1, 1]} : vector<8x512xf32> to vector<8x128xf32>
    %604 = arith.negf %603 : vector<8x128xf32>
    %605 = math.exp %604 : vector<8x128xf32>
    %cst_153 = arith.constant 1.000000e+00 : f32
    %606 = vector.broadcast %cst_153 : f32 to vector<8x128xf32>
    %607 = arith.addf %606, %605 : vector<8x128xf32>
    %608 = arith.divf %606, %607 : vector<8x128xf32>
    %609 = arith.mulf %600, %582 : vector<8x128xf32>
    %610 = arith.mulf %594, %602 : vector<8x128xf32>
    %611 = arith.addf %609, %610 : vector<8x128xf32>
    %612 = math.tanh %611 : vector<8x128xf32>
    %613 = arith.mulf %608, %612 : vector<8x128xf32>
    %c32_154 = arith.constant 32 : index
    %c0_155 = arith.constant 0 : index
    %614 = vector.load %arg11[%c32_154, %c0_155] : memref<64x512xf32, #tpu.memory_space<vmem>>, vector<8x512xf32>
    %615 = arith.truncf %613 : vector<8x128xf32> to vector<8x128xbf16>
    %cst_156 = arith.constant dense<0.000000e+00> : vector<8x512xf32>
    %616 = tpu.matmul %615, %500, %cst_156 {dimension_numbers = #tpu.dot_dimension_numbers<[1], [0], [0], [1], [0, 0, 1, 1], [], []>} : vector<8x128xbf16>, vector<128x512xbf16>, vector<8x512xf32> -> vector<8x512xf32>
    %617 = arith.addf %614, %616 : vector<8x512xf32>
    %618 = vector.extract_strided_slice %617 {offsets = [0, 0], sizes = [8, 128], strides = [1, 1]} : vector<8x512xf32> to vector<8x128xf32>
    %619 = arith.negf %618 : vector<8x128xf32>
    %620 = math.exp %619 : vector<8x128xf32>
    %cst_157 = arith.constant 1.000000e+00 : f32
    %621 = vector.broadcast %cst_157 : f32 to vector<8x128xf32>
    %622 = arith.addf %621, %620 : vector<8x128xf32>
    %623 = arith.divf %621, %622 : vector<8x128xf32>
    %624 = vector.extract_strided_slice %617 {offsets = [0, 128], sizes = [8, 128], strides = [1, 1]} : vector<8x512xf32> to vector<8x128xf32>
    %625 = arith.negf %624 : vector<8x128xf32>
    %626 = math.exp %625 : vector<8x128xf32>
    %cst_158 = arith.constant 1.000000e+00 : f32
    %627 = vector.broadcast %cst_158 : f32 to vector<8x128xf32>
    %628 = arith.addf %627, %626 : vector<8x128xf32>
    %629 = arith.divf %627, %628 : vector<8x128xf32>
    %630 = vector.extract_strided_slice %617 {offsets = [0, 256], sizes = [8, 128], strides = [1, 1]} : vector<8x512xf32> to vector<8x128xf32>
    %631 = math.tanh %630 : vector<8x128xf32>
    %632 = vector.extract_strided_slice %617 {offsets = [0, 384], sizes = [8, 128], strides = [1, 1]} : vector<8x512xf32> to vector<8x128xf32>
    %633 = arith.negf %632 : vector<8x128xf32>
    %634 = math.exp %633 : vector<8x128xf32>
    %cst_159 = arith.constant 1.000000e+00 : f32
    %635 = vector.broadcast %cst_159 : f32 to vector<8x128xf32>
    %636 = arith.addf %635, %634 : vector<8x128xf32>
    %637 = arith.divf %635, %636 : vector<8x128xf32>
    %638 = arith.mulf %629, %611 : vector<8x128xf32>
    %639 = arith.mulf %623, %631 : vector<8x128xf32>
    %640 = arith.addf %638, %639 : vector<8x128xf32>
    %641 = math.tanh %640 : vector<8x128xf32>
    %642 = arith.mulf %637, %641 : vector<8x128xf32>
    %c40_160 = arith.constant 40 : index
    %c0_161 = arith.constant 0 : index
    %643 = vector.load %arg11[%c40_160, %c0_161] : memref<64x512xf32, #tpu.memory_space<vmem>>, vector<8x512xf32>
    %644 = arith.truncf %642 : vector<8x128xf32> to vector<8x128xbf16>
    %cst_162 = arith.constant dense<0.000000e+00> : vector<8x512xf32>
    %645 = tpu.matmul %644, %500, %cst_162 {dimension_numbers = #tpu.dot_dimension_numbers<[1], [0], [0], [1], [0, 0, 1, 1], [], []>} : vector<8x128xbf16>, vector<128x512xbf16>, vector<8x512xf32> -> vector<8x512xf32>
    %646 = arith.addf %643, %645 : vector<8x512xf32>
    %647 = vector.extract_strided_slice %646 {offsets = [0, 0], sizes = [8, 128], strides = [1, 1]} : vector<8x512xf32> to vector<8x128xf32>
    %648 = arith.negf %647 : vector<8x128xf32>
    %649 = math.exp %648 : vector<8x128xf32>
    %cst_163 = arith.constant 1.000000e+00 : f32
    %650 = vector.broadcast %cst_163 : f32 to vector<8x128xf32>
    %651 = arith.addf %650, %649 : vector<8x128xf32>
    %652 = arith.divf %650, %651 : vector<8x128xf32>
    %653 = vector.extract_strided_slice %646 {offsets = [0, 128], sizes = [8, 128], strides = [1, 1]} : vector<8x512xf32> to vector<8x128xf32>
    %654 = arith.negf %653 : vector<8x128xf32>
    %655 = math.exp %654 : vector<8x128xf32>
    %cst_164 = arith.constant 1.000000e+00 : f32
    %656 = vector.broadcast %cst_164 : f32 to vector<8x128xf32>
    %657 = arith.addf %656, %655 : vector<8x128xf32>
    %658 = arith.divf %656, %657 : vector<8x128xf32>
    %659 = vector.extract_strided_slice %646 {offsets = [0, 256], sizes = [8, 128], strides = [1, 1]} : vector<8x512xf32> to vector<8x128xf32>
    %660 = math.tanh %659 : vector<8x128xf32>
    %661 = vector.extract_strided_slice %646 {offsets = [0, 384], sizes = [8, 128], strides = [1, 1]} : vector<8x512xf32> to vector<8x128xf32>
    %662 = arith.negf %661 : vector<8x128xf32>
    %663 = math.exp %662 : vector<8x128xf32>
    %cst_165 = arith.constant 1.000000e+00 : f32
    %664 = vector.broadcast %cst_165 : f32 to vector<8x128xf32>
    %665 = arith.addf %664, %663 : vector<8x128xf32>
    %666 = arith.divf %664, %665 : vector<8x128xf32>
    %667 = arith.mulf %658, %640 : vector<8x128xf32>
    %668 = arith.mulf %652, %660 : vector<8x128xf32>
    %669 = arith.addf %667, %668 : vector<8x128xf32>
    %670 = math.tanh %669 : vector<8x128xf32>
    %671 = arith.mulf %666, %670 : vector<8x128xf32>
    %c48_166 = arith.constant 48 : index
    %c0_167 = arith.constant 0 : index
    %672 = vector.load %arg11[%c48_166, %c0_167] : memref<64x512xf32, #tpu.memory_space<vmem>>, vector<8x512xf32>
    %673 = arith.truncf %671 : vector<8x128xf32> to vector<8x128xbf16>
    %cst_168 = arith.constant dense<0.000000e+00> : vector<8x512xf32>
    %674 = tpu.matmul %673, %500, %cst_168 {dimension_numbers = #tpu.dot_dimension_numbers<[1], [0], [0], [1], [0, 0, 1, 1], [], []>} : vector<8x128xbf16>, vector<128x512xbf16>, vector<8x512xf32> -> vector<8x512xf32>
    %675 = arith.addf %672, %674 : vector<8x512xf32>
    %676 = vector.extract_strided_slice %675 {offsets = [0, 0], sizes = [8, 128], strides = [1, 1]} : vector<8x512xf32> to vector<8x128xf32>
    %677 = arith.negf %676 : vector<8x128xf32>
    %678 = math.exp %677 : vector<8x128xf32>
    %cst_169 = arith.constant 1.000000e+00 : f32
    %679 = vector.broadcast %cst_169 : f32 to vector<8x128xf32>
    %680 = arith.addf %679, %678 : vector<8x128xf32>
    %681 = arith.divf %679, %680 : vector<8x128xf32>
    %682 = vector.extract_strided_slice %675 {offsets = [0, 128], sizes = [8, 128], strides = [1, 1]} : vector<8x512xf32> to vector<8x128xf32>
    %683 = arith.negf %682 : vector<8x128xf32>
    %684 = math.exp %683 : vector<8x128xf32>
    %cst_170 = arith.constant 1.000000e+00 : f32
    %685 = vector.broadcast %cst_170 : f32 to vector<8x128xf32>
    %686 = arith.addf %685, %684 : vector<8x128xf32>
    %687 = arith.divf %685, %686 : vector<8x128xf32>
    %688 = vector.extract_strided_slice %675 {offsets = [0, 256], sizes = [8, 128], strides = [1, 1]} : vector<8x512xf32> to vector<8x128xf32>
    %689 = math.tanh %688 : vector<8x128xf32>
    %690 = vector.extract_strided_slice %675 {offsets = [0, 384], sizes = [8, 128], strides = [1, 1]} : vector<8x512xf32> to vector<8x128xf32>
    %691 = arith.negf %690 : vector<8x128xf32>
    %692 = math.exp %691 : vector<8x128xf32>
    %cst_171 = arith.constant 1.000000e+00 : f32
    %693 = vector.broadcast %cst_171 : f32 to vector<8x128xf32>
    %694 = arith.addf %693, %692 : vector<8x128xf32>
    %695 = arith.divf %693, %694 : vector<8x128xf32>
    %696 = arith.mulf %687, %669 : vector<8x128xf32>
    %697 = arith.mulf %681, %689 : vector<8x128xf32>
    %698 = arith.addf %696, %697 : vector<8x128xf32>
    %699 = math.tanh %698 : vector<8x128xf32>
    %700 = arith.mulf %695, %699 : vector<8x128xf32>
    %c56_172 = arith.constant 56 : index
    %c0_173 = arith.constant 0 : index
    %701 = vector.load %arg11[%c56_172, %c0_173] : memref<64x512xf32, #tpu.memory_space<vmem>>, vector<8x512xf32>
    %702 = arith.truncf %700 : vector<8x128xf32> to vector<8x128xbf16>
    %cst_174 = arith.constant dense<0.000000e+00> : vector<8x512xf32>
    %703 = tpu.matmul %702, %500, %cst_174 {dimension_numbers = #tpu.dot_dimension_numbers<[1], [0], [0], [1], [0, 0, 1, 1], [], []>} : vector<8x128xbf16>, vector<128x512xbf16>, vector<8x512xf32> -> vector<8x512xf32>
    %704 = arith.addf %701, %703 : vector<8x512xf32>
    %705 = vector.extract_strided_slice %704 {offsets = [0, 0], sizes = [8, 128], strides = [1, 1]} : vector<8x512xf32> to vector<8x128xf32>
    %706 = arith.negf %705 : vector<8x128xf32>
    %707 = math.exp %706 : vector<8x128xf32>
    %cst_175 = arith.constant 1.000000e+00 : f32
    %708 = vector.broadcast %cst_175 : f32 to vector<8x128xf32>
    %709 = arith.addf %708, %707 : vector<8x128xf32>
    %710 = arith.divf %708, %709 : vector<8x128xf32>
    %711 = vector.extract_strided_slice %704 {offsets = [0, 128], sizes = [8, 128], strides = [1, 1]} : vector<8x512xf32> to vector<8x128xf32>
    %712 = arith.negf %711 : vector<8x128xf32>
    %713 = math.exp %712 : vector<8x128xf32>
    %cst_176 = arith.constant 1.000000e+00 : f32
    %714 = vector.broadcast %cst_176 : f32 to vector<8x128xf32>
    %715 = arith.addf %714, %713 : vector<8x128xf32>
    %716 = arith.divf %714, %715 : vector<8x128xf32>
    %717 = vector.extract_strided_slice %704 {offsets = [0, 256], sizes = [8, 128], strides = [1, 1]} : vector<8x512xf32> to vector<8x128xf32>
    %718 = math.tanh %717 : vector<8x128xf32>
    %719 = vector.extract_strided_slice %704 {offsets = [0, 384], sizes = [8, 128], strides = [1, 1]} : vector<8x512xf32> to vector<8x128xf32>
    %720 = arith.negf %719 : vector<8x128xf32>
    %721 = math.exp %720 : vector<8x128xf32>
    %cst_177 = arith.constant 1.000000e+00 : f32
    %722 = vector.broadcast %cst_177 : f32 to vector<8x128xf32>
    %723 = arith.addf %722, %721 : vector<8x128xf32>
    %724 = arith.divf %722, %723 : vector<8x128xf32>
    %725 = arith.mulf %716, %698 : vector<8x128xf32>
    %726 = arith.mulf %710, %718 : vector<8x128xf32>
    %727 = arith.addf %725, %726 : vector<8x128xf32>
    %728 = math.tanh %727 : vector<8x128xf32>
    %729 = arith.mulf %724, %728 : vector<8x128xf32>
    %c56_178 = arith.constant 56 : index
    %c0_179 = arith.constant 0 : index
    %730 = vector.load %arg12[%c56_178, %c0_179] : memref<64x256xf32, #tpu.memory_space<vmem>>, vector<8x256xf32>
    %731 = arith.truncf %730 : vector<8x256xf32> to vector<8x256xbf16>
    %c1_180 = arith.constant 1 : index
    %c0_181 = arith.constant 0 : index
    %c0_182 = arith.constant 0 : index
    %732 = vector.load %arg3[%c1_180, %c0_181, %c0_182] : memref<2x256x512xbf16, #tpu.memory_space<vmem>>, vector<1x256x512xbf16>
    %733 = vector.shape_cast %732 : vector<1x256x512xbf16> to vector<256x512xbf16>
    %cst_183 = arith.constant dense<0.000000e+00> : vector<8x512xf32>
    %734 = tpu.matmul %731, %733, %cst_183 {dimension_numbers = #tpu.dot_dimension_numbers<[1], [0], [0], [1], [0, 0, 1, 1], [], []>} : vector<8x256xbf16>, vector<256x512xbf16>, vector<8x512xf32> -> vector<8x512xf32>
    %c1_184 = arith.constant 1 : index
    %c512_185 = arith.constant 512 : index
    %735 = vector.load %arg6[%c1_184, %c512_185] : memref<2x1024xf32, #tpu.memory_space<vmem>>, vector<1x512xf32>
    %736 = vector.broadcast %735 : vector<1x512xf32> to vector<8x512xf32>
    %737 = arith.addf %734, %736 : vector<8x512xf32>
    %738 = vector.extract_strided_slice %737 {offsets = [0, 0], sizes = [8, 128], strides = [1, 1]} : vector<8x512xf32> to vector<8x128xf32>
    %739 = arith.negf %738 : vector<8x128xf32>
    %740 = math.exp %739 : vector<8x128xf32>
    %cst_186 = arith.constant 1.000000e+00 : f32
    %741 = vector.broadcast %cst_186 : f32 to vector<8x128xf32>
    %742 = arith.addf %741, %740 : vector<8x128xf32>
    %743 = arith.divf %741, %742 : vector<8x128xf32>
    %744 = vector.extract_strided_slice %737 {offsets = [0, 128], sizes = [8, 128], strides = [1, 1]} : vector<8x512xf32> to vector<8x128xf32>
    %745 = arith.negf %744 : vector<8x128xf32>
    %746 = math.exp %745 : vector<8x128xf32>
    %cst_187 = arith.constant 1.000000e+00 : f32
    %747 = vector.broadcast %cst_187 : f32 to vector<8x128xf32>
    %748 = arith.addf %747, %746 : vector<8x128xf32>
    %749 = arith.divf %747, %748 : vector<8x128xf32>
    %750 = vector.extract_strided_slice %737 {offsets = [0, 256], sizes = [8, 128], strides = [1, 1]} : vector<8x512xf32> to vector<8x128xf32>
    %751 = math.tanh %750 : vector<8x128xf32>
    %752 = vector.extract_strided_slice %737 {offsets = [0, 384], sizes = [8, 128], strides = [1, 1]} : vector<8x512xf32> to vector<8x128xf32>
    %753 = arith.negf %752 : vector<8x128xf32>
    %754 = math.exp %753 : vector<8x128xf32>
    %cst_188 = arith.constant 1.000000e+00 : f32
    %755 = vector.broadcast %cst_188 : f32 to vector<8x128xf32>
    %756 = arith.addf %755, %754 : vector<8x128xf32>
    %757 = arith.divf %755, %756 : vector<8x128xf32>
    %758 = arith.mulf %749, %0 : vector<8x128xf32>
    %759 = arith.mulf %743, %751 : vector<8x128xf32>
    %760 = arith.addf %758, %759 : vector<8x128xf32>
    %761 = math.tanh %760 : vector<8x128xf32>
    %762 = arith.mulf %757, %761 : vector<8x128xf32>
    %763 = tpu.concatenate %729, %762 in 1 : vector<8x128xf32>, vector<8x128xf32> -> vector<8x256xf32>
    %764 = arith.truncf %763 : vector<8x256xf32> to vector<8x256xbf16>
    tpu.wait_dma2 semaphore(%arg14 : memref<!tpu.dma_semaphore, #tpu.memory_space<semaphore_mem>>) src(%arg7 : memref<1664x256xbf16, #tpu.memory_space<any>>) dst(%arg13 : memref<1664x256xbf16, #tpu.memory_space<vmem>>)
    %c0_189 = arith.constant 0 : index
    %c0_190 = arith.constant 0 : index
    %765 = vector.load %arg13[%c0_189, %c0_190] : memref<1664x256xbf16, #tpu.memory_space<vmem>>, vector<256x256xbf16>
    %cst_191 = arith.constant dense<0.000000e+00> : vector<8x256xf32>
    %766 = tpu.matmul %764, %765, %cst_191 {dimension_numbers = #tpu.dot_dimension_numbers<[1], [0], [0], [1], [0, 0, 1, 1], [], []>} : vector<8x256xbf16>, vector<256x256xbf16>, vector<8x256xf32> -> vector<8x256xf32>
    %c0_192 = arith.constant 0 : index
    %c0_193 = arith.constant 0 : index
    %767 = vector.load %arg8[%c0_192, %c0_193] : memref<10x256xf32, #tpu.memory_space<vmem>>, vector<1x256xf32>
    %768 = vector.broadcast %767 : vector<1x256xf32> to vector<8x256xf32>
    %769 = arith.addf %766, %768 : vector<8x256xf32>
    %cst_194 = arith.constant 0.000000e+00 : f32
    %770 = vector.broadcast %cst_194 : f32 to vector<8x256xf32>
    %771 = arith.maximumf %769, %770 : vector<8x256xf32>
    %c1_195 = arith.constant 1 : index
    %c0_196 = arith.constant 0 : index
    %772 = vector.load %arg8[%c1_195, %c0_196] : memref<10x256xf32, #tpu.memory_space<vmem>>, vector<1x256xf32>
    %773 = vector.broadcast %772 : vector<1x256xf32> to vector<8x256xf32>
    %774 = arith.mulf %771, %773 : vector<8x256xf32>
    %c2 = arith.constant 2 : index
    %c0_197 = arith.constant 0 : index
    %775 = vector.load %arg8[%c2, %c0_197] : memref<10x256xf32, #tpu.memory_space<vmem>>, vector<1x256xf32>
    %776 = vector.broadcast %775 : vector<1x256xf32> to vector<8x256xf32>
    %777 = arith.addf %774, %776 : vector<8x256xf32>
    %778 = arith.truncf %777 : vector<8x256xf32> to vector<8x256xbf16>
    %c256 = arith.constant 256 : index
    %c0_198 = arith.constant 0 : index
    %779 = vector.load %arg13[%c256, %c0_198] : memref<1664x256xbf16, #tpu.memory_space<vmem>>, vector<256x256xbf16>
    %cst_199 = arith.constant dense<0.000000e+00> : vector<8x256xf32>
    %780 = tpu.matmul %778, %779, %cst_199 {dimension_numbers = #tpu.dot_dimension_numbers<[1], [0], [0], [1], [0, 0, 1, 1], [], []>} : vector<8x256xbf16>, vector<256x256xbf16>, vector<8x256xf32> -> vector<8x256xf32>
    %c3 = arith.constant 3 : index
    %c0_200 = arith.constant 0 : index
    %781 = vector.load %arg8[%c3, %c0_200] : memref<10x256xf32, #tpu.memory_space<vmem>>, vector<1x256xf32>
    %782 = vector.broadcast %781 : vector<1x256xf32> to vector<8x256xf32>
    %783 = arith.addf %780, %782 : vector<8x256xf32>
    %784 = arith.addf %783, %777 : vector<8x256xf32>
    %c0_201 = arith.constant 0 : index
    %c0_202 = arith.constant 0 : index
    %785 = vector.load %arg1[%c0_201, %c0_202] : memref<8x256xf32, #tpu.memory_space<vmem>>, vector<8x256xf32>
    %786 = arith.truncf %785 : vector<8x256xf32> to vector<8x256xbf16>
    %c512_203 = arith.constant 512 : index
    %c0_204 = arith.constant 0 : index
    %787 = vector.load %arg13[%c512_203, %c0_204] : memref<1664x256xbf16, #tpu.memory_space<vmem>>, vector<256x128xbf16>
    %cst_205 = arith.constant dense<0.000000e+00> : vector<8x128xf32>
    %788 = tpu.matmul %786, %787, %cst_205 {dimension_numbers = #tpu.dot_dimension_numbers<[1], [0], [0], [1], [0, 0, 1, 1], [], []>} : vector<8x256xbf16>, vector<256x128xbf16>, vector<8x128xf32> -> vector<8x128xf32>
    %c4 = arith.constant 4 : index
    %c0_206 = arith.constant 0 : index
    %789 = vector.load %arg8[%c4, %c0_206] : memref<10x256xf32, #tpu.memory_space<vmem>>, vector<1x128xf32>
    %790 = vector.broadcast %789 : vector<1x128xf32> to vector<8x128xf32>
    %791 = arith.addf %788, %790 : vector<8x128xf32>
    %cst_207 = arith.constant 0.000000e+00 : f32
    %792 = vector.broadcast %cst_207 : f32 to vector<8x128xf32>
    %793 = arith.maximumf %791, %792 : vector<8x128xf32>
    %794 = arith.truncf %793 : vector<8x128xf32> to vector<8x128xbf16>
    %c768 = arith.constant 768 : index
    %c0_208 = arith.constant 0 : index
    %795 = vector.load %arg13[%c768, %c0_208] : memref<1664x256xbf16, #tpu.memory_space<vmem>>, vector<128x256xbf16>
    %cst_209 = arith.constant dense<0.000000e+00> : vector<8x256xf32>
    %796 = tpu.matmul %794, %795, %cst_209 {dimension_numbers = #tpu.dot_dimension_numbers<[1], [0], [0], [1], [0, 0, 1, 1], [], []>} : vector<8x128xbf16>, vector<128x256xbf16>, vector<8x256xf32> -> vector<8x256xf32>
    %c5 = arith.constant 5 : index
    %c0_210 = arith.constant 0 : index
    %797 = vector.load %arg8[%c5, %c0_210] : memref<10x256xf32, #tpu.memory_space<vmem>>, vector<1x256xf32>
    %798 = vector.broadcast %797 : vector<1x256xf32> to vector<8x256xf32>
    %799 = arith.addf %796, %798 : vector<8x256xf32>
    %cst_211 = arith.constant 0.000000e+00 : f32
    %800 = vector.broadcast %cst_211 : f32 to vector<8x256xf32>
    %801 = arith.maximumf %799, %800 : vector<8x256xf32>
    %802 = tpu.concatenate %784, %801 in 1 : vector<8x256xf32>, vector<8x256xf32> -> vector<8x512xf32>
    %803 = arith.truncf %802 : vector<8x512xf32> to vector<8x512xbf16>
    %c896 = arith.constant 896 : index
    %c0_212 = arith.constant 0 : index
    %804 = vector.load %arg13[%c896, %c0_212] : memref<1664x256xbf16, #tpu.memory_space<vmem>>, vector<512x256xbf16>
    %cst_213 = arith.constant dense<0.000000e+00> : vector<8x256xf32>
    %805 = tpu.matmul %803, %804, %cst_213 {dimension_numbers = #tpu.dot_dimension_numbers<[1], [0], [0], [1], [0, 0, 1, 1], [], []>} : vector<8x512xbf16>, vector<512x256xbf16>, vector<8x256xf32> -> vector<8x256xf32>
    %c6 = arith.constant 6 : index
    %c0_214 = arith.constant 0 : index
    %806 = vector.load %arg8[%c6, %c0_214] : memref<10x256xf32, #tpu.memory_space<vmem>>, vector<1x256xf32>
    %807 = vector.broadcast %806 : vector<1x256xf32> to vector<8x256xf32>
    %808 = arith.addf %805, %807 : vector<8x256xf32>
    %cst_215 = arith.constant 0.000000e+00 : f32
    %809 = vector.broadcast %cst_215 : f32 to vector<8x256xf32>
    %810 = arith.maximumf %808, %809 : vector<8x256xf32>
    %811 = arith.truncf %810 : vector<8x256xf32> to vector<8x256xbf16>
    %c1408 = arith.constant 1408 : index
    %c0_216 = arith.constant 0 : index
    %812 = vector.load %arg13[%c1408, %c0_216] : memref<1664x256xbf16, #tpu.memory_space<vmem>>, vector<256x128xbf16>
    %cst_217 = arith.constant dense<0.000000e+00> : vector<8x128xf32>
    %813 = tpu.matmul %811, %812, %cst_217 {dimension_numbers = #tpu.dot_dimension_numbers<[1], [0], [0], [1], [0, 0, 1, 1], [], []>} : vector<8x256xbf16>, vector<256x128xbf16>, vector<8x128xf32> -> vector<8x128xf32>
    %c7 = arith.constant 7 : index
    %c0_218 = arith.constant 0 : index
    %814 = vector.load %arg8[%c7, %c0_218] : memref<10x256xf32, #tpu.memory_space<vmem>>, vector<1x128xf32>
    %815 = vector.broadcast %814 : vector<1x128xf32> to vector<8x128xf32>
    %816 = arith.addf %813, %815 : vector<8x128xf32>
    %cst_219 = arith.constant 0.000000e+00 : f32
    %817 = vector.broadcast %cst_219 : f32 to vector<8x128xf32>
    %818 = arith.maximumf %816, %817 : vector<8x128xf32>
    %c9 = arith.constant 9 : index
    %c0_220 = arith.constant 0 : index
    %819 = vector.load %arg8[%c9, %c0_220] : memref<10x256xf32, #tpu.memory_space<vmem>>, vector<1x128xf32>
    %820 = vector.broadcast %819 : vector<1x128xf32> to vector<8x128xf32>
    %821 = arith.mulf %818, %820 : vector<8x128xf32>
    %cst_221 = arith.constant dense<0.000000e+00> : vector<8xf32>
    %822 = vector.multi_reduction <add>, %821, %cst_221 [1] : vector<8x128xf32> to vector<8xf32>
    %823 = vector.shape_cast %822 : vector<8xf32> to vector<8x1xf32>
    %c8_222 = arith.constant 8 : index
    %c0_223 = arith.constant 0 : index
    %824 = vector.load %arg8[%c8_222, %c0_223] : memref<10x256xf32, #tpu.memory_space<vmem>>, vector<1x1xf32>
    %825 = vector.broadcast %824 : vector<1x1xf32> to vector<8x1xf32>
    %826 = arith.addf %823, %825 : vector<8x1xf32>
    %cst_224 = arith.constant 0.000000e+00 : f32
    %827 = vector.broadcast %cst_224 : f32 to vector<8x1xf32>
    %828 = arith.maximumf %826, %827 : vector<8x1xf32>
    %cst_225 = arith.constant 0.000000e+00 : f32
    %cst_226 = arith.constant 1.000000e+03 : f32
    %829 = vector.broadcast %cst_225 : f32 to vector<8x1xf32>
    %830 = arith.maximumf %829, %828 : vector<8x1xf32>
    %831 = vector.broadcast %cst_226 : f32 to vector<8x1xf32>
    %832 = arith.minimumf %831, %830 : vector<8x1xf32>
    %c0_227 = arith.constant 0 : index
    %c0_228 = arith.constant 0 : index
    %833 = vector.load %arg9[%c0_227, %c0_228] : memref<8x1xf32, #tpu.memory_space<vmem>>, vector<8x1xf32>
    tpu.vector_store %arg9[%c0_227, %c0_228], %832 {strides = array<i32>} : memref<8x1xf32, #tpu.memory_space<vmem>>, vector<8x1xf32>,
    return
  }
}

</mosaic_0001>

<bundles_post_ra>
// kernel: tpu_custom_call.1
= control target key start
LH: loop header
LB: loop body
LE: loop exit
PB: predicated region body
PF: predicated region fallthrough
CT: control target
= control target key end

     0   :  { %14 = vsyncpa [#allocation8], 0  ;;  %s10634_s0 = inlined_call_operand.vmem [shape: f32[64,16], index: 0, kind: input, shape index: {}]   ;;  %s10635_s1 = inlined_call_operand.vmem [shape: f32[8,256], index: 1, kind: input, shape index: {}]   ;;  %s10636_s2 = inlined_call_operand.vmem [shape: bf16[16,1024], index: 2, kind: input, shape index: {}]   ;;  %s10637_s3 = inlined_call_operand.hbm [shape: bf16[2,256,512], index: 3, kind: input, shape index: {}]   ;;  %s10638_s4 = inlined_call_operand.hbm [shape: bf16[256,1024], index: 4, kind: input, shape index: {}]   ;;  %s10639_s5 = inlined_call_operand.hbm [shape: bf16[128,512], index: 5, kind: input, shape index: {}]   ;;  %s10640_s6 = inlined_call_operand.hbm [shape: f32[2,1024], index: 6, kind: input, shape index: {}]   ;;  %s10641_s7 = inlined_call_operand.hbm [shape: bf16[1664,256], index: 7, kind: input, shape index: {}]   ;;  %s10642_s8 = inlined_call_operand.hbm [shape: f32[10,256], index: 8, kind: input, shape index: {}]   ;;  %s10643_s9 = inlined_call_operand.vmem [shape: f32[8,1], index: 9, kind: output, shape index: {}]  }
   0x1   :  { %15 = vsyncpa [#allocation10], 0 }
   0x2   :  { %16 = vsyncpa [#allocation13], 0  ;;  %s8385_s30 = smov [#allocation9]  }
   0x3   :  { %s40_s10 = sshll.u32 %s8385_s30, 4  ;;  %s41_s10 = int_to_ptr.vmem [resolvable:$true] %s40_s10 }
   0x4   :  { %s8265_s11 = scalar_lea.vmem %s41_s10, 16384  ;;  %p8270_p1 = scmp.lt.s32.totalorder %s41_s10, %s41_s10 }
   0x5   :  { %p8266_p0 = scmp.ne.s32.totalorder %s41_s10, %s8265_s11  ;;  %p8271_p2 = scmp.lt.s32.totalorder %s8265_s11, %s8265_s11 }
   0x7   :  { %p8272_p3 = por %p8271_p2, %p8270_p1 }
   0x9   :  { %p8273_p4 = pnand %p8272_p3, %p8266_p0 }
   0xb   :  { %8276 = shalt.err (!%p8273_p4)
}
   0xc   :  { %s8386_s12 = smov 512   ;;  %s8387_s13 = smov 32  }
   0xd   :  { %46 = dma.hbm_to_vmem [thread:$0]  %s10638_s4, 16384, %s41_s10, [#allocation10], %s8386_s12, %s8386_s12, %s8387_s13  }
   0xe   :  { %s8388_s16 = smov [#allocation12]   ;;  %s8389_s18 = smov [#allocation7]  }
   0xf   :  { %s65_s17 = sshll.u32 %s8388_s16, 4  ;;  %s28_s19 = sshll.u32 %s8389_s18, 4  ;;  %s66_s17 = int_to_ptr.vmem [resolvable:$true] %s65_s17  ;;  %s29_s19 = int_to_ptr.vmem [resolvable:$true] %s28_s19 }
  0x10   :  { %s8285_s20 = scalar_lea.vmem %s66_s17, 256  ;;  %p8290_p6 = scmp.lt.s32.totalorder %s66_s17, %s66_s17 }
  0x11   :  { %p8286_p5 = scmp.ne.s32.totalorder %s66_s17, %s8285_s20  ;;  %p8291_p7 = scmp.lt.s32.totalorder %s8285_s20, %s8285_s20 }
  0x13   :  { %p8292_p8 = por %p8291_p7, %p8290_p6 }
  0x15   :  { %p8293_p9 = pnand %p8292_p8, %p8286_p5 }
  0x17   :  { %8296 = shalt.err (!%p8293_p9)
}
  0x18   :  { %68 = dma.hbm_to_vmem [thread:$0]  %s10640_s6, 256, %s66_s17, [#allocation13]  }
  0x19   :  { %s8305_s23 = scalar_lea.vmem %s29_s19, 16384  ;;  %p8310_p11 = scmp.lt.s32.totalorder %s29_s19, %s29_s19 }
  0x1a   :  { %p8306_p10 = scmp.ne.s32.totalorder %s29_s19, %s8305_s23  ;;  %p8311_p12 = scmp.lt.s32.totalorder %s8305_s23, %s8305_s23 }
  0x1c   :  { %p8312_p13 = por %p8311_p12, %p8310_p11 }
  0x1e   :  { %p8313_p0 = pnand %p8312_p13, %p8306_p10 }
  0x20   :  { %8316 = shalt.err (!%p8313_p0)
}
  0x21   :  { %s8390_s4 = smov 256   ;;  %s8391_s24 = smov 16  }
  0x22   :  { %34 = dma.hbm_to_vmem [thread:$0]  %s10637_s3, 16384, %s29_s19, [#allocation8], %s8390_s4, %s8390_s4, %s8391_s24  }
  0x23   :  { %s8392_s27 = smov [#allocation11]   ;;  %s8393_s29 = smov [#allocation14]  }
  0x24   :  { %s52_s28 = sshll.u32 %s8392_s27, 4  ;;  %s74_s30 = sshll.u32 %s8393_s29, 4  ;;  %s53_s28 = int_to_ptr.vmem [resolvable:$true] %s52_s28  ;;  %s75_s30 = int_to_ptr.vmem [resolvable:$true] %s74_s30 }
  0x25   :  { %s8325_s6 = scalar_lea.vmem %s53_s28, 4096  ;;  %p8330_p2 = scmp.lt.s32.totalorder %s53_s28, %s53_s28 }
  0x26   :  { %p8326_p1 = scmp.ne.s32.totalorder %s53_s28, %s8325_s6  ;;  %p8331_p3 = scmp.lt.s32.totalorder %s8325_s6, %s8325_s6 }
  0x28   :  { %p8332_p4 = por %p8331_p3, %p8330_p2 }
  0x2a   :  { %p8333_p5 = pnand %p8332_p4, %p8326_p1 }
  0x2c   :  { %8336 = shalt.err (!%p8333_p5)
}
  0x2d   :  { %58 = dma.hbm_to_vmem [thread:$0]  %s10639_s5, 4096, %s53_s28, [#allocation10], %s8390_s4, %s8390_s4, %s8391_s24  }
  0x2e   :  { %s8345_s12 = scalar_lea.vmem %s75_s30, 512  ;;  %p8350_p7 = scmp.lt.s32.totalorder %s75_s30, %s75_s30 }
  0x2f   :  { %p8346_p6 = scmp.ne.s32.totalorder %s75_s30, %s8345_s12  ;;  %p8351_p8 = scmp.lt.s32.totalorder %s8345_s12, %s8345_s12 }
  0x31   :  { %p8352_p9 = por %p8351_p8, %p8350_p7 }
  0x33   :  { %p8353_p10 = pnand %p8352_p9, %p8346_p6 }
  0x35   :  { %8356 = shalt.err (!%p8353_p10)
}
  0x36   :  { %80 = dma.hbm_to_vmem [thread:$0]  %s10642_s8, 512, %s75_s30, [#allocation13], %s8390_s4, %s8390_s4, %s8391_s24  }
  0x37   :  { %8377 = dma.done.wait [#allocation8], 16384  }
  0x38   :  { %8378 = vsyncadd [#allocation8], 4294950912 }
  0x39   :  { %8379 = dma.done.wait [#allocation10], 20480  }
  0x3a   :  { %8380 = vsyncadd [#allocation10], 4294946816 }
  0x3b   :  { %8381 = dma.done.wait [#allocation13], 768  }
  0x3c   :  { %8382 = vsyncadd [#allocation13], 4294966528  ;;  %v10644_v0 = vmov 0   ;;  %v120_v1 = vld [vmem:[%s10636_s2] sm:$0xff]  ;;  %v109_v6 = vld [vmem:[%s10634_s0 + $0x8] sm:$0xff]  ;;  %vm210_vm0 = vcmask 130048  }
  0x3d   :  { %255 = vmatprep.mubr.bf16.mxu0 %v10644_v0  ;;  %275 = vmatprep.mubr.bf16.mxu1 %v10644_v0  ;;  %v124_v2 = vld [vmem:[%s10636_s2 + $0x20] sm:$0xff]  ;;  %v113_v8 = vld [vmem:[%s10634_s0 + $0x28] sm:$0xff]  ;;  %v122_v14 = vld [vmem:[%s10636_s2 + $0x10] sm:$0xff] }
  0x3e   :  { %v108_v3 = vld [vmem:[%s10634_s0] sm:$0xff]  ;;  %v6723_v4 = vcombine.high %v120_v1, %v124_v2  ;;  %v6722_v5 = vcombine.low %v120_v1, %v124_v2  ;;  %v121_v9 = vld [vmem:[%s10636_s2 + $0x8] sm:$0xff]  ;;  %v126_v15 = vld [vmem:[%s10636_s2 + $0x30] sm:$0xff] }
  0x3f   :  { %v112_v7 = vld [vmem:[%s10634_s0 + $0x20] sm:$0xff]  ;;  %v125_v10 = vld [vmem:[%s10636_s2 + $0x28] sm:$0xff]  ;;  %v116_v11 = vpack.c.bf16 %v109_v6, %v108_v3  ;;  %v6727_v17 = vcombine.high %v122_v14, %v126_v15  ;;  %v123_v18 = vld [vmem:[%s10636_s2 + $0x18] sm:$0xff]  ;;  %v6726_v20 = vcombine.low %v122_v14, %v126_v15 }
  0x40   :  { %237 = vmatprep.subr.bf16.mxu0 %v6723_v4  ;;  %7330 = vmatprep.subr.bf16.mxu1 %v6723_v4  ;;  %v118_v12 = vpack.c.bf16 %v113_v8, %v112_v7  ;;  %v6725_v13 = vcombine.high %v121_v9, %v125_v10  ;;  %v6724_v16 = vcombine.low %v121_v9, %v125_v10  ;;  %v127_v19 = vld [vmem:[%s10636_s2 + $0x38] sm:$0xff]  ;;  %v114_v21 = vld [vmem:[%s10634_s0 + $0x30] sm:$0xff]  ;;  %v635_v29 = vld [vmem:[#allocation9 + $0x1c0] sm:$0xff] }
  0x41   :  { %238 = vmatpush1.bf16.msra.mxu0 %v6722_v5  ;;  %7331 = vmatpush1.bf16.msra.mxu1 %v6722_v5  ;;  %v115_v22 = vld [vmem:[%s10634_s0 + $0x38] sm:$0xff]  ;;  %v6729_v23 = vcombine.high %v123_v18, %v127_v19  ;;  %v110_v24 = vld [vmem:[%s10634_s0 + $0x10] sm:$0xff]  ;;  %v6728_v28 = vcombine.low %v123_v18, %v127_v19  ;;  %v639_v30 = vld [vmem:[#allocation9 + $0x1e0] sm:$0xff] }
  0x42   :  { %310 = vmatprep.subr.bf16.mxu1 %v6725_v13  ;;  %383 = vmatprep.subr.bf16.mxu0 %v6727_v17  ;;  %v111_v25 = vld [vmem:[%s10634_s0 + $0x18] sm:$0xff]  ;;  %v119_v26 = vpack.c.bf16 %v115_v22, %v114_v21  ;;  %v636_v31 = vld [vmem:[#allocation9 + $0x1c8] sm:$0xff]  ;;  %v8541_v32 = vcombine.high %v635_v29, %v639_v30  ;;  %v8545_v35 = vcombine.low %v635_v29, %v639_v30  ;;  %v627_v37 = vld [vmem:[#allocation9 + $0x180] sm:$0xff]  ;;  %s8395_s0 = smov [#allocation5]  }
  0x43   :  { %v117_v27 = vpack.c.bf16 %v111_v25, %v110_v24  ;;  %v640_v33 = vld [vmem:[#allocation9 + $0x1e8] sm:$0xff]  ;;  %v631_v38 = vld [vmem:[#allocation9 + $0x1a0] sm:$0xff]  ;;  %s104_s2 = sshll.u32 %s8395_s0, 4  ;;  %s105_s2 = int_to_ptr.vmem [resolvable:$true] %s104_s2 }
  0x44   :  { %6730 = vmatmul.mubr.msk.bf16.vlgmr.msra.gmra.mxu0 %vm210_vm0, %v116_v11  ;;  %6732 = vmatmul.mubr.msk.bf16.vlgmr.msra.gmra.mxu1 %vm210_vm0, %v118_v12  ;;  %10943 = vst [vmem:[#allocation23_spill] sm:$0xff] %v8541_v32  ;;  %v8543_v34 = vcombine.high %v636_v31, %v640_v33  ;;  %10945 = vst [vmem:[#allocation25_spill] sm:$0xff] %v8545_v35  ;;  %v8547_v36 = vcombine.low %v636_v31, %v640_v33  ;;  %v628_v39 = vld [vmem:[#allocation9 + $0x188] sm:$0xff]  ;;  %v619_v45 = vld [vmem:[#allocation9 + $0x140] sm:$0xff]  ;;  %s8365_s18 = scalar_lea.vmem %s105_s2, 26624  ;;  %p8370_p12 = scmp.lt.s32.totalorder %s105_s2, %s105_s2 }
  0x45   :  { %311 = vmatpush1.bf16.msra.mxu1 %v6724_v16  ;;  %285 = vmatprep.mubr.bf16.mxu1 %v10644_v0  ;;  %v8553_v40 = vcombine.high %v627_v37, %v631_v38  ;;  %v632_v41 = vld [vmem:[#allocation9 + $0x1a8] sm:$0xff]  ;;  %v8557_v43 = vcombine.low %v627_v37, %v631_v38  ;;  %v623_v46 = vld [vmem:[#allocation9 + $0x160] sm:$0xff]  ;;  %p8366_p11 = scmp.ne.s32.totalorder %s105_s2, %s8365_s18  ;;  %p8371_p13 = scmp.lt.s32.totalorder %s8365_s18, %s8365_s18 }
  0x46   :  { %384 = vmatpush1.bf16.msra.mxu0 %v6726_v20  ;;  %265 = vmatprep.mubr.bf16.mxu0 %v10644_v0  ;;  %10944 = vst [vmem:[#allocation24_spill] sm:$0xff] %v8543_v34  ;;  %10946 = vst [vmem:[#allocation26_spill] sm:$0xff] %v8547_v36  ;;  %v8555_v42 = vcombine.high %v628_v39, %v632_v41  ;;  %v8559_v44 = vcombine.low %v628_v39, %v632_v41  ;;  %v620_v47 = vld [vmem:[#allocation9 + $0x148] sm:$0xff]  ;;  %v611_v53 = vld [vmem:[#allocation9 + $0x100] sm:$0xff] }
  0x47   :  { %456 = vmatprep.subr.bf16.mxu1 %v6729_v23  ;;  %1407 = vmatprep.subr.bf16.mxu0 %v8541_v32  ;;  %10947 = vst [vmem:[#allocation27_spill] sm:$0xff] %v8553_v40  ;;  %10949 = vst [vmem:[#allocation29_spill] sm:$0xff] %v8557_v43  ;;  %v8565_v48 = vcombine.high %v619_v45, %v623_v46  ;;  %v624_v49 = vld [vmem:[#allocation9 + $0x168] sm:$0xff]  ;;  %v8569_v51 = vcombine.low %v619_v45, %v623_v46  ;;  %v615_v54 = vld [vmem:[#allocation9 + $0x120] sm:$0xff]  ;;  %p8372_p0 = por %p8371_p13, %p8370_p12 }
  0x48   :  { %10948 = vst [vmem:[#allocation28_spill] sm:$0xff] %v8555_v42  ;;  %10950 = vst [vmem:[#allocation30_spill] sm:$0xff] %v8559_v44  ;;  %v8567_v50 = vcombine.high %v620_v47, %v624_v49  ;;  %v8571_v52 = vcombine.low %v620_v47, %v624_v49  ;;  %v612_v55 = vld [vmem:[#allocation9 + $0x108] sm:$0xff]  ;;  %v8577_v56 = vcombine.high %v611_v53, %v615_v54  ;;  %v603_v61 = vld [vmem:[#allocation9 + $0xc0] sm:$0xff] }
  0x49   :  { %10951 = vst [vmem:[#allocation31_spill] sm:$0xff] %v8565_v48  ;;  %10953 = vst [vmem:[#allocation33_spill] sm:$0xff] %v8569_v51  ;;  %v616_v57 = vld [vmem:[#allocation9 + $0x128] sm:$0xff]  ;;  %v8581_v59 = vcombine.low %v611_v53, %v615_v54  ;;  %v607_v62 = vld [vmem:[#allocation9 + $0xe0] sm:$0xff]  ;;  %p8373_p1 = pnand %p8372_p0, %p8366_p11 }
  0x4a   :  { %10952 = vst [vmem:[#allocation32_spill] sm:$0xff] %v8567_v50  ;;  %10954 = vst [vmem:[#allocation34_spill] sm:$0xff] %v8571_v52  ;;  %v8579_v58 = vcombine.high %v612_v55, %v616_v57  ;;  %v8583_v60 = vcombine.low %v612_v55, %v616_v57  ;;  %v604_v63 = vld [vmem:[#allocation9 + $0xc8] sm:$0xff]  ;;  %v8589_v1 = vcombine.high %v603_v61, %v607_v62  ;;  %v595_v6 = vld [vmem:[#allocation9 + $0x80] sm:$0xff] }
  0x4b   :  { %10955 = vst [vmem:[#allocation35_spill] sm:$0xff] %v8577_v56  ;;  %10957 = vst [vmem:[#allocation37_spill] sm:$0xff] %v8581_v59  ;;  %v608_v2 = vld [vmem:[#allocation9 + $0xe8] sm:$0xff]  ;;  %v8593_v4 = vcombine.low %v603_v61, %v607_v62  ;;  %v599_v7 = vld [vmem:[#allocation9 + $0xa0] sm:$0xff] }
  0x4c   :  { %6733 = vmatmul.mubr.msk.bf16.gmra.mxu1 %vm210_vm0, %v119_v26  ;;  %6731 = vmatmul.mubr.msk.bf16.gmra.mxu0 %vm210_vm0, %v117_v27  ;;  %10956 = vst [vmem:[#allocation36_spill] sm:$0xff] %v8579_v58  ;;  %10958 = vst [vmem:[#allocation38_spill] sm:$0xff] %v8583_v60  ;;  %v8591_v3 = vcombine.high %v604_v63, %v608_v2  ;;  %v8595_v5 = vcombine.low %v604_v63, %v608_v2  ;;  %v596_v8 = vld [vmem:[#allocation9 + $0x88] sm:$0xff]  ;;  %v587_v14 = vld [vmem:[#allocation9 + $0x40] sm:$0xff] }
  0x4d   :  { %328 = vmatprep.mubr.bf16.mxu1 %v10644_v0  ;;  %401 = vmatprep.mubr.bf16.mxu0 %v10644_v0  ;;  %10959 = vst [vmem:[#allocation39_spill] sm:$0xff] %v8589_v1  ;;  %10961 = vst [vmem:[#allocation41_spill] sm:$0xff] %v8593_v4  ;;  %v8601_v9 = vcombine.high %v595_v6, %v599_v7  ;;  %v600_v10 = vld [vmem:[#allocation9 + $0xa8] sm:$0xff]  ;;  %v591_v15 = vld [vmem:[#allocation9 + $0x60] sm:$0xff] }
  0x4e   :  { %10960 = vst [vmem:[#allocation40_spill] sm:$0xff] %v8591_v3  ;;  %10962 = vst [vmem:[#allocation42_spill] sm:$0xff] %v8595_v5  ;;  %v8607_v13 = vcombine.low %v596_v8, %v600_v10  ;;  %v588_v16 = vld [vmem:[#allocation9 + $0x48] sm:$0xff]  ;;  %v8613_v17 = vcombine.high %v587_v14, %v591_v15  ;;  %v8617_v20 = vcombine.low %v587_v14, %v591_v15  ;;  %v579_v22 = vld [vmem:[#allocation9] sm:$0xff] }
  0x4f   :  { %10963 = vst [vmem:[#allocation43_spill] sm:$0xff] %v8601_v9  ;;  %v592_v18 = vld [vmem:[#allocation9 + $0x68] sm:$0xff]  ;;  %v583_v23 = vld [vmem:[#allocation9 + $0x20] sm:$0xff] }
  0x50   :  { %10966 = vst [vmem:[#allocation46_spill] sm:$0xff] %v8607_v13  ;;  %10967 = vst [vmem:[#allocation47_spill] sm:$0xff] %v8613_v17  ;;  %v8615_v19 = vcombine.high %v588_v16, %v592_v18  ;;  %v8619_v21 = vcombine.low %v588_v16, %v592_v18  ;;  %v580_v24 = vld [vmem:[#allocation9 + $0x8] sm:$0xff]  ;;  %v8625_v25 = vcombine.high %v579_v22, %v583_v23  ;;  %v699_v30 = vld [vmem:[#allocation9 + $0x3c0] sm:$0xff] }
  0x51   :  { %10969 = vst [vmem:[#allocation49_spill] sm:$0xff] %v8617_v20  ;;  %v703_v31 = vld [vmem:[#allocation9 + $0x3e0] sm:$0xff]  ;;  %v700_v33 = vld [vmem:[#allocation9 + $0x3c8] sm:$0xff] }
  0x52   :  { %10968 = vst [vmem:[#allocation48_spill] sm:$0xff] %v8615_v19  ;;  %10970 = vst [vmem:[#allocation50_spill] sm:$0xff] %v8619_v21  ;;  %v8637_v37 = vcombine.high %v699_v30, %v703_v31  ;;  %v704_v38 = vld [vmem:[#allocation9 + $0x3e8] sm:$0xff]  ;;  %v8641_v41 = vcombine.low %v699_v30, %v703_v31  ;;  %v691_v46 = vld [vmem:[#allocation9 + $0x380] sm:$0xff] }
  0x53   :  { %10971 = vst [vmem:[#allocation51_spill] sm:$0xff] %v8625_v25  ;;  %v8639_v39 = vcombine.high %v700_v33, %v704_v38  ;;  %v8643_v45 = vcombine.low %v700_v33, %v704_v38  ;;  %v695_v47 = vld [vmem:[#allocation9 + $0x3a0] sm:$0xff]  ;;  %v692_v49 = vld [vmem:[#allocation9 + $0x388] sm:$0xff] }
  0x54   :  { %6734 = vmatmul.mubr.msk.bf16.vlgmr.msra.gmra.mxu1 %vm210_vm0, %v116_v11  ;;  %6738 = vmatmul.mubr.msk.bf16.vlgmr.msra.gmra.mxu0 %vm210_vm0, %v116_v11  ;;  %10975 = vst [vmem:[#allocation55_spill] sm:$0xff] %v8637_v37  ;;  %10977 = vst [vmem:[#allocation57_spill] sm:$0xff] %v8641_v41  ;;  %v8649_v53 = vcombine.high %v691_v46, %v695_v47  ;;  %v696_v54 = vld [vmem:[#allocation9 + $0x3a8] sm:$0xff]  ;;  %v8653_v57 = vcombine.low %v691_v46, %v695_v47  ;;  %v683_v62 = vld [vmem:[#allocation9 + $0x340] sm:$0xff] }
  0x55   :  { %457 = vmatpush1.bf16.msra.mxu1 %v6728_v28  ;;  %338 = vmatprep.mubr.bf16.mxu1 %v10644_v0  ;;  %v8629_v28 = vcombine.low %v579_v22, %v583_v23  ;;  %10976 = vst [vmem:[#allocation56_spill] sm:$0xff] %v8639_v39  ;;  %10978 = vst [vmem:[#allocation58_spill] sm:$0xff] %v8643_v45  ;;  %v8651_v55 = vcombine.high %v692_v49, %v696_v54  ;;  %v687_v63 = vld [vmem:[#allocation9 + $0x360] sm:$0xff]  ;;  %v684_v2 = vld [vmem:[#allocation9 + $0x348] sm:$0xff] }
  0x56   :  { %411 = vmatprep.mubr.bf16.mxu0 %v10644_v0  ;;  %1448 = vmatprep.subr.bf16.mxu1 %v8543_v34  ;;  %10979 = vst [vmem:[#allocation59_spill] sm:$0xff] %v8649_v53  ;;  %10981 = vst [vmem:[#allocation61_spill] sm:$0xff] %v8653_v57  ;;  %v8655_v61 = vcombine.low %v692_v49, %v696_v54  ;;  %v675_v15 = vld [vmem:[#allocation9 + $0x300] sm:$0xff]  ;;  %v676_v18 = vld [vmem:[#allocation9 + $0x308] sm:$0xff] }
  0x57   :  { %1408 = vmatpush1.bf16.msra.mxu0 %v8545_v35  ;;  %10973 = vst [vmem:[#allocation53_spill] sm:$0xff] %v8629_v28  ;;  %10980 = vst [vmem:[#allocation60_spill] sm:$0xff] %v8651_v55  ;;  %v679_v16 = vld [vmem:[#allocation9 + $0x320] sm:$0xff]  ;;  %v680_v23 = vld [vmem:[#allocation9 + $0x328] sm:$0xff] }
  0x58   :  { %1409 = vmatprep.subr.bf16.mxu0 %v8553_v40  ;;  %10982 = vst [vmem:[#allocation62_spill] sm:$0xff] %v8655_v61  ;;  %v8673_v22 = vcombine.high %v675_v15, %v679_v16  ;;  %v8679_v30 = vcombine.low %v676_v18, %v680_v23  ;;  %v667_v31 = vld [vmem:[#allocation9 + $0x2c0] sm:$0xff]  ;;  %v668_v38 = vld [vmem:[#allocation9 + $0x2c8] sm:$0xff] }
  0x59   :  { %v671_v33 = vld [vmem:[#allocation9 + $0x2e0] sm:$0xff]  ;;  %v672_v47 = vld [vmem:[#allocation9 + $0x2e8] sm:$0xff] }
  0x5a   :  { %10987 = vst [vmem:[#allocation67_spill] sm:$0xff] %v8673_v22  ;;  %10990 = vst [vmem:[#allocation70_spill] sm:$0xff] %v8679_v30  ;;  %v8685_v46 = vcombine.high %v667_v31, %v671_v33  ;;  %v8687_v49 = vcombine.low %v667_v31, %v671_v33  ;;  %v659_v54 = vld [vmem:[#allocation9 + $0x280] sm:$0xff] }
  0x5b   :  { %1410 = vmatpush1.bf16.msra.mxu0 %v8557_v43 }
  0x5c   :  { %6735 = vmatmul.mubr.msk.bf16.gmra.mxu1 %vm210_vm0, %v117_v27  ;;  %6739 = vmatmul.mubr.msk.bf16.gmra.mxu0 %vm210_vm0, %v117_v27  ;;  %10991 = vst [vmem:[#allocation71_spill] sm:$0xff] %v8685_v46  ;;  %10992 = vst [vmem:[#allocation72_spill] sm:$0xff] %v8687_v49 }
  0x5d   :  { %348 = vmatprep.mubr.bf16.mxu1 %v10644_v0  ;;  %421 = vmatprep.mubr.bf16.mxu0 %v10644_v0 }
  0x5e   :  { %1411 = vmatprep.subr.bf16.mxu0 %v8565_v48 }
  0x5f   :  { %1412 = vmatpush1.bf16.msra.mxu0 %v8569_v51 }
  0x60   :  { %1413 = vmatprep.subr.bf16.mxu0 %v8577_v56 }
  0x63   :  { %1414 = vmatpush1.bf16.msra.mxu0 %v8581_v59 }
  0x64   :  { %6736 = vmatmul.mubr.msk.bf16.gmra.mxu1 %vm210_vm0, %v118_v12  ;;  %6740 = vmatmul.mubr.msk.bf16.gmra.mxu0 %vm210_vm0, %v118_v12 }
  0x65   :  { %358 = vmatprep.mubr.bf16.mxu1 %v10644_v0  ;;  %431 = vmatprep.mubr.bf16.mxu0 %v10644_v0 }
  0x66   :  { %1415 = vmatprep.subr.bf16.mxu0 %v8589_v1 }
  0x67   :  { %1416 = vmatpush1.bf16.msra.mxu0 %v8593_v4 }
  0x68   :  { %1417 = vmatprep.subr.bf16.mxu0 %v8601_v9 }
  0x6c   :  { %6737 = vmatmul.mubr.msk.bf16.gmra.mxu1 %vm210_vm0, %v119_v26  ;;  %6741 = vmatmul.mubr.msk.bf16.gmra.mxu0 %vm210_vm0, %v119_v26 }
  0x6d   :  { %474 = vmatprep.mubr.bf16.mxu1 %v10644_v0 }
  0x74   :  { %6742 = vmatmul.mubr.msk.bf16.vlgmr.msra.gmra.mxu1 %vm210_vm0, %v116_v11  ;;  %v8603_v11 = vcombine.high %v596_v8, %v600_v10  ;;  %v8665_v10 = vcombine.low %v683_v62, %v687_v63 }
  0x75   :  { %484 = vmatprep.mubr.bf16.mxu1 %v10644_v0  ;;  %1449 = vmatpush1.bf16.msra.mxu1 %v8547_v36 }
  0x76   :  { %1450 = vmatprep.subr.bf16.mxu1 %v8555_v42  ;;  %10964 = vst [vmem:[#allocation44_spill] sm:$0xff] %v8603_v11  ;;  %10985 = vst [vmem:[#allocation65_spill] sm:$0xff] %v8665_v10 }
  0x79   :  { %1451 = vmatpush1.bf16.msra.mxu1 %v8559_v44 }
  0x7a   :  { %1452 = vmatprep.subr.bf16.mxu1 %v8567_v50 }
  0x7c   :  { %6743 = vmatmul.mubr.msk.bf16.gmra.mxu1 %vm210_vm0, %v117_v27 }
  0x7d   :  { %494 = vmatprep.mubr.bf16.mxu1 %v10644_v0  ;;  %1453 = vmatpush1.bf16.msra.mxu1 %v8571_v52 }
  0x7e   :  { %1454 = vmatprep.subr.bf16.mxu1 %v8579_v58 }
  0x81   :  { %1455 = vmatpush1.bf16.msra.mxu1 %v8583_v60 }
  0x82   :  { %1456 = vmatprep.subr.bf16.mxu1 %v8591_v3 }
  0x84   :  { %6744 = vmatmul.mubr.msk.bf16.gmra.mxu1 %vm210_vm0, %v118_v12  ;;  %v8605_v12 = vcombine.low %v595_v6, %v599_v7  ;;  %v8661_v6 = vcombine.high %v683_v62, %v687_v63  ;;  %v688_v7 = vld [vmem:[#allocation9 + $0x368] sm:$0xff]  ;;  %v663_v62 = vld [vmem:[#allocation9 + $0x2a0] sm:$0xff]  ;;  %v8689_v63 = vcombine.high %v668_v38, %v672_v47 }
  0x85   :  { %504 = vmatprep.mubr.bf16.mxu1 %v10644_v0  ;;  %1457 = vmatpush1.bf16.msra.mxu1 %v8595_v5  ;;  %v8663_v8 = vcombine.high %v684_v2, %v688_v7  ;;  %v8667_v14 = vcombine.low %v684_v2, %v688_v7  ;;  %v8691_v2 = vcombine.low %v668_v38, %v672_v47  ;;  %v655_v0 = vld [vmem:[#allocation9 + $0x260] sm:$0xff] }
  0x86   :  { %10965 = vst [vmem:[#allocation45_spill] sm:$0xff] %v8605_v12  ;;  %1458 = vmatprep.subr.bf16.mxu1 %v8603_v11  ;;  %1418 = vmatpush1.bf16.msra.mxu0 %v8605_v12  ;;  %10983 = vst [vmem:[#allocation63_spill] sm:$0xff] %v8661_v6  ;;  %v8693_v7 = vcombine.high %v659_v54, %v663_v62  ;;  %v8700_v31 = vcombine.low %v659_v54, %v663_v62 }
  0x87   :  { %1419 = vmatprep.subr.bf16.mxu0 %v8613_v17  ;;  %10984 = vst [vmem:[#allocation64_spill] sm:$0xff] %v8663_v8  ;;  %10986 = vst [vmem:[#allocation66_spill] sm:$0xff] %v8667_v14 }
  0x88   :  { %10993 = vst [vmem:[#allocation73_spill] sm:$0xff] %v8689_v63  ;;  %10994 = vst [vmem:[#allocation74_spill] sm:$0xff] %v8691_v2 }
  0x89   :  { %1459 = vmatpush1.bf16.msra.mxu1 %v8607_v13  ;;  %10995 = vst [vmem:[#allocation75_spill] sm:$0xff] %v8693_v7  ;;  %10997 = vst [vmem:[#allocation77_spill] sm:$0xff] %v8700_v31 }
  0x8a   :  { %1460 = vmatprep.subr.bf16.mxu1 %v8615_v19  ;;  %1420 = vmatpush1.bf16.msra.mxu0 %v8617_v20 }
  0x8b   :  { %1421 = vmatprep.subr.bf16.mxu0 %v8625_v25 }
  0x8c   :  { %6745 = vmatmul.mubr.msk.bf16.gmra.mxu1 %vm210_vm0, %v119_v26  ;;  %v584_v26 = vld [vmem:[#allocation9 + $0x28] sm:$0xff] }
  0x8d   :  { %1461 = vmatpush1.bf16.msra.mxu1 %v8619_v21  ;;  %v8627_v27 = vcombine.high %v580_v24, %v584_v26  ;;  %v8631_v29 = vcombine.low %v580_v24, %v584_v26  ;;  %v8675_v24 = vcombine.high %v676_v18, %v680_v23  ;;  %v8677_v26 = vcombine.low %v675_v15, %v679_v16  ;;  %v660_v15 = vld [vmem:[#allocation9 + $0x288] sm:$0xff]  ;;  %v651_v18 = vld [vmem:[#allocation9 + $0x240] sm:$0xff] }
  0x8e   :  { %1422 = vmatpush1.bf16.msra.mxu0 %v8629_v28  ;;  %v664_v16 = vld [vmem:[#allocation9 + $0x2a8] sm:$0xff]  ;;  %v8706_v38 = vcombine.high %v651_v18, %v655_v0  ;;  %v8712_v54 = vcombine.low %v651_v18, %v655_v0  ;;  %v130_v18 = vlaneseq }
  0x8f   :  { %10972 = vst [vmem:[#allocation52_spill] sm:$0xff] %v8627_v27  ;;  %10974 = vst [vmem:[#allocation54_spill] sm:$0xff] %v8631_v29  ;;  %1462 = vmatprep.subr.bf16.mxu1 %v8627_v27  ;;  %1423 = vmatprep.subr.bf16.mxu0 %v8637_v37  ;;  %v8696_v23 = vcombine.high %v660_v15, %v664_v16  ;;  %v8704_v33 = vcombine.low %v660_v15, %v664_v16 }
  0x90   :  { %10988 = vst [vmem:[#allocation68_spill] sm:$0xff] %v8675_v24  ;;  %10989 = vst [vmem:[#allocation69_spill] sm:$0xff] %v8677_v26 }
  0x91   :  { %1463 = vmatpush1.bf16.msra.mxu1 %v8631_v29  ;;  %10996 = vst [vmem:[#allocation76_spill] sm:$0xff] %v8696_v23  ;;  %10998 = vst [vmem:[#allocation78_spill] sm:$0xff] %v8704_v33 }
  0x92   :  { %1464 = vmatprep.subr.bf16.mxu1 %v8639_v39  ;;  %1424 = vmatpush2.bf16.msra.mxu0 %v8641_v41  ;;  %10999 = vst [vmem:[#allocation79_spill] sm:$0xff] %v8706_v38  ;;  %11001 = vst [vmem:[#allocation81_spill] sm:$0xff] %v8712_v54 }
  0x93   :  { %1425 = vmatprep.subr.bf16.mxu0 %v8649_v53 }
  0x95   :  { %1465 = vmatpush2.bf16.msra.mxu1 %v8643_v45 }
  0x96   :  { %1466 = vmatprep.subr.bf16.mxu1 %v8651_v55  ;;  %1426 = vmatpush2.bf16.msra.mxu0 %v8653_v57 }
  0x97   :  { %1427 = vmatprep.subr.bf16.mxu0 %v8661_v6 }
  0x99   :  { %1467 = vmatpush2.bf16.msra.mxu1 %v8655_v61 }
  0x9a   :  { %1468 = vmatprep.subr.bf16.mxu1 %v8663_v8  ;;  %1428 = vmatpush2.bf16.msra.mxu0 %v8665_v10 }
  0x9b   :  { %1429 = vmatprep.subr.bf16.mxu0 %v8673_v22  ;;  %v644_v22 = vld [vmem:[#allocation9 + $0x208] sm:$0xff] }
  0x9d   :  { %1469 = vmatpush2.bf16.msra.mxu1 %v8667_v14 }
  0x9e   :  { %1470 = vmatprep.subr.bf16.mxu1 %v8675_v24  ;;  %1430 = vmatpush2.bf16.msra.mxu0 %v8677_v26  ;;  %v656_v26 = vld [vmem:[#allocation9 + $0x268] sm:$0xff]  ;;  %v647_v24 = vld [vmem:[#allocation9 + $0x220] sm:$0xff] }
  0x9f   :  { %1431 = vmatprep.subr.bf16.mxu0 %v8685_v46  ;;  %v643_v46 = vld [vmem:[#allocation9 + $0x200] sm:$0xff] }
  0xa0   :  { %v8718_v15 = vcombine.high %v643_v46, %v647_v24 }
  0xa1   :  { %1471 = vmatpush2.bf16.msra.mxu1 %v8679_v30  ;;  %v652_v30 = vld [vmem:[#allocation9 + $0x248] sm:$0xff] }
  0xa2   :  { %1472 = vmatprep.subr.bf16.mxu1 %v8689_v63  ;;  %1432 = vmatpush2.bf16.msra.mxu0 %v8687_v49  ;;  %v8709_v47 = vcombine.high %v652_v30, %v656_v26  ;;  %v648_v63 = vld [vmem:[#allocation9 + $0x228] sm:$0xff]  ;;  %v8716_v62 = vcombine.low %v652_v30, %v656_v26  ;;  %11003 = vst [vmem:[#allocation83_spill] sm:$0xff] %v8718_v15  ;;  %v637_v26 = vld [vmem:[#allocation9 + $0x1d0] sm:$0xff] }
  0xa3   :  { %1433 = vmatprep.subr.bf16.mxu0 %v8693_v7  ;;  %v8721_v16 = vcombine.high %v644_v22, %v648_v63  ;;  %v8728_v0 = vcombine.low %v644_v22, %v648_v63  ;;  %v641_v30 = vld [vmem:[#allocation9 + $0x1f0] sm:$0xff] }
  0xa4   :  { %11000 = vst [vmem:[#allocation80_spill] sm:$0xff] %v8709_v47  ;;  %11002 = vst [vmem:[#allocation82_spill] sm:$0xff] %v8716_v62 }
  0xa5   :  { %1473 = vmatpush2.bf16.msra.mxu1 %v8691_v2  ;;  %11004 = vst [vmem:[#allocation84_spill] sm:$0xff] %v8721_v16  ;;  %11006 = vst [vmem:[#allocation86_spill] sm:$0xff] %v8728_v0 }
  0xa6   :  { %1474 = vmatprep.subr.bf16.mxu1 %v8696_v23  ;;  %1434 = vmatpush2.bf16.msra.mxu0 %v8700_v31  ;;  %v8724_v23 = vcombine.low %v643_v46, %v647_v24  ;;  %v642_v24 = vld [vmem:[#allocation9 + $0x1f8] sm:$0xff]  ;;  %v8735_v46 = vshrl.u32 %v130_v18, 7 }
  0xa7   :  { %1435 = vmatprep.subr.bf16.mxu0 %v8706_v38  ;;  %v8733_v38 = vcombine.high %v637_v26, %v641_v30 }
  0xa8   :  { %11005 = vst [vmem:[#allocation85_spill] sm:$0xff] %v8724_v23  ;;  %v8746_v63 = vsub.s32 0, %v8735_v46 }
  0xa9   :  { %1475 = vmatpush2.bf16.msra.mxu1 %v8704_v33  ;;  %11007 = vst [vmem:[#allocation87_spill] sm:$0xff] %v8733_v38 }
  0xaa   :  { %1476 = vmatprep.subr.bf16.mxu1 %v8709_v47  ;;  %1436 = vmatpush2.bf16.msra.mxu0 %v8712_v54  ;;  %v638_v47 = vld [vmem:[#allocation9 + $0x1d8] sm:$0xff]  ;;  %11010 = vst [vmem:[#allocation90_spill] sm:$0xff] %v8746_v63 }
  0xab   :  { %1437 = vmatprep.subr.bf16.mxu0 %v8718_v15  ;;  %v8739_v15 = vcombine.low %v637_v26, %v641_v30  ;;  %v8741_v22 = vcombine.low %v638_v47, %v642_v24 }
  0xad   :  { %1477 = vmatpush2.bf16.msra.mxu1 %v8716_v62  ;;  %v8737_v62 = vcombine.high %v638_v47, %v642_v24  ;;  %11009 = vst [vmem:[#allocation89_spill] sm:$0xff] %v8741_v22 }
  0xae   :  { %1478 = vmatprep.subr.bf16.mxu1 %v8721_v16  ;;  %1438 = vmatpush2.bf16.msra.mxu0 %v8724_v23  ;;  %v8748_v23 = vld [vmem:[#allocation12] ss:$2 sm:$0xff] }
  0xaf   :  { %11008 = vst [vmem:[#allocation88_spill] sm:$0xff] %v8737_v62  ;;  %1489 = vmatprep.subr.bf16.mxu0 %v8733_v38  ;;  %v8755_v18 = vrot.slane %v8748_v23, %v8746_v63 }
  0xb1   :  { %1479 = vmatpush2.bf16.msra.mxu1 %v8728_v0  ;;  %v8751_v0 = vsub.s32 1, %v8735_v46 }
  0xb2   :  { %1530 = vmatprep.subr.bf16.mxu1 %v8737_v62 }
  0xb3   :  { %11011 = vst [vmem:[#allocation91_spill] sm:$0xff] %v8751_v0  ;;  %v8759_v47 = vrot.slane %v8748_v23, %v8751_v0 }
  0xb5   :  { %11012 = vst [vmem:[#allocation92_spill] sm:$0xff] %v8759_v47 }
 0x104   :  { %v8761_v26 = vpop.f32.mrf.mxu0  ;;  %v277_v30 = vpop.f32.mrf.mxu1 }
 0x105   :  { %v8764_v24 = vadd.f32 %v277_v30, %v8755_v18 }
 0x106   :  { %v8766_v62 = vpop.f32.mrf.mxu0  ;;  %v279_v38 = vpop.f32.mrf.mxu1 }
 0x107   :  { %11013 = vst [vmem:[#allocation93_spill] sm:$0xff] %v8764_v24  ;;  %v8769_v16 = vadd.f32 %v279_v38, %v8759_v47 }
 0x108   :  { %v281_v54 = vpop.f32.mrf.mxu1  ;;  %v261_v33 = vpop.f32.mrf.mxu0 }
 0x109   :  { %11014 = vst [vmem:[#allocation94_spill] sm:$0xff] %v8769_v16  ;;  %v8772_v63 = vadd.f32 %v281_v54, %v8755_v18  ;;  %v8775_v0 = vadd.f32 %v261_v33, %v8755_v18  ;;  %v148_v16 = vsub.s32 4, %v8735_v46 }
 0x10a   :  { %v8777_v31 = vpop.f32.mrf.mxu1  ;;  %v8779_v7 = vpop.f32.mrf.mxu0 }
 0x10b   :  { %11015 = vst [vmem:[#allocation95_spill] sm:$0xff] %v8772_v63  ;;  %11016 = vst [vmem:[#allocation96_spill] sm:$0xff] %v8775_v0 }
 0x10c   :  { %11017 = vst [vmem:[#allocation97_spill] sm:$0xff] %v8777_v31  ;;  %11018 = vst [vmem:[#allocation98_spill] sm:$0xff] %v8779_v7  ;;  %v287_v30 = vpop.f32.mrf.mxu1  ;;  %v267_v24 = vpop.f32.mrf.mxu0  ;;  %v152_v31 = vsub.s32 5, %v8735_v46 }
 0x10d   :  { %v8782_v2 = vadd.f32 %v287_v30, %v8755_v18  ;;  %v8785_v38 = vadd.f32 %v267_v24, %v8755_v18 }
 0x10e   :  { %v289_v49 = vpop.f32.mrf.mxu1  ;;  %v269_v54 = vpop.f32.mrf.mxu0 }
 0x10f   :  { %11019 = vst [vmem:[#allocation99_spill] sm:$0xff] %v8782_v2  ;;  %11020 = vst [vmem:[#allocation100_spill] sm:$0xff] %v8785_v38  ;;  %v8789_v63 = vadd.f32 %v289_v49, %v8759_v47  ;;  %v8792_v33 = vadd.f32 %v269_v54, %v8759_v47  ;;  %v8802_v2 = vrot.slane %v8748_v23, %v148_v16  ;;  %v8809_v54 = vsub.s32 2, %v8735_v46 }
 0x110   :  { %v291_v0 = vpop.f32.mrf.mxu1  ;;  %v271_v7 = vpop.f32.mrf.mxu0 }
 0x111   :  { %11021 = vst [vmem:[#allocation101_spill] sm:$0xff] %v8789_v63  ;;  %11022 = vst [vmem:[#allocation102_spill] sm:$0xff] %v8792_v33  ;;  %v8796_v30 = vadd.f32 %v291_v0, %v8755_v18  ;;  %v8799_v24 = vadd.f32 %v271_v7, %v8755_v18  ;;  %v8812_v63 = vrot.slane %v8748_v23, %v152_v31  ;;  %v8829_v31 = vsub.s32 3, %v8735_v46 }
 0x112   :  { %v8804_v38 = vpop.f32.mrf.mxu1  ;;  %v8806_v49 = vpop.f32.mrf.mxu0  ;;  %11027 = vst [vmem:[#allocation107_spill] sm:$0xff] %v8809_v54 }
 0x113   :  { %11023 = vst [vmem:[#allocation103_spill] sm:$0xff] %v8796_v30  ;;  %11024 = vst [vmem:[#allocation104_spill] sm:$0xff] %v8799_v24 }
 0x114   :  { %11025 = vst [vmem:[#allocation105_spill] sm:$0xff] %v8804_v38  ;;  %11026 = vst [vmem:[#allocation106_spill] sm:$0xff] %v8806_v49  ;;  %v8814_v33 = vpop.f32.mrf.mxu1  ;;  %v403_v0 = vpop.f32.mrf.mxu0  ;;  %v8823_v38 = vrot.slane %v8748_v23, %v8809_v54 }
 0x115   :  { %11028 = vst [vmem:[#allocation108_spill] sm:$0xff] %v8812_v63  ;;  %v8817_v30 = vadd.f32 %v403_v0, %v8802_v2  ;;  %11031 = vst [vmem:[#allocation111_spill] sm:$0xff] %v8829_v31 }
 0x116   :  { %v8819_v7 = vpop.f32.mrf.mxu1  ;;  %v405_v16 = vpop.f32.mrf.mxu0 }
 0x117   :  { %11029 = vst [vmem:[#allocation109_spill] sm:$0xff] %v8817_v30  ;;  %v8826_v24 = vadd.f32 %v405_v16, %v8812_v63  ;;  %v8843_v16 = vrot.slane %v8748_v23, %v8829_v31 }
 0x118   :  { %v334_v49 = vpop.f32.mrf.mxu1  ;;  %v407_v14 = vpop.f32.mrf.mxu0 }
 0x119   :  { %11030 = vst [vmem:[#allocation110_spill] sm:$0xff] %v8826_v24  ;;  %v8832_v10 = vadd.f32 %v334_v49, %v8823_v38  ;;  %v8837_v30 = vadd.f32 %v407_v14, %v8802_v2  ;;  %11036 = vst [vmem:[#allocation116_spill] sm:$0xff] %v8843_v16 }
 0x11a   :  { %v8834_v0 = vpop.f32.mrf.mxu1  ;;  %v8839_v8 = vpop.f32.mrf.mxu0 }
 0x11b   :  { %11032 = vst [vmem:[#allocation112_spill] sm:$0xff] %v8832_v10  ;;  %11033 = vst [vmem:[#allocation113_spill] sm:$0xff] %v8834_v0 }
 0x11c   :  { %11034 = vst [vmem:[#allocation114_spill] sm:$0xff] %v8837_v30  ;;  %11035 = vst [vmem:[#allocation115_spill] sm:$0xff] %v8839_v8  ;;  %v340_v54 = vpop.f32.mrf.mxu1  ;;  %v413_v6 = vpop.f32.mrf.mxu0 }
 0x11d   :  { %v8846_v24 = vadd.f32 %v340_v54, %v8823_v38  ;;  %v8849_v61 = vadd.f32 %v413_v6, %v8802_v2 }
 0x11e   :  { %v342_v49 = vpop.f32.mrf.mxu1  ;;  %v415_v10 = vpop.f32.mrf.mxu0 }
 0x11f   :  { %11037 = vst [vmem:[#allocation117_spill] sm:$0xff] %v8846_v24  ;;  %11038 = vst [vmem:[#allocation118_spill] sm:$0xff] %v8849_v61  ;;  %v8852_v0 = vadd.f32 %v342_v49, %v8843_v16  ;;  %v8855_v14 = vadd.f32 %v415_v10, %v8812_v63 }
 0x120   :  { %v344_v30 = vpop.f32.mrf.mxu1  ;;  %v417_v8 = vpop.f32.mrf.mxu0 }
 0x121   :  { %11039 = vst [vmem:[#allocation119_spill] sm:$0xff] %v8852_v0  ;;  %11040 = vst [vmem:[#allocation120_spill] sm:$0xff] %v8855_v14  ;;  %v8858_v57 = vadd.f32 %v344_v30, %v8823_v38  ;;  %v8861_v31 = vadd.f32 %v417_v8, %v8802_v2 }
 0x122   :  { %v8863_v54 = vpop.f32.mrf.mxu1  ;;  %v8865_v6 = vpop.f32.mrf.mxu0 }
 0x123   :  { %11041 = vst [vmem:[#allocation121_spill] sm:$0xff] %v8858_v57  ;;  %11042 = vst [vmem:[#allocation122_spill] sm:$0xff] %v8861_v31 }
 0x124   :  { %11043 = vst [vmem:[#allocation123_spill] sm:$0xff] %v8863_v54  ;;  %11044 = vst [vmem:[#allocation124_spill] sm:$0xff] %v8865_v6  ;;  %v350_v61 = vpop.f32.mrf.mxu1  ;;  %v423_v24 = vpop.f32.mrf.mxu0 }
 0x125   :  { %v8868_v49 = vadd.f32 %v350_v61, %v8823_v38  ;;  %v8871_v10 = vadd.f32 %v423_v24, %v8802_v2 }
 0x126   :  { %v352_v14 = vpop.f32.mrf.mxu1  ;;  %v425_v0 = vpop.f32.mrf.mxu0 }
 0x127   :  { %11045 = vst [vmem:[#allocation125_spill] sm:$0xff] %v8868_v49  ;;  %11046 = vst [vmem:[#allocation126_spill] sm:$0xff] %v8871_v10  ;;  %v8874_v30 = vadd.f32 %v352_v14, %v8843_v16  ;;  %v8877_v8 = vadd.f32 %v425_v0, %v8812_v63  ;;  %v156_v0 = vsub.s32 6, %v8735_v46 }
 0x128   :  { %v354_v31 = vpop.f32.mrf.mxu1  ;;  %v427_v57 = vpop.f32.mrf.mxu0 }
 0x129   :  { %11047 = vst [vmem:[#allocation127_spill] sm:$0xff] %v8874_v30  ;;  %11048 = vst [vmem:[#allocation128_spill] sm:$0xff] %v8877_v8  ;;  %v8880_v6 = vadd.f32 %v354_v31, %v8823_v38  ;;  %v8883_v54 = vadd.f32 %v427_v57, %v8802_v2 }
 0x12a   :  { %v8885_v61 = vpop.f32.mrf.mxu1  ;;  %v429_v24 = vpop.f32.mrf.mxu0 }
 0x12b   :  { %11049 = vst [vmem:[#allocation129_spill] sm:$0xff] %v8880_v6  ;;  %11050 = vst [vmem:[#allocation130_spill] sm:$0xff] %v8883_v54  ;;  %v8888_v49 = vadd.f32 %v429_v24, %v8812_v63 }
 0x12c   :  { %11051 = vst [vmem:[#allocation131_spill] sm:$0xff] %v8885_v61  ;;  %v360_v10 = vpop.f32.mrf.mxu1  ;;  %v433_v14 = vpop.f32.mrf.mxu0  ;;  %v160_v61 = vsub.s32 7, %v8735_v46 }
 0x12d   :  { %11052 = vst [vmem:[#allocation132_spill] sm:$0xff] %v8888_v49  ;;  %v8891_v30 = vadd.f32 %v360_v10, %v8823_v38  ;;  %v8895_v8 = vadd.f32 %v433_v14, %v8802_v2  ;;  %v260_v49 = vadd.f32 %v8766_v62, %v8759_v47  ;;  %v157_v14 = vrot.slane %v8748_v23, %v156_v0 }
 0x12e   :  { %v362_v31 = vpop.f32.mrf.mxu1  ;;  %v435_v6 = vpop.f32.mrf.mxu0  ;;  %v8915_v46 = vrot.slane %v8748_v23, %v160_v61 }
 0x12f   :  { %11053 = vst [vmem:[#allocation133_spill] sm:$0xff] %v8891_v30  ;;  %11054 = vst [vmem:[#allocation134_spill] sm:$0xff] %v8895_v8  ;;  %v8898_v57 = vadd.f32 %v362_v31, %v8843_v16  ;;  %v8902_v24 = vadd.f32 %v435_v6, %v8812_v63  ;;  %v258_v8 = vadd.f32 %v8761_v26, %v8755_v18  ;;  %v6747_v6 = vmul.f32 -1.442695, %v260_v49 }
 0x130   :  { %v364_v10 = vpop.f32.mrf.mxu1  ;;  %v437_v30 = vpop.f32.mrf.mxu0  ;;  %11059 = vst [vmem:[#allocation139_spill] sm:$0xff] %v8915_v46 }
 0x131   :  { %11055 = vst [vmem:[#allocation135_spill] sm:$0xff] %v8898_v57  ;;  %11056 = vst [vmem:[#allocation136_spill] sm:$0xff] %v8902_v24  ;;  %v8907_v54 = vadd.f32 %v364_v10, %v8823_v38  ;;  %v6746_v47 = vmul.f32 -1.442695, %v258_v8  ;;  %7583 = vpow2.f32 %v6747_v6 }
 0x132   :  { %v8912_v31 = vpop.f32.mrf.mxu1  ;;  %v439_v57 = vpop.f32.mrf.mxu0 }
 0x133   :  { %11057 = vst [vmem:[#allocation137_spill] sm:$0xff] %v8907_v54  ;;  %11058 = vst [vmem:[#allocation138_spill] sm:$0xff] %v8912_v31  ;;  %v440_v62 = vadd.f32 %v439_v57, %v8812_v63  ;;  %v438_v54 = vadd.f32 %v437_v30, %v8802_v2  ;;  %7585 = vpow2.f32 %v6746_v47 }
 0x134   :  { %v476_v24 = vpop.f32.mrf.mxu1 }
 0x135   :  { %v8917_v55 = vadd.f32 %v476_v24, %v157_v14  ;;  %v6750_v31 = vmul.f32 -1.442695, %v440_v62  ;;  %v6749_v23 = vmul.f32 -1.442695, %v438_v54 }
 0x136   :  { %v478_v10 = vpop.f32.mrf.mxu1 }
 0x137   :  { %11060 = vst [vmem:[#allocation140_spill] sm:$0xff] %v8917_v55  ;;  %v8922_v0 = vadd.f32 %v478_v10, %v8915_v46  ;;  %7587 = vpow2.f32 %v6750_v31 }
 0x138   :  { %v480_v18 = vpop.f32.mrf.mxu1  ;;  %7589 = vpow2.f32 %v6749_v23  ;;  %v333_v23 = vadd.f32 %v8819_v7, %v8843_v16 }
 0x139   :  { %11061 = vst [vmem:[#allocation141_spill] sm:$0xff] %v8922_v0  ;;  %v8924_v26 = vadd.f32 %v480_v18, %v157_v14 }
 0x13a   :  { %v8926_v49 = vpop.f32.mrf.mxu1 }
 0x13b   :  { %11062 = vst [vmem:[#allocation142_spill] sm:$0xff] %v8924_v26  ;;  %11063 = vst [vmem:[#allocation143_spill] sm:$0xff] %v8926_v49 }
 0x13c   :  { %v486_v61 = vpop.f32.mrf.mxu1 }
 0x13d   :  { %v8928_v24 = vadd.f32 %v486_v61, %v157_v14 }
 0x13e   :  { %v488_v8 = vpop.f32.mrf.mxu1  ;;  %v7584_v62 = vpop.eup %7583 }
 0x13f   :  { %11064 = vst [vmem:[#allocation144_spill] sm:$0xff] %v8928_v24  ;;  %v8931_v2 = vadd.f32 %v488_v8, %v8915_v46  ;;  %v724_v61 = vadd.f32 1.0, %v7584_v62 }
 0x140   :  { %v490_v30 = vpop.f32.mrf.mxu1  ;;  %v7586_v18 = vpop.eup %7585 }
 0x141   :  { %11065 = vst [vmem:[#allocation145_spill] sm:$0xff] %v8931_v2  ;;  %v8933_v57 = vadd.f32 %v490_v30, %v157_v14  ;;  %v718_v0 = vadd.f32 1.0, %v7586_v18  ;;  %7591 = vrcp.f32 %v724_v61 }
 0x142   :  { %v8935_v6 = vpop.f32.mrf.mxu1 }
 0x143   :  { %11066 = vst [vmem:[#allocation146_spill] sm:$0xff] %v8933_v57  ;;  %11067 = vst [vmem:[#allocation147_spill] sm:$0xff] %v8935_v6  ;;  %7593 = vrcp.f32 %v718_v0 }
 0x144   :  { %v496_v10 = vpop.f32.mrf.mxu1  ;;  %v7588_v30 = vpop.eup %7587 }
 0x145   :  { %v8937_v47 = vadd.f32 %v496_v10, %v157_v14  ;;  %v7590_v49 = vpop.eup %7589  ;;  %v331_v10 = vadd.f32 %v8814_v33, %v8823_v38  ;;  %v748_v62 = vadd.f32 1.0, %v7588_v30 }
 0x146   :  { %v498_v54 = vpop.f32.mrf.mxu1  ;;  %v742_v7 = vadd.f32 1.0, %v7590_v49 }
 0x147   :  { %11068 = vst [vmem:[#allocation148_spill] sm:$0xff] %v8937_v47  ;;  %v8940_v31 = vadd.f32 %v498_v54, %v8915_v46  ;;  %v6748_v54 = vmul.f32 -1.442695, %v333_v23  ;;  %7595 = vtanh.f32 %v331_v10 }
 0x148   :  { %v500_v8 = vpop.f32.mrf.mxu1 }
 0x149   :  { %11069 = vst [vmem:[#allocation149_spill] sm:$0xff] %v8940_v31  ;;  %v8944_v55 = vadd.f32 %v500_v8, %v157_v14  ;;  %7597 = vpow2.f32 %v6748_v54  ;;  %v617_v31 = vld [vmem:[#allocation9 + $0x130] sm:$0xff] }
 0x14a   :  { %v502_v26 = vpop.f32.mrf.mxu1  ;;  %7599 = vrcp.f32 %v748_v62 }
 0x14b   :  { %11070 = vst [vmem:[#allocation150_spill] sm:$0xff] %v8944_v55  ;;  %v8949_v24 = vadd.f32 %v502_v26, %v8915_v46  ;;  %7601 = vrcp.f32 %v742_v7  ;;  %v614_v55 = vld [vmem:[#allocation9 + $0x118] sm:$0xff] }
 0x14c   :  { %v506_v2 = vpop.f32.mrf.mxu1 }
 0x14d   :  { %11071 = vst [vmem:[#allocation151_spill] sm:$0xff] %v8949_v24  ;;  %v8951_v57 = vadd.f32 %v506_v2, %v157_v14  ;;  %v618_v24 = vld [vmem:[#allocation9 + $0x138] sm:$0xff] }
 0x14e   :  { %v508_v8 = vpop.f32.mrf.mxu1  ;;  %v7592_v2 = vpop.eup %7591 }
 0x14f   :  { %v8954_v18 = vadd.f32 %v508_v8, %v8915_v46  ;;  %v734_v49 = vmul.f32 0.0, %v7592_v2 }
 0x150   :  { %v510_v6 = vpop.f32.mrf.mxu1  ;;  %v7594_v23 = vpop.eup %7593 }
 0x151   :  { %v511_v38 = vadd.f32 %v510_v6, %v157_v14 }
 0x152   :  { %v512_v33 = vpop.f32.mrf.mxu1 }
 0x153   :  { %7603 = vtanh.f32 %v511_v38  ;;  %v513_v26 = vadd.f32 %v512_v33, %v8915_v46  ;;  %v613_v46 = vld [vmem:[#allocation9 + $0x110] sm:$0xff] }
 0x154   :  { %v7596_v0 = vpop.eup %7595 }
 0x155   :  { %v6751_v61 = vmul.f32 -1.442695, %v513_v26  ;;  %v735_v63 = vmul.f32 %v7596_v0, %v7594_v23 }
 0x156   :  { %v7598_v30 = vpop.eup %7597 }
 0x157   :  { %7605 = vpow2.f32 %v6751_v61  ;;  %v7600_v10 = vpop.eup %7599  ;;  %v8957_v54 = vadd.f32 %v735_v63, %v734_v49  ;;  %v731_v62 = vadd.f32 1.0, %v7598_v30  ;;  %v629_v49 = vld [vmem:[#allocation9 + $0x190] sm:$0xff]  ;;  %v630_v30 = vld [vmem:[#allocation9 + $0x198] sm:$0xff] }
 0x158   :  { %v7602_v8 = vpop.eup %7601  ;;  %v758_v14 = vmul.f32 0.0, %v7600_v10  ;;  %v634_v10 = vld [vmem:[#allocation9 + $0x1b8] sm:$0xff] }
 0x159   :  { %7607 = vtanh.f32 %v8957_v54 }
 0x15a   :  { %7609 = vrcp.f32 %v731_v62 }
 0x160   :  { %v7604_v47 = vpop.eup %7603 }
 0x161   :  { %v759_v6 = vmul.f32 %v7604_v47, %v7602_v8  ;;  %v633_v47 = vld [vmem:[#allocation9 + $0x1b0] sm:$0xff] }
 0x163   :  { %v8959_v7 = vadd.f32 %v759_v6, %v758_v14  ;;  %v621_v14 = vld [vmem:[#allocation9 + $0x150] sm:$0xff]  ;;  %v8977_v6 = vcombine.high %v629_v49, %v633_v47 }
 0x164   :  { %v7606_v38 = vpop.eup %7605 }
 0x165   :  { %v755_v33 = vadd.f32 1.0, %v7606_v38  ;;  %7611 = vtanh.f32 %v8959_v7  ;;  %11075 = vst [vmem:[#allocation155_spill] sm:$0xff] %v8977_v6  ;;  %v8979_v38 = vcombine.high %v630_v30, %v634_v10 }
 0x166   :  { %v7608_v26 = vpop.eup %7607 }
 0x167   :  { %7613 = vrcp.f32 %v755_v33  ;;  %v7610_v61 = vpop.eup %7609  ;;  %11076 = vst [vmem:[#allocation156_spill] sm:$0xff] %v8979_v38  ;;  %v625_v33 = vld [vmem:[#allocation9 + $0x170] sm:$0xff] }
 0x168   :  { %v8963_v0 = vmul.f32 %v7610_v61, %v7608_v26  ;;  %v622_v26 = vld [vmem:[#allocation9 + $0x158] sm:$0xff] }
 0x169   :  { %v626_v61 = vld [vmem:[#allocation9 + $0x178] sm:$0xff] }
 0x16a   :  { %11072 = vst [vmem:[#allocation152_spill] sm:$0xff] %v8963_v0  ;;  %v8973_v62 = vpack.c.bf16 %v8963_v0, %v8963_v0  ;;  %v8993_v0 = vcombine.high %v622_v26, %v626_v61 }
 0x16c   :  { %11080 = vst [vmem:[#allocation160_spill] sm:$0xff] %v8993_v0 }
 0x172   :  { %v7612_v2 = vpop.eup %7611 }
 0x174   :  { %v7614_v23 = vpop.eup %7613 }
 0x175   :  { %v8965_v63 = vmul.f32 %v7614_v23, %v7612_v2  ;;  %v8985_v2 = vcombine.low %v629_v49, %v633_v47  ;;  %v8987_v23 = vcombine.low %v630_v30, %v634_v10  ;;  %v8999_v49 = vcombine.low %v621_v14, %v625_v33 }
 0x176   :  { %v9001_v47 = vcombine.low %v622_v26, %v626_v61  ;;  %v9005_v30 = vcombine.high %v613_v46, %v617_v31  ;;  %v9007_v10 = vcombine.high %v614_v55, %v618_v24 }
 0x177   :  { %11073 = vst [vmem:[#allocation153_spill] sm:$0xff] %v8965_v63  ;;  %v8969_v8 = vpack.c.bf16 %v8965_v63, %v8965_v63  ;;  %11077 = vst [vmem:[#allocation157_spill] sm:$0xff] %v8985_v2  ;;  %v8991_v63 = vcombine.high %v621_v14, %v625_v33  ;;  %v9011_v14 = vcombine.low %v613_v46, %v617_v31 }
 0x178   :  { %11078 = vst [vmem:[#allocation158_spill] sm:$0xff] %v8987_v23  ;;  %11081 = vst [vmem:[#allocation161_spill] sm:$0xff] %v8999_v49  ;;  %v9013_v33 = vcombine.low %v614_v55, %v618_v24 }
 0x179   :  { %11074 = vst [vmem:[#allocation154_spill] sm:$0xff] %v8969_v8  ;;  %1439 = vmatprep.mubr.bf16.mxu0 %v8969_v8  ;;  %1480 = vmatprep.mubr.bf16.mxu1 %v8969_v8  ;;  %11079 = vst [vmem:[#allocation159_spill] sm:$0xff] %v8991_v63 }
 0x17a   :  { %1440 = vmatmul.mubr.bf16.vlgmr.msra.gmra.mxu0 %v8973_v62  ;;  %1481 = vmatmul.mubr.bf16.vlgmr.msra.gmra.mxu1 %v8973_v62  ;;  %11082 = vst [vmem:[#allocation162_spill] sm:$0xff] %v9001_v47  ;;  %11083 = vst [vmem:[#allocation163_spill] sm:$0xff] %v9005_v30 }
 0x17b   :  { %1490 = vmatpush1.bf16.msra.mxu0 %v8739_v15  ;;  %1531 = vmatpush1.bf16.msra.mxu1 %v8741_v22  ;;  %11084 = vst [vmem:[#allocation164_spill] sm:$0xff] %v9007_v10  ;;  %v610_v22 = vld [vmem:[#allocation9 + $0xf8] sm:$0xff]  ;;  %11085 = vst [vmem:[#allocation165_spill] sm:$0xff] %v9011_v14 }
 0x17c   :  { %1521 = vmatprep.mubr.bf16.mxu0 %v8969_v8  ;;  %1562 = vmatprep.mubr.bf16.mxu1 %v8969_v8  ;;  %v605_v8 = vld [vmem:[#allocation9 + $0xd0] sm:$0xff]  ;;  %11086 = vst [vmem:[#allocation166_spill] sm:$0xff] %v9013_v33 }
 0x17d   :  { %1491 = vmatprep.subr.bf16.mxu0 %v8977_v6  ;;  %1532 = vmatprep.subr.bf16.mxu1 %v8979_v38  ;;  %v609_v38 = vld [vmem:[#allocation9 + $0xf0] sm:$0xff]  ;;  %v606_v6 = vld [vmem:[#allocation9 + $0xd8] sm:$0xff] }
 0x17e   :  { %v9017_v26 = vcombine.high %v605_v8, %v609_v38  ;;  %v9019_v61 = vcombine.high %v606_v6, %v610_v22  ;;  %v9023_v46 = vcombine.low %v605_v8, %v609_v38  ;;  %v9025_v55 = vcombine.low %v606_v6, %v610_v22 }
 0x17f   :  { %1492 = vmatpush1.bf16.msra.mxu0 %v8985_v2  ;;  %1533 = vmatpush1.bf16.msra.mxu1 %v8987_v23  ;;  %v598_v23 = vld [vmem:[#allocation9 + $0x98] sm:$0xff] }
 0x180   :  { %1493 = vmatprep.subr.bf16.mxu0 %v8991_v63  ;;  %1534 = vmatprep.subr.bf16.mxu1 %v8993_v0  ;;  %11087 = vst [vmem:[#allocation167_spill] sm:$0xff] %v9017_v26  ;;  %11088 = vst [vmem:[#allocation168_spill] sm:$0xff] %v9019_v61  ;;  %v597_v0 = vld [vmem:[#allocation9 + $0x90] sm:$0xff]  ;;  %v602_v2 = vld [vmem:[#allocation9 + $0xb8] sm:$0xff] }
 0x181   :  { %v601_v63 = vld [vmem:[#allocation9 + $0xb0] sm:$0xff]  ;;  %11089 = vst [vmem:[#allocation169_spill] sm:$0xff] %v9023_v46  ;;  %11090 = vst [vmem:[#allocation170_spill] sm:$0xff] %v9025_v55  ;;  %v9031_v31 = vcombine.high %v598_v23, %v602_v2  ;;  %v9037_v22 = vcombine.low %v598_v23, %v602_v2 }
 0x182   :  { %v9029_v24 = vcombine.high %v597_v0, %v601_v63  ;;  %v9035_v8 = vcombine.low %v597_v0, %v601_v63 }
 0x183   :  { %1494 = vmatpush1.bf16.msra.mxu0 %v8999_v49  ;;  %1535 = vmatpush1.bf16.msra.mxu1 %v9001_v47  ;;  %11092 = vst [vmem:[#allocation172_spill] sm:$0xff] %v9031_v31  ;;  %v590_v47 = vld [vmem:[#allocation9 + $0x58] sm:$0xff]  ;;  %11094 = vst [vmem:[#allocation174_spill] sm:$0xff] %v9037_v22 }
 0x184   :  { %1495 = vmatprep.subr.bf16.mxu0 %v9005_v30  ;;  %1536 = vmatprep.subr.bf16.mxu1 %v9007_v10  ;;  %11091 = vst [vmem:[#allocation171_spill] sm:$0xff] %v9029_v24  ;;  %v589_v10 = vld [vmem:[#allocation9 + $0x50] sm:$0xff]  ;;  %v594_v49 = vld [vmem:[#allocation9 + $0x78] sm:$0xff]  ;;  %11093 = vst [vmem:[#allocation173_spill] sm:$0xff] %v9035_v8 }
 0x185   :  { %v593_v30 = vld [vmem:[#allocation9 + $0x70] sm:$0xff]  ;;  %v9043_v38 = vcombine.high %v590_v47, %v594_v49  ;;  %v9049_v63 = vcombine.low %v590_v47, %v594_v49 }
 0x186   :  { %v9041_v6 = vcombine.high %v589_v10, %v593_v30  ;;  %v9047_v0 = vcombine.low %v589_v10, %v593_v30 }
 0x187   :  { %1496 = vmatpush1.bf16.msra.mxu0 %v9011_v14  ;;  %1537 = vmatpush1.bf16.msra.mxu1 %v9013_v33  ;;  %11096 = vst [vmem:[#allocation176_spill] sm:$0xff] %v9043_v38  ;;  %v582_v33 = vld [vmem:[#allocation9 + $0x18] sm:$0xff]  ;;  %11098 = vst [vmem:[#allocation178_spill] sm:$0xff] %v9049_v63 }
 0x188   :  { %1497 = vmatprep.subr.bf16.mxu0 %v9017_v26  ;;  %1538 = vmatprep.subr.bf16.mxu1 %v9019_v61  ;;  %11095 = vst [vmem:[#allocation175_spill] sm:$0xff] %v9041_v6  ;;  %v581_v61 = vld [vmem:[#allocation9 + $0x10] sm:$0xff]  ;;  %v586_v14 = vld [vmem:[#allocation9 + $0x38] sm:$0xff]  ;;  %11097 = vst [vmem:[#allocation177_spill] sm:$0xff] %v9047_v0 }
 0x189   :  { %v585_v26 = vld [vmem:[#allocation9 + $0x30] sm:$0xff]  ;;  %v9055_v23 = vcombine.high %v582_v33, %v586_v14  ;;  %v9061_v49 = vcombine.low %v582_v33, %v586_v14 }
 0x18a   :  { %v9053_v2 = vcombine.high %v581_v61, %v585_v26  ;;  %v9059_v30 = vcombine.low %v581_v61, %v585_v26 }
 0x18b   :  { %1498 = vmatpush1.bf16.msra.mxu0 %v9023_v46  ;;  %1539 = vmatpush1.bf16.msra.mxu1 %v9025_v55  ;;  %11100 = vst [vmem:[#allocation180_spill] sm:$0xff] %v9055_v23  ;;  %v702_v55 = vld [vmem:[#allocation9 + $0x3d8] sm:$0xff]  ;;  %11102 = vst [vmem:[#allocation182_spill] sm:$0xff] %v9061_v49 }
 0x18c   :  { %1499 = vmatprep.subr.bf16.mxu0 %v9029_v24  ;;  %1540 = vmatprep.subr.bf16.mxu1 %v9031_v31  ;;  %11099 = vst [vmem:[#allocation179_spill] sm:$0xff] %v9053_v2  ;;  %v701_v31 = vld [vmem:[#allocation9 + $0x3d0] sm:$0xff]  ;;  %v706_v46 = vld [vmem:[#allocation9 + $0x3f8] sm:$0xff]  ;;  %11101 = vst [vmem:[#allocation181_spill] sm:$0xff] %v9059_v30 }
 0x18d   :  { %v705_v24 = vld [vmem:[#allocation9 + $0x3f0] sm:$0xff]  ;;  %v9067_v10 = vcombine.high %v702_v55, %v706_v46  ;;  %v9073_v14 = vcombine.low %v702_v55, %v706_v46 }
 0x18e   :  { %v9065_v47 = vcombine.high %v701_v31, %v705_v24  ;;  %v9071_v26 = vcombine.low %v701_v31, %v705_v24 }
 0x18f   :  { %1500 = vmatpush1.bf16.msra.mxu0 %v9035_v8  ;;  %1541 = vmatpush1.bf16.msra.mxu1 %v9037_v22  ;;  %11104 = vst [vmem:[#allocation184_spill] sm:$0xff] %v9067_v10  ;;  %v694_v22 = vld [vmem:[#allocation9 + $0x398] sm:$0xff]  ;;  %11106 = vst [vmem:[#allocation186_spill] sm:$0xff] %v9073_v14 }
 0x190   :  { %1501 = vmatprep.subr.bf16.mxu0 %v9041_v6  ;;  %1542 = vmatprep.subr.bf16.mxu1 %v9043_v38  ;;  %11103 = vst [vmem:[#allocation183_spill] sm:$0xff] %v9065_v47  ;;  %v693_v38 = vld [vmem:[#allocation9 + $0x390] sm:$0xff]  ;;  %v698_v8 = vld [vmem:[#allocation9 + $0x3b8] sm:$0xff]  ;;  %11105 = vst [vmem:[#allocation185_spill] sm:$0xff] %v9071_v26 }
 0x191   :  { %v697_v6 = vld [vmem:[#allocation9 + $0x3b0] sm:$0xff]  ;;  %v9079_v61 = vcombine.high %v694_v22, %v698_v8  ;;  %v9085_v46 = vcombine.low %v694_v22, %v698_v8 }
 0x192   :  { %v9077_v33 = vcombine.high %v693_v38, %v697_v6  ;;  %v9083_v24 = vcombine.low %v693_v38, %v697_v6 }
 0x193   :  { %1502 = vmatpush1.bf16.msra.mxu0 %v9047_v0  ;;  %1543 = vmatpush1.bf16.msra.mxu1 %v9049_v63  ;;  %11108 = vst [vmem:[#allocation188_spill] sm:$0xff] %v9079_v61  ;;  %v686_v63 = vld [vmem:[#allocation9 + $0x358] sm:$0xff]  ;;  %11110 = vst [vmem:[#allocation190_spill] sm:$0xff] %v9085_v46 }
 0x194   :  { %1503 = vmatprep.subr.bf16.mxu0 %v9053_v2  ;;  %1544 = vmatprep.subr.bf16.mxu1 %v9055_v23  ;;  %11107 = vst [vmem:[#allocation187_spill] sm:$0xff] %v9077_v33  ;;  %v685_v23 = vld [vmem:[#allocation9 + $0x350] sm:$0xff]  ;;  %v690_v0 = vld [vmem:[#allocation9 + $0x378] sm:$0xff]  ;;  %11109 = vst [vmem:[#allocation189_spill] sm:$0xff] %v9083_v24 }
 0x195   :  { %v689_v2 = vld [vmem:[#allocation9 + $0x370] sm:$0xff]  ;;  %v9091_v31 = vcombine.high %v686_v63, %v690_v0  ;;  %v9097_v8 = vcombine.low %v686_v63, %v690_v0 }
 0x196   :  { %v9089_v55 = vcombine.high %v685_v23, %v689_v2  ;;  %v9095_v6 = vcombine.low %v685_v23, %v689_v2 }
 0x197   :  { %1504 = vmatpush1.bf16.msra.mxu0 %v9059_v30  ;;  %1545 = vmatpush1.bf16.msra.mxu1 %v9061_v49  ;;  %11112 = vst [vmem:[#allocation192_spill] sm:$0xff] %v9091_v31  ;;  %v678_v49 = vld [vmem:[#allocation9 + $0x318] sm:$0xff]  ;;  %11114 = vst [vmem:[#allocation194_spill] sm:$0xff] %v9097_v8 }
 0x198   :  { %1505 = vmatprep.subr.bf16.mxu0 %v9065_v47  ;;  %1546 = vmatprep.subr.bf16.mxu1 %v9067_v10  ;;  %11111 = vst [vmem:[#allocation191_spill] sm:$0xff] %v9089_v55  ;;  %v677_v10 = vld [vmem:[#allocation9 + $0x310] sm:$0xff]  ;;  %v682_v30 = vld [vmem:[#allocation9 + $0x338] sm:$0xff]  ;;  %11113 = vst [vmem:[#allocation193_spill] sm:$0xff] %v9095_v6 }
 0x199   :  { %v681_v47 = vld [vmem:[#allocation9 + $0x330] sm:$0xff]  ;;  %v9103_v38 = vcombine.high %v678_v49, %v682_v30  ;;  %v9109_v0 = vcombine.low %v678_v49, %v682_v30 }
 0x19a   :  { %v9101_v22 = vcombine.high %v677_v10, %v681_v47  ;;  %v9107_v2 = vcombine.low %v677_v10, %v681_v47 }
 0x19b   :  { %1506 = vmatpush2.bf16.msra.mxu0 %v9071_v26  ;;  %1547 = vmatpush2.bf16.msra.mxu1 %v9073_v14  ;;  %11116 = vst [vmem:[#allocation196_spill] sm:$0xff] %v9103_v38  ;;  %v670_v14 = vld [vmem:[#allocation9 + $0x2d8] sm:$0xff]  ;;  %11118 = vst [vmem:[#allocation198_spill] sm:$0xff] %v9109_v0 }
 0x19c   :  { %1507 = vmatprep.subr.bf16.mxu0 %v9077_v33  ;;  %1548 = vmatprep.subr.bf16.mxu1 %v9079_v61  ;;  %11115 = vst [vmem:[#allocation195_spill] sm:$0xff] %v9101_v22  ;;  %v669_v61 = vld [vmem:[#allocation9 + $0x2d0] sm:$0xff]  ;;  %v674_v26 = vld [vmem:[#allocation9 + $0x2f8] sm:$0xff]  ;;  %11117 = vst [vmem:[#allocation197_spill] sm:$0xff] %v9107_v2 }
 0x19d   :  { %v673_v33 = vld [vmem:[#allocation9 + $0x2f0] sm:$0xff]  ;;  %v9115_v23 = vcombine.high %v670_v14, %v674_v26  ;;  %v9121_v30 = vcombine.low %v670_v14, %v674_v26 }
 0x19e   :  { %v9113_v63 = vcombine.high %v669_v61, %v673_v33  ;;  %v9119_v47 = vcombine.low %v669_v61, %v673_v33 }
 0x19f   :  { %1508 = vmatpush2.bf16.msra.mxu0 %v9083_v24  ;;  %1549 = vmatpush2.bf16.msra.mxu1 %v9085_v46  ;;  %11120 = vst [vmem:[#allocation200_spill] sm:$0xff] %v9115_v23  ;;  %v662_v46 = vld [vmem:[#allocation9 + $0x298] sm:$0xff]  ;;  %11122 = vst [vmem:[#allocation202_spill] sm:$0xff] %v9121_v30 }
 0x1a0   :  { %1509 = vmatprep.subr.bf16.mxu0 %v9089_v55  ;;  %1550 = vmatprep.subr.bf16.mxu1 %v9091_v31  ;;  %11119 = vst [vmem:[#allocation199_spill] sm:$0xff] %v9113_v63  ;;  %v661_v31 = vld [vmem:[#allocation9 + $0x290] sm:$0xff]  ;;  %v666_v24 = vld [vmem:[#allocation9 + $0x2b8] sm:$0xff]  ;;  %11121 = vst [vmem:[#allocation201_spill] sm:$0xff] %v9119_v47 }
 0x1a1   :  { %v665_v55 = vld [vmem:[#allocation9 + $0x2b0] sm:$0xff]  ;;  %v9127_v10 = vcombine.high %v662_v46, %v666_v24  ;;  %v9133_v26 = vcombine.low %v662_v46, %v666_v24 }
 0x1a2   :  { %v9125_v49 = vcombine.high %v661_v31, %v665_v55  ;;  %v9131_v33 = vcombine.low %v661_v31, %v665_v55 }
 0x1a3   :  { %1510 = vmatpush2.bf16.msra.mxu0 %v9095_v6  ;;  %1551 = vmatpush2.bf16.msra.mxu1 %v9097_v8  ;;  %11124 = vst [vmem:[#allocation204_spill] sm:$0xff] %v9127_v10  ;;  %v654_v8 = vld [vmem:[#allocation9 + $0x258] sm:$0xff]  ;;  %11126 = vst [vmem:[#allocation206_spill] sm:$0xff] %v9133_v26 }
 0x1a4   :  { %1511 = vmatprep.subr.bf16.mxu0 %v9101_v22  ;;  %1552 = vmatprep.subr.bf16.mxu1 %v9103_v38  ;;  %11123 = vst [vmem:[#allocation203_spill] sm:$0xff] %v9125_v49  ;;  %v653_v38 = vld [vmem:[#allocation9 + $0x250] sm:$0xff]  ;;  %v658_v6 = vld [vmem:[#allocation9 + $0x278] sm:$0xff]  ;;  %11125 = vst [vmem:[#allocation205_spill] sm:$0xff] %v9131_v33 }
 0x1a5   :  { %v657_v22 = vld [vmem:[#allocation9 + $0x270] sm:$0xff]  ;;  %v9139_v61 = vcombine.high %v654_v8, %v658_v6  ;;  %v9145_v24 = vcombine.low %v654_v8, %v658_v6  ;;  %v11136_v6 = vld [vmem:[#allocation61_spill] sm:$0xff]  ;;  %v11137_v8 = vld [vmem:[#allocation62_spill] sm:$0xff] }
 0x1a6   :  { %v9137_v14 = vcombine.high %v653_v38, %v657_v22  ;;  %v9143_v55 = vcombine.low %v653_v38, %v657_v22  ;;  %v11138_v22 = vld [vmem:[#allocation63_spill] sm:$0xff]  ;;  %v11139_v38 = vld [vmem:[#allocation64_spill] sm:$0xff] }
 0x1a7   :  { %1512 = vmatpush2.bf16.msra.mxu0 %v9107_v2  ;;  %1553 = vmatpush2.bf16.msra.mxu1 %v9109_v0  ;;  %11128 = vst [vmem:[#allocation208_spill] sm:$0xff] %v9139_v61  ;;  %v646_v0 = vld [vmem:[#allocation9 + $0x218] sm:$0xff]  ;;  %11130 = vst [vmem:[#allocation210_spill] sm:$0xff] %v9145_v24 }
 0x1a8   :  { %1513 = vmatprep.subr.bf16.mxu0 %v9113_v63  ;;  %1554 = vmatprep.subr.bf16.mxu1 %v9115_v23  ;;  %11127 = vst [vmem:[#allocation207_spill] sm:$0xff] %v9137_v14  ;;  %v645_v23 = vld [vmem:[#allocation9 + $0x210] sm:$0xff]  ;;  %v650_v2 = vld [vmem:[#allocation9 + $0x238] sm:$0xff]  ;;  %11129 = vst [vmem:[#allocation209_spill] sm:$0xff] %v9143_v55 }
 0x1a9   :  { %v649_v63 = vld [vmem:[#allocation9 + $0x230] sm:$0xff]  ;;  %v9151_v31 = vcombine.high %v646_v0, %v650_v2 }
 0x1aa   :  { %v9149_v46 = vcombine.high %v645_v23, %v649_v63 }
 0x1ab   :  { %1514 = vmatpush2.bf16.msra.mxu0 %v9119_v47  ;;  %1555 = vmatpush2.bf16.msra.mxu1 %v9121_v30  ;;  %11132 = vst [vmem:[#allocation212_spill] sm:$0xff] %v9151_v31 }
 0x1ac   :  { %1515 = vmatprep.subr.bf16.mxu0 %v9125_v49  ;;  %1556 = vmatprep.subr.bf16.mxu1 %v9127_v10  ;;  %11131 = vst [vmem:[#allocation211_spill] sm:$0xff] %v9149_v46  ;;  %v9155_v10 = vcombine.low %v645_v23, %v649_v63  ;;  %v11142_v63 = vld [vmem:[#allocation67_spill] sm:$0xff]  ;;  %v11143_v23 = vld [vmem:[#allocation68_spill] sm:$0xff] }
 0x1ae   :  { %11133 = vst [vmem:[#allocation213_spill] sm:$0xff] %v9155_v10 }
 0x1af   :  { %1516 = vmatpush2.bf16.msra.mxu0 %v9131_v33  ;;  %1557 = vmatpush2.bf16.msra.mxu1 %v9133_v26  ;;  %v9157_v33 = vcombine.low %v646_v0, %v650_v2  ;;  %v11140_v2 = vld [vmem:[#allocation65_spill] sm:$0xff]  ;;  %v11141_v0 = vld [vmem:[#allocation66_spill] sm:$0xff] }
 0x1b0   :  { %1517 = vmatprep.subr.bf16.mxu0 %v9137_v14  ;;  %1558 = vmatprep.subr.bf16.mxu1 %v9139_v61 }
 0x1b1   :  { %11134 = vst [vmem:[#allocation214_spill] sm:$0xff] %v9157_v33 }
 0x1b3   :  { %1518 = vmatpush2.bf16.msra.mxu0 %v9143_v55  ;;  %1559 = vmatpush2.bf16.msra.mxu1 %v9145_v24 }
 0x1b4   :  { %1519 = vmatprep.subr.bf16.mxu0 %v9149_v46  ;;  %1560 = vmatprep.subr.bf16.mxu1 %v9151_v31 }
 0x1b7   :  { %1520 = vmatpush2.bf16.msra.mxu0 %v9155_v10  ;;  %1561 = vmatpush2.bf16.msra.mxu1 %v9157_v33 }
 0x1b8   :  { %1639 = vmatprep.subr.bf16.mxu0 %v8541_v32  ;;  %1680 = vmatprep.subr.bf16.mxu1 %v8543_v34 }
 0x1ba   :  { %1522 = vmatmul.mubr.bf16.vlgmr.msra.gmra.mxu0 %v8973_v62  ;;  %1563 = vmatmul.mubr.bf16.vlgmr.msra.gmra.mxu1 %v8973_v62  ;;  %v11135_v62 = vld [vmem:[#allocation60_spill] sm:$0xff] }
 0x1bb   :  { %1640 = vmatpush1.bf16.msra.mxu0 %v8545_v35  ;;  %1681 = vmatpush1.bf16.msra.mxu1 %v8547_v36 }
 0x1bc   :  { %1641 = vmatprep.subr.bf16.mxu0 %v8553_v40  ;;  %1682 = vmatprep.subr.bf16.mxu1 %v8555_v42 }
 0x1bf   :  { %1642 = vmatpush1.bf16.msra.mxu0 %v8557_v43  ;;  %1683 = vmatpush1.bf16.msra.mxu1 %v8559_v44 }
 0x1c0   :  { %1643 = vmatprep.subr.bf16.mxu0 %v8565_v48  ;;  %1684 = vmatprep.subr.bf16.mxu1 %v8567_v50 }
 0x1c3   :  { %1644 = vmatpush1.bf16.msra.mxu0 %v8569_v51  ;;  %1685 = vmatpush1.bf16.msra.mxu1 %v8571_v52 }
 0x1c4   :  { %1645 = vmatprep.subr.bf16.mxu0 %v8577_v56  ;;  %1686 = vmatprep.subr.bf16.mxu1 %v8579_v58 }
 0x1c7   :  { %1646 = vmatpush1.bf16.msra.mxu0 %v8581_v59  ;;  %1687 = vmatpush1.bf16.msra.mxu1 %v8583_v60 }
 0x1c8   :  { %1647 = vmatprep.subr.bf16.mxu0 %v8589_v1  ;;  %1688 = vmatprep.subr.bf16.mxu1 %v8591_v3 }
 0x1cb   :  { %1648 = vmatpush1.bf16.msra.mxu0 %v8593_v4  ;;  %1689 = vmatpush1.bf16.msra.mxu1 %v8595_v5 }
 0x1cc   :  { %1649 = vmatprep.subr.bf16.mxu0 %v8601_v9  ;;  %1690 = vmatprep.subr.bf16.mxu1 %v8603_v11 }
 0x1cf   :  { %1650 = vmatpush1.bf16.msra.mxu0 %v8605_v12  ;;  %1691 = vmatpush1.bf16.msra.mxu1 %v8607_v13 }
 0x1d0   :  { %1651 = vmatprep.subr.bf16.mxu0 %v8613_v17  ;;  %1692 = vmatprep.subr.bf16.mxu1 %v8615_v19 }
 0x1d3   :  { %1652 = vmatpush1.bf16.msra.mxu0 %v8617_v20  ;;  %1693 = vmatpush1.bf16.msra.mxu1 %v8619_v21 }
 0x1d4   :  { %1653 = vmatprep.subr.bf16.mxu0 %v8625_v25  ;;  %1694 = vmatprep.subr.bf16.mxu1 %v8627_v27 }
 0x1d7   :  { %1654 = vmatpush1.bf16.msra.mxu0 %v8629_v28  ;;  %1695 = vmatpush1.bf16.msra.mxu1 %v8631_v29  ;;  %v11168_v29 = vld [vmem:[#allocation112_spill] sm:$0xff] }
 0x1d8   :  { %1655 = vmatprep.subr.bf16.mxu0 %v8637_v37  ;;  %1696 = vmatprep.subr.bf16.mxu1 %v8639_v39  ;;  %v11167_v37 = vld [vmem:[#allocation96_spill] sm:$0xff] }
 0x1db   :  { %1656 = vmatpush2.bf16.msra.mxu0 %v8641_v41  ;;  %1697 = vmatpush2.bf16.msra.mxu1 %v8643_v45  ;;  %v11144_v45 = vld [vmem:[#allocation69_spill] sm:$0xff]  ;;  %v11164_v41 = vld [vmem:[#allocation92_spill] sm:$0xff] }
 0x1dc   :  { %1657 = vmatprep.subr.bf16.mxu0 %v8649_v53  ;;  %1698 = vmatprep.subr.bf16.mxu1 %v11135_v62  ;;  %v11145_v53 = vld [vmem:[#allocation70_spill] sm:$0xff]  ;;  %v11146_v62 = vld [vmem:[#allocation71_spill] sm:$0xff] }
 0x1df   :  { %1658 = vmatpush2.bf16.msra.mxu0 %v11136_v6  ;;  %1699 = vmatpush2.bf16.msra.mxu1 %v11137_v8  ;;  %v11147_v6 = vld [vmem:[#allocation73_spill] sm:$0xff]  ;;  %v11148_v8 = vld [vmem:[#allocation72_spill] sm:$0xff] }
 0x1e0   :  { %1659 = vmatprep.subr.bf16.mxu0 %v11138_v22  ;;  %1700 = vmatprep.subr.bf16.mxu1 %v11139_v38  ;;  %v11149_v22 = vld [vmem:[#allocation74_spill] sm:$0xff]  ;;  %v11150_v38 = vld [vmem:[#allocation75_spill] sm:$0xff] }
 0x1e3   :  { %1660 = vmatpush2.bf16.msra.mxu0 %v11140_v2  ;;  %1701 = vmatpush2.bf16.msra.mxu1 %v11141_v0  ;;  %v11151_v2 = vld [vmem:[#allocation76_spill] sm:$0xff]  ;;  %v11152_v0 = vld [vmem:[#allocation77_spill] sm:$0xff] }
 0x1e4   :  { %1661 = vmatprep.subr.bf16.mxu0 %v11142_v63  ;;  %1702 = vmatprep.subr.bf16.mxu1 %v11143_v23  ;;  %v11153_v63 = vld [vmem:[#allocation78_spill] sm:$0xff]  ;;  %v11154_v23 = vld [vmem:[#allocation79_spill] sm:$0xff] }
 0x1e7   :  { %1662 = vmatpush2.bf16.msra.mxu0 %v11144_v45  ;;  %1703 = vmatpush2.bf16.msra.mxu1 %v11145_v53  ;;  %v11155_v45 = vld [vmem:[#allocation80_spill] sm:$0xff]  ;;  %v11156_v53 = vld [vmem:[#allocation81_spill] sm:$0xff] }
 0x1e8   :  { %1663 = vmatprep.subr.bf16.mxu0 %v11146_v62  ;;  %1704 = vmatprep.subr.bf16.mxu1 %v11147_v6  ;;  %v11157_v62 = vld [vmem:[#allocation82_spill] sm:$0xff]  ;;  %v11158_v6 = vld [vmem:[#allocation83_spill] sm:$0xff] }
 0x1eb   :  { %1664 = vmatpush2.bf16.msra.mxu0 %v11148_v8  ;;  %1705 = vmatpush2.bf16.msra.mxu1 %v11149_v22  ;;  %v11159_v8 = vld [vmem:[#allocation84_spill] sm:$0xff]  ;;  %v11160_v22 = vld [vmem:[#allocation85_spill] sm:$0xff] }
 0x1ec   :  { %1665 = vmatprep.subr.bf16.mxu0 %v11150_v38  ;;  %1706 = vmatprep.subr.bf16.mxu1 %v11151_v2  ;;  %v11161_v38 = vld [vmem:[#allocation86_spill] sm:$0xff]  ;;  %v11162_v2 = vld [vmem:[#allocation87_spill] sm:$0xff] }
 0x1ef   :  { %1666 = vmatpush2.bf16.msra.mxu0 %v11152_v0  ;;  %1707 = vmatpush2.bf16.msra.mxu1 %v11153_v63  ;;  %v11163_v0 = vld [vmem:[#allocation88_spill] sm:$0xff] }
 0x1f0   :  { %1667 = vmatprep.subr.bf16.mxu0 %v11154_v23  ;;  %1708 = vmatprep.subr.bf16.mxu1 %v11155_v45  ;;  %v11165_v45 = vld [vmem:[#allocation98_spill] sm:$0xff] }
 0x1f1   :  { %v264_v39 = vadd.f32 %v11165_v45, %v11164_v41 }
 0x1f3   :  { %1668 = vmatpush2.bf16.msra.mxu0 %v11156_v53  ;;  %1709 = vmatpush2.bf16.msra.mxu1 %v11157_v62  ;;  %v11166_v53 = vld [vmem:[#allocation113_spill] sm:$0xff] }
 0x1f4   :  { %1669 = vmatprep.subr.bf16.mxu0 %v11158_v6  ;;  %1710 = vmatprep.subr.bf16.mxu1 %v11159_v8  ;;  %v337_v62 = vadd.f32 %v11166_v53, %v8843_v16  ;;  %v11196_v16 = vld [vmem:[#allocation177_spill] sm:$0xff] }
 0x1f7   :  { %1670 = vmatpush2.bf16.msra.mxu0 %v11160_v22  ;;  %1711 = vmatpush2.bf16.msra.mxu1 %v11161_v38 }
 0x1f8   :  { %1721 = vmatprep.subr.bf16.mxu0 %v11162_v2  ;;  %1762 = vmatprep.subr.bf16.mxu1 %v11163_v0 }
 0x23a   :  { %v1441_v63 = vpop.f32.mrf.mxu0  ;;  %v1482_v23 = vpop.f32.mrf.mxu1 }
 0x23b   :  { %v1575_v6 = vadd.f32 %v1441_v63, %v11167_v37  ;;  %v1577_v8 = vadd.f32 %v1482_v23, %v11168_v29 }
 0x23c   :  { %v1443_v28 = vpop.f32.mrf.mxu0  ;;  %v1484_v22 = vpop.f32.mrf.mxu1 }
 0x23d   :  { %v6880_v27 = vmul.f32 -1.442695, %v1575_v6  ;;  %v1576_v38 = vadd.f32 %v1443_v28, %v264_v39  ;;  %v1578_v25 = vadd.f32 %v1484_v22, %v337_v62 }
 0x23e   :  { %v1445_v2 = vpop.f32.mrf.mxu0  ;;  %v1486_v21 = vpop.f32.mrf.mxu1 }
 0x23f   :  { %7615 = vpow2.f32 %v6880_v27  ;;  %v6881_v0 = vmul.f32 -1.442695, %v1576_v38  ;;  %v11170_v2 = vld [vmem:[#allocation136_spill] sm:$0xff] }
 0x240   :  { %v1446_v20 = vpop.f32.mrf.mxu0  ;;  %v1487_v19 = vpop.f32.mrf.mxu1 }
 0x241   :  { %7617 = vpow2.f32 %v6881_v0  ;;  %v11169_v20 = vld [vmem:[#allocation134_spill] sm:$0xff] }
 0x242   :  { %7619 = vtanh.f32 %v1577_v8 }
 0x24c   :  { %v7616_v45 = vpop.eup %7615 }
 0x24d   :  { %v1590_v41 = vadd.f32 1.0, %v7616_v45 }
 0x24e   :  { %v7618_v17 = vpop.eup %7617 }
 0x24f   :  { %7621 = vrcp.f32 %v1590_v41  ;;  %v1596_v37 = vadd.f32 1.0, %v7618_v17  ;;  %v7620_v29 = vpop.eup %7619 }
 0x251   :  { %7623 = vrcp.f32 %v1596_v37  ;;  %v6882_v37 = vmul.f32 -1.442695, %v1578_v25 }
 0x25c   :  { %v7622_v53 = vpop.eup %7621 }
 0x25d   :  { %v1607_v63 = vmul.f32 %v7622_v53, %v7620_v29 }
 0x25e   :  { %v7624_v6 = vpop.eup %7623 }
 0x25f   :  { %v1606_v28 = vmul.f32 %v7624_v6, %v8957_v54 }
 0x261   :  { %v9238_v39 = vadd.f32 %v1607_v63, %v1606_v28 }
 0x27a   :  { %v1523_v21 = vpop.f32.mrf.mxu0  ;;  %v1564_v27 = vpop.f32.mrf.mxu1 }
 0x27b   :  { %v1583_v19 = vadd.f32 %v1523_v21, %v11169_v20  ;;  %v1585_v29 = vadd.f32 %v1564_v27, %v8951_v57 }
 0x27c   :  { %v1525_v62 = vpop.f32.mrf.mxu0  ;;  %v1566_v22 = vpop.f32.mrf.mxu1 }
 0x27d   :  { %v6883_v38 = vmul.f32 -1.442695, %v1583_v19  ;;  %v1584_v8 = vadd.f32 %v1525_v62, %v11170_v2  ;;  %v1586_v54 = vadd.f32 %v1566_v22, %v8954_v18 }
 0x27e   :  { %v1527_v41 = vpop.f32.mrf.mxu0  ;;  %v1568_v17 = vpop.f32.mrf.mxu1 }
 0x27f   :  { %7625 = vpow2.f32 %v6883_v38  ;;  %v6884_v0 = vmul.f32 -1.442695, %v1584_v8  ;;  %v6885_v53 = vmul.f32 -1.442695, %v1586_v54 }
 0x280   :  { %v1528_v23 = vpop.f32.mrf.mxu0  ;;  %v1569_v45 = vpop.f32.mrf.mxu1 }
 0x281   :  { %7627 = vpow2.f32 %v6884_v0 }
 0x282   :  { %7629 = vpow2.f32 %v6882_v37  ;;  %v11173_v37 = vld [vmem:[#allocation89_spill] sm:$0xff] }
 0x283   :  { %7631 = vtanh.f32 %v1585_v29  ;;  %v11174_v29 = vld [vmem:[#allocation155_spill] sm:$0xff] }
 0x284   :  { %7633 = vpow2.f32 %v6885_v53  ;;  %v11175_v53 = vld [vmem:[#allocation156_spill] sm:$0xff] }
 0x28c   :  { %v7626_v63 = vpop.eup %7625 }
 0x28d   :  { %v1614_v6 = vadd.f32 1.0, %v7626_v63  ;;  %v11176_v63 = vld [vmem:[#allocation157_spill] sm:$0xff] }
 0x28e   :  { %v7628_v28 = vpop.eup %7627 }
 0x28f   :  { %7635 = vrcp.f32 %v1614_v6  ;;  %v1620_v21 = vadd.f32 1.0, %v7628_v28  ;;  %v7630_v20 = vpop.eup %7629  ;;  %v11177_v6 = vld [vmem:[#allocation158_spill] sm:$0xff]  ;;  %v11178_v28 = vld [vmem:[#allocation159_spill] sm:$0xff] }
 0x290   :  { %v7632_v19 = vpop.eup %7631  ;;  %v1603_v2 = vadd.f32 1.0, %v7630_v20  ;;  %v11180_v20 = vld [vmem:[#allocation161_spill] sm:$0xff] }
 0x291   :  { %7637 = vrcp.f32 %v1620_v21  ;;  %v7634_v62 = vpop.eup %7633  ;;  %v11179_v21 = vld [vmem:[#allocation160_spill] sm:$0xff] }
 0x292   :  { %v1627_v25 = vadd.f32 1.0, %v7634_v62  ;;  %7639 = vtanh.f32 %v9238_v39  ;;  %v11182_v62 = vld [vmem:[#allocation163_spill] sm:$0xff] }
 0x293   :  { %7641 = vrcp.f32 %v1603_v2  ;;  %v11184_v2 = vld [vmem:[#allocation165_spill] sm:$0xff] }
 0x294   :  { %7643 = vrcp.f32 %v1627_v25  ;;  %v11187_v25 = vld [vmem:[#allocation168_spill] sm:$0xff] }
 0x29c   :  { %v7636_v38 = vpop.eup %7635 }
 0x29d   :  { %v1631_v8 = vmul.f32 %v7636_v38, %v7632_v19  ;;  %v11181_v19 = vld [vmem:[#allocation162_spill] sm:$0xff]  ;;  %v11183_v38 = vld [vmem:[#allocation164_spill] sm:$0xff] }
 0x29e   :  { %v7638_v18 = vpop.eup %7637 }
 0x29f   :  { %v1630_v57 = vmul.f32 %v7638_v18, %v8959_v7  ;;  %v7640_v22 = vpop.eup %7639  ;;  %v11186_v18 = vld [vmem:[#allocation167_spill] sm:$0xff] }
 0x2a0   :  { %v7642_v41 = vpop.eup %7641 }
 0x2a1   :  { %v9246_v27 = vadd.f32 %v1631_v8, %v1630_v57  ;;  %v7644_v17 = vpop.eup %7643  ;;  %v9249_v23 = vmul.f32 %v7642_v41, %v7640_v22  ;;  %v11185_v8 = vld [vmem:[#allocation166_spill] sm:$0xff]  ;;  %v11188_v57 = vld [vmem:[#allocation169_spill] sm:$0xff]  ;;  %v11190_v41 = vld [vmem:[#allocation171_spill] sm:$0xff] }
 0x2a2   :  { %v11189_v22 = vld [vmem:[#allocation170_spill] sm:$0xff] }
 0x2a3   :  { %7645 = vtanh.f32 %v9246_v27  ;;  %11171 = vst [vmem:[#allocation98_spill] sm:$0xff] %v9249_v23  ;;  %v9257_v7 = vpack.c.bf16 %v9249_v23, %v9249_v23  ;;  %v11195_v23 = vld [vmem:[#allocation176_spill] sm:$0xff] }
 0x2b0   :  { %v7646_v0 = vpop.eup %7645 }
 0x2b1   :  { %v9251_v45 = vmul.f32 %v7646_v0, %v7644_v17  ;;  %v11191_v17 = vld [vmem:[#allocation172_spill] sm:$0xff]  ;;  %v11192_v0 = vld [vmem:[#allocation173_spill] sm:$0xff] }
 0x2b3   :  { %11172 = vst [vmem:[#allocation113_spill] sm:$0xff] %v9251_v45  ;;  %v1638_v54 = vpack.c.bf16 %v9251_v45, %v9251_v45  ;;  %v11194_v45 = vld [vmem:[#allocation175_spill] sm:$0xff] }
 0x2b5   :  { %1671 = vmatprep.mubr.bf16.mxu0 %v1638_v54  ;;  %1712 = vmatprep.mubr.bf16.mxu1 %v1638_v54 }
 0x2b6   :  { %1672 = vmatmul.mubr.bf16.vlgmr.msra.gmra.mxu0 %v9257_v7  ;;  %1713 = vmatmul.mubr.bf16.vlgmr.msra.gmra.mxu1 %v9257_v7 }
 0x2b7   :  { %1722 = vmatpush1.bf16.msra.mxu0 %v8739_v15  ;;  %1763 = vmatpush1.bf16.msra.mxu1 %v11173_v37 }
 0x2b8   :  { %1753 = vmatprep.mubr.bf16.mxu0 %v1638_v54  ;;  %1794 = vmatprep.mubr.bf16.mxu1 %v1638_v54  ;;  %v11193_v54 = vld [vmem:[#allocation174_spill] sm:$0xff] }
 0x2b9   :  { %1723 = vmatprep.subr.bf16.mxu0 %v11174_v29  ;;  %1764 = vmatprep.subr.bf16.mxu1 %v11175_v53 }
 0x2bb   :  { %1724 = vmatpush1.bf16.msra.mxu0 %v11176_v63  ;;  %1765 = vmatpush1.bf16.msra.mxu1 %v11177_v6 }
 0x2bc   :  { %1725 = vmatprep.subr.bf16.mxu0 %v11178_v28  ;;  %1766 = vmatprep.subr.bf16.mxu1 %v11179_v21 }
 0x2bf   :  { %1726 = vmatpush1.bf16.msra.mxu0 %v11180_v20  ;;  %1767 = vmatpush1.bf16.msra.mxu1 %v11181_v19 }
 0x2c0   :  { %1727 = vmatprep.subr.bf16.mxu0 %v11182_v62  ;;  %1768 = vmatprep.subr.bf16.mxu1 %v11183_v38 }
 0x2c3   :  { %1728 = vmatpush1.bf16.msra.mxu0 %v11184_v2  ;;  %1769 = vmatpush1.bf16.msra.mxu1 %v11185_v8 }
 0x2c4   :  { %1729 = vmatprep.subr.bf16.mxu0 %v11186_v18  ;;  %1770 = vmatprep.subr.bf16.mxu1 %v11187_v25  ;;  %v11197_v18 = vld [vmem:[#allocation178_spill] sm:$0xff]  ;;  %v11198_v25 = vld [vmem:[#allocation179_spill] sm:$0xff] }
 0x2c7   :  { %1730 = vmatpush1.bf16.msra.mxu0 %v11188_v57  ;;  %1771 = vmatpush1.bf16.msra.mxu1 %v11189_v22  ;;  %v11199_v57 = vld [vmem:[#allocation180_spill] sm:$0xff]  ;;  %v11200_v22 = vld [vmem:[#allocation181_spill] sm:$0xff] }
 0x2c8   :  { %1731 = vmatprep.subr.bf16.mxu0 %v11190_v41  ;;  %1772 = vmatprep.subr.bf16.mxu1 %v11191_v17  ;;  %v11201_v41 = vld [vmem:[#allocation182_spill] sm:$0xff]  ;;  %v11202_v17 = vld [vmem:[#allocation183_spill] sm:$0xff] }
 0x2cb   :  { %1732 = vmatpush1.bf16.msra.mxu0 %v11192_v0  ;;  %1773 = vmatpush1.bf16.msra.mxu1 %v11193_v54  ;;  %v11203_v0 = vld [vmem:[#allocation184_spill] sm:$0xff]  ;;  %v11204_v54 = vld [vmem:[#allocation185_spill] sm:$0xff] }
 0x2cc   :  { %1733 = vmatprep.subr.bf16.mxu0 %v11194_v45  ;;  %1774 = vmatprep.subr.bf16.mxu1 %v11195_v23  ;;  %v11205_v45 = vld [vmem:[#allocation186_spill] sm:$0xff]  ;;  %v11206_v23 = vld [vmem:[#allocation187_spill] sm:$0xff] }
 0x2cf   :  { %1734 = vmatpush1.bf16.msra.mxu0 %v11196_v16  ;;  %1775 = vmatpush1.bf16.msra.mxu1 %v11197_v18  ;;  %v11207_v16 = vld [vmem:[#allocation188_spill] sm:$0xff]  ;;  %v11208_v18 = vld [vmem:[#allocation189_spill] sm:$0xff] }
 0x2d0   :  { %1735 = vmatprep.subr.bf16.mxu0 %v11198_v25  ;;  %1776 = vmatprep.subr.bf16.mxu1 %v11199_v57  ;;  %v11209_v25 = vld [vmem:[#allocation190_spill] sm:$0xff]  ;;  %v11210_v57 = vld [vmem:[#allocation191_spill] sm:$0xff] }
 0x2d3   :  { %1736 = vmatpush1.bf16.msra.mxu0 %v11200_v22  ;;  %1777 = vmatpush1.bf16.msra.mxu1 %v11201_v41  ;;  %v11211_v22 = vld [vmem:[#allocation192_spill] sm:$0xff]  ;;  %v11212_v41 = vld [vmem:[#allocation193_spill] sm:$0xff] }
 0x2d4   :  { %1737 = vmatprep.subr.bf16.mxu0 %v11202_v17  ;;  %1778 = vmatprep.subr.bf16.mxu1 %v11203_v0  ;;  %v11213_v17 = vld [vmem:[#allocation194_spill] sm:$0xff]  ;;  %v11214_v0 = vld [vmem:[#allocation195_spill] sm:$0xff] }
 0x2d7   :  { %1738 = vmatpush2.bf16.msra.mxu0 %v11204_v54  ;;  %1779 = vmatpush2.bf16.msra.mxu1 %v11205_v45  ;;  %v11215_v54 = vld [vmem:[#allocation196_spill] sm:$0xff]  ;;  %v11216_v45 = vld [vmem:[#allocation197_spill] sm:$0xff] }
 0x2d8   :  { %1739 = vmatprep.subr.bf16.mxu0 %v11206_v23  ;;  %1780 = vmatprep.subr.bf16.mxu1 %v11207_v16  ;;  %v11217_v23 = vld [vmem:[#allocation198_spill] sm:$0xff]  ;;  %v11218_v16 = vld [vmem:[#allocation199_spill] sm:$0xff] }
 0x2db   :  { %1740 = vmatpush2.bf16.msra.mxu0 %v11208_v18  ;;  %1781 = vmatpush2.bf16.msra.mxu1 %v11209_v25  ;;  %v11219_v18 = vld [vmem:[#allocation200_spill] sm:$0xff] }
 0x2dc   :  { %1741 = vmatprep.subr.bf16.mxu0 %v11210_v57  ;;  %1782 = vmatprep.subr.bf16.mxu1 %v11211_v22 }
 0x2df   :  { %1742 = vmatpush2.bf16.msra.mxu0 %v11212_v41  ;;  %1783 = vmatpush2.bf16.msra.mxu1 %v11213_v17  ;;  %v11220_v41 = vld [vmem:[#allocation204_spill] sm:$0xff]  ;;  %v11221_v17 = vld [vmem:[#allocation205_spill] sm:$0xff] }
 0x2e0   :  { %1743 = vmatprep.subr.bf16.mxu0 %v11214_v0  ;;  %1784 = vmatprep.subr.bf16.mxu1 %v11215_v54 }
 0x2e3   :  { %1744 = vmatpush2.bf16.msra.mxu0 %v11216_v45  ;;  %1785 = vmatpush2.bf16.msra.mxu1 %v11217_v23 }
 0x2e4   :  { %1745 = vmatprep.subr.bf16.mxu0 %v11218_v16  ;;  %1786 = vmatprep.subr.bf16.mxu1 %v11219_v18 }
 0x2e7   :  { %1746 = vmatpush2.bf16.msra.mxu0 %v9119_v47  ;;  %1787 = vmatpush2.bf16.msra.mxu1 %v9121_v30 }
 0x2e8   :  { %1747 = vmatprep.subr.bf16.mxu0 %v9125_v49  ;;  %1788 = vmatprep.subr.bf16.mxu1 %v11220_v41 }
 0x2eb   :  { %1748 = vmatpush2.bf16.msra.mxu0 %v11221_v17  ;;  %1789 = vmatpush2.bf16.msra.mxu1 %v9133_v26 }
 0x2ec   :  { %1749 = vmatprep.subr.bf16.mxu0 %v9137_v14  ;;  %1790 = vmatprep.subr.bf16.mxu1 %v9139_v61 }
 0x2ef   :  { %1750 = vmatpush2.bf16.msra.mxu0 %v9143_v55  ;;  %1791 = vmatpush2.bf16.msra.mxu1 %v9145_v24 }
 0x2f0   :  { %1751 = vmatprep.subr.bf16.mxu0 %v9149_v46  ;;  %1792 = vmatprep.subr.bf16.mxu1 %v9151_v31 }
 0x2f3   :  { %1752 = vmatpush2.bf16.msra.mxu0 %v9155_v10  ;;  %1793 = vmatpush2.bf16.msra.mxu1 %v9157_v33 }
 0x2f4   :  { %1871 = vmatprep.subr.bf16.mxu0 %v8541_v32  ;;  %1912 = vmatprep.subr.bf16.mxu1 %v8543_v34 }
 0x2f6   :  { %1754 = vmatmul.mubr.bf16.vlgmr.msra.gmra.mxu0 %v9257_v7  ;;  %1795 = vmatmul.mubr.bf16.vlgmr.msra.gmra.mxu1 %v9257_v7  ;;  %v11222_v7 = vld [vmem:[#allocation47_spill] sm:$0xff] }
 0x2f7   :  { %1872 = vmatpush1.bf16.msra.mxu0 %v8545_v35  ;;  %1913 = vmatpush1.bf16.msra.mxu1 %v8547_v36 }
 0x2f8   :  { %1873 = vmatprep.subr.bf16.mxu0 %v8553_v40  ;;  %1914 = vmatprep.subr.bf16.mxu1 %v8555_v42 }
 0x2fb   :  { %1874 = vmatpush1.bf16.msra.mxu0 %v8557_v43  ;;  %1915 = vmatpush1.bf16.msra.mxu1 %v8559_v44 }
 0x2fc   :  { %1875 = vmatprep.subr.bf16.mxu0 %v8565_v48  ;;  %1916 = vmatprep.subr.bf16.mxu1 %v8567_v50 }
 0x2ff   :  { %1876 = vmatpush1.bf16.msra.mxu0 %v8569_v51  ;;  %1917 = vmatpush1.bf16.msra.mxu1 %v8571_v52 }
 0x300   :  { %1877 = vmatprep.subr.bf16.mxu0 %v8577_v56  ;;  %1918 = vmatprep.subr.bf16.mxu1 %v8579_v58  ;;  %v11264_v58 = vld [vmem:[#allocation100_spill] sm:$0xff]  ;;  %v11265_v56 = vld [vmem:[#allocation117_spill] sm:$0xff] }
 0x303   :  { %1878 = vmatpush1.bf16.msra.mxu0 %v8581_v59  ;;  %1919 = vmatpush1.bf16.msra.mxu1 %v8583_v60  ;;  %v11223_v59 = vld [vmem:[#allocation48_spill] sm:$0xff]  ;;  %v11224_v60 = vld [vmem:[#allocation49_spill] sm:$0xff] }
 0x304   :  { %1879 = vmatprep.subr.bf16.mxu0 %v8589_v1  ;;  %1920 = vmatprep.subr.bf16.mxu1 %v8591_v3  ;;  %v11225_v1 = vld [vmem:[#allocation50_spill] sm:$0xff]  ;;  %v11226_v3 = vld [vmem:[#allocation51_spill] sm:$0xff] }
 0x307   :  { %1880 = vmatpush1.bf16.msra.mxu0 %v8593_v4  ;;  %1921 = vmatpush1.bf16.msra.mxu1 %v8595_v5  ;;  %v11227_v4 = vld [vmem:[#allocation52_spill] sm:$0xff]  ;;  %v11228_v5 = vld [vmem:[#allocation53_spill] sm:$0xff] }
 0x308   :  { %1881 = vmatprep.subr.bf16.mxu0 %v8601_v9  ;;  %1922 = vmatprep.subr.bf16.mxu1 %v8603_v11  ;;  %v11229_v9 = vld [vmem:[#allocation54_spill] sm:$0xff]  ;;  %v11230_v11 = vld [vmem:[#allocation55_spill] sm:$0xff] }
 0x30b   :  { %1882 = vmatpush1.bf16.msra.mxu0 %v8605_v12  ;;  %1923 = vmatpush1.bf16.msra.mxu1 %v8607_v13  ;;  %v11231_v12 = vld [vmem:[#allocation56_spill] sm:$0xff]  ;;  %v11232_v13 = vld [vmem:[#allocation57_spill] sm:$0xff] }
 0x30c   :  { %1883 = vmatprep.subr.bf16.mxu0 %v11222_v7  ;;  %1924 = vmatprep.subr.bf16.mxu1 %v11223_v59  ;;  %v11233_v7 = vld [vmem:[#allocation58_spill] sm:$0xff]  ;;  %v11234_v59 = vld [vmem:[#allocation59_spill] sm:$0xff] }
 0x30f   :  { %1884 = vmatpush1.bf16.msra.mxu0 %v11224_v60  ;;  %1925 = vmatpush1.bf16.msra.mxu1 %v11225_v1  ;;  %v11235_v60 = vld [vmem:[#allocation60_spill] sm:$0xff]  ;;  %v11236_v1 = vld [vmem:[#allocation61_spill] sm:$0xff] }
 0x310   :  { %1885 = vmatprep.subr.bf16.mxu0 %v11226_v3  ;;  %1926 = vmatprep.subr.bf16.mxu1 %v11227_v4  ;;  %v11237_v3 = vld [vmem:[#allocation62_spill] sm:$0xff]  ;;  %v11238_v4 = vld [vmem:[#allocation63_spill] sm:$0xff] }
 0x313   :  { %1886 = vmatpush1.bf16.msra.mxu0 %v11228_v5  ;;  %1927 = vmatpush1.bf16.msra.mxu1 %v11229_v9  ;;  %v11239_v5 = vld [vmem:[#allocation64_spill] sm:$0xff]  ;;  %v11240_v9 = vld [vmem:[#allocation65_spill] sm:$0xff] }
 0x314   :  { %1887 = vmatprep.subr.bf16.mxu0 %v11230_v11  ;;  %1928 = vmatprep.subr.bf16.mxu1 %v11231_v12  ;;  %v11241_v11 = vld [vmem:[#allocation66_spill] sm:$0xff]  ;;  %v11242_v12 = vld [vmem:[#allocation67_spill] sm:$0xff] }
 0x317   :  { %1888 = vmatpush2.bf16.msra.mxu0 %v11232_v13  ;;  %1929 = vmatpush2.bf16.msra.mxu1 %v11233_v7  ;;  %v11243_v13 = vld [vmem:[#allocation68_spill] sm:$0xff]  ;;  %v11244_v7 = vld [vmem:[#allocation69_spill] sm:$0xff] }
 0x318   :  { %1889 = vmatprep.subr.bf16.mxu0 %v11234_v59  ;;  %1930 = vmatprep.subr.bf16.mxu1 %v11235_v60  ;;  %v11245_v59 = vld [vmem:[#allocation70_spill] sm:$0xff]  ;;  %v11246_v60 = vld [vmem:[#allocation71_spill] sm:$0xff] }
 0x31b   :  { %1890 = vmatpush2.bf16.msra.mxu0 %v11236_v1  ;;  %1931 = vmatpush2.bf16.msra.mxu1 %v11237_v3  ;;  %v11247_v1 = vld [vmem:[#allocation73_spill] sm:$0xff]  ;;  %v11248_v3 = vld [vmem:[#allocation72_spill] sm:$0xff] }
 0x31c   :  { %1891 = vmatprep.subr.bf16.mxu0 %v11238_v4  ;;  %1932 = vmatprep.subr.bf16.mxu1 %v11239_v5  ;;  %v11249_v4 = vld [vmem:[#allocation74_spill] sm:$0xff]  ;;  %v11250_v5 = vld [vmem:[#allocation75_spill] sm:$0xff] }
 0x31f   :  { %1892 = vmatpush2.bf16.msra.mxu0 %v11240_v9  ;;  %1933 = vmatpush2.bf16.msra.mxu1 %v11241_v11  ;;  %v11251_v9 = vld [vmem:[#allocation76_spill] sm:$0xff]  ;;  %v11252_v11 = vld [vmem:[#allocation77_spill] sm:$0xff] }
 0x320   :  { %1893 = vmatprep.subr.bf16.mxu0 %v11242_v12  ;;  %1934 = vmatprep.subr.bf16.mxu1 %v11243_v13  ;;  %v11253_v12 = vld [vmem:[#allocation78_spill] sm:$0xff]  ;;  %v11254_v13 = vld [vmem:[#allocation79_spill] sm:$0xff] }
 0x323   :  { %1894 = vmatpush2.bf16.msra.mxu0 %v11244_v7  ;;  %1935 = vmatpush2.bf16.msra.mxu1 %v11245_v59  ;;  %v11255_v7 = vld [vmem:[#allocation80_spill] sm:$0xff]  ;;  %v11256_v59 = vld [vmem:[#allocation81_spill] sm:$0xff] }
 0x324   :  { %1895 = vmatprep.subr.bf16.mxu0 %v11246_v60  ;;  %1936 = vmatprep.subr.bf16.mxu1 %v11247_v1  ;;  %v11257_v60 = vld [vmem:[#allocation82_spill] sm:$0xff]  ;;  %v11258_v1 = vld [vmem:[#allocation83_spill] sm:$0xff] }
 0x327   :  { %1896 = vmatpush2.bf16.msra.mxu0 %v11248_v3  ;;  %1937 = vmatpush2.bf16.msra.mxu1 %v11249_v4  ;;  %v11259_v3 = vld [vmem:[#allocation84_spill] sm:$0xff]  ;;  %v11260_v4 = vld [vmem:[#allocation85_spill] sm:$0xff] }
 0x328   :  { %1897 = vmatprep.subr.bf16.mxu0 %v11250_v5  ;;  %1938 = vmatprep.subr.bf16.mxu1 %v11251_v9  ;;  %v11261_v5 = vld [vmem:[#allocation86_spill] sm:$0xff]  ;;  %v11262_v9 = vld [vmem:[#allocation87_spill] sm:$0xff] }
 0x32b   :  { %1898 = vmatpush2.bf16.msra.mxu0 %v11252_v11  ;;  %1939 = vmatpush2.bf16.msra.mxu1 %v11253_v12  ;;  %v11263_v11 = vld [vmem:[#allocation88_spill] sm:$0xff] }
 0x32c   :  { %1899 = vmatprep.subr.bf16.mxu0 %v11254_v13  ;;  %1940 = vmatprep.subr.bf16.mxu1 %v11255_v7 }
 0x32f   :  { %1900 = vmatpush2.bf16.msra.mxu0 %v11256_v59  ;;  %1941 = vmatpush2.bf16.msra.mxu1 %v11257_v60 }
 0x330   :  { %1901 = vmatprep.subr.bf16.mxu0 %v11258_v1  ;;  %1942 = vmatprep.subr.bf16.mxu1 %v11259_v3  ;;  %v11266_v1 = vld [vmem:[#allocation102_spill] sm:$0xff]  ;;  %v11267_v3 = vld [vmem:[#allocation119_spill] sm:$0xff] }
 0x333   :  { %1902 = vmatpush2.bf16.msra.mxu0 %v11260_v4  ;;  %1943 = vmatpush2.bf16.msra.mxu1 %v11261_v5 }
 0x334   :  { %1953 = vmatprep.subr.bf16.mxu0 %v11262_v9  ;;  %1994 = vmatprep.subr.bf16.mxu1 %v11263_v11 }
 0x376   :  { %v1673_v12 = vpop.f32.mrf.mxu0  ;;  %v1714_v13 = vpop.f32.mrf.mxu1 }
 0x377   :  { %v1807_v7 = vadd.f32 %v1673_v12, %v11264_v58  ;;  %v1809_v59 = vadd.f32 %v1714_v13, %v11265_v56 }
 0x378   :  { %v1675_v52 = vpop.f32.mrf.mxu0  ;;  %v1716_v60 = vpop.f32.mrf.mxu1 }
 0x379   :  { %v6886_v51 = vmul.f32 -1.442695, %v1807_v7  ;;  %v1808_v50 = vadd.f32 %v1675_v52, %v11266_v1  ;;  %v1810_v48 = vadd.f32 %v1716_v60, %v11267_v3 }
 0x37a   :  { %v1677_v4 = vpop.f32.mrf.mxu0  ;;  %v1718_v44 = vpop.f32.mrf.mxu1 }
 0x37b   :  { %7647 = vpow2.f32 %v6886_v51  ;;  %v6887_v5 = vmul.f32 -1.442695, %v1808_v50  ;;  %v11268_v51 = vld [vmem:[#allocation130_spill] sm:$0xff] }
 0x37c   :  { %v1678_v9 = vpop.f32.mrf.mxu0  ;;  %v1719_v43 = vpop.f32.mrf.mxu1 }
 0x37d   :  { %7649 = vpow2.f32 %v6887_v5  ;;  %v11269_v9 = vld [vmem:[#allocation132_spill] sm:$0xff] }
 0x37e   :  { %7651 = vtanh.f32 %v1809_v59 }
 0x388   :  { %v7648_v11 = vpop.eup %7647 }
 0x389   :  { %v1822_v42 = vadd.f32 1.0, %v7648_v11 }
 0x38a   :  { %v7650_v40 = vpop.eup %7649 }
 0x38b   :  { %7653 = vrcp.f32 %v1822_v42  ;;  %v1828_v56 = vadd.f32 1.0, %v7650_v40  ;;  %v7652_v58 = vpop.eup %7651 }
 0x38d   :  { %7655 = vrcp.f32 %v1828_v56 }
 0x398   :  { %v7654_v12 = vpop.eup %7653 }
 0x399   :  { %v1839_v13 = vmul.f32 %v7654_v12, %v7652_v58  ;;  %v11270_v58 = vld [vmem:[#allocation151_spill] sm:$0xff]  ;;  %v6888_v12 = vmul.f32 -1.442695, %v1810_v48 }
 0x39a   :  { %v7656_v52 = vpop.eup %7655 }
 0x39b   :  { %v1838_v60 = vmul.f32 %v7656_v52, %v9238_v39 }
 0x39d   :  { %v9396_v1 = vadd.f32 %v1839_v13, %v1838_v60  ;;  %v11271_v13 = vld [vmem:[#allocation150_spill] sm:$0xff] }
 0x3b6   :  { %v1755_v44 = vpop.f32.mrf.mxu0  ;;  %v1796_v50 = vpop.f32.mrf.mxu1 }
 0x3b7   :  { %v1815_v43 = vadd.f32 %v1755_v44, %v11268_v51  ;;  %v1817_v52 = vadd.f32 %v1796_v50, %v11271_v13 }
 0x3b8   :  { %v1757_v3 = vpop.f32.mrf.mxu0  ;;  %v1798_v4 = vpop.f32.mrf.mxu1 }
 0x3b9   :  { %v6889_v5 = vmul.f32 -1.442695, %v1815_v43  ;;  %v1816_v59 = vadd.f32 %v1757_v3, %v11269_v9  ;;  %v1818_v39 = vadd.f32 %v1798_v4, %v11270_v58 }
 0x3ba   :  { %v1759_v42 = vpop.f32.mrf.mxu0  ;;  %v1800_v40 = vpop.f32.mrf.mxu1 }
 0x3bb   :  { %7657 = vpow2.f32 %v6889_v5  ;;  %v6890_v11 = vmul.f32 -1.442695, %v1816_v59  ;;  %v6891_v60 = vmul.f32 -1.442695, %v1818_v39 }
 0x3bc   :  { %v1760_v7 = vpop.f32.mrf.mxu0  ;;  %v1801_v56 = vpop.f32.mrf.mxu1 }
 0x3bd   :  { %7659 = vpow2.f32 %v6890_v11 }
 0x3be   :  { %7661 = vpow2.f32 %v6888_v12 }
 0x3bf   :  { %7663 = vtanh.f32 %v1817_v52  ;;  %v11274_v52 = vld [vmem:[#allocation167_spill] sm:$0xff] }
 0x3c0   :  { %7665 = vpow2.f32 %v6891_v60  ;;  %v11275_v60 = vld [vmem:[#allocation168_spill] sm:$0xff] }
 0x3c8   :  { %v7658_v36 = vpop.eup %7657 }
 0x3c9   :  { %v1846_v44 = vadd.f32 1.0, %v7658_v36 }
 0x3ca   :  { %v7660_v51 = vpop.eup %7659 }
 0x3cb   :  { %7667 = vrcp.f32 %v1846_v44  ;;  %v1852_v43 = vadd.f32 1.0, %v7660_v51  ;;  %v7662_v3 = vpop.eup %7661  ;;  %v11276_v44 = vld [vmem:[#allocation169_spill] sm:$0xff]  ;;  %v11277_v51 = vld [vmem:[#allocation170_spill] sm:$0xff] }
 0x3cc   :  { %v7664_v5 = vpop.eup %7663  ;;  %v1835_v42 = vadd.f32 1.0, %v7662_v3  ;;  %v11279_v3 = vld [vmem:[#allocation172_spill] sm:$0xff] }
 0x3cd   :  { %7669 = vrcp.f32 %v1852_v43  ;;  %v7666_v9 = vpop.eup %7665  ;;  %v11278_v43 = vld [vmem:[#allocation171_spill] sm:$0xff] }
 0x3ce   :  { %v1859_v48 = vadd.f32 1.0, %v7666_v9  ;;  %7671 = vtanh.f32 %v9396_v1  ;;  %v11281_v9 = vld [vmem:[#allocation174_spill] sm:$0xff] }
 0x3cf   :  { %7673 = vrcp.f32 %v1835_v42  ;;  %v11283_v42 = vld [vmem:[#allocation176_spill] sm:$0xff] }
 0x3d0   :  { %7675 = vrcp.f32 %v1859_v48  ;;  %v11286_v48 = vld [vmem:[#allocation179_spill] sm:$0xff] }
 0x3d8   :  { %v7668_v59 = vpop.eup %7667 }
 0x3d9   :  { %v1863_v40 = vmul.f32 %v7668_v59, %v7664_v5  ;;  %v11280_v5 = vld [vmem:[#allocation173_spill] sm:$0xff]  ;;  %v11282_v59 = vld [vmem:[#allocation175_spill] sm:$0xff] }
 0x3da   :  { %v7670_v4 = vpop.eup %7669 }
 0x3db   :  { %v1862_v50 = vmul.f32 %v7670_v4, %v9246_v27  ;;  %v7672_v11 = vpop.eup %7671  ;;  %v11285_v4 = vld [vmem:[#allocation178_spill] sm:$0xff] }
 0x3dc   :  { %v7674_v7 = vpop.eup %7673 }
 0x3dd   :  { %v9404_v36 = vadd.f32 %v1863_v40, %v1862_v50  ;;  %v7676_v56 = vpop.eup %7675  ;;  %v9407_v39 = vmul.f32 %v7674_v7, %v7672_v11  ;;  %v11284_v40 = vld [vmem:[#allocation177_spill] sm:$0xff]  ;;  %v11287_v50 = vld [vmem:[#allocation180_spill] sm:$0xff]  ;;  %v11289_v7 = vld [vmem:[#allocation182_spill] sm:$0xff] }
 0x3de   :  { %v11288_v11 = vld [vmem:[#allocation181_spill] sm:$0xff] }
 0x3df   :  { %7677 = vtanh.f32 %v9404_v36  ;;  %11272 = vst [vmem:[#allocation96_spill] sm:$0xff] %v9407_v39  ;;  %v9415_v27 = vpack.c.bf16 %v9407_v39, %v9407_v39  ;;  %v11294_v39 = vld [vmem:[#allocation187_spill] sm:$0xff] }
 0x3ec   :  { %v7678_v58 = vpop.eup %7677 }
 0x3ed   :  { %v9409_v12 = vmul.f32 %v7678_v58, %v7676_v56  ;;  %v11290_v56 = vld [vmem:[#allocation183_spill] sm:$0xff]  ;;  %v11291_v58 = vld [vmem:[#allocation184_spill] sm:$0xff] }
 0x3ef   :  { %11273 = vst [vmem:[#allocation112_spill] sm:$0xff] %v9409_v12  ;;  %v1870_v13 = vpack.c.bf16 %v9409_v12, %v9409_v12  ;;  %v11293_v12 = vld [vmem:[#allocation186_spill] sm:$0xff] }
 0x3f1   :  { %1903 = vmatprep.mubr.bf16.mxu0 %v1870_v13  ;;  %1944 = vmatprep.mubr.bf16.mxu1 %v1870_v13 }
 0x3f2   :  { %1904 = vmatmul.mubr.bf16.vlgmr.msra.gmra.mxu0 %v9415_v27  ;;  %1945 = vmatmul.mubr.bf16.vlgmr.msra.gmra.mxu1 %v9415_v27 }
 0x3f3   :  { %1954 = vmatpush1.bf16.msra.mxu0 %v8739_v15  ;;  %1995 = vmatpush1.bf16.msra.mxu1 %v11173_v37 }
 0x3f4   :  { %1985 = vmatprep.mubr.bf16.mxu0 %v1870_v13  ;;  %2026 = vmatprep.mubr.bf16.mxu1 %v1870_v13  ;;  %v11292_v13 = vld [vmem:[#allocation185_spill] sm:$0xff] }
 0x3f5   :  { %1955 = vmatprep.subr.bf16.mxu0 %v11174_v29  ;;  %1996 = vmatprep.subr.bf16.mxu1 %v11175_v53 }
 0x3f7   :  { %1956 = vmatpush1.bf16.msra.mxu0 %v11176_v63  ;;  %1997 = vmatpush1.bf16.msra.mxu1 %v11177_v6 }
 0x3f8   :  { %1957 = vmatprep.subr.bf16.mxu0 %v11178_v28  ;;  %1998 = vmatprep.subr.bf16.mxu1 %v11179_v21 }
 0x3fb   :  { %1958 = vmatpush1.bf16.msra.mxu0 %v11180_v20  ;;  %1999 = vmatpush1.bf16.msra.mxu1 %v11181_v19 }
 0x3fc   :  { %1959 = vmatprep.subr.bf16.mxu0 %v11182_v62  ;;  %2000 = vmatprep.subr.bf16.mxu1 %v11183_v38 }
 0x3ff   :  { %1960 = vmatpush1.bf16.msra.mxu0 %v11184_v2  ;;  %2001 = vmatpush1.bf16.msra.mxu1 %v11185_v8 }
 0x400   :  { %1961 = vmatprep.subr.bf16.mxu0 %v11274_v52  ;;  %2002 = vmatprep.subr.bf16.mxu1 %v11275_v60 }
 0x403   :  { %1962 = vmatpush1.bf16.msra.mxu0 %v11276_v44  ;;  %2003 = vmatpush1.bf16.msra.mxu1 %v11277_v51 }
 0x404   :  { %1963 = vmatprep.subr.bf16.mxu0 %v11278_v43  ;;  %2004 = vmatprep.subr.bf16.mxu1 %v11279_v3 }
 0x407   :  { %1964 = vmatpush1.bf16.msra.mxu0 %v11280_v5  ;;  %2005 = vmatpush1.bf16.msra.mxu1 %v11281_v9 }
 0x408   :  { %1965 = vmatprep.subr.bf16.mxu0 %v11282_v59  ;;  %2006 = vmatprep.subr.bf16.mxu1 %v11283_v42 }
 0x40b   :  { %1966 = vmatpush1.bf16.msra.mxu0 %v11284_v40  ;;  %2007 = vmatpush1.bf16.msra.mxu1 %v11285_v4  ;;  %v11295_v40 = vld [vmem:[#allocation188_spill] sm:$0xff]  ;;  %v11296_v4 = vld [vmem:[#allocation189_spill] sm:$0xff] }
 0x40c   :  { %1967 = vmatprep.subr.bf16.mxu0 %v11286_v48  ;;  %2008 = vmatprep.subr.bf16.mxu1 %v11287_v50 }
 0x40f   :  { %1968 = vmatpush1.bf16.msra.mxu0 %v11288_v11  ;;  %2009 = vmatpush1.bf16.msra.mxu1 %v11289_v7  ;;  %v11297_v7 = vld [vmem:[#allocation193_spill] sm:$0xff] }
 0x410   :  { %1969 = vmatprep.subr.bf16.mxu0 %v11290_v56  ;;  %2010 = vmatprep.subr.bf16.mxu1 %v11291_v58  ;;  %v11298_v56 = vld [vmem:[#allocation194_spill] sm:$0xff] }
 0x413   :  { %1970 = vmatpush2.bf16.msra.mxu0 %v11292_v13  ;;  %2011 = vmatpush2.bf16.msra.mxu1 %v11293_v12 }
 0x414   :  { %1971 = vmatprep.subr.bf16.mxu0 %v11294_v39  ;;  %2012 = vmatprep.subr.bf16.mxu1 %v11295_v40 }
 0x417   :  { %1972 = vmatpush2.bf16.msra.mxu0 %v11296_v4  ;;  %2013 = vmatpush2.bf16.msra.mxu1 %v11209_v25 }
 0x418   :  { %1973 = vmatprep.subr.bf16.mxu0 %v11210_v57  ;;  %2014 = vmatprep.subr.bf16.mxu1 %v11211_v22 }
 0x41b   :  { %1974 = vmatpush2.bf16.msra.mxu0 %v11297_v7  ;;  %2015 = vmatpush2.bf16.msra.mxu1 %v11298_v56 }
 0x41c   :  { %1975 = vmatprep.subr.bf16.mxu0 %v11214_v0  ;;  %2016 = vmatprep.subr.bf16.mxu1 %v11215_v54 }
 0x41f   :  { %1976 = vmatpush2.bf16.msra.mxu0 %v11216_v45  ;;  %2017 = vmatpush2.bf16.msra.mxu1 %v11217_v23 }
 0x420   :  { %1977 = vmatprep.subr.bf16.mxu0 %v11218_v16  ;;  %2018 = vmatprep.subr.bf16.mxu1 %v11219_v18 }
 0x423   :  { %1978 = vmatpush2.bf16.msra.mxu0 %v9119_v47  ;;  %2019 = vmatpush2.bf16.msra.mxu1 %v9121_v30 }
 0x424   :  { %1979 = vmatprep.subr.bf16.mxu0 %v9125_v49  ;;  %2020 = vmatprep.subr.bf16.mxu1 %v11220_v41  ;;  %v11366_v41 = vld [vmem:[#allocation104_spill] sm:$0xff]  ;;  %v11367_v49 = vld [vmem:[#allocation121_spill] sm:$0xff] }
 0x427   :  { %1980 = vmatpush2.bf16.msra.mxu0 %v11221_v17  ;;  %2021 = vmatpush2.bf16.msra.mxu1 %v9133_v26  ;;  %v11365_v17 = vld [vmem:[#allocation123_spill] sm:$0xff] }
 0x428   :  { %1981 = vmatprep.subr.bf16.mxu0 %v9137_v14  ;;  %2022 = vmatprep.subr.bf16.mxu1 %v9139_v61  ;;  %v11307_v61 = vld [vmem:[#allocation34_spill] sm:$0xff]  ;;  %v11362_v14 = vld [vmem:[#allocation92_spill] sm:$0xff] }
 0x42b   :  { %1982 = vmatpush2.bf16.msra.mxu0 %v9143_v55  ;;  %2023 = vmatpush2.bf16.msra.mxu1 %v9145_v24  ;;  %v11299_v55 = vld [vmem:[#allocation26_spill] sm:$0xff]  ;;  %v11300_v24 = vld [vmem:[#allocation27_spill] sm:$0xff] }
 0x42c   :  { %1983 = vmatprep.subr.bf16.mxu0 %v9149_v46  ;;  %2024 = vmatprep.subr.bf16.mxu1 %v9151_v31  ;;  %v11301_v46 = vld [vmem:[#allocation28_spill] sm:$0xff]  ;;  %v11302_v31 = vld [vmem:[#allocation29_spill] sm:$0xff] }
 0x42f   :  { %1984 = vmatpush2.bf16.msra.mxu0 %v9155_v10  ;;  %2025 = vmatpush2.bf16.msra.mxu1 %v9157_v33  ;;  %v11303_v10 = vld [vmem:[#allocation30_spill] sm:$0xff]  ;;  %v11304_v33 = vld [vmem:[#allocation31_spill] sm:$0xff] }
 0x430   :  { %2103 = vmatprep.subr.bf16.mxu0 %v8541_v32  ;;  %2144 = vmatprep.subr.bf16.mxu1 %v8543_v34  ;;  %v11305_v32 = vld [vmem:[#allocation32_spill] sm:$0xff]  ;;  %v11306_v34 = vld [vmem:[#allocation33_spill] sm:$0xff] }
 0x432   :  { %1986 = vmatmul.mubr.bf16.vlgmr.msra.gmra.mxu0 %v9415_v27  ;;  %2027 = vmatmul.mubr.bf16.vlgmr.msra.gmra.mxu1 %v9415_v27  ;;  %v11308_v27 = vld [vmem:[#allocation35_spill] sm:$0xff] }
 0x433   :  { %2104 = vmatpush1.bf16.msra.mxu0 %v8545_v35  ;;  %2145 = vmatpush1.bf16.msra.mxu1 %v11299_v55  ;;  %v11309_v35 = vld [vmem:[#allocation36_spill] sm:$0xff]  ;;  %v11310_v55 = vld [vmem:[#allocation37_spill] sm:$0xff] }
 0x434   :  { %2105 = vmatprep.subr.bf16.mxu0 %v11300_v24  ;;  %2146 = vmatprep.subr.bf16.mxu1 %v11301_v46  ;;  %v11311_v24 = vld [vmem:[#allocation38_spill] sm:$0xff]  ;;  %v11312_v46 = vld [vmem:[#allocation39_spill] sm:$0xff] }
 0x437   :  { %2106 = vmatpush1.bf16.msra.mxu0 %v11302_v31  ;;  %2147 = vmatpush1.bf16.msra.mxu1 %v11303_v10  ;;  %v11313_v31 = vld [vmem:[#allocation40_spill] sm:$0xff]  ;;  %v11314_v10 = vld [vmem:[#allocation41_spill] sm:$0xff] }
 0x438   :  { %2107 = vmatprep.subr.bf16.mxu0 %v11304_v33  ;;  %2148 = vmatprep.subr.bf16.mxu1 %v11305_v32  ;;  %v11315_v33 = vld [vmem:[#allocation42_spill] sm:$0xff]  ;;  %v11316_v32 = vld [vmem:[#allocation43_spill] sm:$0xff] }
 0x43b   :  { %2108 = vmatpush1.bf16.msra.mxu0 %v11306_v34  ;;  %2149 = vmatpush1.bf16.msra.mxu1 %v11307_v61  ;;  %v11317_v34 = vld [vmem:[#allocation44_spill] sm:$0xff]  ;;  %v11318_v61 = vld [vmem:[#allocation45_spill] sm:$0xff] }
 0x43c   :  { %2109 = vmatprep.subr.bf16.mxu0 %v11308_v27  ;;  %2150 = vmatprep.subr.bf16.mxu1 %v11309_v35  ;;  %v11319_v27 = vld [vmem:[#allocation46_spill] sm:$0xff]  ;;  %v11320_v35 = vld [vmem:[#allocation47_spill] sm:$0xff] }
 0x43f   :  { %2110 = vmatpush1.bf16.msra.mxu0 %v11310_v55  ;;  %2151 = vmatpush1.bf16.msra.mxu1 %v11311_v24  ;;  %v11321_v55 = vld [vmem:[#allocation48_spill] sm:$0xff]  ;;  %v11322_v24 = vld [vmem:[#allocation49_spill] sm:$0xff] }
 0x440   :  { %2111 = vmatprep.subr.bf16.mxu0 %v11312_v46  ;;  %2152 = vmatprep.subr.bf16.mxu1 %v11313_v31  ;;  %v11323_v46 = vld [vmem:[#allocation50_spill] sm:$0xff]  ;;  %v11324_v31 = vld [vmem:[#allocation51_spill] sm:$0xff] }
 0x443   :  { %2112 = vmatpush1.bf16.msra.mxu0 %v11314_v10  ;;  %2153 = vmatpush1.bf16.msra.mxu1 %v11315_v33  ;;  %v11325_v10 = vld [vmem:[#allocation52_spill] sm:$0xff]  ;;  %v11326_v33 = vld [vmem:[#allocation53_spill] sm:$0xff] }
 0x444   :  { %2113 = vmatprep.subr.bf16.mxu0 %v11316_v32  ;;  %2154 = vmatprep.subr.bf16.mxu1 %v11317_v34  ;;  %v11327_v32 = vld [vmem:[#allocation54_spill] sm:$0xff]  ;;  %v11328_v34 = vld [vmem:[#allocation55_spill] sm:$0xff] }
 0x447   :  { %2114 = vmatpush1.bf16.msra.mxu0 %v11318_v61  ;;  %2155 = vmatpush1.bf16.msra.mxu1 %v11319_v27  ;;  %v11329_v61 = vld [vmem:[#allocation56_spill] sm:$0xff]  ;;  %v11330_v27 = vld [vmem:[#allocation57_spill] sm:$0xff] }
 0x448   :  { %2115 = vmatprep.subr.bf16.mxu0 %v11320_v35  ;;  %2156 = vmatprep.subr.bf16.mxu1 %v11321_v55  ;;  %v11331_v35 = vld [vmem:[#allocation58_spill] sm:$0xff]  ;;  %v11332_v55 = vld [vmem:[#allocation59_spill] sm:$0xff] }
 0x44b   :  { %2116 = vmatpush1.bf16.msra.mxu0 %v11322_v24  ;;  %2157 = vmatpush1.bf16.msra.mxu1 %v11323_v46  ;;  %v11333_v24 = vld [vmem:[#allocation60_spill] sm:$0xff]  ;;  %v11334_v46 = vld [vmem:[#allocation61_spill] sm:$0xff] }
 0x44c   :  { %2117 = vmatprep.subr.bf16.mxu0 %v11324_v31  ;;  %2158 = vmatprep.subr.bf16.mxu1 %v11325_v10  ;;  %v11335_v31 = vld [vmem:[#allocation62_spill] sm:$0xff]  ;;  %v11336_v10 = vld [vmem:[#allocation63_spill] sm:$0xff] }
 0x44f   :  { %2118 = vmatpush1.bf16.msra.mxu0 %v11326_v33  ;;  %2159 = vmatpush1.bf16.msra.mxu1 %v11327_v32  ;;  %v11337_v33 = vld [vmem:[#allocation64_spill] sm:$0xff]  ;;  %v11338_v32 = vld [vmem:[#allocation65_spill] sm:$0xff] }
 0x450   :  { %2119 = vmatprep.subr.bf16.mxu0 %v11328_v34  ;;  %2160 = vmatprep.subr.bf16.mxu1 %v11329_v61  ;;  %v11339_v34 = vld [vmem:[#allocation66_spill] sm:$0xff]  ;;  %v11340_v61 = vld [vmem:[#allocation67_spill] sm:$0xff] }
 0x453   :  { %2120 = vmatpush2.bf16.msra.mxu0 %v11330_v27  ;;  %2161 = vmatpush2.bf16.msra.mxu1 %v11331_v35  ;;  %v11341_v27 = vld [vmem:[#allocation68_spill] sm:$0xff]  ;;  %v11342_v35 = vld [vmem:[#allocation69_spill] sm:$0xff] }
 0x454   :  { %2121 = vmatprep.subr.bf16.mxu0 %v11332_v55  ;;  %2162 = vmatprep.subr.bf16.mxu1 %v11333_v24  ;;  %v11343_v55 = vld [vmem:[#allocation70_spill] sm:$0xff]  ;;  %v11344_v24 = vld [vmem:[#allocation71_spill] sm:$0xff] }
 0x457   :  { %2122 = vmatpush2.bf16.msra.mxu0 %v11334_v46  ;;  %2163 = vmatpush2.bf16.msra.mxu1 %v11335_v31  ;;  %v11345_v46 = vld [vmem:[#allocation73_spill] sm:$0xff]  ;;  %v11346_v31 = vld [vmem:[#allocation72_spill] sm:$0xff] }
 0x458   :  { %2123 = vmatprep.subr.bf16.mxu0 %v11336_v10  ;;  %2164 = vmatprep.subr.bf16.mxu1 %v11337_v33  ;;  %v11347_v10 = vld [vmem:[#allocation74_spill] sm:$0xff]  ;;  %v11348_v33 = vld [vmem:[#allocation75_spill] sm:$0xff] }
 0x45b   :  { %2124 = vmatpush2.bf16.msra.mxu0 %v11338_v32  ;;  %2165 = vmatpush2.bf16.msra.mxu1 %v11339_v34  ;;  %v11349_v32 = vld [vmem:[#allocation76_spill] sm:$0xff]  ;;  %v11350_v34 = vld [vmem:[#allocation77_spill] sm:$0xff] }
 0x45c   :  { %2125 = vmatprep.subr.bf16.mxu0 %v11340_v61  ;;  %2166 = vmatprep.subr.bf16.mxu1 %v11341_v27  ;;  %v11351_v61 = vld [vmem:[#allocation78_spill] sm:$0xff]  ;;  %v11352_v27 = vld [vmem:[#allocation79_spill] sm:$0xff] }
 0x45f   :  { %2126 = vmatpush2.bf16.msra.mxu0 %v11342_v35  ;;  %2167 = vmatpush2.bf16.msra.mxu1 %v11343_v55  ;;  %v11353_v35 = vld [vmem:[#allocation80_spill] sm:$0xff]  ;;  %v11354_v55 = vld [vmem:[#allocation81_spill] sm:$0xff] }
 0x460   :  { %2127 = vmatprep.subr.bf16.mxu0 %v11344_v24  ;;  %2168 = vmatprep.subr.bf16.mxu1 %v11345_v46  ;;  %v11355_v24 = vld [vmem:[#allocation82_spill] sm:$0xff]  ;;  %v11356_v46 = vld [vmem:[#allocation83_spill] sm:$0xff] }
 0x463   :  { %2128 = vmatpush2.bf16.msra.mxu0 %v11346_v31  ;;  %2169 = vmatpush2.bf16.msra.mxu1 %v11347_v10  ;;  %v11357_v31 = vld [vmem:[#allocation84_spill] sm:$0xff]  ;;  %v11358_v10 = vld [vmem:[#allocation85_spill] sm:$0xff] }
 0x464   :  { %2129 = vmatprep.subr.bf16.mxu0 %v11348_v33  ;;  %2170 = vmatprep.subr.bf16.mxu1 %v11349_v32  ;;  %v11359_v33 = vld [vmem:[#allocation86_spill] sm:$0xff]  ;;  %v11360_v32 = vld [vmem:[#allocation87_spill] sm:$0xff] }
 0x467   :  { %2130 = vmatpush2.bf16.msra.mxu0 %v11350_v34  ;;  %2171 = vmatpush2.bf16.msra.mxu1 %v11351_v61  ;;  %v11361_v34 = vld [vmem:[#allocation88_spill] sm:$0xff] }
 0x468   :  { %2131 = vmatprep.subr.bf16.mxu0 %v11352_v27  ;;  %2172 = vmatprep.subr.bf16.mxu1 %v11353_v35  ;;  %v11363_v35 = vld [vmem:[#allocation106_spill] sm:$0xff] }
 0x469   :  { %v274_v26 = vadd.f32 %v11363_v35, %v11362_v14 }
 0x46b   :  { %2132 = vmatpush2.bf16.msra.mxu0 %v11354_v55  ;;  %2173 = vmatpush2.bf16.msra.mxu1 %v11355_v24  ;;  %v11364_v55 = vld [vmem:[#allocation116_spill] sm:$0xff] }
 0x46c   :  { %2133 = vmatprep.subr.bf16.mxu0 %v11356_v46  ;;  %2174 = vmatprep.subr.bf16.mxu1 %v11357_v31  ;;  %v347_v24 = vadd.f32 %v11365_v17, %v11364_v55  ;;  %v11395_v55 = vld [vmem:[#allocation213_spill] sm:$0xff] }
 0x46f   :  { %2134 = vmatpush2.bf16.msra.mxu0 %v11358_v10  ;;  %2175 = vmatpush2.bf16.msra.mxu1 %v11359_v33 }
 0x470   :  { %2185 = vmatprep.subr.bf16.mxu0 %v11360_v32  ;;  %2226 = vmatprep.subr.bf16.mxu1 %v11361_v34 }
 0x4b2   :  { %v1905_v61 = vpop.f32.mrf.mxu0  ;;  %v1946_v27 = vpop.f32.mrf.mxu1 }
 0x4b3   :  { %v2039_v46 = vadd.f32 %v1905_v61, %v11366_v41  ;;  %v2041_v31 = vadd.f32 %v1946_v27, %v11367_v49 }
 0x4b4   :  { %v1907_v30 = vpop.f32.mrf.mxu0  ;;  %v1948_v10 = vpop.f32.mrf.mxu1 }
 0x4b5   :  { %v6892_v47 = vmul.f32 -1.442695, %v2039_v46  ;;  %v2040_v33 = vadd.f32 %v1907_v30, %v274_v26  ;;  %v2042_v18 = vadd.f32 %v1948_v10, %v347_v24  ;;  %v11368_v10 = vld [vmem:[#allocation126_spill] sm:$0xff] }
 0x4b6   :  { %v1909_v32 = vpop.f32.mrf.mxu0  ;;  %v1950_v16 = vpop.f32.mrf.mxu1 }
 0x4b7   :  { %7679 = vpow2.f32 %v6892_v47  ;;  %v6893_v34 = vmul.f32 -1.442695, %v2040_v33 }
 0x4b8   :  { %v1910_v23 = vpop.f32.mrf.mxu0  ;;  %v1951_v45 = vpop.f32.mrf.mxu1 }
 0x4b9   :  { %7681 = vpow2.f32 %v6893_v34  ;;  %v11369_v23 = vld [vmem:[#allocation128_spill] sm:$0xff] }
 0x4ba   :  { %7683 = vtanh.f32 %v2041_v31 }
 0x4c4   :  { %v7680_v35 = vpop.eup %7679 }
 0x4c5   :  { %v2054_v14 = vadd.f32 1.0, %v7680_v35 }
 0x4c6   :  { %v7682_v54 = vpop.eup %7681 }
 0x4c7   :  { %7685 = vrcp.f32 %v2054_v14  ;;  %v2060_v61 = vadd.f32 1.0, %v7682_v54  ;;  %v7684_v49 = vpop.eup %7683 }
 0x4c9   :  { %7687 = vrcp.f32 %v2060_v61  ;;  %v11370_v61 = vld [vmem:[#allocation149_spill] sm:$0xff] }
 0x4d4   :  { %v7686_v41 = vpop.eup %7685 }
 0x4d5   :  { %v2071_v17 = vmul.f32 %v7686_v41, %v7684_v49  ;;  %v6894_v49 = vmul.f32 -1.442695, %v2042_v18  ;;  %v11371_v41 = vld [vmem:[#allocation148_spill] sm:$0xff] }
 0x4d6   :  { %v7688_v46 = vpop.eup %7687 }
 0x4d7   :  { %v2070_v30 = vmul.f32 %v7688_v46, %v9396_v1 }
 0x4d9   :  { %v9556_v32 = vadd.f32 %v2071_v17, %v2070_v30 }
 0x4f2   :  { %v1987_v16 = vpop.f32.mrf.mxu0  ;;  %v2028_v47 = vpop.f32.mrf.mxu1 }
 0x4f3   :  { %v2047_v33 = vadd.f32 %v1987_v16, %v11368_v10  ;;  %v2049_v17 = vadd.f32 %v2028_v47, %v11371_v41 }
 0x4f4   :  { %v1989_v34 = vpop.f32.mrf.mxu0  ;;  %v2030_v26 = vpop.f32.mrf.mxu1 }
 0x4f5   :  { %v6895_v24 = vmul.f32 -1.442695, %v2047_v33  ;;  %v2048_v31 = vadd.f32 %v1989_v34, %v11369_v23  ;;  %v2050_v1 = vadd.f32 %v2030_v26, %v11370_v61 }
 0x4f6   :  { %v1991_v14 = vpop.f32.mrf.mxu0  ;;  %v2032_v45 = vpop.f32.mrf.mxu1 }
 0x4f7   :  { %7689 = vpow2.f32 %v6895_v24  ;;  %v6896_v54 = vmul.f32 -1.442695, %v2048_v31  ;;  %v6897_v46 = vmul.f32 -1.442695, %v2050_v1 }
 0x4f8   :  { %v1992_v27 = vpop.f32.mrf.mxu0  ;;  %v2033_v35 = vpop.f32.mrf.mxu1 }
 0x4f9   :  { %7691 = vpow2.f32 %v6896_v54 }
 0x4fa   :  { %7693 = vpow2.f32 %v6894_v49 }
 0x4fb   :  { %7695 = vtanh.f32 %v2049_v17 }
 0x4fc   :  { %7697 = vpow2.f32 %v6897_v46  ;;  %v11374_v46 = vld [vmem:[#allocation177_spill] sm:$0xff] }
 0x504   :  { %v7690_v30 = vpop.eup %7689 }
 0x505   :  { %v2078_v16 = vadd.f32 1.0, %v7690_v30  ;;  %v11375_v30 = vld [vmem:[#allocation178_spill] sm:$0xff] }
 0x506   :  { %v7692_v10 = vpop.eup %7691 }
 0x507   :  { %7699 = vrcp.f32 %v2078_v16  ;;  %v2084_v33 = vadd.f32 1.0, %v7692_v10  ;;  %v7694_v34 = vpop.eup %7693  ;;  %v11376_v16 = vld [vmem:[#allocation182_spill] sm:$0xff]  ;;  %v11377_v10 = vld [vmem:[#allocation183_spill] sm:$0xff] }
 0x508   :  { %v7696_v24 = vpop.eup %7695  ;;  %v2067_v14 = vadd.f32 1.0, %v7694_v34  ;;  %v11379_v34 = vld [vmem:[#allocation197_spill] sm:$0xff] }
 0x509   :  { %7701 = vrcp.f32 %v2084_v33  ;;  %v7698_v23 = vpop.eup %7697  ;;  %v11378_v33 = vld [vmem:[#allocation196_spill] sm:$0xff] }
 0x50a   :  { %v2091_v18 = vadd.f32 1.0, %v7698_v23  ;;  %7703 = vtanh.f32 %v9556_v32  ;;  %v11381_v23 = vld [vmem:[#allocation199_spill] sm:$0xff] }
 0x50b   :  { %7705 = vrcp.f32 %v2067_v14  ;;  %v11383_v14 = vld [vmem:[#allocation201_spill] sm:$0xff] }
 0x50c   :  { %7707 = vrcp.f32 %v2091_v18  ;;  %v11386_v18 = vld [vmem:[#allocation204_spill] sm:$0xff] }
 0x514   :  { %v7700_v31 = vpop.eup %7699 }
 0x515   :  { %v2095_v45 = vmul.f32 %v7700_v31, %v7696_v24  ;;  %v11380_v24 = vld [vmem:[#allocation198_spill] sm:$0xff]  ;;  %v11382_v31 = vld [vmem:[#allocation200_spill] sm:$0xff] }
 0x516   :  { %v7702_v26 = vpop.eup %7701 }
 0x517   :  { %v2094_v47 = vmul.f32 %v7702_v26, %v9404_v36  ;;  %v7704_v27 = vpop.eup %7703  ;;  %v11385_v26 = vld [vmem:[#allocation203_spill] sm:$0xff] }
 0x518   :  { %v7706_v35 = vpop.eup %7705 }
 0x519   :  { %v9564_v54 = vadd.f32 %v2095_v45, %v2094_v47  ;;  %v7708_v61 = vpop.eup %7707  ;;  %v9567_v49 = vmul.f32 %v7706_v35, %v7704_v27  ;;  %v11384_v45 = vld [vmem:[#allocation202_spill] sm:$0xff]  ;;  %v11387_v47 = vld [vmem:[#allocation205_spill] sm:$0xff]  ;;  %v11389_v35 = vld [vmem:[#allocation207_spill] sm:$0xff] }
 0x51a   :  { %v11388_v27 = vld [vmem:[#allocation206_spill] sm:$0xff] }
 0x51b   :  { %7709 = vtanh.f32 %v9564_v54  ;;  %11372 = vst [vmem:[#allocation134_spill] sm:$0xff] %v9567_v49  ;;  %v9575_v36 = vpack.c.bf16 %v9567_v49, %v9567_v49  ;;  %v11394_v49 = vld [vmem:[#allocation212_spill] sm:$0xff] }
 0x528   :  { %v7710_v1 = vpop.eup %7709 }
 0x529   :  { %v9569_v41 = vmul.f32 %v7710_v1, %v7708_v61  ;;  %v11390_v61 = vld [vmem:[#allocation208_spill] sm:$0xff]  ;;  %v11391_v1 = vld [vmem:[#allocation209_spill] sm:$0xff] }
 0x52b   :  { %11373 = vst [vmem:[#allocation136_spill] sm:$0xff] %v9569_v41  ;;  %v2102_v17 = vpack.c.bf16 %v9569_v41, %v9569_v41  ;;  %v11393_v41 = vld [vmem:[#allocation211_spill] sm:$0xff] }
 0x52d   :  { %2135 = vmatprep.mubr.bf16.mxu0 %v2102_v17  ;;  %2176 = vmatprep.mubr.bf16.mxu1 %v2102_v17 }
 0x52e   :  { %2136 = vmatmul.mubr.bf16.vlgmr.msra.gmra.mxu0 %v9575_v36  ;;  %2177 = vmatmul.mubr.bf16.vlgmr.msra.gmra.mxu1 %v9575_v36 }
 0x52f   :  { %2186 = vmatpush1.bf16.msra.mxu0 %v8739_v15  ;;  %2227 = vmatpush1.bf16.msra.mxu1 %v11173_v37 }
 0x530   :  { %2217 = vmatprep.mubr.bf16.mxu0 %v2102_v17  ;;  %2258 = vmatprep.mubr.bf16.mxu1 %v2102_v17  ;;  %v11392_v17 = vld [vmem:[#allocation210_spill] sm:$0xff] }
 0x531   :  { %2187 = vmatprep.subr.bf16.mxu0 %v11174_v29  ;;  %2228 = vmatprep.subr.bf16.mxu1 %v11175_v53 }
 0x533   :  { %2188 = vmatpush1.bf16.msra.mxu0 %v11176_v63  ;;  %2229 = vmatpush1.bf16.msra.mxu1 %v11177_v6 }
 0x534   :  { %2189 = vmatprep.subr.bf16.mxu0 %v11178_v28  ;;  %2230 = vmatprep.subr.bf16.mxu1 %v11179_v21 }
 0x537   :  { %2190 = vmatpush1.bf16.msra.mxu0 %v11180_v20  ;;  %2231 = vmatpush1.bf16.msra.mxu1 %v11181_v19 }
 0x538   :  { %2191 = vmatprep.subr.bf16.mxu0 %v11182_v62  ;;  %2232 = vmatprep.subr.bf16.mxu1 %v11183_v38 }
 0x53b   :  { %2192 = vmatpush1.bf16.msra.mxu0 %v11184_v2  ;;  %2233 = vmatpush1.bf16.msra.mxu1 %v11185_v8 }
 0x53c   :  { %2193 = vmatprep.subr.bf16.mxu0 %v11274_v52  ;;  %2234 = vmatprep.subr.bf16.mxu1 %v11275_v60 }
 0x53f   :  { %2194 = vmatpush1.bf16.msra.mxu0 %v11276_v44  ;;  %2235 = vmatpush1.bf16.msra.mxu1 %v11277_v51 }
 0x540   :  { %2195 = vmatprep.subr.bf16.mxu0 %v11278_v43  ;;  %2236 = vmatprep.subr.bf16.mxu1 %v11279_v3 }
 0x543   :  { %2196 = vmatpush1.bf16.msra.mxu0 %v11280_v5  ;;  %2237 = vmatpush1.bf16.msra.mxu1 %v11281_v9 }
 0x544   :  { %2197 = vmatprep.subr.bf16.mxu0 %v11282_v59  ;;  %2238 = vmatprep.subr.bf16.mxu1 %v11283_v42 }
 0x547   :  { %2198 = vmatpush1.bf16.msra.mxu0 %v11374_v46  ;;  %2239 = vmatpush1.bf16.msra.mxu1 %v11375_v30 }
 0x548   :  { %2199 = vmatprep.subr.bf16.mxu0 %v11286_v48  ;;  %2240 = vmatprep.subr.bf16.mxu1 %v11287_v50 }
 0x54b   :  { %2200 = vmatpush1.bf16.msra.mxu0 %v11288_v11  ;;  %2241 = vmatpush1.bf16.msra.mxu1 %v11376_v16 }
 0x54c   :  { %2201 = vmatprep.subr.bf16.mxu0 %v11377_v10  ;;  %2242 = vmatprep.subr.bf16.mxu1 %v11291_v58 }
 0x54f   :  { %2202 = vmatpush2.bf16.msra.mxu0 %v11292_v13  ;;  %2243 = vmatpush2.bf16.msra.mxu1 %v11293_v12 }
 0x550   :  { %2203 = vmatprep.subr.bf16.mxu0 %v11294_v39  ;;  %2244 = vmatprep.subr.bf16.mxu1 %v11295_v40 }
 0x553   :  { %2204 = vmatpush2.bf16.msra.mxu0 %v11296_v4  ;;  %2245 = vmatpush2.bf16.msra.mxu1 %v11209_v25 }
 0x554   :  { %2205 = vmatprep.subr.bf16.mxu0 %v11210_v57  ;;  %2246 = vmatprep.subr.bf16.mxu1 %v11211_v22  ;;  %v11472_v22 = vld [vmem:[#allocation146_spill] sm:$0xff] }
 0x557   :  { %2206 = vmatpush2.bf16.msra.mxu0 %v11297_v7  ;;  %2247 = vmatpush2.bf16.msra.mxu1 %v11298_v56 }
 0x558   :  { %2207 = vmatprep.subr.bf16.mxu0 %v11214_v0  ;;  %2248 = vmatprep.subr.bf16.mxu1 %v11378_v33 }
 0x55b   :  { %2208 = vmatpush2.bf16.msra.mxu0 %v11379_v34  ;;  %2249 = vmatpush2.bf16.msra.mxu1 %v11380_v24 }
 0x55c   :  { %2209 = vmatprep.subr.bf16.mxu0 %v11381_v23  ;;  %2250 = vmatprep.subr.bf16.mxu1 %v11382_v31 }
 0x55f   :  { %2210 = vmatpush2.bf16.msra.mxu0 %v11383_v14  ;;  %2251 = vmatpush2.bf16.msra.mxu1 %v11384_v45  ;;  %v11464_v45 = vld [vmem:[#allocation125_spill] sm:$0xff] }
 0x560   :  { %2211 = vmatprep.subr.bf16.mxu0 %v11385_v26  ;;  %2252 = vmatprep.subr.bf16.mxu1 %v11386_v18  ;;  %v11396_v26 = vld [vmem:[#allocation214_spill] sm:$0xff]  ;;  %v11397_v18 = vld [vmem:[#allocation23_spill] sm:$0xff] }
 0x563   :  { %2212 = vmatpush2.bf16.msra.mxu0 %v11387_v47  ;;  %2253 = vmatpush2.bf16.msra.mxu1 %v11388_v27  ;;  %v11398_v47 = vld [vmem:[#allocation24_spill] sm:$0xff]  ;;  %v11463_v27 = vld [vmem:[#allocation93_spill] sm:$0xff] }
 0x564   :  { %2213 = vmatprep.subr.bf16.mxu0 %v11389_v35  ;;  %2254 = vmatprep.subr.bf16.mxu1 %v11390_v61  ;;  %v11399_v61 = vld [vmem:[#allocation25_spill] sm:$0xff]  ;;  %v11408_v35 = vld [vmem:[#allocation34_spill] sm:$0xff] }
 0x567   :  { %2214 = vmatpush2.bf16.msra.mxu0 %v11391_v1  ;;  %2255 = vmatpush2.bf16.msra.mxu1 %v11392_v17  ;;  %v11400_v1 = vld [vmem:[#allocation26_spill] sm:$0xff]  ;;  %v11401_v17 = vld [vmem:[#allocation27_spill] sm:$0xff] }
 0x568   :  { %2215 = vmatprep.subr.bf16.mxu0 %v11393_v41  ;;  %2256 = vmatprep.subr.bf16.mxu1 %v11394_v49  ;;  %v11402_v41 = vld [vmem:[#allocation28_spill] sm:$0xff]  ;;  %v11403_v49 = vld [vmem:[#allocation29_spill] sm:$0xff] }
 0x56b   :  { %2216 = vmatpush2.bf16.msra.mxu0 %v11395_v55  ;;  %2257 = vmatpush2.bf16.msra.mxu1 %v11396_v26  ;;  %v11404_v55 = vld [vmem:[#allocation30_spill] sm:$0xff]  ;;  %v11405_v26 = vld [vmem:[#allocation31_spill] sm:$0xff] }
 0x56c   :  { %2335 = vmatprep.subr.bf16.mxu0 %v11397_v18  ;;  %2376 = vmatprep.subr.bf16.mxu1 %v11398_v47  ;;  %v11406_v18 = vld [vmem:[#allocation32_spill] sm:$0xff]  ;;  %v11407_v47 = vld [vmem:[#allocation33_spill] sm:$0xff] }
 0x56e   :  { %2218 = vmatmul.mubr.bf16.vlgmr.msra.gmra.mxu0 %v9575_v36  ;;  %2259 = vmatmul.mubr.bf16.vlgmr.msra.gmra.mxu1 %v9575_v36  ;;  %v11409_v36 = vld [vmem:[#allocation35_spill] sm:$0xff] }
 0x56f   :  { %2336 = vmatpush1.bf16.msra.mxu0 %v11399_v61  ;;  %2377 = vmatpush1.bf16.msra.mxu1 %v11400_v1  ;;  %v11410_v61 = vld [vmem:[#allocation36_spill] sm:$0xff]  ;;  %v11411_v1 = vld [vmem:[#allocation37_spill] sm:$0xff] }
 0x570   :  { %2337 = vmatprep.subr.bf16.mxu0 %v11401_v17  ;;  %2378 = vmatprep.subr.bf16.mxu1 %v11402_v41  ;;  %v11412_v17 = vld [vmem:[#allocation38_spill] sm:$0xff]  ;;  %v11413_v41 = vld [vmem:[#allocation39_spill] sm:$0xff] }
 0x573   :  { %2338 = vmatpush1.bf16.msra.mxu0 %v11403_v49  ;;  %2379 = vmatpush1.bf16.msra.mxu1 %v11404_v55  ;;  %v11414_v49 = vld [vmem:[#allocation40_spill] sm:$0xff]  ;;  %v11415_v55 = vld [vmem:[#allocation41_spill] sm:$0xff] }
 0x574   :  { %2339 = vmatprep.subr.bf16.mxu0 %v11405_v26  ;;  %2380 = vmatprep.subr.bf16.mxu1 %v11406_v18  ;;  %v11416_v26 = vld [vmem:[#allocation42_spill] sm:$0xff]  ;;  %v11417_v18 = vld [vmem:[#allocation43_spill] sm:$0xff] }
 0x577   :  { %2340 = vmatpush1.bf16.msra.mxu0 %v11407_v47  ;;  %2381 = vmatpush1.bf16.msra.mxu1 %v11408_v35  ;;  %v11418_v47 = vld [vmem:[#allocation44_spill] sm:$0xff]  ;;  %v11419_v35 = vld [vmem:[#allocation45_spill] sm:$0xff] }
 0x578   :  { %2341 = vmatprep.subr.bf16.mxu0 %v11409_v36  ;;  %2382 = vmatprep.subr.bf16.mxu1 %v11410_v61  ;;  %v11420_v36 = vld [vmem:[#allocation46_spill] sm:$0xff]  ;;  %v11421_v61 = vld [vmem:[#allocation47_spill] sm:$0xff] }
 0x57b   :  { %2342 = vmatpush1.bf16.msra.mxu0 %v11411_v1  ;;  %2383 = vmatpush1.bf16.msra.mxu1 %v11412_v17  ;;  %v11422_v1 = vld [vmem:[#allocation48_spill] sm:$0xff]  ;;  %v11423_v17 = vld [vmem:[#allocation49_spill] sm:$0xff] }
 0x57c   :  { %2343 = vmatprep.subr.bf16.mxu0 %v11413_v41  ;;  %2384 = vmatprep.subr.bf16.mxu1 %v11414_v49  ;;  %v11424_v41 = vld [vmem:[#allocation50_spill] sm:$0xff]  ;;  %v11425_v49 = vld [vmem:[#allocation51_spill] sm:$0xff] }
 0x57f   :  { %2344 = vmatpush1.bf16.msra.mxu0 %v11415_v55  ;;  %2385 = vmatpush1.bf16.msra.mxu1 %v11416_v26  ;;  %v11426_v55 = vld [vmem:[#allocation52_spill] sm:$0xff]  ;;  %v11427_v26 = vld [vmem:[#allocation53_spill] sm:$0xff] }
 0x580   :  { %2345 = vmatprep.subr.bf16.mxu0 %v11417_v18  ;;  %2386 = vmatprep.subr.bf16.mxu1 %v11418_v47  ;;  %v11428_v18 = vld [vmem:[#allocation54_spill] sm:$0xff]  ;;  %v11429_v47 = vld [vmem:[#allocation55_spill] sm:$0xff] }
 0x583   :  { %2346 = vmatpush1.bf16.msra.mxu0 %v11419_v35  ;;  %2387 = vmatpush1.bf16.msra.mxu1 %v11420_v36  ;;  %v11430_v35 = vld [vmem:[#allocation56_spill] sm:$0xff]  ;;  %v11431_v36 = vld [vmem:[#allocation57_spill] sm:$0xff] }
 0x584   :  { %2347 = vmatprep.subr.bf16.mxu0 %v11421_v61  ;;  %2388 = vmatprep.subr.bf16.mxu1 %v11422_v1  ;;  %v11432_v61 = vld [vmem:[#allocation58_spill] sm:$0xff]  ;;  %v11433_v1 = vld [vmem:[#allocation59_spill] sm:$0xff] }
 0x587   :  { %2348 = vmatpush1.bf16.msra.mxu0 %v11423_v17  ;;  %2389 = vmatpush1.bf16.msra.mxu1 %v11424_v41  ;;  %v11434_v17 = vld [vmem:[#allocation60_spill] sm:$0xff]  ;;  %v11435_v41 = vld [vmem:[#allocation61_spill] sm:$0xff] }
 0x588   :  { %2349 = vmatprep.subr.bf16.mxu0 %v11425_v49  ;;  %2390 = vmatprep.subr.bf16.mxu1 %v11426_v55  ;;  %v11436_v49 = vld [vmem:[#allocation62_spill] sm:$0xff]  ;;  %v11437_v55 = vld [vmem:[#allocation63_spill] sm:$0xff] }
 0x58b   :  { %2350 = vmatpush1.bf16.msra.mxu0 %v11427_v26  ;;  %2391 = vmatpush1.bf16.msra.mxu1 %v11428_v18  ;;  %v11438_v26 = vld [vmem:[#allocation64_spill] sm:$0xff]  ;;  %v11439_v18 = vld [vmem:[#allocation65_spill] sm:$0xff] }
 0x58c   :  { %2351 = vmatprep.subr.bf16.mxu0 %v11429_v47  ;;  %2392 = vmatprep.subr.bf16.mxu1 %v11430_v35  ;;  %v11440_v47 = vld [vmem:[#allocation66_spill] sm:$0xff]  ;;  %v11441_v35 = vld [vmem:[#allocation67_spill] sm:$0xff] }
 0x58f   :  { %2352 = vmatpush2.bf16.msra.mxu0 %v11431_v36  ;;  %2393 = vmatpush2.bf16.msra.mxu1 %v11432_v61  ;;  %v11442_v36 = vld [vmem:[#allocation68_spill] sm:$0xff]  ;;  %v11443_v61 = vld [vmem:[#allocation69_spill] sm:$0xff] }
 0x590   :  { %2353 = vmatprep.subr.bf16.mxu0 %v11433_v1  ;;  %2394 = vmatprep.subr.bf16.mxu1 %v11434_v17  ;;  %v11444_v1 = vld [vmem:[#allocation70_spill] sm:$0xff]  ;;  %v11445_v17 = vld [vmem:[#allocation71_spill] sm:$0xff] }
 0x593   :  { %2354 = vmatpush2.bf16.msra.mxu0 %v11435_v41  ;;  %2395 = vmatpush2.bf16.msra.mxu1 %v11436_v49  ;;  %v11446_v41 = vld [vmem:[#allocation73_spill] sm:$0xff]  ;;  %v11447_v49 = vld [vmem:[#allocation72_spill] sm:$0xff] }
 0x594   :  { %2355 = vmatprep.subr.bf16.mxu0 %v11437_v55  ;;  %2396 = vmatprep.subr.bf16.mxu1 %v11438_v26  ;;  %v11448_v55 = vld [vmem:[#allocation74_spill] sm:$0xff]  ;;  %v11449_v26 = vld [vmem:[#allocation75_spill] sm:$0xff] }
 0x597   :  { %2356 = vmatpush2.bf16.msra.mxu0 %v11439_v18  ;;  %2397 = vmatpush2.bf16.msra.mxu1 %v11440_v47  ;;  %v11450_v18 = vld [vmem:[#allocation76_spill] sm:$0xff]  ;;  %v11451_v47 = vld [vmem:[#allocation77_spill] sm:$0xff] }
 0x598   :  { %2357 = vmatprep.subr.bf16.mxu0 %v11441_v35  ;;  %2398 = vmatprep.subr.bf16.mxu1 %v11442_v36  ;;  %v11452_v35 = vld [vmem:[#allocation78_spill] sm:$0xff]  ;;  %v11453_v36 = vld [vmem:[#allocation79_spill] sm:$0xff] }
 0x59b   :  { %2358 = vmatpush2.bf16.msra.mxu0 %v11443_v61  ;;  %2399 = vmatpush2.bf16.msra.mxu1 %v11444_v1  ;;  %v11454_v61 = vld [vmem:[#allocation80_spill] sm:$0xff]  ;;  %v11455_v1 = vld [vmem:[#allocation81_spill] sm:$0xff] }
 0x59c   :  { %2359 = vmatprep.subr.bf16.mxu0 %v11445_v17  ;;  %2400 = vmatprep.subr.bf16.mxu1 %v11446_v41  ;;  %v11456_v17 = vld [vmem:[#allocation82_spill] sm:$0xff]  ;;  %v11457_v41 = vld [vmem:[#allocation83_spill] sm:$0xff] }
 0x59f   :  { %2360 = vmatpush2.bf16.msra.mxu0 %v11447_v49  ;;  %2401 = vmatpush2.bf16.msra.mxu1 %v11448_v55  ;;  %v11458_v49 = vld [vmem:[#allocation84_spill] sm:$0xff]  ;;  %v11459_v55 = vld [vmem:[#allocation85_spill] sm:$0xff] }
 0x5a0   :  { %2361 = vmatprep.subr.bf16.mxu0 %v11449_v26  ;;  %2402 = vmatprep.subr.bf16.mxu1 %v11450_v18  ;;  %v11460_v26 = vld [vmem:[#allocation86_spill] sm:$0xff]  ;;  %v11461_v18 = vld [vmem:[#allocation87_spill] sm:$0xff] }
 0x5a3   :  { %2362 = vmatpush2.bf16.msra.mxu0 %v11451_v47  ;;  %2403 = vmatpush2.bf16.msra.mxu1 %v11452_v35  ;;  %v11462_v47 = vld [vmem:[#allocation88_spill] sm:$0xff] }
 0x5a4   :  { %2363 = vmatprep.subr.bf16.mxu0 %v11453_v36  ;;  %2404 = vmatprep.subr.bf16.mxu1 %v11454_v61 }
 0x5a7   :  { %2364 = vmatpush2.bf16.msra.mxu0 %v11455_v1  ;;  %2405 = vmatpush2.bf16.msra.mxu1 %v11456_v17 }
 0x5a8   :  { %2365 = vmatprep.subr.bf16.mxu0 %v11457_v41  ;;  %2406 = vmatprep.subr.bf16.mxu1 %v11458_v49  ;;  %v11465_v41 = vld [vmem:[#allocation94_spill] sm:$0xff]  ;;  %v11466_v49 = vld [vmem:[#allocation127_spill] sm:$0xff] }
 0x5ab   :  { %2366 = vmatpush2.bf16.msra.mxu0 %v11459_v55  ;;  %2407 = vmatpush2.bf16.msra.mxu1 %v11460_v26 }
 0x5ac   :  { %2417 = vmatprep.subr.bf16.mxu0 %v11461_v18  ;;  %2458 = vmatprep.subr.bf16.mxu1 %v11462_v47 }
 0x5ee   :  { %v2137_v35 = vpop.f32.mrf.mxu0  ;;  %v2178_v36 = vpop.f32.mrf.mxu1 }
 0x5ef   :  { %v2271_v61 = vadd.f32 %v2137_v35, %v11463_v27  ;;  %v2273_v1 = vadd.f32 %v2178_v36, %v11464_v45 }
 0x5f0   :  { %v2139_v14 = vpop.f32.mrf.mxu0  ;;  %v2180_v17 = vpop.f32.mrf.mxu1 }
 0x5f1   :  { %v6898_v31 = vmul.f32 -1.442695, %v2271_v61  ;;  %v2272_v23 = vadd.f32 %v2139_v14, %v11465_v41  ;;  %v2274_v24 = vadd.f32 %v2180_v17, %v11466_v49 }
 0x5f2   :  { %v2141_v55 = vpop.f32.mrf.mxu0  ;;  %v2182_v34 = vpop.f32.mrf.mxu1 }
 0x5f3   :  { %7711 = vpow2.f32 %v6898_v31  ;;  %v6899_v26 = vmul.f32 -1.442695, %v2272_v23  ;;  %v11467_v31 = vld [vmem:[#allocation108_spill] sm:$0xff]  ;;  %v6900_v7 = vmul.f32 -1.442695, %v2274_v24 }
 0x5f4   :  { %v2142_v18 = vpop.f32.mrf.mxu0  ;;  %v2183_v33 = vpop.f32.mrf.mxu1 }
 0x5f5   :  { %7713 = vpow2.f32 %v6899_v26  ;;  %v11468_v33 = vld [vmem:[#allocation124_spill] sm:$0xff]  ;;  %v11469_v26 = vld [vmem:[#allocation122_spill] sm:$0xff] }
 0x5f6   :  { %7715 = vtanh.f32 %v2273_v1  ;;  %v420_v14 = vadd.f32 %v11468_v33, %v11467_v31 }
 0x600   :  { %v7712_v47 = vpop.eup %7711 }
 0x601   :  { %v2286_v0 = vadd.f32 1.0, %v7712_v47 }
 0x602   :  { %v7714_v56 = vpop.eup %7713 }
 0x603   :  { %7717 = vrcp.f32 %v2286_v0  ;;  %v2292_v45 = vadd.f32 1.0, %v7714_v56  ;;  %v7716_v27 = vpop.eup %7715 }
 0x605   :  { %7719 = vrcp.f32 %v2292_v45 }
 0x610   :  { %v7718_v35 = vpop.eup %7717 }
 0x611   :  { %v2303_v61 = vmul.f32 %v7718_v35, %v7716_v27 }
 0x612   :  { %v7720_v41 = vpop.eup %7719 }
 0x613   :  { %v2302_v49 = vmul.f32 %v7720_v41, %v9556_v32  ;;  %v11470_v32 = vld [vmem:[#allocation139_spill] sm:$0xff] }
 0x615   :  { %v9714_v55 = vadd.f32 %v2303_v61, %v2302_v49  ;;  %v11471_v61 = vld [vmem:[#allocation147_spill] sm:$0xff] }
 0x616   :  { %v493_v41 = vadd.f32 %v11471_v61, %v11470_v32  ;;  %v11496_v32 = vld [vmem:[#allocation213_spill] sm:$0xff] }
 0x62e   :  { %v2219_v34 = vpop.f32.mrf.mxu0  ;;  %v2260_v23 = vpop.f32.mrf.mxu1 }
 0x62f   :  { %v2279_v18 = vadd.f32 %v2219_v34, %v11469_v26  ;;  %v2281_v33 = vadd.f32 %v2260_v23, %v11472_v22 }
 0x630   :  { %v2221_v47 = vpop.f32.mrf.mxu0  ;;  %v2262_v1 = vpop.f32.mrf.mxu1 }
 0x631   :  { %v6901_v0 = vmul.f32 -1.442695, %v2279_v18  ;;  %v2280_v56 = vadd.f32 %v2221_v47, %v420_v14  ;;  %v2282_v49 = vadd.f32 %v2262_v1, %v493_v41 }
 0x632   :  { %v2223_v17 = vpop.f32.mrf.mxu0  ;;  %v2264_v36 = vpop.f32.mrf.mxu1 }
 0x633   :  { %7721 = vpow2.f32 %v6901_v0  ;;  %v6902_v45 = vmul.f32 -1.442695, %v2280_v56  ;;  %v6903_v31 = vmul.f32 -1.442695, %v2282_v49 }
 0x634   :  { %v2224_v27 = vpop.f32.mrf.mxu0  ;;  %v2265_v35 = vpop.f32.mrf.mxu1 }
 0x635   :  { %7723 = vpow2.f32 %v6902_v45 }
 0x636   :  { %7725 = vpow2.f32 %v6900_v7 }
 0x637   :  { %7727 = vtanh.f32 %v2281_v33  ;;  %v11475_v33 = vld [vmem:[#allocation192_spill] sm:$0xff] }
 0x638   :  { %7729 = vpow2.f32 %v6903_v31 }
 0x640   :  { %v7722_v34 = vpop.eup %7721 }
 0x641   :  { %v2310_v26 = vadd.f32 1.0, %v7722_v34  ;;  %v11476_v34 = vld [vmem:[#allocation193_spill] sm:$0xff] }
 0x642   :  { %v7724_v14 = vpop.eup %7723 }
 0x643   :  { %7731 = vrcp.f32 %v2310_v26  ;;  %v2316_v18 = vadd.f32 1.0, %v7724_v14  ;;  %v7726_v47 = vpop.eup %7725  ;;  %v11477_v26 = vld [vmem:[#allocation194_spill] sm:$0xff]  ;;  %v11478_v14 = vld [vmem:[#allocation195_spill] sm:$0xff] }
 0x644   :  { %v7728_v0 = vpop.eup %7727  ;;  %v2299_v36 = vadd.f32 1.0, %v7726_v47  ;;  %v11480_v47 = vld [vmem:[#allocation197_spill] sm:$0xff] }
 0x645   :  { %7733 = vrcp.f32 %v2316_v18  ;;  %v7730_v56 = vpop.eup %7729  ;;  %v11479_v18 = vld [vmem:[#allocation196_spill] sm:$0xff] }
 0x646   :  { %v2323_v24 = vadd.f32 1.0, %v7730_v56  ;;  %7735 = vtanh.f32 %v9714_v55  ;;  %v11482_v56 = vld [vmem:[#allocation199_spill] sm:$0xff] }
 0x647   :  { %7737 = vrcp.f32 %v2299_v36  ;;  %v11484_v36 = vld [vmem:[#allocation201_spill] sm:$0xff] }
 0x648   :  { %7739 = vrcp.f32 %v2323_v24  ;;  %v11487_v24 = vld [vmem:[#allocation204_spill] sm:$0xff] }
 0x650   :  { %v7732_v17 = vpop.eup %7731 }
 0x651   :  { %v2327_v45 = vmul.f32 %v7732_v17, %v7728_v0  ;;  %v11481_v0 = vld [vmem:[#allocation198_spill] sm:$0xff]  ;;  %v11483_v17 = vld [vmem:[#allocation200_spill] sm:$0xff] }
 0x652   :  { %v7734_v1 = vpop.eup %7733 }
 0x653   :  { %v2326_v22 = vmul.f32 %v7734_v1, %v9564_v54  ;;  %v7736_v23 = vpop.eup %7735  ;;  %v11486_v1 = vld [vmem:[#allocation203_spill] sm:$0xff] }
 0x654   :  { %v7738_v31 = vpop.eup %7737 }
 0x655   :  { %v9724_v7 = vadd.f32 %v2327_v45, %v2326_v22  ;;  %v7740_v27 = vpop.eup %7739  ;;  %v9727_v61 = vmul.f32 %v7738_v31, %v7736_v23  ;;  %v11485_v45 = vld [vmem:[#allocation202_spill] sm:$0xff]  ;;  %v11488_v22 = vld [vmem:[#allocation205_spill] sm:$0xff]  ;;  %v11490_v31 = vld [vmem:[#allocation207_spill] sm:$0xff] }
 0x656   :  { %v11489_v23 = vld [vmem:[#allocation206_spill] sm:$0xff] }
 0x657   :  { %7741 = vtanh.f32 %v9724_v7  ;;  %11473 = vst [vmem:[#allocation89_spill] sm:$0xff] %v9727_v61  ;;  %v9735_v54 = vpack.c.bf16 %v9727_v61, %v9727_v61  ;;  %v11494_v61 = vld [vmem:[#allocation211_spill] sm:$0xff] }
 0x664   :  { %v7742_v35 = vpop.eup %7741 }
 0x665   :  { %v9729_v41 = vmul.f32 %v7742_v35, %v7740_v27  ;;  %v11491_v27 = vld [vmem:[#allocation208_spill] sm:$0xff]  ;;  %v11492_v35 = vld [vmem:[#allocation209_spill] sm:$0xff] }
 0x667   :  { %11474 = vst [vmem:[#allocation155_spill] sm:$0xff] %v9729_v41  ;;  %v2334_v49 = vpack.c.bf16 %v9729_v41, %v9729_v41  ;;  %v11495_v41 = vld [vmem:[#allocation212_spill] sm:$0xff] }
 0x669   :  { %2367 = vmatprep.mubr.bf16.mxu0 %v2334_v49  ;;  %2408 = vmatprep.mubr.bf16.mxu1 %v2334_v49 }
 0x66a   :  { %2368 = vmatmul.mubr.bf16.vlgmr.msra.gmra.mxu0 %v9735_v54  ;;  %2409 = vmatmul.mubr.bf16.vlgmr.msra.gmra.mxu1 %v9735_v54 }
 0x66b   :  { %2418 = vmatpush1.bf16.msra.mxu0 %v8739_v15  ;;  %2459 = vmatpush1.bf16.msra.mxu1 %v11173_v37 }
 0x66c   :  { %2449 = vmatprep.mubr.bf16.mxu0 %v2334_v49  ;;  %2490 = vmatprep.mubr.bf16.mxu1 %v2334_v49  ;;  %v11493_v49 = vld [vmem:[#allocation210_spill] sm:$0xff] }
 0x66d   :  { %2419 = vmatprep.subr.bf16.mxu0 %v11174_v29  ;;  %2460 = vmatprep.subr.bf16.mxu1 %v11175_v53 }
 0x66f   :  { %2420 = vmatpush1.bf16.msra.mxu0 %v11176_v63  ;;  %2461 = vmatpush1.bf16.msra.mxu1 %v11177_v6 }
 0x670   :  { %2421 = vmatprep.subr.bf16.mxu0 %v11178_v28  ;;  %2462 = vmatprep.subr.bf16.mxu1 %v11179_v21 }
 0x673   :  { %2422 = vmatpush1.bf16.msra.mxu0 %v11180_v20  ;;  %2463 = vmatpush1.bf16.msra.mxu1 %v11181_v19 }
 0x674   :  { %2423 = vmatprep.subr.bf16.mxu0 %v11182_v62  ;;  %2464 = vmatprep.subr.bf16.mxu1 %v11183_v38 }
 0x677   :  { %2424 = vmatpush1.bf16.msra.mxu0 %v11184_v2  ;;  %2465 = vmatpush1.bf16.msra.mxu1 %v11185_v8 }
 0x678   :  { %2425 = vmatprep.subr.bf16.mxu0 %v11274_v52  ;;  %2466 = vmatprep.subr.bf16.mxu1 %v11275_v60 }
 0x67b   :  { %2426 = vmatpush1.bf16.msra.mxu0 %v11276_v44  ;;  %2467 = vmatpush1.bf16.msra.mxu1 %v11277_v51 }
 0x67c   :  { %2427 = vmatprep.subr.bf16.mxu0 %v11278_v43  ;;  %2468 = vmatprep.subr.bf16.mxu1 %v11279_v3 }
 0x67f   :  { %2428 = vmatpush1.bf16.msra.mxu0 %v11280_v5  ;;  %2469 = vmatpush1.bf16.msra.mxu1 %v11281_v9 }
 0x680   :  { %2429 = vmatprep.subr.bf16.mxu0 %v11282_v59  ;;  %2470 = vmatprep.subr.bf16.mxu1 %v11283_v42 }
 0x683   :  { %2430 = vmatpush1.bf16.msra.mxu0 %v11374_v46  ;;  %2471 = vmatpush1.bf16.msra.mxu1 %v11375_v30 }
 0x684   :  { %2431 = vmatprep.subr.bf16.mxu0 %v11286_v48  ;;  %2472 = vmatprep.subr.bf16.mxu1 %v11287_v50 }
 0x687   :  { %2432 = vmatpush1.bf16.msra.mxu0 %v11288_v11  ;;  %2473 = vmatpush1.bf16.msra.mxu1 %v11376_v16 }
 0x688   :  { %2433 = vmatprep.subr.bf16.mxu0 %v11377_v10  ;;  %2474 = vmatprep.subr.bf16.mxu1 %v11291_v58 }
 0x68b   :  { %2434 = vmatpush2.bf16.msra.mxu0 %v11292_v13  ;;  %2475 = vmatpush2.bf16.msra.mxu1 %v11293_v12 }
 0x68c   :  { %2435 = vmatprep.subr.bf16.mxu0 %v11294_v39  ;;  %2476 = vmatprep.subr.bf16.mxu1 %v11295_v40 }
 0x68f   :  { %2436 = vmatpush2.bf16.msra.mxu0 %v11296_v4  ;;  %2477 = vmatpush2.bf16.msra.mxu1 %v11209_v25 }
 0x690   :  { %2437 = vmatprep.subr.bf16.mxu0 %v11210_v57  ;;  %2478 = vmatprep.subr.bf16.mxu1 %v11475_v33 }
 0x693   :  { %2438 = vmatpush2.bf16.msra.mxu0 %v11476_v34  ;;  %2479 = vmatpush2.bf16.msra.mxu1 %v11477_v26 }
 0x694   :  { %2439 = vmatprep.subr.bf16.mxu0 %v11478_v14  ;;  %2480 = vmatprep.subr.bf16.mxu1 %v11479_v18 }
 0x697   :  { %2440 = vmatpush2.bf16.msra.mxu0 %v11480_v47  ;;  %2481 = vmatpush2.bf16.msra.mxu1 %v11481_v0 }
 0x698   :  { %2441 = vmatprep.subr.bf16.mxu0 %v11482_v56  ;;  %2482 = vmatprep.subr.bf16.mxu1 %v11483_v17  ;;  %v11568_v17 = vld [vmem:[#allocation95_spill] sm:$0xff]  ;;  %v11569_v56 = vld [vmem:[#allocation129_spill] sm:$0xff] }
 0x69b   :  { %2442 = vmatpush2.bf16.msra.mxu0 %v11484_v36  ;;  %2483 = vmatpush2.bf16.msra.mxu1 %v11485_v45  ;;  %v11567_v36 = vld [vmem:[#allocation131_spill] sm:$0xff] }
 0x69c   :  { %2443 = vmatprep.subr.bf16.mxu0 %v11486_v1  ;;  %2484 = vmatprep.subr.bf16.mxu1 %v11487_v24  ;;  %v11497_v1 = vld [vmem:[#allocation214_spill] sm:$0xff]  ;;  %v11498_v24 = vld [vmem:[#allocation23_spill] sm:$0xff] }
 0x69f   :  { %2444 = vmatpush2.bf16.msra.mxu0 %v11488_v22  ;;  %2485 = vmatpush2.bf16.msra.mxu1 %v11489_v23  ;;  %v11499_v22 = vld [vmem:[#allocation24_spill] sm:$0xff] }
 0x6a0   :  { %2445 = vmatprep.subr.bf16.mxu0 %v11490_v31  ;;  %2486 = vmatprep.subr.bf16.mxu1 %v11491_v27  ;;  %v11500_v27 = vld [vmem:[#allocation25_spill] sm:$0xff]  ;;  %v11509_v31 = vld [vmem:[#allocation34_spill] sm:$0xff]  ;;  %v11564_v23 = vld [vmem:[#allocation92_spill] sm:$0xff] }
 0x6a3   :  { %2446 = vmatpush2.bf16.msra.mxu0 %v11492_v35  ;;  %2487 = vmatpush2.bf16.msra.mxu1 %v11493_v49  ;;  %v11501_v35 = vld [vmem:[#allocation26_spill] sm:$0xff]  ;;  %v11502_v49 = vld [vmem:[#allocation27_spill] sm:$0xff] }
 0x6a4   :  { %2447 = vmatprep.subr.bf16.mxu0 %v11494_v61  ;;  %2488 = vmatprep.subr.bf16.mxu1 %v11495_v41  ;;  %v11503_v61 = vld [vmem:[#allocation28_spill] sm:$0xff]  ;;  %v11504_v41 = vld [vmem:[#allocation29_spill] sm:$0xff] }
 0x6a7   :  { %2448 = vmatpush2.bf16.msra.mxu0 %v11496_v32  ;;  %2489 = vmatpush2.bf16.msra.mxu1 %v11497_v1  ;;  %v11505_v32 = vld [vmem:[#allocation30_spill] sm:$0xff]  ;;  %v11506_v1 = vld [vmem:[#allocation31_spill] sm:$0xff] }
 0x6a8   :  { %2567 = vmatprep.subr.bf16.mxu0 %v11498_v24  ;;  %2608 = vmatprep.subr.bf16.mxu1 %v11499_v22  ;;  %v11507_v24 = vld [vmem:[#allocation32_spill] sm:$0xff]  ;;  %v11508_v22 = vld [vmem:[#allocation33_spill] sm:$0xff] }
 0x6aa   :  { %2450 = vmatmul.mubr.bf16.vlgmr.msra.gmra.mxu0 %v9735_v54  ;;  %2491 = vmatmul.mubr.bf16.vlgmr.msra.gmra.mxu1 %v9735_v54  ;;  %v11510_v54 = vld [vmem:[#allocation35_spill] sm:$0xff] }
 0x6ab   :  { %2568 = vmatpush1.bf16.msra.mxu0 %v11500_v27  ;;  %2609 = vmatpush1.bf16.msra.mxu1 %v11501_v35  ;;  %v11511_v27 = vld [vmem:[#allocation36_spill] sm:$0xff]  ;;  %v11512_v35 = vld [vmem:[#allocation37_spill] sm:$0xff] }
 0x6ac   :  { %2569 = vmatprep.subr.bf16.mxu0 %v11502_v49  ;;  %2610 = vmatprep.subr.bf16.mxu1 %v11503_v61  ;;  %v11513_v49 = vld [vmem:[#allocation38_spill] sm:$0xff]  ;;  %v11514_v61 = vld [vmem:[#allocation39_spill] sm:$0xff] }
 0x6af   :  { %2570 = vmatpush1.bf16.msra.mxu0 %v11504_v41  ;;  %2611 = vmatpush1.bf16.msra.mxu1 %v11505_v32  ;;  %v11515_v41 = vld [vmem:[#allocation40_spill] sm:$0xff]  ;;  %v11516_v32 = vld [vmem:[#allocation41_spill] sm:$0xff] }
 0x6b0   :  { %2571 = vmatprep.subr.bf16.mxu0 %v11506_v1  ;;  %2612 = vmatprep.subr.bf16.mxu1 %v11507_v24  ;;  %v11517_v1 = vld [vmem:[#allocation42_spill] sm:$0xff]  ;;  %v11518_v24 = vld [vmem:[#allocation43_spill] sm:$0xff] }
 0x6b3   :  { %2572 = vmatpush1.bf16.msra.mxu0 %v11508_v22  ;;  %2613 = vmatpush1.bf16.msra.mxu1 %v11509_v31  ;;  %v11519_v22 = vld [vmem:[#allocation44_spill] sm:$0xff]  ;;  %v11520_v31 = vld [vmem:[#allocation45_spill] sm:$0xff] }
 0x6b4   :  { %2573 = vmatprep.subr.bf16.mxu0 %v11510_v54  ;;  %2614 = vmatprep.subr.bf16.mxu1 %v11511_v27  ;;  %v11521_v54 = vld [vmem:[#allocation46_spill] sm:$0xff]  ;;  %v11522_v27 = vld [vmem:[#allocation47_spill] sm:$0xff] }
 0x6b7   :  { %2574 = vmatpush1.bf16.msra.mxu0 %v11512_v35  ;;  %2615 = vmatpush1.bf16.msra.mxu1 %v11513_v49  ;;  %v11523_v35 = vld [vmem:[#allocation48_spill] sm:$0xff]  ;;  %v11524_v49 = vld [vmem:[#allocation49_spill] sm:$0xff] }
 0x6b8   :  { %2575 = vmatprep.subr.bf16.mxu0 %v11514_v61  ;;  %2616 = vmatprep.subr.bf16.mxu1 %v11515_v41  ;;  %v11525_v61 = vld [vmem:[#allocation50_spill] sm:$0xff]  ;;  %v11526_v41 = vld [vmem:[#allocation51_spill] sm:$0xff] }
 0x6bb   :  { %2576 = vmatpush1.bf16.msra.mxu0 %v11516_v32  ;;  %2617 = vmatpush1.bf16.msra.mxu1 %v11517_v1  ;;  %v11527_v32 = vld [vmem:[#allocation52_spill] sm:$0xff]  ;;  %v11528_v1 = vld [vmem:[#allocation53_spill] sm:$0xff] }
 0x6bc   :  { %2577 = vmatprep.subr.bf16.mxu0 %v11518_v24  ;;  %2618 = vmatprep.subr.bf16.mxu1 %v11519_v22  ;;  %v11529_v24 = vld [vmem:[#allocation54_spill] sm:$0xff]  ;;  %v11530_v22 = vld [vmem:[#allocation55_spill] sm:$0xff] }
 0x6bf   :  { %2578 = vmatpush1.bf16.msra.mxu0 %v11520_v31  ;;  %2619 = vmatpush1.bf16.msra.mxu1 %v11521_v54  ;;  %v11531_v31 = vld [vmem:[#allocation56_spill] sm:$0xff]  ;;  %v11532_v54 = vld [vmem:[#allocation57_spill] sm:$0xff] }
 0x6c0   :  { %2579 = vmatprep.subr.bf16.mxu0 %v11522_v27  ;;  %2620 = vmatprep.subr.bf16.mxu1 %v11523_v35  ;;  %v11533_v27 = vld [vmem:[#allocation58_spill] sm:$0xff]  ;;  %v11534_v35 = vld [vmem:[#allocation59_spill] sm:$0xff] }
 0x6c3   :  { %2580 = vmatpush1.bf16.msra.mxu0 %v11524_v49  ;;  %2621 = vmatpush1.bf16.msra.mxu1 %v11525_v61  ;;  %v11535_v49 = vld [vmem:[#allocation60_spill] sm:$0xff]  ;;  %v11536_v61 = vld [vmem:[#allocation61_spill] sm:$0xff] }
 0x6c4   :  { %2581 = vmatprep.subr.bf16.mxu0 %v11526_v41  ;;  %2622 = vmatprep.subr.bf16.mxu1 %v11527_v32  ;;  %v11537_v41 = vld [vmem:[#allocation62_spill] sm:$0xff]  ;;  %v11538_v32 = vld [vmem:[#allocation63_spill] sm:$0xff] }
 0x6c7   :  { %2582 = vmatpush1.bf16.msra.mxu0 %v11528_v1  ;;  %2623 = vmatpush1.bf16.msra.mxu1 %v11529_v24  ;;  %v11539_v1 = vld [vmem:[#allocation64_spill] sm:$0xff]  ;;  %v11540_v24 = vld [vmem:[#allocation65_spill] sm:$0xff] }
 0x6c8   :  { %2583 = vmatprep.subr.bf16.mxu0 %v11530_v22  ;;  %2624 = vmatprep.subr.bf16.mxu1 %v11531_v31  ;;  %v11541_v22 = vld [vmem:[#allocation66_spill] sm:$0xff]  ;;  %v11542_v31 = vld [vmem:[#allocation67_spill] sm:$0xff] }
 0x6cb   :  { %2584 = vmatpush2.bf16.msra.mxu0 %v11532_v54  ;;  %2625 = vmatpush2.bf16.msra.mxu1 %v11533_v27  ;;  %v11543_v54 = vld [vmem:[#allocation68_spill] sm:$0xff]  ;;  %v11544_v27 = vld [vmem:[#allocation69_spill] sm:$0xff] }
 0x6cc   :  { %2585 = vmatprep.subr.bf16.mxu0 %v11534_v35  ;;  %2626 = vmatprep.subr.bf16.mxu1 %v11535_v49  ;;  %v11545_v35 = vld [vmem:[#allocation70_spill] sm:$0xff]  ;;  %v11546_v49 = vld [vmem:[#allocation71_spill] sm:$0xff] }
 0x6cf   :  { %2586 = vmatpush2.bf16.msra.mxu0 %v11536_v61  ;;  %2627 = vmatpush2.bf16.msra.mxu1 %v11537_v41  ;;  %v11547_v61 = vld [vmem:[#allocation73_spill] sm:$0xff]  ;;  %v11548_v41 = vld [vmem:[#allocation72_spill] sm:$0xff] }
 0x6d0   :  { %2587 = vmatprep.subr.bf16.mxu0 %v11538_v32  ;;  %2628 = vmatprep.subr.bf16.mxu1 %v11539_v1  ;;  %v11549_v32 = vld [vmem:[#allocation74_spill] sm:$0xff]  ;;  %v11550_v1 = vld [vmem:[#allocation75_spill] sm:$0xff] }
 0x6d3   :  { %2588 = vmatpush2.bf16.msra.mxu0 %v11540_v24  ;;  %2629 = vmatpush2.bf16.msra.mxu1 %v11541_v22  ;;  %v11551_v24 = vld [vmem:[#allocation76_spill] sm:$0xff]  ;;  %v11552_v22 = vld [vmem:[#allocation77_spill] sm:$0xff] }
 0x6d4   :  { %2589 = vmatprep.subr.bf16.mxu0 %v11542_v31  ;;  %2630 = vmatprep.subr.bf16.mxu1 %v11543_v54  ;;  %v11553_v31 = vld [vmem:[#allocation78_spill] sm:$0xff]  ;;  %v11554_v54 = vld [vmem:[#allocation79_spill] sm:$0xff] }
 0x6d7   :  { %2590 = vmatpush2.bf16.msra.mxu0 %v11544_v27  ;;  %2631 = vmatpush2.bf16.msra.mxu1 %v11545_v35  ;;  %v11555_v27 = vld [vmem:[#allocation80_spill] sm:$0xff]  ;;  %v11556_v35 = vld [vmem:[#allocation81_spill] sm:$0xff] }
 0x6d8   :  { %2591 = vmatprep.subr.bf16.mxu0 %v11546_v49  ;;  %2632 = vmatprep.subr.bf16.mxu1 %v11547_v61  ;;  %v11557_v49 = vld [vmem:[#allocation82_spill] sm:$0xff]  ;;  %v11558_v61 = vld [vmem:[#allocation83_spill] sm:$0xff] }
 0x6db   :  { %2592 = vmatpush2.bf16.msra.mxu0 %v11548_v41  ;;  %2633 = vmatpush2.bf16.msra.mxu1 %v11549_v32  ;;  %v11559_v41 = vld [vmem:[#allocation84_spill] sm:$0xff]  ;;  %v11560_v32 = vld [vmem:[#allocation85_spill] sm:$0xff] }
 0x6dc   :  { %2593 = vmatprep.subr.bf16.mxu0 %v11550_v1  ;;  %2634 = vmatprep.subr.bf16.mxu1 %v11551_v24  ;;  %v11561_v1 = vld [vmem:[#allocation86_spill] sm:$0xff]  ;;  %v11562_v24 = vld [vmem:[#allocation87_spill] sm:$0xff] }
 0x6df   :  { %2594 = vmatpush2.bf16.msra.mxu0 %v11552_v22  ;;  %2635 = vmatpush2.bf16.msra.mxu1 %v11553_v31  ;;  %v11563_v22 = vld [vmem:[#allocation88_spill] sm:$0xff] }
 0x6e0   :  { %2595 = vmatprep.subr.bf16.mxu0 %v11554_v54  ;;  %2636 = vmatprep.subr.bf16.mxu1 %v11555_v27  ;;  %v11565_v27 = vld [vmem:[#allocation97_spill] sm:$0xff] }
 0x6e1   :  { %v284_v45 = vadd.f32 %v11565_v27, %v11564_v23 }
 0x6e3   :  { %2596 = vmatpush2.bf16.msra.mxu0 %v11556_v35  ;;  %2637 = vmatpush2.bf16.msra.mxu1 %v11557_v49  ;;  %v11566_v35 = vld [vmem:[#allocation116_spill] sm:$0xff] }
 0x6e4   :  { %2597 = vmatprep.subr.bf16.mxu0 %v11558_v61  ;;  %2638 = vmatprep.subr.bf16.mxu1 %v11559_v41  ;;  %v357_v49 = vadd.f32 %v11567_v36, %v11566_v35  ;;  %v11597_v35 = vld [vmem:[#allocation213_spill] sm:$0xff] }
 0x6e7   :  { %2598 = vmatpush2.bf16.msra.mxu0 %v11560_v32  ;;  %2639 = vmatpush2.bf16.msra.mxu1 %v11561_v1 }
 0x6e8   :  { %2649 = vmatprep.subr.bf16.mxu0 %v11562_v24  ;;  %2690 = vmatprep.subr.bf16.mxu1 %v11563_v22 }
 0x72a   :  { %v2369_v31 = vpop.f32.mrf.mxu0  ;;  %v2410_v54 = vpop.f32.mrf.mxu1 }
 0x72b   :  { %v2503_v61 = vadd.f32 %v2369_v31, %v11568_v17  ;;  %v2505_v41 = vadd.f32 %v2410_v54, %v11569_v56 }
 0x72c   :  { %v2371_v0 = vpop.f32.mrf.mxu0  ;;  %v2412_v32 = vpop.f32.mrf.mxu1 }
 0x72d   :  { %v6904_v47 = vmul.f32 -1.442695, %v2503_v61  ;;  %v2504_v1 = vadd.f32 %v2371_v0, %v284_v45  ;;  %v2506_v18 = vadd.f32 %v2412_v32, %v357_v49 }
 0x72e   :  { %v2373_v24 = vpop.f32.mrf.mxu0  ;;  %v2414_v14 = vpop.f32.mrf.mxu1 }
 0x72f   :  { %7743 = vpow2.f32 %v6904_v47  ;;  %v6905_v22 = vmul.f32 -1.442695, %v2504_v1 }
 0x730   :  { %v2374_v26 = vpop.f32.mrf.mxu0  ;;  %v2415_v34 = vpop.f32.mrf.mxu1 }
 0x731   :  { %7745 = vpow2.f32 %v6905_v22  ;;  %v11570_v26 = vld [vmem:[#allocation118_spill] sm:$0xff]  ;;  %v11571_v22 = vld [vmem:[#allocation120_spill] sm:$0xff] }
 0x732   :  { %7747 = vtanh.f32 %v2505_v41 }
 0x73c   :  { %v7744_v27 = vpop.eup %7743 }
 0x73d   :  { %v2518_v23 = vadd.f32 1.0, %v7744_v27 }
 0x73e   :  { %v7746_v33 = vpop.eup %7745 }
 0x73f   :  { %7749 = vrcp.f32 %v2518_v23  ;;  %v2524_v17 = vadd.f32 1.0, %v7746_v33  ;;  %v7748_v56 = vpop.eup %7747 }
 0x741   :  { %7751 = vrcp.f32 %v2524_v17  ;;  %v11572_v17 = vld [vmem:[#allocation145_spill] sm:$0xff] }
 0x74c   :  { %v7750_v36 = vpop.eup %7749 }
 0x74d   :  { %v2535_v31 = vmul.f32 %v7750_v36, %v7748_v56  ;;  %v6906_v56 = vmul.f32 -1.442695, %v2506_v18  ;;  %v11573_v36 = vld [vmem:[#allocation144_spill] sm:$0xff] }
 0x74e   :  { %v7752_v61 = vpop.eup %7751 }
 0x74f   :  { %v2534_v32 = vmul.f32 %v7752_v61, %v9714_v55 }
 0x751   :  { %v9876_v0 = vadd.f32 %v2535_v31, %v2534_v32 }
 0x76a   :  { %v2451_v14 = vpop.f32.mrf.mxu0  ;;  %v2492_v47 = vpop.f32.mrf.mxu1 }
 0x76b   :  { %v2511_v34 = vadd.f32 %v2451_v14, %v11570_v26  ;;  %v2513_v31 = vadd.f32 %v2492_v47, %v11573_v36 }
 0x76c   :  { %v2453_v45 = vpop.f32.mrf.mxu0  ;;  %v2494_v1 = vpop.f32.mrf.mxu1 }
 0x76d   :  { %v6907_v24 = vmul.f32 -1.442695, %v2511_v34  ;;  %v2512_v41 = vadd.f32 %v2453_v45, %v11571_v22  ;;  %v2514_v55 = vadd.f32 %v2494_v1, %v11572_v17 }
 0x76e   :  { %v2455_v23 = vpop.f32.mrf.mxu0  ;;  %v2496_v33 = vpop.f32.mrf.mxu1 }
 0x76f   :  { %7753 = vpow2.f32 %v6907_v24  ;;  %v6908_v49 = vmul.f32 -1.442695, %v2512_v41  ;;  %v6909_v61 = vmul.f32 -1.442695, %v2514_v55 }
 0x770   :  { %v2456_v54 = vpop.f32.mrf.mxu0  ;;  %v2497_v27 = vpop.f32.mrf.mxu1 }
 0x771   :  { %7755 = vpow2.f32 %v6908_v49 }
 0x772   :  { %7757 = vpow2.f32 %v6906_v56 }
 0x773   :  { %7759 = vtanh.f32 %v2513_v31 }
 0x774   :  { %7761 = vpow2.f32 %v6909_v61  ;;  %v11576_v61 = vld [vmem:[#allocation192_spill] sm:$0xff] }
 0x77c   :  { %v7754_v32 = vpop.eup %7753 }
 0x77d   :  { %v2542_v14 = vadd.f32 1.0, %v7754_v32  ;;  %v11577_v32 = vld [vmem:[#allocation193_spill] sm:$0xff] }
 0x77e   :  { %v7756_v26 = vpop.eup %7755 }
 0x77f   :  { %7763 = vrcp.f32 %v2542_v14  ;;  %v2548_v34 = vadd.f32 1.0, %v7756_v26  ;;  %v7758_v45 = vpop.eup %7757  ;;  %v11578_v14 = vld [vmem:[#allocation194_spill] sm:$0xff]  ;;  %v11579_v26 = vld [vmem:[#allocation195_spill] sm:$0xff] }
 0x780   :  { %v7760_v24 = vpop.eup %7759  ;;  %v2531_v23 = vadd.f32 1.0, %v7758_v45  ;;  %v11581_v45 = vld [vmem:[#allocation197_spill] sm:$0xff] }
 0x781   :  { %7765 = vrcp.f32 %v2548_v34  ;;  %v7762_v22 = vpop.eup %7761  ;;  %v11580_v34 = vld [vmem:[#allocation196_spill] sm:$0xff] }
 0x782   :  { %v2555_v18 = vadd.f32 1.0, %v7762_v22  ;;  %7767 = vtanh.f32 %v9876_v0  ;;  %v11583_v22 = vld [vmem:[#allocation199_spill] sm:$0xff] }
 0x783   :  { %7769 = vrcp.f32 %v2531_v23  ;;  %v11585_v23 = vld [vmem:[#allocation201_spill] sm:$0xff] }
 0x784   :  { %7771 = vrcp.f32 %v2555_v18  ;;  %v11588_v18 = vld [vmem:[#allocation204_spill] sm:$0xff] }
 0x78c   :  { %v7764_v41 = vpop.eup %7763 }
 0x78d   :  { %v2559_v33 = vmul.f32 %v7764_v41, %v7760_v24  ;;  %v11582_v24 = vld [vmem:[#allocation198_spill] sm:$0xff]  ;;  %v11584_v41 = vld [vmem:[#allocation200_spill] sm:$0xff] }
 0x78e   :  { %v7766_v1 = vpop.eup %7765 }
 0x78f   :  { %v2558_v47 = vmul.f32 %v7766_v1, %v9724_v7  ;;  %v7768_v54 = vpop.eup %7767  ;;  %v11587_v1 = vld [vmem:[#allocation203_spill] sm:$0xff] }
 0x790   :  { %v7770_v27 = vpop.eup %7769 }
 0x791   :  { %v9884_v49 = vadd.f32 %v2559_v33, %v2558_v47  ;;  %v7772_v17 = vpop.eup %7771  ;;  %v9887_v56 = vmul.f32 %v7770_v27, %v7768_v54  ;;  %v11586_v33 = vld [vmem:[#allocation202_spill] sm:$0xff]  ;;  %v11589_v47 = vld [vmem:[#allocation205_spill] sm:$0xff]  ;;  %v11591_v27 = vld [vmem:[#allocation207_spill] sm:$0xff] }
 0x792   :  { %v11590_v54 = vld [vmem:[#allocation206_spill] sm:$0xff] }
 0x793   :  { %7773 = vtanh.f32 %v9884_v49  ;;  %11574 = vst [vmem:[#allocation156_spill] sm:$0xff] %v9887_v56  ;;  %v9895_v7 = vpack.c.bf16 %v9887_v56, %v9887_v56  ;;  %v11595_v56 = vld [vmem:[#allocation211_spill] sm:$0xff] }
 0x7a0   :  { %v7774_v55 = vpop.eup %7773 }
 0x7a1   :  { %v9889_v36 = vmul.f32 %v7774_v55, %v7772_v17  ;;  %v11592_v17 = vld [vmem:[#allocation208_spill] sm:$0xff]  ;;  %v11593_v55 = vld [vmem:[#allocation209_spill] sm:$0xff] }
 0x7a3   :  { %11575 = vst [vmem:[#allocation157_spill] sm:$0xff] %v9889_v36  ;;  %v2566_v31 = vpack.c.bf16 %v9889_v36, %v9889_v36  ;;  %v11596_v36 = vld [vmem:[#allocation212_spill] sm:$0xff] }
 0x7a5   :  { %2599 = vmatprep.mubr.bf16.mxu0 %v2566_v31  ;;  %2640 = vmatprep.mubr.bf16.mxu1 %v2566_v31 }
 0x7a6   :  { %2600 = vmatmul.mubr.bf16.vlgmr.msra.gmra.mxu0 %v9895_v7  ;;  %2641 = vmatmul.mubr.bf16.vlgmr.msra.gmra.mxu1 %v9895_v7 }
 0x7a7   :  { %2650 = vmatpush1.bf16.msra.mxu0 %v8739_v15  ;;  %2691 = vmatpush1.bf16.msra.mxu1 %v11173_v37 }
 0x7a8   :  { %2681 = vmatprep.mubr.bf16.mxu0 %v2566_v31  ;;  %2722 = vmatprep.mubr.bf16.mxu1 %v2566_v31  ;;  %v11594_v31 = vld [vmem:[#allocation210_spill] sm:$0xff] }
 0x7a9   :  { %2651 = vmatprep.subr.bf16.mxu0 %v11174_v29  ;;  %2692 = vmatprep.subr.bf16.mxu1 %v11175_v53 }
 0x7ab   :  { %2652 = vmatpush1.bf16.msra.mxu0 %v11176_v63  ;;  %2693 = vmatpush1.bf16.msra.mxu1 %v11177_v6 }
 0x7ac   :  { %2653 = vmatprep.subr.bf16.mxu0 %v11178_v28  ;;  %2694 = vmatprep.subr.bf16.mxu1 %v11179_v21 }
 0x7af   :  { %2654 = vmatpush1.bf16.msra.mxu0 %v11180_v20  ;;  %2695 = vmatpush1.bf16.msra.mxu1 %v11181_v19 }
 0x7b0   :  { %2655 = vmatprep.subr.bf16.mxu0 %v11182_v62  ;;  %2696 = vmatprep.subr.bf16.mxu1 %v11183_v38 }
 0x7b3   :  { %2656 = vmatpush1.bf16.msra.mxu0 %v11184_v2  ;;  %2697 = vmatpush1.bf16.msra.mxu1 %v11185_v8 }
 0x7b4   :  { %2657 = vmatprep.subr.bf16.mxu0 %v11274_v52  ;;  %2698 = vmatprep.subr.bf16.mxu1 %v11275_v60 }
 0x7b7   :  { %2658 = vmatpush1.bf16.msra.mxu0 %v11276_v44  ;;  %2699 = vmatpush1.bf16.msra.mxu1 %v11277_v51 }
 0x7b8   :  { %2659 = vmatprep.subr.bf16.mxu0 %v11278_v43  ;;  %2700 = vmatprep.subr.bf16.mxu1 %v11279_v3 }
 0x7bb   :  { %2660 = vmatpush1.bf16.msra.mxu0 %v11280_v5  ;;  %2701 = vmatpush1.bf16.msra.mxu1 %v11281_v9 }
 0x7bc   :  { %2661 = vmatprep.subr.bf16.mxu0 %v11282_v59  ;;  %2702 = vmatprep.subr.bf16.mxu1 %v11283_v42 }
 0x7bf   :  { %2662 = vmatpush1.bf16.msra.mxu0 %v11374_v46  ;;  %2703 = vmatpush1.bf16.msra.mxu1 %v11375_v30 }
 0x7c0   :  { %2663 = vmatprep.subr.bf16.mxu0 %v11286_v48  ;;  %2704 = vmatprep.subr.bf16.mxu1 %v11287_v50 }
 0x7c3   :  { %2664 = vmatpush1.bf16.msra.mxu0 %v11288_v11  ;;  %2705 = vmatpush1.bf16.msra.mxu1 %v11376_v16 }
 0x7c4   :  { %2665 = vmatprep.subr.bf16.mxu0 %v11377_v10  ;;  %2706 = vmatprep.subr.bf16.mxu1 %v11291_v58 }
 0x7c7   :  { %2666 = vmatpush2.bf16.msra.mxu0 %v11292_v13  ;;  %2707 = vmatpush2.bf16.msra.mxu1 %v11293_v12 }
 0x7c8   :  { %2667 = vmatprep.subr.bf16.mxu0 %v11294_v39  ;;  %2708 = vmatprep.subr.bf16.mxu1 %v11295_v40 }
 0x7cb   :  { %2668 = vmatpush2.bf16.msra.mxu0 %v11296_v4  ;;  %2709 = vmatpush2.bf16.msra.mxu1 %v11209_v25 }
 0x7cc   :  { %2669 = vmatprep.subr.bf16.mxu0 %v11210_v57  ;;  %2710 = vmatprep.subr.bf16.mxu1 %v11576_v61  ;;  %v11674_v61 = vld [vmem:[#allocation142_spill] sm:$0xff] }
 0x7cf   :  { %2670 = vmatpush2.bf16.msra.mxu0 %v11577_v32  ;;  %2711 = vmatpush2.bf16.msra.mxu1 %v11578_v14 }
 0x7d0   :  { %2671 = vmatprep.subr.bf16.mxu0 %v11579_v26  ;;  %2712 = vmatprep.subr.bf16.mxu1 %v11580_v34 }
 0x7d3   :  { %2672 = vmatpush2.bf16.msra.mxu0 %v11581_v45  ;;  %2713 = vmatpush2.bf16.msra.mxu1 %v11582_v24 }
 0x7d4   :  { %2673 = vmatprep.subr.bf16.mxu0 %v11583_v22  ;;  %2714 = vmatprep.subr.bf16.mxu1 %v11584_v41 }
 0x7d7   :  { %2674 = vmatpush2.bf16.msra.mxu0 %v11585_v23  ;;  %2715 = vmatpush2.bf16.msra.mxu1 %v11586_v33  ;;  %v11666_v33 = vld [vmem:[#allocation133_spill] sm:$0xff] }
 0x7d8   :  { %2675 = vmatprep.subr.bf16.mxu0 %v11587_v1  ;;  %2716 = vmatprep.subr.bf16.mxu1 %v11588_v18  ;;  %v11598_v1 = vld [vmem:[#allocation214_spill] sm:$0xff]  ;;  %v11599_v18 = vld [vmem:[#allocation23_spill] sm:$0xff] }
 0x7db   :  { %2676 = vmatpush2.bf16.msra.mxu0 %v11589_v47  ;;  %2717 = vmatpush2.bf16.msra.mxu1 %v11590_v54  ;;  %v11600_v47 = vld [vmem:[#allocation24_spill] sm:$0xff]  ;;  %v11665_v54 = vld [vmem:[#allocation99_spill] sm:$0xff] }
 0x7dc   :  { %2677 = vmatprep.subr.bf16.mxu0 %v11591_v27  ;;  %2718 = vmatprep.subr.bf16.mxu1 %v11592_v17  ;;  %v11601_v17 = vld [vmem:[#allocation25_spill] sm:$0xff]  ;;  %v11610_v27 = vld [vmem:[#allocation34_spill] sm:$0xff] }
 0x7df   :  { %2678 = vmatpush2.bf16.msra.mxu0 %v11593_v55  ;;  %2719 = vmatpush2.bf16.msra.mxu1 %v11594_v31  ;;  %v11602_v55 = vld [vmem:[#allocation26_spill] sm:$0xff]  ;;  %v11603_v31 = vld [vmem:[#allocation27_spill] sm:$0xff] }
 0x7e0   :  { %2679 = vmatprep.subr.bf16.mxu0 %v11595_v56  ;;  %2720 = vmatprep.subr.bf16.mxu1 %v11596_v36  ;;  %v11604_v56 = vld [vmem:[#allocation28_spill] sm:$0xff]  ;;  %v11605_v36 = vld [vmem:[#allocation29_spill] sm:$0xff] }
 0x7e3   :  { %2680 = vmatpush2.bf16.msra.mxu0 %v11597_v35  ;;  %2721 = vmatpush2.bf16.msra.mxu1 %v11598_v1  ;;  %v11606_v35 = vld [vmem:[#allocation30_spill] sm:$0xff]  ;;  %v11607_v1 = vld [vmem:[#allocation31_spill] sm:$0xff] }
 0x7e4   :  { %2799 = vmatprep.subr.bf16.mxu0 %v11599_v18  ;;  %2840 = vmatprep.subr.bf16.mxu1 %v11600_v47  ;;  %v11608_v18 = vld [vmem:[#allocation32_spill] sm:$0xff]  ;;  %v11609_v47 = vld [vmem:[#allocation33_spill] sm:$0xff] }
 0x7e6   :  { %2682 = vmatmul.mubr.bf16.vlgmr.msra.gmra.mxu0 %v9895_v7  ;;  %2723 = vmatmul.mubr.bf16.vlgmr.msra.gmra.mxu1 %v9895_v7  ;;  %v11611_v7 = vld [vmem:[#allocation35_spill] sm:$0xff] }
 0x7e7   :  { %2800 = vmatpush1.bf16.msra.mxu0 %v11601_v17  ;;  %2841 = vmatpush1.bf16.msra.mxu1 %v11602_v55  ;;  %v11612_v17 = vld [vmem:[#allocation36_spill] sm:$0xff]  ;;  %v11613_v55 = vld [vmem:[#allocation37_spill] sm:$0xff] }
 0x7e8   :  { %2801 = vmatprep.subr.bf16.mxu0 %v11603_v31  ;;  %2842 = vmatprep.subr.bf16.mxu1 %v11604_v56  ;;  %v11614_v31 = vld [vmem:[#allocation38_spill] sm:$0xff]  ;;  %v11615_v56 = vld [vmem:[#allocation39_spill] sm:$0xff] }
 0x7eb   :  { %2802 = vmatpush1.bf16.msra.mxu0 %v11605_v36  ;;  %2843 = vmatpush1.bf16.msra.mxu1 %v11606_v35  ;;  %v11616_v36 = vld [vmem:[#allocation40_spill] sm:$0xff]  ;;  %v11617_v35 = vld [vmem:[#allocation41_spill] sm:$0xff] }
 0x7ec   :  { %2803 = vmatprep.subr.bf16.mxu0 %v11607_v1  ;;  %2844 = vmatprep.subr.bf16.mxu1 %v11608_v18  ;;  %v11618_v1 = vld [vmem:[#allocation42_spill] sm:$0xff]  ;;  %v11619_v18 = vld [vmem:[#allocation43_spill] sm:$0xff] }
 0x7ef   :  { %2804 = vmatpush1.bf16.msra.mxu0 %v11609_v47  ;;  %2845 = vmatpush1.bf16.msra.mxu1 %v11610_v27  ;;  %v11620_v47 = vld [vmem:[#allocation44_spill] sm:$0xff]  ;;  %v11621_v27 = vld [vmem:[#allocation45_spill] sm:$0xff] }
 0x7f0   :  { %2805 = vmatprep.subr.bf16.mxu0 %v11611_v7  ;;  %2846 = vmatprep.subr.bf16.mxu1 %v11612_v17  ;;  %v11622_v7 = vld [vmem:[#allocation46_spill] sm:$0xff]  ;;  %v11623_v17 = vld [vmem:[#allocation47_spill] sm:$0xff] }
 0x7f3   :  { %2806 = vmatpush1.bf16.msra.mxu0 %v11613_v55  ;;  %2847 = vmatpush1.bf16.msra.mxu1 %v11614_v31  ;;  %v11624_v55 = vld [vmem:[#allocation48_spill] sm:$0xff]  ;;  %v11625_v31 = vld [vmem:[#allocation49_spill] sm:$0xff] }
 0x7f4   :  { %2807 = vmatprep.subr.bf16.mxu0 %v11615_v56  ;;  %2848 = vmatprep.subr.bf16.mxu1 %v11616_v36  ;;  %v11626_v56 = vld [vmem:[#allocation50_spill] sm:$0xff]  ;;  %v11627_v36 = vld [vmem:[#allocation51_spill] sm:$0xff] }
 0x7f7   :  { %2808 = vmatpush1.bf16.msra.mxu0 %v11617_v35  ;;  %2849 = vmatpush1.bf16.msra.mxu1 %v11618_v1  ;;  %v11628_v35 = vld [vmem:[#allocation52_spill] sm:$0xff]  ;;  %v11629_v1 = vld [vmem:[#allocation53_spill] sm:$0xff] }
 0x7f8   :  { %2809 = vmatprep.subr.bf16.mxu0 %v11619_v18  ;;  %2850 = vmatprep.subr.bf16.mxu1 %v11620_v47  ;;  %v11630_v18 = vld [vmem:[#allocation54_spill] sm:$0xff]  ;;  %v11631_v47 = vld [vmem:[#allocation55_spill] sm:$0xff] }
 0x7fb   :  { %2810 = vmatpush1.bf16.msra.mxu0 %v11621_v27  ;;  %2851 = vmatpush1.bf16.msra.mxu1 %v11622_v7  ;;  %v11632_v27 = vld [vmem:[#allocation56_spill] sm:$0xff]  ;;  %v11633_v7 = vld [vmem:[#allocation57_spill] sm:$0xff] }
 0x7fc   :  { %2811 = vmatprep.subr.bf16.mxu0 %v11623_v17  ;;  %2852 = vmatprep.subr.bf16.mxu1 %v11624_v55  ;;  %v11634_v17 = vld [vmem:[#allocation58_spill] sm:$0xff]  ;;  %v11635_v55 = vld [vmem:[#allocation59_spill] sm:$0xff] }
 0x7ff   :  { %2812 = vmatpush1.bf16.msra.mxu0 %v11625_v31  ;;  %2853 = vmatpush1.bf16.msra.mxu1 %v11626_v56  ;;  %v11636_v31 = vld [vmem:[#allocation60_spill] sm:$0xff]  ;;  %v11637_v56 = vld [vmem:[#allocation61_spill] sm:$0xff] }
 0x800   :  { %2813 = vmatprep.subr.bf16.mxu0 %v11627_v36  ;;  %2854 = vmatprep.subr.bf16.mxu1 %v11628_v35  ;;  %v11638_v36 = vld [vmem:[#allocation62_spill] sm:$0xff]  ;;  %v11639_v35 = vld [vmem:[#allocation63_spill] sm:$0xff] }
 0x803   :  { %2814 = vmatpush1.bf16.msra.mxu0 %v11629_v1  ;;  %2855 = vmatpush1.bf16.msra.mxu1 %v11630_v18  ;;  %v11640_v1 = vld [vmem:[#allocation64_spill] sm:$0xff]  ;;  %v11641_v18 = vld [vmem:[#allocation65_spill] sm:$0xff] }
 0x804   :  { %2815 = vmatprep.subr.bf16.mxu0 %v11631_v47  ;;  %2856 = vmatprep.subr.bf16.mxu1 %v11632_v27  ;;  %v11642_v47 = vld [vmem:[#allocation66_spill] sm:$0xff]  ;;  %v11643_v27 = vld [vmem:[#allocation67_spill] sm:$0xff] }
 0x807   :  { %2816 = vmatpush2.bf16.msra.mxu0 %v11633_v7  ;;  %2857 = vmatpush2.bf16.msra.mxu1 %v11634_v17  ;;  %v11644_v7 = vld [vmem:[#allocation68_spill] sm:$0xff]  ;;  %v11645_v17 = vld [vmem:[#allocation69_spill] sm:$0xff] }
 0x808   :  { %2817 = vmatprep.subr.bf16.mxu0 %v11635_v55  ;;  %2858 = vmatprep.subr.bf16.mxu1 %v11636_v31  ;;  %v11646_v55 = vld [vmem:[#allocation70_spill] sm:$0xff]  ;;  %v11647_v31 = vld [vmem:[#allocation71_spill] sm:$0xff] }
 0x80b   :  { %2818 = vmatpush2.bf16.msra.mxu0 %v11637_v56  ;;  %2859 = vmatpush2.bf16.msra.mxu1 %v11638_v36  ;;  %v11648_v56 = vld [vmem:[#allocation73_spill] sm:$0xff]  ;;  %v11649_v36 = vld [vmem:[#allocation72_spill] sm:$0xff] }
 0x80c   :  { %2819 = vmatprep.subr.bf16.mxu0 %v11639_v35  ;;  %2860 = vmatprep.subr.bf16.mxu1 %v11640_v1  ;;  %v11650_v35 = vld [vmem:[#allocation74_spill] sm:$0xff]  ;;  %v11651_v1 = vld [vmem:[#allocation75_spill] sm:$0xff] }
 0x80f   :  { %2820 = vmatpush2.bf16.msra.mxu0 %v11641_v18  ;;  %2861 = vmatpush2.bf16.msra.mxu1 %v11642_v47  ;;  %v11652_v18 = vld [vmem:[#allocation76_spill] sm:$0xff]  ;;  %v11653_v47 = vld [vmem:[#allocation77_spill] sm:$0xff] }
 0x810   :  { %2821 = vmatprep.subr.bf16.mxu0 %v11643_v27  ;;  %2862 = vmatprep.subr.bf16.mxu1 %v11644_v7  ;;  %v11654_v27 = vld [vmem:[#allocation78_spill] sm:$0xff]  ;;  %v11655_v7 = vld [vmem:[#allocation79_spill] sm:$0xff] }
 0x813   :  { %2822 = vmatpush2.bf16.msra.mxu0 %v11645_v17  ;;  %2863 = vmatpush2.bf16.msra.mxu1 %v11646_v55  ;;  %v11656_v17 = vld [vmem:[#allocation80_spill] sm:$0xff]  ;;  %v11657_v55 = vld [vmem:[#allocation81_spill] sm:$0xff] }
 0x814   :  { %2823 = vmatprep.subr.bf16.mxu0 %v11647_v31  ;;  %2864 = vmatprep.subr.bf16.mxu1 %v11648_v56  ;;  %v11658_v31 = vld [vmem:[#allocation82_spill] sm:$0xff]  ;;  %v11659_v56 = vld [vmem:[#allocation83_spill] sm:$0xff] }
 0x817   :  { %2824 = vmatpush2.bf16.msra.mxu0 %v11649_v36  ;;  %2865 = vmatpush2.bf16.msra.mxu1 %v11650_v35  ;;  %v11660_v36 = vld [vmem:[#allocation84_spill] sm:$0xff]  ;;  %v11661_v35 = vld [vmem:[#allocation85_spill] sm:$0xff] }
 0x818   :  { %2825 = vmatprep.subr.bf16.mxu0 %v11651_v1  ;;  %2866 = vmatprep.subr.bf16.mxu1 %v11652_v18  ;;  %v11662_v1 = vld [vmem:[#allocation86_spill] sm:$0xff]  ;;  %v11663_v18 = vld [vmem:[#allocation87_spill] sm:$0xff] }
 0x81b   :  { %2826 = vmatpush2.bf16.msra.mxu0 %v11653_v47  ;;  %2867 = vmatpush2.bf16.msra.mxu1 %v11654_v27  ;;  %v11664_v47 = vld [vmem:[#allocation88_spill] sm:$0xff] }
 0x81c   :  { %2827 = vmatprep.subr.bf16.mxu0 %v11655_v7  ;;  %2868 = vmatprep.subr.bf16.mxu1 %v11656_v17 }
 0x81f   :  { %2828 = vmatpush2.bf16.msra.mxu0 %v11657_v55  ;;  %2869 = vmatpush2.bf16.msra.mxu1 %v11658_v31 }
 0x820   :  { %2829 = vmatprep.subr.bf16.mxu0 %v11659_v56  ;;  %2870 = vmatprep.subr.bf16.mxu1 %v11660_v36  ;;  %v11667_v56 = vld [vmem:[#allocation101_spill] sm:$0xff]  ;;  %v11668_v36 = vld [vmem:[#allocation135_spill] sm:$0xff] }
 0x823   :  { %2830 = vmatpush2.bf16.msra.mxu0 %v11661_v35  ;;  %2871 = vmatpush2.bf16.msra.mxu1 %v11662_v1 }
 0x824   :  { %2881 = vmatprep.subr.bf16.mxu0 %v11663_v18  ;;  %2922 = vmatprep.subr.bf16.mxu1 %v11664_v47 }
 0x866   :  { %v2601_v27 = vpop.f32.mrf.mxu0  ;;  %v2642_v7 = vpop.f32.mrf.mxu1 }
 0x867   :  { %v2735_v17 = vadd.f32 %v2601_v27, %v11665_v54  ;;  %v2737_v55 = vadd.f32 %v2642_v7, %v11666_v33 }
 0x868   :  { %v2603_v23 = vpop.f32.mrf.mxu0  ;;  %v2644_v31 = vpop.f32.mrf.mxu1 }
 0x869   :  { %v6910_v41 = vmul.f32 -1.442695, %v2735_v17  ;;  %v2736_v22 = vadd.f32 %v2603_v23, %v11667_v56  ;;  %v2738_v24 = vadd.f32 %v2644_v31, %v11668_v36  ;;  %v11671_v36 = vld [vmem:[#allocation114_spill] sm:$0xff] }
 0x86a   :  { %v2605_v35 = vpop.f32.mrf.mxu0  ;;  %v2646_v45 = vpop.f32.mrf.mxu1 }
 0x86b   :  { %7775 = vpow2.f32 %v6910_v41  ;;  %v6911_v1 = vmul.f32 -1.442695, %v2736_v22  ;;  %v11669_v41 = vld [vmem:[#allocation108_spill] sm:$0xff]  ;;  %v6912_v32 = vmul.f32 -1.442695, %v2738_v24 }
 0x86c   :  { %v2606_v18 = vpop.f32.mrf.mxu0  ;;  %v2647_v34 = vpop.f32.mrf.mxu1 }
 0x86d   :  { %7777 = vpow2.f32 %v6911_v1  ;;  %v11670_v34 = vld [vmem:[#allocation115_spill] sm:$0xff] }
 0x86e   :  { %7779 = vtanh.f32 %v2737_v55  ;;  %v410_v56 = vadd.f32 %v11670_v34, %v11669_v41 }
 0x878   :  { %v7776_v47 = vpop.eup %7775 }
 0x879   :  { %v2750_v26 = vadd.f32 1.0, %v7776_v47 }
 0x87a   :  { %v7778_v14 = vpop.eup %7777 }
 0x87b   :  { %7781 = vrcp.f32 %v2750_v26  ;;  %v2756_v33 = vadd.f32 1.0, %v7778_v14  ;;  %v7780_v54 = vpop.eup %7779 }
 0x87d   :  { %7783 = vrcp.f32 %v2756_v33 }
 0x888   :  { %v7782_v27 = vpop.eup %7781 }
 0x889   :  { %v2767_v7 = vmul.f32 %v7782_v27, %v7780_v54 }
 0x88a   :  { %v7784_v23 = vpop.eup %7783 }
 0x88b   :  { %v2766_v17 = vmul.f32 %v7784_v23, %v9876_v0  ;;  %v11672_v0 = vld [vmem:[#allocation139_spill] sm:$0xff] }
 0x88d   :  { %v10034_v31 = vadd.f32 %v2767_v7, %v2766_v17  ;;  %v11673_v7 = vld [vmem:[#allocation143_spill] sm:$0xff] }
 0x88e   :  { %v483_v23 = vadd.f32 %v11673_v7, %v11672_v0 }
 0x8a6   :  { %v2683_v45 = vpop.f32.mrf.mxu0  ;;  %v2724_v22 = vpop.f32.mrf.mxu1 }
 0x8a7   :  { %v2743_v35 = vadd.f32 %v2683_v45, %v11671_v36  ;;  %v2745_v41 = vadd.f32 %v2724_v22, %v11674_v61 }
 0x8a8   :  { %v2685_v1 = vpop.f32.mrf.mxu0  ;;  %v2726_v55 = vpop.f32.mrf.mxu1 }
 0x8a9   :  { %v6913_v26 = vmul.f32 -1.442695, %v2743_v35  ;;  %v2744_v14 = vadd.f32 %v2685_v1, %v410_v56  ;;  %v2746_v17 = vadd.f32 %v2726_v55, %v483_v23 }
 0x8aa   :  { %v2687_v18 = vpop.f32.mrf.mxu0  ;;  %v2728_v47 = vpop.f32.mrf.mxu1 }
 0x8ab   :  { %7785 = vpow2.f32 %v6913_v26  ;;  %v6914_v33 = vmul.f32 -1.442695, %v2744_v14  ;;  %v6915_v34 = vmul.f32 -1.442695, %v2746_v17 }
 0x8ac   :  { %v2688_v54 = vpop.f32.mrf.mxu0  ;;  %v2729_v27 = vpop.f32.mrf.mxu1 }
 0x8ad   :  { %7787 = vpow2.f32 %v6914_v33 }
 0x8ae   :  { %7789 = vpow2.f32 %v6912_v32 }
 0x8af   :  { %7791 = vtanh.f32 %v2745_v41  ;;  %v7369_v41 = vld [vmem:[#allocation7 + $0x64] ss:$16 sps:$4 sm:$0xff]  }
 0x8b0   :  { %7793 = vpow2.f32 %v6915_v34  ;;  %v7372_v34 = vld [vmem:[#allocation7 + $0x6c] ss:$16 sps:$4 sm:$0xff]  }
 0x8b8   :  { %v7786_v45 = vpop.eup %7785 }
 0x8b9   :  { %v2774_v36 = vadd.f32 1.0, %v7786_v45  ;;  %v7367_v45 = vld [vmem:[#allocation7 + $0x60] ss:$16 sps:$4 sm:$0xff]  }
 0x8ba   :  { %v7788_v56 = vpop.eup %7787 }
 0x8bb   :  { %7795 = vrcp.f32 %v2774_v36  ;;  %v2780_v35 = vadd.f32 1.0, %v7788_v56  ;;  %v7790_v1 = vpop.eup %7789  ;;  %v7370_v36 = vld [vmem:[#allocation7 + $0x68] ss:$16 sps:$4 sm:$0xff]   ;;  %v7375_v56 = vld [vmem:[#allocation7 + $0x44] ss:$16 sps:$4 sm:$0xff]  }
 0x8bc   :  { %v7792_v26 = vpop.eup %7791  ;;  %v2763_v47 = vadd.f32 1.0, %v7790_v1  ;;  %v7373_v1 = vld [vmem:[#allocation7 + $0x40] ss:$16 sps:$4 sm:$0xff]  }
 0x8bd   :  { %7797 = vrcp.f32 %v2780_v35  ;;  %v7794_v14 = vpop.eup %7793  ;;  %v7378_v35 = vld [vmem:[#allocation7 + $0x4c] ss:$16 sps:$4 sm:$0xff]  }
 0x8be   :  { %v2787_v24 = vadd.f32 1.0, %v7794_v14  ;;  %7799 = vtanh.f32 %v10034_v31  ;;  %v7381_v14 = vld [vmem:[#allocation7 + $0x24] ss:$16 sps:$4 sm:$0xff]  }
 0x8bf   :  { %7801 = vrcp.f32 %v2763_v47  ;;  %v7379_v47 = vld [vmem:[#allocation7 + $0x20] ss:$16 sps:$4 sm:$0xff]  }
 0x8c0   :  { %7803 = vrcp.f32 %v2787_v24  ;;  %v7390_v24 = vld [vmem:[#allocation7 + $0xc] ss:$16 sps:$4 sm:$0xff]  }
 0x8c8   :  { %v7796_v18 = vpop.eup %7795 }
 0x8c9   :  { %v2791_v33 = vmul.f32 %v7796_v18, %v7792_v26  ;;  %v7376_v26 = vld [vmem:[#allocation7 + $0x48] ss:$16 sps:$4 sm:$0xff]   ;;  %v7384_v18 = vld [vmem:[#allocation7 + $0x2c] ss:$16 sps:$4 sm:$0xff]  }
 0x8ca   :  { %v7798_v55 = vpop.eup %7797 }
 0x8cb   :  { %v2790_v61 = vmul.f32 %v7798_v55, %v9884_v49  ;;  %v7800_v22 = vpop.eup %7799  ;;  %v7387_v55 = vld [vmem:[#allocation7 + $0x4] ss:$16 sps:$4 sm:$0xff]  }
 0x8cc   :  { %v7802_v54 = vpop.eup %7801 }
 0x8cd   :  { %v10044_v32 = vadd.f32 %v2791_v33, %v2790_v61  ;;  %v7804_v27 = vpop.eup %7803  ;;  %v10047_v7 = vmul.f32 %v7802_v54, %v7800_v22  ;;  %v7382_v33 = vld [vmem:[#allocation7 + $0x28] ss:$16 sps:$4 sm:$0xff]   ;;  %v7385_v61 = vld [vmem:[#allocation7] ss:$16 sps:$4 sm:$0xff]   ;;  %v7393_v54 = vld [vmem:[#allocation7 + $0x1e4] ss:$16 sps:$4 sm:$0xff]  }
 0x8ce   :  { %v7388_v22 = vld [vmem:[#allocation7 + $0x8] ss:$16 sps:$4 sm:$0xff]  }
 0x8cf   :  { %7805 = vtanh.f32 %v10044_v32  ;;  %v10055_v49 = vpack.c.bf16 %v10047_v7, %v10047_v7 }
 0x8dc   :  { %v7806_v0 = vpop.eup %7805 }
 0x8dd   :  { %v10049_v23 = vmul.f32 %v7806_v0, %v7804_v27  ;;  %v7396_v27 = vld [vmem:[#allocation7 + $0x1ec] ss:$16 sps:$4 sm:$0xff]   ;;  %v7391_v0 = vld [vmem:[#allocation7 + $0x1e0] ss:$16 sps:$4 sm:$0xff]  }
 0x8df   :  { %v2798_v17 = vpack.c.bf16 %v10049_v23, %v10049_v23 }
 0x8e1   :  { %2831 = vmatprep.mubr.bf16.mxu0 %v2798_v17  ;;  %2872 = vmatprep.mubr.bf16.mxu1 %v2798_v17 }
 0x8e2   :  { %2832 = vmatmul.mubr.bf16.vlgmr.msra.gmra.mxu0 %v10055_v49  ;;  %2873 = vmatmul.mubr.bf16.vlgmr.msra.gmra.mxu1 %v10055_v49 }
 0x8e3   :  { %2882 = vmatpush1.bf16.msra.mxu0 %v8739_v15  ;;  %2923 = vmatpush1.bf16.msra.mxu1 %v11173_v37  ;;  %v11675_v15 = vld [vmem:[#allocation192_spill] sm:$0xff]  ;;  %v11676_v37 = vld [vmem:[#allocation193_spill] sm:$0xff] }
 0x8e4   :  { %2913 = vmatprep.mubr.bf16.mxu0 %v2798_v17  ;;  %2954 = vmatprep.mubr.bf16.mxu1 %v2798_v17  ;;  %v7394_v17 = vld [vmem:[#allocation7 + $0x1e8] ss:$16 sps:$4 sm:$0xff]  }
 0x8e5   :  { %2883 = vmatprep.subr.bf16.mxu0 %v11174_v29  ;;  %2924 = vmatprep.subr.bf16.mxu1 %v11175_v53  ;;  %v11677_v29 = vld [vmem:[#allocation194_spill] sm:$0xff]  ;;  %v11678_v53 = vld [vmem:[#allocation195_spill] sm:$0xff] }
 0x8e7   :  { %2884 = vmatpush1.bf16.msra.mxu0 %v11176_v63  ;;  %2925 = vmatpush1.bf16.msra.mxu1 %v11177_v6  ;;  %v11679_v63 = vld [vmem:[#allocation196_spill] sm:$0xff]  ;;  %v11680_v6 = vld [vmem:[#allocation197_spill] sm:$0xff] }
 0x8e8   :  { %2885 = vmatprep.subr.bf16.mxu0 %v11178_v28  ;;  %2926 = vmatprep.subr.bf16.mxu1 %v11179_v21  ;;  %v11681_v28 = vld [vmem:[#allocation198_spill] sm:$0xff]  ;;  %v11682_v21 = vld [vmem:[#allocation199_spill] sm:$0xff] }
 0x8eb   :  { %2886 = vmatpush1.bf16.msra.mxu0 %v11180_v20  ;;  %2927 = vmatpush1.bf16.msra.mxu1 %v11181_v19  ;;  %v11683_v20 = vld [vmem:[#allocation200_spill] sm:$0xff]  ;;  %v11684_v19 = vld [vmem:[#allocation201_spill] sm:$0xff] }
 0x8ec   :  { %2887 = vmatprep.subr.bf16.mxu0 %v11182_v62  ;;  %2928 = vmatprep.subr.bf16.mxu1 %v11183_v38  ;;  %v11685_v62 = vld [vmem:[#allocation202_spill] sm:$0xff]  ;;  %v11686_v38 = vld [vmem:[#allocation203_spill] sm:$0xff] }
 0x8ef   :  { %2888 = vmatpush1.bf16.msra.mxu0 %v11184_v2  ;;  %2929 = vmatpush1.bf16.msra.mxu1 %v11185_v8  ;;  %v11687_v2 = vld [vmem:[#allocation204_spill] sm:$0xff]  ;;  %v11688_v8 = vld [vmem:[#allocation205_spill] sm:$0xff] }
 0x8f0   :  { %2889 = vmatprep.subr.bf16.mxu0 %v11274_v52  ;;  %2930 = vmatprep.subr.bf16.mxu1 %v11275_v60  ;;  %v11693_v52 = vld [vmem:[#allocation210_spill] sm:$0xff]  ;;  %v11694_v60 = vld [vmem:[#allocation211_spill] sm:$0xff] }
 0x8f3   :  { %2890 = vmatpush1.bf16.msra.mxu0 %v11276_v44  ;;  %2931 = vmatpush1.bf16.msra.mxu1 %v11277_v51  ;;  %v11695_v44 = vld [vmem:[#allocation212_spill] sm:$0xff]  ;;  %v11696_v51 = vld [vmem:[#allocation213_spill] sm:$0xff] }
 0x8f4   :  { %2891 = vmatprep.subr.bf16.mxu0 %v11278_v43  ;;  %2932 = vmatprep.subr.bf16.mxu1 %v11279_v3  ;;  %v11697_v43 = vld [vmem:[#allocation214_spill] sm:$0xff]  ;;  %v7343_v3 = vld [vmem:[#allocation7 + $0xe0] ss:$16 sps:$4 sm:$0xff]  }
 0x8f7   :  { %2892 = vmatpush1.bf16.msra.mxu0 %v11280_v5  ;;  %2933 = vmatpush1.bf16.msra.mxu1 %v11281_v9  ;;  %v7345_v5 = vld [vmem:[#allocation7 + $0xe4] ss:$16 sps:$4 sm:$0xff]   ;;  %v7346_v9 = vld [vmem:[#allocation7 + $0xe8] ss:$16 sps:$4 sm:$0xff]  }
 0x8f8   :  { %2893 = vmatprep.subr.bf16.mxu0 %v11282_v59  ;;  %2934 = vmatprep.subr.bf16.mxu1 %v11283_v42  ;;  %v7348_v59 = vld [vmem:[#allocation7 + $0xec] ss:$16 sps:$4 sm:$0xff]   ;;  %v7351_v42 = vld [vmem:[#allocation7 + $0xc4] ss:$16 sps:$4 sm:$0xff]  }
 0x8fb   :  { %2894 = vmatpush1.bf16.msra.mxu0 %v11374_v46  ;;  %2935 = vmatpush1.bf16.msra.mxu1 %v11375_v30  ;;  %v7363_v46 = vld [vmem:[#allocation7 + $0x84] ss:$16 sps:$4 sm:$0xff]   ;;  %v7366_v30 = vld [vmem:[#allocation7 + $0x8c] ss:$16 sps:$4 sm:$0xff]  }
 0x8fc   :  { %2895 = vmatprep.subr.bf16.mxu0 %v11286_v48  ;;  %2936 = vmatprep.subr.bf16.mxu1 %v11287_v50  ;;  %v7352_v48 = vld [vmem:[#allocation7 + $0xc8] ss:$16 sps:$4 sm:$0xff]   ;;  %v7357_v50 = vld [vmem:[#allocation7 + $0xa4] ss:$16 sps:$4 sm:$0xff]  }
 0x8ff   :  { %2896 = vmatpush1.bf16.msra.mxu0 %v11288_v11  ;;  %2937 = vmatpush1.bf16.msra.mxu1 %v11376_v16  ;;  %v7360_v11 = vld [vmem:[#allocation7 + $0xac] ss:$16 sps:$4 sm:$0xff]   ;;  %v7361_v16 = vld [vmem:[#allocation7 + $0x80] ss:$16 sps:$4 sm:$0xff]  }
 0x900   :  { %2897 = vmatprep.subr.bf16.mxu0 %v11377_v10  ;;  %2938 = vmatprep.subr.bf16.mxu1 %v11291_v58  ;;  %v7355_v58 = vld [vmem:[#allocation7 + $0xa0] ss:$16 sps:$4 sm:$0xff]   ;;  %v7364_v10 = vld [vmem:[#allocation7 + $0x88] ss:$16 sps:$4 sm:$0xff]  }
 0x903   :  { %2898 = vmatpush2.bf16.msra.mxu0 %v11292_v13  ;;  %2939 = vmatpush2.bf16.msra.mxu1 %v11293_v12  ;;  %v11692_v12 = vld [vmem:[#allocation209_spill] sm:$0xff]  ;;  %v7358_v13 = vld [vmem:[#allocation7 + $0xa8] ss:$16 sps:$4 sm:$0xff]  }
 0x904   :  { %2899 = vmatprep.subr.bf16.mxu0 %v11294_v39  ;;  %2940 = vmatprep.subr.bf16.mxu1 %v11295_v40  ;;  %v11691_v39 = vld [vmem:[#allocation208_spill] sm:$0xff] }
 0x905   :  { %v7354_v40 = vld [vmem:[#allocation7 + $0xcc] ss:$16 sps:$4 sm:$0xff]  }
 0x907   :  { %2900 = vmatpush2.bf16.msra.mxu0 %v11296_v4  ;;  %2941 = vmatpush2.bf16.msra.mxu1 %v11209_v25  ;;  %v11689_v25 = vld [vmem:[#allocation206_spill] sm:$0xff]  ;;  %v7349_v4 = vld [vmem:[#allocation7 + $0xc0] ss:$16 sps:$4 sm:$0xff]  }
 0x908   :  { %2901 = vmatprep.subr.bf16.mxu0 %v11210_v57  ;;  %2942 = vmatprep.subr.bf16.mxu1 %v11675_v15  ;;  %v11690_v57 = vld [vmem:[#allocation207_spill] sm:$0xff]  ;;  %v7402_v15 = vld [vmem:[#allocation7 + $0x1cc] ss:$16 sps:$4 sm:$0xff]  }
 0x90b   :  { %2902 = vmatpush2.bf16.msra.mxu0 %v11676_v37  ;;  %2943 = vmatpush2.bf16.msra.mxu1 %v11677_v29  ;;  %v7397_v37 = vld [vmem:[#allocation7 + $0x1c0] ss:$16 sps:$4 sm:$0xff]   ;;  %v7400_v29 = vld [vmem:[#allocation7 + $0x1c8] ss:$16 sps:$4 sm:$0xff]  }
 0x90c   :  { %2903 = vmatprep.subr.bf16.mxu0 %v11678_v53  ;;  %2944 = vmatprep.subr.bf16.mxu1 %v11679_v63  ;;  %v7405_v53 = vld [vmem:[#allocation7 + $0x1a4] ss:$16 sps:$4 sm:$0xff]   ;;  %v7408_v63 = vld [vmem:[#allocation7 + $0x1ac] ss:$16 sps:$4 sm:$0xff]  }
 0x90f   :  { %2904 = vmatpush2.bf16.msra.mxu0 %v11680_v6  ;;  %2945 = vmatpush2.bf16.msra.mxu1 %v11681_v28  ;;  %v7403_v6 = vld [vmem:[#allocation7 + $0x1a0] ss:$16 sps:$4 sm:$0xff]   ;;  %v7406_v28 = vld [vmem:[#allocation7 + $0x1a8] ss:$16 sps:$4 sm:$0xff]  }
 0x910   :  { %2905 = vmatprep.subr.bf16.mxu0 %v11682_v21  ;;  %2946 = vmatprep.subr.bf16.mxu1 %v11683_v20  ;;  %v7411_v21 = vld [vmem:[#allocation7 + $0x184] ss:$16 sps:$4 sm:$0xff]   ;;  %v7409_v20 = vld [vmem:[#allocation7 + $0x180] ss:$16 sps:$4 sm:$0xff]  }
 0x913   :  { %2906 = vmatpush2.bf16.msra.mxu0 %v11684_v19  ;;  %2947 = vmatpush2.bf16.msra.mxu1 %v11685_v62  ;;  %v7412_v19 = vld [vmem:[#allocation7 + $0x188] ss:$16 sps:$4 sm:$0xff]   ;;  %v7414_v62 = vld [vmem:[#allocation7 + $0x18c] ss:$16 sps:$4 sm:$0xff]  }
 0x914   :  { %2907 = vmatprep.subr.bf16.mxu0 %v11686_v38  ;;  %2948 = vmatprep.subr.bf16.mxu1 %v11687_v2  ;;  %v7417_v38 = vld [vmem:[#allocation7 + $0x164] ss:$16 sps:$4 sm:$0xff]   ;;  %v7420_v2 = vld [vmem:[#allocation7 + $0x16c] ss:$16 sps:$4 sm:$0xff]  }
 0x917   :  { %2908 = vmatpush2.bf16.msra.mxu0 %v11688_v8  ;;  %2949 = vmatpush2.bf16.msra.mxu1 %v11689_v25  ;;  %v7415_v8 = vld [vmem:[#allocation7 + $0x160] ss:$16 sps:$4 sm:$0xff]   ;;  %v7418_v25 = vld [vmem:[#allocation7 + $0x168] ss:$16 sps:$4 sm:$0xff]  }
 0x918   :  { %2909 = vmatprep.subr.bf16.mxu0 %v11690_v57  ;;  %2950 = vmatprep.subr.bf16.mxu1 %v11691_v39  ;;  %v7423_v57 = vld [vmem:[#allocation7 + $0x144] ss:$16 sps:$4 sm:$0xff]   ;;  %v7426_v39 = vld [vmem:[#allocation7 + $0x14c] ss:$16 sps:$4 sm:$0xff]  }
 0x91b   :  { %2910 = vmatpush2.bf16.msra.mxu0 %v11692_v12  ;;  %2951 = vmatpush2.bf16.msra.mxu1 %v11693_v52  ;;  %v7421_v12 = vld [vmem:[#allocation7 + $0x140] ss:$16 sps:$4 sm:$0xff]   ;;  %v7424_v52 = vld [vmem:[#allocation7 + $0x148] ss:$16 sps:$4 sm:$0xff]  }
 0x91c   :  { %2911 = vmatprep.subr.bf16.mxu0 %v11694_v60  ;;  %2952 = vmatprep.subr.bf16.mxu1 %v11695_v44  ;;  %v7429_v60 = vld [vmem:[#allocation7 + $0x124] ss:$16 sps:$4 sm:$0xff]   ;;  %v7432_v44 = vld [vmem:[#allocation7 + $0x12c] ss:$16 sps:$4 sm:$0xff]  }
 0x91f   :  { %2912 = vmatpush2.bf16.msra.mxu0 %v11696_v51  ;;  %2953 = vmatpush2.bf16.msra.mxu1 %v11697_v43  ;;  %v7427_v51 = vld [vmem:[#allocation7 + $0x120] ss:$16 sps:$4 sm:$0xff]   ;;  %v7430_v43 = vld [vmem:[#allocation7 + $0x128] ss:$16 sps:$4 sm:$0xff]  }
 0x920   :  { %3460 = vmatprep.subr.bf16.mxu0 %v7345_v5  ;;  %3533 = vmatprep.subr.bf16.mxu1 %v7348_v59  ;;  %v7438_v5 = vld [vmem:[#allocation7 + $0x10c] ss:$16 sps:$4 sm:$0xff]   ;;  %v7436_v59 = vld [vmem:[#allocation7 + $0x108] ss:$16 sps:$4 sm:$0xff]  }
 0x922   :  { %2914 = vmatmul.mubr.bf16.vlgmr.msra.gmra.mxu0 %v10055_v49  ;;  %2955 = vmatmul.mubr.bf16.vlgmr.msra.gmra.mxu1 %v10055_v49  ;;  %v7399_v49 = vld [vmem:[#allocation7 + $0x1c4] ss:$16 sps:$4 sm:$0xff]  }
 0x923   :  { %3461 = vmatpush1.bf16.msra.mxu0 %v7343_v3  ;;  %3534 = vmatpush1.bf16.msra.mxu1 %v7346_v9  ;;  %v7435_v3 = vld [vmem:[#allocation7 + $0x104] ss:$16 sps:$4 sm:$0xff]   ;;  %v7433_v9 = vld [vmem:[#allocation7 + $0x100] ss:$16 sps:$4 sm:$0xff]  }
 0x924   :  { %3462 = vmatprep.subr.bf16.mxu0 %v7351_v42  ;;  %3535 = vmatprep.subr.bf16.mxu1 %v7354_v40 }
 0x927   :  { %3463 = vmatpush1.bf16.msra.mxu0 %v7349_v4  ;;  %3536 = vmatpush1.bf16.msra.mxu1 %v7352_v48  ;;  %v11698_v4 = vld [vmem:[#allocation92_spill] sm:$0xff]  ;;  %v11699_v48 = vld [vmem:[#allocation105_spill] sm:$0xff] }
 0x928   :  { %3464 = vmatprep.subr.bf16.mxu0 %v7357_v50  ;;  %3537 = vmatprep.subr.bf16.mxu1 %v7360_v11  ;;  %v294_v50 = vadd.f32 %v11699_v48, %v11698_v4  ;;  %v11700_v11 = vld [vmem:[#allocation116_spill] sm:$0xff] }
 0x92b   :  { %3465 = vmatpush1.bf16.msra.mxu0 %v7355_v58  ;;  %3538 = vmatpush1.bf16.msra.mxu1 %v7358_v13  ;;  %v11701_v58 = vld [vmem:[#allocation138_spill] sm:$0xff] }
 0x92c   :  { %3466 = vmatprep.subr.bf16.mxu0 %v7363_v46  ;;  %3539 = vmatprep.subr.bf16.mxu1 %v7366_v30  ;;  %v367_v13 = vadd.f32 %v11701_v58, %v11700_v11  ;;  %v11702_v46 = vld [vmem:[#allocation103_spill] sm:$0xff] }
 0x92f   :  { %3467 = vmatpush1.bf16.msra.mxu0 %v7361_v16  ;;  %3540 = vmatpush1.bf16.msra.mxu1 %v7364_v10  ;;  %v11703_v16 = vld [vmem:[#allocation137_spill] sm:$0xff] }
 0x930   :  { %3468 = vmatprep.subr.bf16.mxu0 %v7369_v41  ;;  %3541 = vmatprep.subr.bf16.mxu1 %v7372_v34 }
 0x933   :  { %3469 = vmatpush1.bf16.msra.mxu0 %v7367_v45  ;;  %3542 = vmatpush1.bf16.msra.mxu1 %v7370_v36 }
 0x934   :  { %3470 = vmatprep.subr.bf16.mxu0 %v7375_v56  ;;  %3543 = vmatprep.subr.bf16.mxu1 %v7378_v35 }
 0x937   :  { %3471 = vmatpush1.bf16.msra.mxu0 %v7373_v1  ;;  %3544 = vmatpush1.bf16.msra.mxu1 %v7376_v26 }
 0x938   :  { %3472 = vmatprep.subr.bf16.mxu0 %v7381_v14  ;;  %3545 = vmatprep.subr.bf16.mxu1 %v7384_v18 }
 0x93b   :  { %3473 = vmatpush1.bf16.msra.mxu0 %v7379_v47  ;;  %3546 = vmatpush1.bf16.msra.mxu1 %v7382_v33 }
 0x93c   :  { %3474 = vmatprep.subr.bf16.mxu0 %v7387_v55  ;;  %3547 = vmatprep.subr.bf16.mxu1 %v7390_v24 }
 0x93f   :  { %3475 = vmatpush1.bf16.msra.mxu0 %v7385_v61  ;;  %3548 = vmatpush1.bf16.msra.mxu1 %v7388_v22 }
 0x940   :  { %3476 = vmatprep.subr.bf16.mxu0 %v7393_v54  ;;  %3549 = vmatprep.subr.bf16.mxu1 %v7396_v27 }
 0x943   :  { %3477 = vmatpush2.bf16.msra.mxu0 %v7391_v0  ;;  %3550 = vmatpush2.bf16.msra.mxu1 %v7394_v17 }
 0x944   :  { %3478 = vmatprep.subr.bf16.mxu0 %v7399_v49  ;;  %3551 = vmatprep.subr.bf16.mxu1 %v7402_v15 }
 0x947   :  { %3479 = vmatpush2.bf16.msra.mxu0 %v7397_v37  ;;  %3552 = vmatpush2.bf16.msra.mxu1 %v7400_v29 }
 0x948   :  { %3480 = vmatprep.subr.bf16.mxu0 %v7405_v53  ;;  %3553 = vmatprep.subr.bf16.mxu1 %v7408_v63 }
 0x94b   :  { %3481 = vmatpush2.bf16.msra.mxu0 %v7403_v6  ;;  %3554 = vmatpush2.bf16.msra.mxu1 %v7406_v28 }
 0x94c   :  { %3482 = vmatprep.subr.bf16.mxu0 %v7411_v21  ;;  %3555 = vmatprep.subr.bf16.mxu1 %v7414_v62  ;;  %v11705_v21 = vld [vmem:[#allocation109_spill] sm:$0xff] }
 0x94f   :  { %3483 = vmatpush2.bf16.msra.mxu0 %v7409_v20  ;;  %3556 = vmatpush2.bf16.msra.mxu1 %v7412_v19 }
 0x950   :  { %3484 = vmatprep.subr.bf16.mxu0 %v7417_v38  ;;  %3557 = vmatprep.subr.bf16.mxu1 %v7420_v2  ;;  %v11706_v2 = vld [vmem:[#allocation110_spill] sm:$0xff] }
 0x953   :  { %3485 = vmatpush2.bf16.msra.mxu0 %v7415_v8  ;;  %3558 = vmatpush2.bf16.msra.mxu1 %v7418_v25 }
 0x954   :  { %3486 = vmatprep.subr.bf16.mxu0 %v7423_v57  ;;  %3559 = vmatprep.subr.bf16.mxu1 %v7426_v39 }
 0x957   :  { %3487 = vmatpush2.bf16.msra.mxu0 %v7421_v12  ;;  %3560 = vmatpush2.bf16.msra.mxu1 %v7424_v52  ;;  %v11707_v52 = vld [vmem:[#allocation141_spill] sm:$0xff] }
 0x958   :  { %3488 = vmatprep.subr.bf16.mxu0 %v7429_v60  ;;  %3561 = vmatprep.subr.bf16.mxu1 %v7432_v44  ;;  %v11708_v44 = vld [vmem:[#allocation140_spill] sm:$0xff] }
 0x95b   :  { %3489 = vmatpush2.bf16.msra.mxu0 %v7427_v51  ;;  %3562 = vmatpush2.bf16.msra.mxu1 %v7430_v43 }
 0x95c   :  { %3490 = vmatprep.subr.bf16.mxu0 %v7435_v3  ;;  %3563 = vmatprep.subr.bf16.mxu1 %v7438_v5 }
 0x95f   :  { %3491 = vmatpush2.bf16.msra.mxu0 %v7433_v9  ;;  %3564 = vmatpush2.bf16.msra.mxu1 %v7436_v59 }
 0x9a2   :  { %v2833_v42 = vpop.f32.mrf.mxu0  ;;  %v2874_v40 = vpop.f32.mrf.mxu1 }
 0x9a3   :  { %v2967_v30 = vadd.f32 %v2833_v42, %v11702_v46  ;;  %v2969_v10 = vadd.f32 %v2874_v40, %v11703_v16 }
 0x9a4   :  { %v2835_v41 = vpop.f32.mrf.mxu0  ;;  %v2876_v34 = vpop.f32.mrf.mxu1 }
 0x9a5   :  { %v6916_v45 = vmul.f32 -1.442695, %v2967_v30  ;;  %v2968_v36 = vadd.f32 %v2835_v41, %v294_v50  ;;  %v2970_v56 = vadd.f32 %v2876_v34, %v367_v13  ;;  %v11709_v41 = vld [vmem:[#allocation152_spill] sm:$0xff]  ;;  %v11710_v34 = vld [vmem:[#allocation98_spill] sm:$0xff] }
 0x9a6   :  { %v2837_v35 = vpop.f32.mrf.mxu0  ;;  %v2878_v1 = vpop.f32.mrf.mxu1 }
 0x9a7   :  { %7807 = vpow2.f32 %v6916_v45  ;;  %v6917_v26 = vmul.f32 -1.442695, %v2968_v36  ;;  %v6918_v47 = vmul.f32 -1.442695, %v2970_v56  ;;  %v3045_v45 = vpack.c.bf16 %v11710_v34, %v11709_v41  ;;  %v11711_v36 = vld [vmem:[#allocation157_spill] sm:$0xff]  ;;  %v11712_v56 = vld [vmem:[#allocation155_spill] sm:$0xff] }
 0x9a8   :  { %v2838_v14 = vpop.f32.mrf.mxu0  ;;  %v2879_v18 = vpop.f32.mrf.mxu1  ;;  %v3048_v35 = vpack.c.bf16 %v11712_v56, %v11711_v36  ;;  %v11714_v1 = vld [vmem:[#allocation134_spill] sm:$0xff] }
 0x9a9   :  { %7809 = vpow2.f32 %v6917_v26  ;;  %v11715_v14 = vld [vmem:[#allocation136_spill] sm:$0xff] }
 0x9aa   :  { %7811 = vtanh.f32 %v2969_v10  ;;  %v11716_v18 = vld [vmem:[#allocation112_spill] sm:$0xff] }
 0x9ab   :  { %7813 = vpow2.f32 %v6918_v47  ;;  %v3050_v47 = vpack.c.bf16 %v11716_v18, %v11715_v14 }
 0x9b4   :  { %v7808_v33 = vpop.eup %7807 }
 0x9b5   :  { %v2982_v55 = vadd.f32 1.0, %v7808_v33  ;;  %v11718_v33 = vld [vmem:[#allocation156_spill] sm:$0xff] }
 0x9b6   :  { %v7810_v24 = vpop.eup %7809 }
 0x9b7   :  { %7815 = vrcp.f32 %v2982_v55  ;;  %v2988_v61 = vadd.f32 1.0, %v7810_v24  ;;  %v7812_v22 = vpop.eup %7811  ;;  %v11719_v24 = vld [vmem:[#allocation113_spill] sm:$0xff] }
 0x9b8   :  { %v7814_v54 = vpop.eup %7813 }
 0x9b9   :  { %7817 = vrcp.f32 %v2988_v61  ;;  %v2995_v49 = vadd.f32 1.0, %v7814_v54  ;;  %v11720_v61 = vld [vmem:[#allocation153_spill] sm:$0xff] }
 0x9bb   :  { %7819 = vrcp.f32 %v2995_v49  ;;  %v10158_v49 = vld [vmem:[#allocation11 + $0xe0] ss:$16 sps:$4 sm:$0xff]  }
 0x9c4   :  { %v7816_v27 = vpop.eup %7815 }
 0x9c5   :  { %v2999_v0 = vmul.f32 %v7816_v27, %v7812_v22  ;;  %v3052_v22 = vpack.c.bf16 %v11720_v61, %v11719_v24  ;;  %v11721_v27 = vmov 0  }
 0x9c6   :  { %v7818_v17 = vpop.eup %7817 }
 0x9c7   :  { %v2998_v15 = vmul.f32 %v7818_v17, %v10034_v31  ;;  %v10156_v17 = vld [vmem:[#allocation11 + $0xec] ss:$16 sps:$4 sm:$0xff]  }
 0x9c8   :  { %v7820_v29 = vpop.eup %7819  ;;  %3904 = vmatprep.subr.bf16.mxu1 %v10156_v17 }
 0x9c9   :  { %v3000_v37 = vadd.f32 %v2999_v0, %v2998_v15  ;;  %v10154_v0 = vld [vmem:[#allocation11 + $0xe4] ss:$16 sps:$4 sm:$0xff]   ;;  %v10160_v15 = vld [vmem:[#allocation11 + $0xe8] ss:$16 sps:$4 sm:$0xff]  }
 0x9ca   :  { %3863 = vmatprep.subr.bf16.mxu0 %v10154_v0 }
 0x9cb   :  { %7821 = vtanh.f32 %v3000_v37  ;;  %v10168_v37 = vld [vmem:[#allocation11 + $0xcc] ss:$16 sps:$4 sm:$0xff]  }
 0x9d8   :  { %v7822_v53 = vpop.eup %7821 }
 0x9d9   :  { %v10130_v63 = vmul.f32 %v7822_v53, %v7820_v29  ;;  %v10170_v29 = vld [vmem:[#allocation11 + $0xc0] ss:$16 sps:$4 sm:$0xff]   ;;  %v10172_v53 = vld [vmem:[#allocation11 + $0xc8] ss:$16 sps:$4 sm:$0xff]  }
 0x9db   :  { %11704 = vst [vmem:[#allocation158_spill] sm:$0xff] %v10130_v63  ;;  %v3051_v54 = vpack.c.bf16 %v10130_v63, %v10047_v7  ;;  %v10166_v7 = vld [vmem:[#allocation11 + $0xc4] ss:$16 sps:$4 sm:$0xff]  }
 0x9e2   :  { %v2915_v6 = vpop.f32.mrf.mxu0  ;;  %v2956_v28 = vpop.f32.mrf.mxu1 }
 0x9e3   :  { %v2975_v20 = vadd.f32 %v2915_v6, %v11705_v21  ;;  %v2977_v51 = vadd.f32 %v2956_v28, %v11708_v44  ;;  %v10178_v6 = vld [vmem:[#allocation11 + $0xa4] ss:$16 sps:$4 sm:$0xff]   ;;  %v10180_v28 = vld [vmem:[#allocation11 + $0xac] ss:$16 sps:$4 sm:$0xff]   ;;  %v10182_v21 = vld [vmem:[#allocation11 + $0xa0] ss:$16 sps:$4 sm:$0xff]  }
 0x9e4   :  { %v2917_v19 = vpop.f32.mrf.mxu0  ;;  %v2958_v62 = vpop.f32.mrf.mxu1  ;;  %v10224_v44 = vld [vmem:[#allocation11 + $0x24] ss:$16 sps:$4 sm:$0xff]  }
 0x9e5   :  { %v6919_v38 = vmul.f32 -1.442695, %v2975_v20  ;;  %v2976_v8 = vadd.f32 %v2917_v19, %v11706_v2  ;;  %v2978_v60 = vadd.f32 %v2958_v62, %v11707_v52  ;;  %v10184_v20 = vld [vmem:[#allocation11 + $0xa8] ss:$16 sps:$4 sm:$0xff]   ;;  %v10190_v19 = vld [vmem:[#allocation11 + $0x84] ss:$16 sps:$4 sm:$0xff]  }
 0x9e6   :  { %v2919_v25 = vpop.f32.mrf.mxu0  ;;  %v2960_v57 = vpop.f32.mrf.mxu1  ;;  %v10192_v62 = vld [vmem:[#allocation11 + $0x8c] ss:$16 sps:$4 sm:$0xff]   ;;  %v10196_v2 = vld [vmem:[#allocation11 + $0x88] ss:$16 sps:$4 sm:$0xff]   ;;  %v10218_v52 = vld [vmem:[#allocation11 + $0x40] ss:$16 sps:$4 sm:$0xff]  }
 0x9e7   :  { %7823 = vpow2.f32 %v6919_v38  ;;  %v6920_v31 = vmul.f32 -1.442695, %v2976_v8  ;;  %v6921_v43 = vmul.f32 -1.442695, %v2978_v60  ;;  %v10194_v38 = vld [vmem:[#allocation11 + $0x80] ss:$16 sps:$4 sm:$0xff]  }
 0x9e8   :  { %v2920_v39 = vpop.f32.mrf.mxu0  ;;  %v2961_v12 = vpop.f32.mrf.mxu1  ;;  %v10202_v8 = vld [vmem:[#allocation11 + $0x64] ss:$16 sps:$4 sm:$0xff]   ;;  %v10204_v25 = vld [vmem:[#allocation11 + $0x6c] ss:$16 sps:$4 sm:$0xff]   ;;  %v10206_v57 = vld [vmem:[#allocation11 + $0x60] ss:$16 sps:$4 sm:$0xff]  }
 0x9e9   :  { %7825 = vpow2.f32 %v6920_v31  ;;  %v10208_v31 = vld [vmem:[#allocation11 + $0x68] ss:$16 sps:$4 sm:$0xff]   ;;  %v10210_v39 = vld [vmem:[#allocation11 + $0x44] ss:$16 sps:$4 sm:$0xff]   ;;  %v10212_v12 = vld [vmem:[#allocation11 + $0x4c] ss:$16 sps:$4 sm:$0xff]  }
 0x9ea   :  { %7827 = vtanh.f32 %v2977_v51  ;;  %v10220_v60 = vld [vmem:[#allocation11 + $0x48] ss:$16 sps:$4 sm:$0xff]   ;;  %v10226_v51 = vld [vmem:[#allocation11 + $0x2c] ss:$16 sps:$4 sm:$0xff]  }
 0x9eb   :  { %7829 = vpow2.f32 %v6921_v43  ;;  %v10230_v43 = vld [vmem:[#allocation11 + $0x20] ss:$16 sps:$4 sm:$0xff]  }
 0x9f4   :  { %v7824_v3 = vpop.eup %7823 }
 0x9f5   :  { %v3006_v5 = vadd.f32 1.0, %v7824_v3  ;;  %v10232_v3 = vld [vmem:[#allocation11 + $0x28] ss:$16 sps:$4 sm:$0xff]  }
 0x9f6   :  { %v7826_v9 = vpop.eup %7825 }
 0x9f7   :  { %7831 = vrcp.f32 %v3006_v5  ;;  %v3012_v59 = vadd.f32 1.0, %v7826_v9  ;;  %v7828_v42 = vpop.eup %7827  ;;  %v10236_v5 = vld [vmem:[#allocation11 + $0x4] ss:$16 sps:$4 sm:$0xff]   ;;  %v10238_v9 = vld [vmem:[#allocation11 + $0xc] ss:$16 sps:$4 sm:$0xff]  }
 0x9f8   :  { %v7830_v40 = vpop.eup %7829 }
 0x9f9   :  { %7833 = vrcp.f32 %v3012_v59  ;;  %v3019_v11 = vadd.f32 1.0, %v7830_v40  ;;  %v10242_v59 = vld [vmem:[#allocation11] ss:$16 sps:$4 sm:$0xff]  }
 0x9fa   :  { %v3118_v40 = vld [vmem:[#allocation12 + $0x1] ss:$2 sm:$0xf] }
 0x9fb   :  { %7835 = vrcp.f32 %v3019_v11 }
 0xa04   :  { %v7832_v4 = vpop.eup %7831 }
 0xa05   :  { %v3023_v48 = vmul.f32 %v7832_v4, %v7828_v42  ;;  %v10244_v42 = vld [vmem:[#allocation11 + $0x8] ss:$16 sps:$4 sm:$0xff]  }
 0xa06   :  { %v7834_v50 = vpop.eup %7833  ;;  %v11722_v4 = vld [vmem:[#allocation90_spill] sm:$0xff] }
 0xa07   :  { %v3022_v58 = vmul.f32 %v7834_v50, %v10044_v32  ;;  %v11713_v32 = vld [vmem:[#allocation96_spill] sm:$0xff]  ;;  %v11723_v50 = vld [vmem:[#allocation91_spill] sm:$0xff] }
 0xa08   :  { %v7836_v46 = vpop.eup %7835  ;;  %v3047_v26 = vpack.c.bf16 %v11714_v1, %v11713_v32  ;;  %v10256_v11 = vrot.slane %v3118_v40, %v11723_v50  ;;  %v11725_v32 = vld [vmem:[#allocation107_spill] sm:$0xff] }
 0xa09   :  { %v3024_v13 = vadd.f32 %v3023_v48, %v3022_v58  ;;  %v10253_v48 = vrot.slane %v3118_v40, %v11722_v4  ;;  %v10269_v1 = vrot.slane %v3118_v40, %v11725_v32 }
 0xa0a   :  { %11724 = vst [vmem:[#allocation159_spill] sm:$0xff] %v10256_v11 }
 0xa0b   :  { %7837 = vtanh.f32 %v3024_v13 }
 0xa18   :  { %v7838_v30 = vpop.eup %7837 }
 0xa19   :  { %v3026_v16 = vmul.f32 %v7838_v30, %v7836_v46 }
 0xa1b   :  { %v3046_v10 = vpack.c.bf16 %v10049_v23, %v3026_v16  ;;  %v11717_v23 = vld [vmem:[#allocation89_spill] sm:$0xff] }
 0xa1c   :  { %v3049_v55 = vpack.c.bf16 %v11718_v33, %v11717_v23 }
 0xa1d   :  { %3492 = vmatprep.mubr.bf16.mxu0 %v3046_v10  ;;  %3565 = vmatprep.mubr.bf16.mxu1 %v3046_v10 }
 0xa1e   :  { %3493 = vmatmul.mubr.bf16.vlgmr.msra.gmra.mxu0 %v3045_v45  ;;  %3566 = vmatmul.mubr.bf16.vlgmr.msra.gmra.mxu1 %v3045_v45 }
 0xa1f   :  { %3502 = vmatprep.mubr.bf16.mxu0 %v3048_v35  ;;  %3575 = vmatprep.mubr.bf16.mxu1 %v3048_v35 }
 0xa20   :  { %3864 = vmatpush1.bf16.msra.mxu0 %v10158_v49  ;;  %3905 = vmatpush1.bf16.msra.mxu1 %v10160_v15 }
 0xa21   :  { %3865 = vmatprep.subr.bf16.mxu0 %v10166_v7  ;;  %3906 = vmatprep.subr.bf16.mxu1 %v10168_v37 }
 0xa24   :  { %3866 = vmatpush1.bf16.msra.mxu0 %v10170_v29  ;;  %3907 = vmatpush1.bf16.msra.mxu1 %v10172_v53 }
 0xa25   :  { %3867 = vmatprep.subr.bf16.mxu0 %v10178_v6  ;;  %3908 = vmatprep.subr.bf16.mxu1 %v10180_v28 }
 0xa26   :  { %3503 = vmatmul.mubr.bf16.gmra.mxu0 %v3047_v26  ;;  %3576 = vmatmul.mubr.bf16.gmra.mxu1 %v3047_v26  ;;  %v11726_v26 = vld [vmem:[#allocation111_spill] sm:$0xff] }
 0xa27   :  { %3512 = vmatprep.mubr.bf16.mxu0 %v3050_v47  ;;  %3585 = vmatprep.mubr.bf16.mxu1 %v3050_v47  ;;  %v10272_v14 = vrot.slane %v3118_v40, %v11726_v26 }
 0xa28   :  { %3868 = vmatpush1.bf16.msra.mxu0 %v10182_v21  ;;  %3909 = vmatpush1.bf16.msra.mxu1 %v10184_v20 }
 0xa29   :  { %3869 = vmatprep.subr.bf16.mxu0 %v10190_v19  ;;  %3910 = vmatprep.subr.bf16.mxu1 %v10192_v62 }
 0xa2c   :  { %3870 = vmatpush1.bf16.msra.mxu0 %v10194_v38  ;;  %3911 = vmatpush1.bf16.msra.mxu1 %v10196_v2 }
 0xa2d   :  { %3871 = vmatprep.subr.bf16.mxu0 %v10202_v8  ;;  %3912 = vmatprep.subr.bf16.mxu1 %v10204_v25 }
 0xa2e   :  { %3513 = vmatmul.mubr.bf16.gmra.mxu0 %v3049_v55  ;;  %3586 = vmatmul.mubr.bf16.gmra.mxu1 %v3049_v55 }
 0xa2f   :  { %3522 = vmatprep.mubr.bf16.mxu0 %v3052_v22  ;;  %3595 = vmatprep.mubr.bf16.mxu1 %v3052_v22 }
 0xa30   :  { %3872 = vmatpush1.bf16.msra.mxu0 %v10206_v57  ;;  %3913 = vmatpush1.bf16.msra.mxu1 %v10208_v31 }
 0xa31   :  { %3873 = vmatprep.subr.bf16.mxu0 %v10210_v39  ;;  %3914 = vmatprep.subr.bf16.mxu1 %v10212_v12 }
 0xa34   :  { %3874 = vmatpush1.bf16.msra.mxu0 %v10218_v52  ;;  %3915 = vmatpush1.bf16.msra.mxu1 %v10220_v60 }
 0xa35   :  { %3875 = vmatprep.subr.bf16.mxu0 %v10224_v44  ;;  %3916 = vmatprep.subr.bf16.mxu1 %v10226_v51 }
 0xa36   :  { %3523 = vmatmul.mubr.bf16.gmra.mxu0 %v3051_v54  ;;  %3596 = vmatmul.mubr.bf16.gmra.mxu1 %v3051_v54 }
 0xa37   :  { %3895 = vmatprep.mubr.bf16.mxu0 %v11721_v27  ;;  %3936 = vmatprep.mubr.bf16.mxu1 %v11721_v27 }
 0xa38   :  { %3876 = vmatpush1.bf16.msra.mxu0 %v10230_v43  ;;  %3917 = vmatpush1.bf16.msra.mxu1 %v10232_v3 }
 0xa39   :  { %3877 = vmatprep.subr.bf16.mxu0 %v10236_v5  ;;  %3918 = vmatprep.subr.bf16.mxu1 %v10238_v9 }
 0xa3c   :  { %3878 = vmatpush1.bf16.msra.mxu0 %v10242_v59  ;;  %3919 = vmatpush1.bf16.msra.mxu1 %v10244_v42 }
 0xa3d   :  { %3978 = vmatprep.subr.bf16.mxu0 %v10154_v0  ;;  %4019 = vmatprep.subr.bf16.mxu1 %v10156_v17 }
 0xade   :  { %v3494_v58 = vpop.f32.mrf.mxu0  ;;  %v3567_v13 = vpop.f32.mrf.mxu1 }
 0xadf   :  { %v3495_v46 = vadd.f32 %v3494_v58, %v10253_v48 }
 0xae0   :  { %v3496_v30 = vpop.f32.mrf.mxu0  ;;  %v3569_v16 = vpop.f32.mrf.mxu1 }
 0xae1   :  { %v6986_v10 = vmul.f32 -1.442695, %v3495_v46  ;;  %v3497_v41 = vadd.f32 %v3496_v30, %v10256_v11  ;;  %v3570_v54 = vadd.f32 %v3569_v16, %v10272_v14 }
 0xae2   :  { %v10260_v34 = vpop.f32.mrf.mxu0  ;;  %v10262_v45 = vpop.f32.mrf.mxu1 }
 0xae3   :  { %7839 = vpow2.f32 %v6986_v10  ;;  %v6987_v36 = vmul.f32 -1.442695, %v3497_v41 }
 0xae4   :  { %v10264_v56 = vpop.f32.mrf.mxu0  ;;  %v10266_v35 = vpop.f32.mrf.mxu1 }
 0xae5   :  { %7841 = vpow2.f32 %v6987_v36 }
 0xae6   :  { %v3504_v18 = vpop.f32.mrf.mxu0  ;;  %v3577_v47 = vpop.f32.mrf.mxu1 }
 0xae7   :  { %v10275_v23 = vadd.f32 %v3504_v18, %v10253_v48  ;;  %v10278_v33 = vadd.f32 %v3577_v47, %v10269_v1  ;;  %v6988_v47 = vmul.f32 -1.442695, %v3570_v54 }
 0xae8   :  { %v3506_v55 = vpop.f32.mrf.mxu0  ;;  %v3579_v24 = vpop.f32.mrf.mxu1 }
 0xae9   :  { %v10281_v61 = vadd.f32 %v3506_v55, %v10256_v11  ;;  %v10284_v22 = vadd.f32 %v3579_v24, %v10272_v14  ;;  %7843 = vpow2.f32 %v6988_v47 }
 0xaea   :  { %v3508_v40 = vpop.f32.mrf.mxu0  ;;  %v3581_v58 = vpop.f32.mrf.mxu1 }
 0xaeb   :  { %v10288_v46 = vadd.f32 %v3508_v40, %v10253_v48  ;;  %v10291_v30 = vadd.f32 %v3581_v58, %v10269_v1  ;;  %v3568_v58 = vadd.f32 %v3567_v13, %v10269_v1 }
 0xaec   :  { %v3510_v10 = vpop.f32.mrf.mxu0  ;;  %v3583_v41 = vpop.f32.mrf.mxu1 }
 0xaed   :  { %11727 = vst [vmem:[#allocation160_spill] sm:$0xff] %v10291_v30  ;;  %v10294_v36 = vadd.f32 %v3510_v10, %v10256_v11  ;;  %v10297_v18 = vadd.f32 %v3583_v41, %v10272_v14 }
 0xaee   :  { %v3514_v55 = vpop.f32.mrf.mxu0  ;;  %v3587_v24 = vpop.f32.mrf.mxu1 }
 0xaef   :  { %v10300_v16 = vadd.f32 %v3514_v55, %v10253_v48  ;;  %v10303_v40 = vadd.f32 %v3587_v24, %v10269_v1 }
 0xaf0   :  { %v7840_v32 = vpop.eup %7839  ;;  %v3516_v26 = vpop.f32.mrf.mxu0 }
 0xaf1   :  { %11728 = vst [vmem:[#allocation161_spill] sm:$0xff] %v10300_v16  ;;  %11729 = vst [vmem:[#allocation162_spill] sm:$0xff] %v10303_v40  ;;  %v3589_v50 = vpop.f32.mrf.mxu1  ;;  %v3677_v4 = vadd.f32 1.0, %v7840_v32  ;;  %v10307_v10 = vadd.f32 %v3516_v26, %v10256_v11 }
 0xaf2   :  { %v10310_v41 = vadd.f32 %v3589_v50, %v10272_v14  ;;  %v7842_v54 = vpop.eup %7841  ;;  %v3518_v63 = vpop.f32.mrf.mxu0 }
 0xaf3   :  { %11730 = vst [vmem:[#allocation163_spill] sm:$0xff] %v10307_v10  ;;  %v3591_v55 = vpop.f32.mrf.mxu1  ;;  %7845 = vrcp.f32 %v3677_v4  ;;  %v3683_v16 = vadd.f32 1.0, %v7842_v54  ;;  %v10313_v24 = vadd.f32 %v3518_v63, %v10253_v48 }
 0xaf4   :  { %11731 = vst [vmem:[#allocation164_spill] sm:$0xff] %v10310_v41  ;;  %v10316_v13 = vadd.f32 %v3591_v55, %v10269_v1  ;;  %7847 = vtanh.f32 %v3568_v58  ;;  %v3520_v32 = vpop.f32.mrf.mxu0 }
 0xaf5   :  { %11732 = vst [vmem:[#allocation165_spill] sm:$0xff] %v10313_v24  ;;  %v3593_v40 = vpop.f32.mrf.mxu1  ;;  %7849 = vrcp.f32 %v3683_v16  ;;  %v10319_v26 = vadd.f32 %v3520_v32, %v10256_v11 }
 0xaf6   :  { %11733 = vst [vmem:[#allocation166_spill] sm:$0xff] %v10316_v13  ;;  %v10322_v50 = vadd.f32 %v3593_v40, %v10272_v14  ;;  %v3524_v47 = vpop.f32.mrf.mxu0 }
 0xaf7   :  { %11734 = vst [vmem:[#allocation190_spill] sm:$0xff] %v10319_v26  ;;  %v3597_v41 = vpop.f32.mrf.mxu1  ;;  %v10325_v4 = vadd.f32 %v3524_v47, %v10253_v48  ;;  %v7844_v47 = vpop.eup %7843 }
 0xaf8   :  { %11735 = vst [vmem:[#allocation191_spill] sm:$0xff] %v10322_v50  ;;  %v10328_v63 = vadd.f32 %v3597_v41, %v10269_v1  ;;  %v3526_v54 = vpop.f32.mrf.mxu0  ;;  %v3690_v26 = vadd.f32 1.0, %v7844_v47 }
 0xaf9   :  { %11736 = vst [vmem:[#allocation100_spill] sm:$0xff] %v10325_v4  ;;  %v3599_v55 = vpop.f32.mrf.mxu1  ;;  %v10331_v58 = vadd.f32 %v3526_v54, %v10256_v11 }
 0xafa   :  { %11737 = vst [vmem:[#allocation117_spill] sm:$0xff] %v10328_v63  ;;  %v10334_v16 = vadd.f32 %v3599_v55, %v10272_v14  ;;  %v3528_v32 = vpop.f32.mrf.mxu0  ;;  %7851 = vrcp.f32 %v3690_v26 }
 0xafb   :  { %11738 = vst [vmem:[#allocation102_spill] sm:$0xff] %v10331_v58  ;;  %v3601_v13 = vpop.f32.mrf.mxu1  ;;  %v10337_v40 = vadd.f32 %v3528_v32, %v10253_v48 }
 0xafc   :  { %11739 = vst [vmem:[#allocation119_spill] sm:$0xff] %v10334_v16  ;;  %v10340_v50 = vadd.f32 %v3601_v13, %v10269_v1  ;;  %v3499_v13 = vadd.f32 %v10260_v34, %v10253_v48  ;;  %v3574_v48 = vadd.f32 %v10266_v35, %v10272_v14 }
 0xafd   :  { %11740 = vst [vmem:[#allocation130_spill] sm:$0xff] %v10337_v40 }
 0xafe   :  { %11741 = vst [vmem:[#allocation132_spill] sm:$0xff] %v10340_v50 }
 0xb00   :  { %v7846_v4 = vpop.eup %7845 }
 0xb01   :  { %v7848_v41 = vpop.eup %7847 }
 0xb02   :  { %v7850_v63 = vpop.eup %7849  ;;  %v3694_v10 = vmul.f32 %v7848_v41, %v7846_v4 }
 0xb03   :  { %v3693_v24 = vmul.f32 0.0, %v7850_v63  ;;  %v3501_v63 = vadd.f32 %v10264_v56, %v10256_v11 }
 0xb05   :  { %v10342_v54 = vadd.f32 %v3694_v10, %v3693_v24  ;;  %v10379_v10 = vpop.f32.mrf.mxu0  ;;  %v10381_v24 = vpop.f32.mrf.mxu1 }
 0xb06   :  { %11742 = vst [vmem:[#allocation151_spill] sm:$0xff] %v10379_v10  ;;  %11743 = vst [vmem:[#allocation150_spill] sm:$0xff] %v10381_v24  ;;  %v3572_v24 = vadd.f32 %v10262_v45, %v10269_v1 }
 0xb07   :  { %7853 = vtanh.f32 %v10342_v54  ;;  %v7852_v55 = vpop.eup %7851 }
 0xb14   :  { %v7854_v16 = vpop.eup %7853 }
 0xb15   :  { %v3697_v58 = vmul.f32 %v7854_v16, %v7852_v55 }
 0xb17   :  { %v3702_v32 = vpack.c.bf16 %v3697_v58, %v3697_v58 }
 0xb19   :  { %3896 = vmatmul.mubr.bf16.vlgmr.msra.gmra.mxu0 %v3702_v32  ;;  %3937 = vmatmul.mubr.bf16.vlgmr.msra.gmra.mxu1 %v3702_v32 }
 0xb1a   :  { %3979 = vmatpush1.bf16.msra.mxu0 %v10158_v49  ;;  %4020 = vmatpush1.bf16.msra.mxu1 %v10160_v15 }
 0xb1b   :  { %3980 = vmatprep.subr.bf16.mxu0 %v10166_v7  ;;  %4021 = vmatprep.subr.bf16.mxu1 %v10168_v37 }
 0xb1c   :  { %4010 = vmatprep.mubr.bf16.mxu0 %v11721_v27  ;;  %4051 = vmatprep.mubr.bf16.mxu1 %v11721_v27 }
 0xb1e   :  { %3981 = vmatpush1.bf16.msra.mxu0 %v10170_v29  ;;  %4022 = vmatpush1.bf16.msra.mxu1 %v10172_v53 }
 0xb1f   :  { %3982 = vmatprep.subr.bf16.mxu0 %v10178_v6  ;;  %4023 = vmatprep.subr.bf16.mxu1 %v10180_v28 }
 0xb22   :  { %3983 = vmatpush1.bf16.msra.mxu0 %v10182_v21  ;;  %4024 = vmatpush1.bf16.msra.mxu1 %v10184_v20 }
 0xb23   :  { %3984 = vmatprep.subr.bf16.mxu0 %v10190_v19  ;;  %4025 = vmatprep.subr.bf16.mxu1 %v10192_v62 }
 0xb26   :  { %3985 = vmatpush1.bf16.msra.mxu0 %v10194_v38  ;;  %4026 = vmatpush1.bf16.msra.mxu1 %v10196_v2 }
 0xb27   :  { %3986 = vmatprep.subr.bf16.mxu0 %v10202_v8  ;;  %4027 = vmatprep.subr.bf16.mxu1 %v10204_v25 }
 0xb2a   :  { %3987 = vmatpush1.bf16.msra.mxu0 %v10206_v57  ;;  %4028 = vmatpush1.bf16.msra.mxu1 %v10208_v31 }
 0xb2b   :  { %3988 = vmatprep.subr.bf16.mxu0 %v10210_v39  ;;  %4029 = vmatprep.subr.bf16.mxu1 %v10212_v12 }
 0xb2e   :  { %3989 = vmatpush1.bf16.msra.mxu0 %v10218_v52  ;;  %4030 = vmatpush1.bf16.msra.mxu1 %v10220_v60 }
 0xb2f   :  { %3990 = vmatprep.subr.bf16.mxu0 %v10224_v44  ;;  %4031 = vmatprep.subr.bf16.mxu1 %v10226_v51 }
 0xb32   :  { %3991 = vmatpush1.bf16.msra.mxu0 %v10230_v43  ;;  %4032 = vmatpush1.bf16.msra.mxu1 %v10232_v3 }
 0xb33   :  { %3992 = vmatprep.subr.bf16.mxu0 %v10236_v5  ;;  %4033 = vmatprep.subr.bf16.mxu1 %v10238_v9 }
 0xb36   :  { %3993 = vmatpush1.bf16.msra.mxu0 %v10242_v59  ;;  %4034 = vmatpush1.bf16.msra.mxu1 %v10244_v42 }
 0xb37   :  { %4093 = vmatprep.subr.bf16.mxu0 %v10154_v0  ;;  %4134 = vmatprep.subr.bf16.mxu1 %v10156_v17 }
 0xbd9   :  { %v3897_v26 = vpop.f32.mrf.mxu0  ;;  %v3938_v4 = vpop.f32.mrf.mxu1 }
 0xbda   :  { %v3945_v58 = vadd.f32 %v3897_v26, %v3499_v13  ;;  %v3947_v56 = vadd.f32 %v3938_v4, %v3572_v24 }
 0xbdb   :  { %v3899_v16 = vpop.f32.mrf.mxu0  ;;  %v3940_v47 = vpop.f32.mrf.mxu1 }
 0xbdc   :  { %v7021_v41 = vmul.f32 -1.442695, %v3945_v58  ;;  %v3946_v55 = vadd.f32 %v3899_v16, %v3501_v63  ;;  %v3948_v34 = vadd.f32 %v3940_v47, %v3574_v48 }
 0xbdd   :  { %v3901_v32 = vpop.f32.mrf.mxu0  ;;  %v3942_v50 = vpop.f32.mrf.mxu1 }
 0xbde   :  { %7855 = vpow2.f32 %v7021_v41  ;;  %v7022_v40 = vmul.f32 -1.442695, %v3946_v55  ;;  %v7023_v13 = vmul.f32 -1.442695, %v3948_v34 }
 0xbdf   :  { %v3902_v10 = vpop.f32.mrf.mxu0  ;;  %v3943_v30 = vpop.f32.mrf.mxu1 }
 0xbe0   :  { %7857 = vpow2.f32 %v7022_v40 }
 0xbe1   :  { %7859 = vtanh.f32 %v3947_v56 }
 0xbe2   :  { %7861 = vpow2.f32 %v7023_v13 }
 0xbeb   :  { %v7856_v26 = vpop.eup %7855 }
 0xbec   :  { %v3952_v11 = vadd.f32 1.0, %v7856_v26 }
 0xbed   :  { %v7858_v63 = vpop.eup %7857 }
 0xbee   :  { %7863 = vrcp.f32 %v3952_v11  ;;  %v3958_v50 = vadd.f32 1.0, %v7858_v63  ;;  %v7860_v10 = vpop.eup %7859 }
 0xbef   :  { %v7862_v30 = vpop.eup %7861 }
 0xbf0   :  { %7865 = vrcp.f32 %v3958_v50  ;;  %v3965_v35 = vadd.f32 1.0, %v7862_v30 }
 0xbf2   :  { %7867 = vrcp.f32 %v3965_v35 }
 0xbfb   :  { %v7864_v40 = vpop.eup %7863 }
 0xbfc   :  { %v3969_v58 = vmul.f32 %v7864_v40, %v7860_v10 }
 0xbfd   :  { %v7866_v16 = vpop.eup %7865 }
 0xbfe   :  { %v3968_v47 = vmul.f32 %v7866_v16, %v10342_v54 }
 0xbff   :  { %v7868_v45 = vpop.eup %7867 }
 0xc00   :  { %v10392_v41 = vadd.f32 %v3969_v58, %v3968_v47 }
 0xc02   :  { %7869 = vtanh.f32 %v10392_v41 }
 0xc0f   :  { %v7870_v1 = vpop.eup %7869 }
 0xc10   :  { %v3972_v24 = vmul.f32 %v7870_v1, %v7868_v45 }
 0xc12   :  { %v3977_v4 = vpack.c.bf16 %v3972_v24, %v3972_v24 }
 0xc14   :  { %4011 = vmatmul.mubr.bf16.vlgmr.msra.gmra.mxu0 %v3977_v4  ;;  %4052 = vmatmul.mubr.bf16.vlgmr.msra.gmra.mxu1 %v3977_v4 }
 0xc15   :  { %4094 = vmatpush1.bf16.msra.mxu0 %v10158_v49  ;;  %4135 = vmatpush1.bf16.msra.mxu1 %v10160_v15 }
 0xc16   :  { %4095 = vmatprep.subr.bf16.mxu0 %v10166_v7  ;;  %4136 = vmatprep.subr.bf16.mxu1 %v10168_v37 }
 0xc17   :  { %4125 = vmatprep.mubr.bf16.mxu0 %v11721_v27  ;;  %4166 = vmatprep.mubr.bf16.mxu1 %v11721_v27 }
 0xc19   :  { %4096 = vmatpush1.bf16.msra.mxu0 %v10170_v29  ;;  %4137 = vmatpush1.bf16.msra.mxu1 %v10172_v53 }
 0xc1a   :  { %4097 = vmatprep.subr.bf16.mxu0 %v10178_v6  ;;  %4138 = vmatprep.subr.bf16.mxu1 %v10180_v28 }
 0xc1d   :  { %4098 = vmatpush1.bf16.msra.mxu0 %v10182_v21  ;;  %4139 = vmatpush1.bf16.msra.mxu1 %v10184_v20 }
 0xc1e   :  { %4099 = vmatprep.subr.bf16.mxu0 %v10190_v19  ;;  %4140 = vmatprep.subr.bf16.mxu1 %v10192_v62 }
 0xc21   :  { %4100 = vmatpush1.bf16.msra.mxu0 %v10194_v38  ;;  %4141 = vmatpush1.bf16.msra.mxu1 %v10196_v2 }
 0xc22   :  { %4101 = vmatprep.subr.bf16.mxu0 %v10202_v8  ;;  %4142 = vmatprep.subr.bf16.mxu1 %v10204_v25 }
 0xc25   :  { %4102 = vmatpush1.bf16.msra.mxu0 %v10206_v57  ;;  %4143 = vmatpush1.bf16.msra.mxu1 %v10208_v31 }
 0xc26   :  { %4103 = vmatprep.subr.bf16.mxu0 %v10210_v39  ;;  %4144 = vmatprep.subr.bf16.mxu1 %v10212_v12 }
 0xc29   :  { %4104 = vmatpush1.bf16.msra.mxu0 %v10218_v52  ;;  %4145 = vmatpush1.bf16.msra.mxu1 %v10220_v60 }
 0xc2a   :  { %4105 = vmatprep.subr.bf16.mxu0 %v10224_v44  ;;  %4146 = vmatprep.subr.bf16.mxu1 %v10226_v51 }
 0xc2d   :  { %4106 = vmatpush1.bf16.msra.mxu0 %v10230_v43  ;;  %4147 = vmatpush1.bf16.msra.mxu1 %v10232_v3 }
 0xc2e   :  { %4107 = vmatprep.subr.bf16.mxu0 %v10236_v5  ;;  %4148 = vmatprep.subr.bf16.mxu1 %v10238_v9 }
 0xc31   :  { %4108 = vmatpush1.bf16.msra.mxu0 %v10242_v59  ;;  %4149 = vmatpush1.bf16.msra.mxu1 %v10244_v42 }
 0xc32   :  { %4208 = vmatprep.subr.bf16.mxu0 %v10154_v0  ;;  %4249 = vmatprep.subr.bf16.mxu1 %v10156_v17 }
 0xcd4   :  { %v4012_v11 = vpop.f32.mrf.mxu0  ;;  %v4053_v54 = vpop.f32.mrf.mxu1 }
 0xcd5   :  { %v4060_v55 = vadd.f32 %v4012_v11, %v10275_v23  ;;  %v4062_v40 = vadd.f32 %v4053_v54, %v10278_v33 }
 0xcd6   :  { %v4014_v32 = vpop.f32.mrf.mxu0  ;;  %v4055_v48 = vpop.f32.mrf.mxu1 }
 0xcd7   :  { %v7024_v34 = vmul.f32 -1.442695, %v4060_v55  ;;  %v4061_v56 = vadd.f32 %v4014_v32, %v10281_v61  ;;  %v4063_v30 = vadd.f32 %v4055_v48, %v10284_v22 }
 0xcd8   :  { %v4016_v13 = vpop.f32.mrf.mxu0  ;;  %v4057_v26 = vpop.f32.mrf.mxu1 }
 0xcd9   :  { %7871 = vpow2.f32 %v7024_v34  ;;  %v7025_v63 = vmul.f32 -1.442695, %v4061_v56  ;;  %v7026_v58 = vmul.f32 -1.442695, %v4063_v30 }
 0xcda   :  { %v4017_v50 = vpop.f32.mrf.mxu0  ;;  %v4058_v10 = vpop.f32.mrf.mxu1 }
 0xcdb   :  { %7873 = vpow2.f32 %v7025_v63 }
 0xcdc   :  { %7875 = vtanh.f32 %v4062_v40 }
 0xcdd   :  { %7877 = vpow2.f32 %v7026_v58 }
 0xce6   :  { %v7872_v16 = vpop.eup %7871 }
 0xce7   :  { %v4067_v35 = vadd.f32 1.0, %v7872_v16 }
 0xce8   :  { %v7874_v23 = vpop.eup %7873 }
 0xce9   :  { %7879 = vrcp.f32 %v4067_v35  ;;  %v4073_v47 = vadd.f32 1.0, %v7874_v23  ;;  %v7876_v61 = vpop.eup %7875  ;;  %v11744_v23 = vld [vmem:[#allocation160_spill] sm:$0xff] }
 0xcea   :  { %v7878_v45 = vpop.eup %7877 }
 0xceb   :  { %7881 = vrcp.f32 %v4073_v47  ;;  %v4080_v11 = vadd.f32 1.0, %v7878_v45 }
 0xced   :  { %7883 = vrcp.f32 %v4080_v11 }
 0xcf6   :  { %v7880_v1 = vpop.eup %7879 }
 0xcf7   :  { %v4084_v24 = vmul.f32 %v7880_v1, %v7876_v61 }
 0xcf8   :  { %v7882_v4 = vpop.eup %7881 }
 0xcf9   :  { %v4083_v55 = vmul.f32 %v7882_v4, %v10392_v41 }
 0xcfa   :  { %v7884_v33 = vpop.eup %7883 }
 0xcfb   :  { %v10434_v22 = vadd.f32 %v4084_v24, %v4083_v55 }
 0xcfd   :  { %7885 = vtanh.f32 %v10434_v22 }
 0xd0a   :  { %v7886_v54 = vpop.eup %7885 }
 0xd0b   :  { %v4087_v32 = vmul.f32 %v7886_v54, %v7884_v33 }
 0xd0d   :  { %v4092_v48 = vpack.c.bf16 %v4087_v32, %v4087_v32 }
 0xd0f   :  { %4126 = vmatmul.mubr.bf16.vlgmr.msra.gmra.mxu0 %v4092_v48  ;;  %4167 = vmatmul.mubr.bf16.vlgmr.msra.gmra.mxu1 %v4092_v48 }
 0xd10   :  { %4209 = vmatpush1.bf16.msra.mxu0 %v10158_v49  ;;  %4250 = vmatpush1.bf16.msra.mxu1 %v10160_v15 }
 0xd11   :  { %4210 = vmatprep.subr.bf16.mxu0 %v10166_v7  ;;  %4251 = vmatprep.subr.bf16.mxu1 %v10168_v37 }
 0xd12   :  { %4240 = vmatprep.mubr.bf16.mxu0 %v11721_v27  ;;  %4281 = vmatprep.mubr.bf16.mxu1 %v11721_v27 }
 0xd14   :  { %4211 = vmatpush1.bf16.msra.mxu0 %v10170_v29  ;;  %4252 = vmatpush1.bf16.msra.mxu1 %v10172_v53 }
 0xd15   :  { %4212 = vmatprep.subr.bf16.mxu0 %v10178_v6  ;;  %4253 = vmatprep.subr.bf16.mxu1 %v10180_v28 }
 0xd18   :  { %4213 = vmatpush1.bf16.msra.mxu0 %v10182_v21  ;;  %4254 = vmatpush1.bf16.msra.mxu1 %v10184_v20 }
 0xd19   :  { %4214 = vmatprep.subr.bf16.mxu0 %v10190_v19  ;;  %4255 = vmatprep.subr.bf16.mxu1 %v10192_v62 }
 0xd1c   :  { %4215 = vmatpush1.bf16.msra.mxu0 %v10194_v38  ;;  %4256 = vmatpush1.bf16.msra.mxu1 %v10196_v2 }
 0xd1d   :  { %4216 = vmatprep.subr.bf16.mxu0 %v10202_v8  ;;  %4257 = vmatprep.subr.bf16.mxu1 %v10204_v25 }
 0xd20   :  { %4217 = vmatpush1.bf16.msra.mxu0 %v10206_v57  ;;  %4258 = vmatpush1.bf16.msra.mxu1 %v10208_v31 }
 0xd21   :  { %4218 = vmatprep.subr.bf16.mxu0 %v10210_v39  ;;  %4259 = vmatprep.subr.bf16.mxu1 %v10212_v12 }
 0xd24   :  { %4219 = vmatpush1.bf16.msra.mxu0 %v10218_v52  ;;  %4260 = vmatpush1.bf16.msra.mxu1 %v10220_v60 }
 0xd25   :  { %4220 = vmatprep.subr.bf16.mxu0 %v10224_v44  ;;  %4261 = vmatprep.subr.bf16.mxu1 %v10226_v51 }
 0xd28   :  { %4221 = vmatpush1.bf16.msra.mxu0 %v10230_v43  ;;  %4262 = vmatpush1.bf16.msra.mxu1 %v10232_v3 }
 0xd29   :  { %4222 = vmatprep.subr.bf16.mxu0 %v10236_v5  ;;  %4263 = vmatprep.subr.bf16.mxu1 %v10238_v9 }
 0xd2c   :  { %4223 = vmatpush1.bf16.msra.mxu0 %v10242_v59  ;;  %4264 = vmatpush1.bf16.msra.mxu1 %v10244_v42 }
 0xd2d   :  { %4323 = vmatprep.subr.bf16.mxu0 %v10154_v0  ;;  %4364 = vmatprep.subr.bf16.mxu1 %v10156_v17 }
 0xdcf   :  { %v4127_v41 = vpop.f32.mrf.mxu0  ;;  %v4168_v34 = vpop.f32.mrf.mxu1 }
 0xdd0   :  { %v4175_v56 = vadd.f32 %v4127_v41, %v10288_v46  ;;  %v4177_v47 = vadd.f32 %v4168_v34, %v11744_v23 }
 0xdd1   :  { %v4129_v13 = vpop.f32.mrf.mxu0  ;;  %v4170_v26 = vpop.f32.mrf.mxu1 }
 0xdd2   :  { %v7027_v63 = vmul.f32 -1.442695, %v4175_v56  ;;  %v4176_v50 = vadd.f32 %v4129_v13, %v10294_v36  ;;  %v4178_v35 = vadd.f32 %v4170_v26, %v10297_v18  ;;  %v11745_v26 = vld [vmem:[#allocation161_spill] sm:$0xff] }
 0xdd3   :  { %v4131_v10 = vpop.f32.mrf.mxu0  ;;  %v4172_v30 = vpop.f32.mrf.mxu1 }
 0xdd4   :  { %7887 = vpow2.f32 %v7027_v63  ;;  %v7028_v40 = vmul.f32 -1.442695, %v4176_v50  ;;  %v7029_v61 = vmul.f32 -1.442695, %v4178_v35 }
 0xdd5   :  { %v4132_v58 = vpop.f32.mrf.mxu0  ;;  %v4173_v16 = vpop.f32.mrf.mxu1 }
 0xdd6   :  { %7889 = vpow2.f32 %v7028_v40  ;;  %v11746_v40 = vld [vmem:[#allocation163_spill] sm:$0xff] }
 0xdd7   :  { %7891 = vtanh.f32 %v4177_v47 }
 0xdd8   :  { %7893 = vpow2.f32 %v7029_v61 }
 0xde1   :  { %v7888_v45 = vpop.eup %7887 }
 0xde2   :  { %v4182_v1 = vadd.f32 1.0, %v7888_v45  ;;  %v11747_v45 = vld [vmem:[#allocation164_spill] sm:$0xff] }
 0xde3   :  { %v7890_v46 = vpop.eup %7889 }
 0xde4   :  { %7895 = vrcp.f32 %v4182_v1  ;;  %v4188_v24 = vadd.f32 1.0, %v7890_v46  ;;  %v7892_v36 = vpop.eup %7891  ;;  %v11748_v46 = vld [vmem:[#allocation162_spill] sm:$0xff] }
 0xde5   :  { %v7894_v4 = vpop.eup %7893 }
 0xde6   :  { %7897 = vrcp.f32 %v4188_v24  ;;  %v4195_v54 = vadd.f32 1.0, %v7894_v4 }
 0xde8   :  { %7899 = vrcp.f32 %v4195_v54 }
 0xdf1   :  { %v7896_v11 = vpop.eup %7895 }
 0xdf2   :  { %v4199_v55 = vmul.f32 %v7896_v11, %v7892_v36 }
 0xdf3   :  { %v7898_v33 = vpop.eup %7897 }
 0xdf4   :  { %v4198_v32 = vmul.f32 %v7898_v33, %v10434_v22 }
 0xdf5   :  { %v7900_v48 = vpop.eup %7899 }
 0xdf6   :  { %v10476_v18 = vadd.f32 %v4199_v55, %v4198_v32 }
 0xdf8   :  { %7901 = vtanh.f32 %v10476_v18 }
 0xe05   :  { %v7902_v41 = vpop.eup %7901 }
 0xe06   :  { %v4202_v34 = vmul.f32 %v7902_v41, %v7900_v48 }
 0xe08   :  { %v4207_v56 = vpack.c.bf16 %v4202_v34, %v4202_v34 }
 0xe0a   :  { %4241 = vmatmul.mubr.bf16.vlgmr.msra.gmra.mxu0 %v4207_v56  ;;  %4282 = vmatmul.mubr.bf16.vlgmr.msra.gmra.mxu1 %v4207_v56 }
 0xe0b   :  { %4324 = vmatpush1.bf16.msra.mxu0 %v10158_v49  ;;  %4365 = vmatpush1.bf16.msra.mxu1 %v10160_v15 }
 0xe0c   :  { %4325 = vmatprep.subr.bf16.mxu0 %v10166_v7  ;;  %4366 = vmatprep.subr.bf16.mxu1 %v10168_v37 }
 0xe0d   :  { %4355 = vmatprep.mubr.bf16.mxu0 %v11721_v27  ;;  %4396 = vmatprep.mubr.bf16.mxu1 %v11721_v27 }
 0xe0f   :  { %4326 = vmatpush1.bf16.msra.mxu0 %v10170_v29  ;;  %4367 = vmatpush1.bf16.msra.mxu1 %v10172_v53 }
 0xe10   :  { %4327 = vmatprep.subr.bf16.mxu0 %v10178_v6  ;;  %4368 = vmatprep.subr.bf16.mxu1 %v10180_v28 }
 0xe13   :  { %4328 = vmatpush1.bf16.msra.mxu0 %v10182_v21  ;;  %4369 = vmatpush1.bf16.msra.mxu1 %v10184_v20 }
 0xe14   :  { %4329 = vmatprep.subr.bf16.mxu0 %v10190_v19  ;;  %4370 = vmatprep.subr.bf16.mxu1 %v10192_v62 }
 0xe17   :  { %4330 = vmatpush1.bf16.msra.mxu0 %v10194_v38  ;;  %4371 = vmatpush1.bf16.msra.mxu1 %v10196_v2 }
 0xe18   :  { %4331 = vmatprep.subr.bf16.mxu0 %v10202_v8  ;;  %4372 = vmatprep.subr.bf16.mxu1 %v10204_v25 }
 0xe1b   :  { %4332 = vmatpush1.bf16.msra.mxu0 %v10206_v57  ;;  %4373 = vmatpush1.bf16.msra.mxu1 %v10208_v31 }
 0xe1c   :  { %4333 = vmatprep.subr.bf16.mxu0 %v10210_v39  ;;  %4374 = vmatprep.subr.bf16.mxu1 %v10212_v12 }
 0xe1f   :  { %4334 = vmatpush1.bf16.msra.mxu0 %v10218_v52  ;;  %4375 = vmatpush1.bf16.msra.mxu1 %v10220_v60 }
 0xe20   :  { %4335 = vmatprep.subr.bf16.mxu0 %v10224_v44  ;;  %4376 = vmatprep.subr.bf16.mxu1 %v10226_v51 }
 0xe23   :  { %4336 = vmatpush1.bf16.msra.mxu0 %v10230_v43  ;;  %4377 = vmatpush1.bf16.msra.mxu1 %v10232_v3 }
 0xe24   :  { %4337 = vmatprep.subr.bf16.mxu0 %v10236_v5  ;;  %4378 = vmatprep.subr.bf16.mxu1 %v10238_v9 }
 0xe27   :  { %4338 = vmatpush1.bf16.msra.mxu0 %v10242_v59  ;;  %4379 = vmatpush1.bf16.msra.mxu1 %v10244_v42 }
 0xe28   :  { %4438 = vmatprep.subr.bf16.mxu0 %v10154_v0  ;;  %4479 = vmatprep.subr.bf16.mxu1 %v10156_v17 }
 0xeca   :  { %v4242_v22 = vpop.f32.mrf.mxu0  ;;  %v4283_v13 = vpop.f32.mrf.mxu1 }
 0xecb   :  { %v4290_v63 = vadd.f32 %v4242_v22, %v11745_v26  ;;  %v4292_v24 = vadd.f32 %v4283_v13, %v11748_v46  ;;  %v7987_v46 = vld [vmem:[#allocation11 + $0xc0] ss:$16 sps:$4 sm:$0xff]  }
 0xecc   :  { %v4244_v50 = vpop.f32.mrf.mxu0  ;;  %v4285_v10 = vpop.f32.mrf.mxu1 }
 0xecd   :  { %v7030_v30 = vmul.f32 -1.442695, %v4290_v63  ;;  %v4291_v58 = vadd.f32 %v4244_v50, %v11746_v40  ;;  %v4293_v1 = vadd.f32 %v4285_v10, %v11747_v45  ;;  %v7985_v45 = vld [vmem:[#allocation11 + $0xc4] ss:$16 sps:$4 sm:$0xff]  }
 0xece   :  { %v4246_v16 = vpop.f32.mrf.mxu0  ;;  %v4287_v35 = vpop.f32.mrf.mxu1 }
 0xecf   :  { %7903 = vpow2.f32 %v7030_v30  ;;  %v7031_v23 = vmul.f32 -1.442695, %v4291_v58  ;;  %v7032_v36 = vmul.f32 -1.442695, %v4293_v1  ;;  %v7986_v1 = vld [vmem:[#allocation11 + $0xcc] ss:$16 sps:$4 sm:$0xff]  }
 0xed0   :  { %v4247_v47 = vpop.f32.mrf.mxu0  ;;  %v4288_v61 = vpop.f32.mrf.mxu1 }
 0xed1   :  { %7905 = vpow2.f32 %v7031_v23  ;;  %v7983_v47 = vld [vmem:[#allocation11 + $0xe0] ss:$16 sps:$4 sm:$0xff]   ;;  %v7984_v61 = vld [vmem:[#allocation11 + $0xe8] ss:$16 sps:$4 sm:$0xff]  }
 0xed2   :  { %7907 = vtanh.f32 %v4292_v24  ;;  %v7988_v24 = vld [vmem:[#allocation11 + $0xc8] ss:$16 sps:$4 sm:$0xff]  }
 0xed3   :  { %7909 = vpow2.f32 %v7032_v36  ;;  %v7989_v36 = vld [vmem:[#allocation11 + $0xa4] ss:$16 sps:$4 sm:$0xff]  }
 0xedc   :  { %v7904_v4 = vpop.eup %7903 }
 0xedd   :  { %v4297_v11 = vadd.f32 1.0, %v7904_v4  ;;  %v7990_v4 = vld [vmem:[#allocation11 + $0xac] ss:$16 sps:$4 sm:$0xff]  }
 0xede   :  { %v7906_v55 = vpop.eup %7905 }
 0xedf   :  { %7911 = vrcp.f32 %v4297_v11  ;;  %v4303_v33 = vadd.f32 1.0, %v7906_v55  ;;  %v7908_v54 = vpop.eup %7907  ;;  %v7991_v11 = vld [vmem:[#allocation11 + $0xa0] ss:$16 sps:$4 sm:$0xff]   ;;  %v7992_v55 = vld [vmem:[#allocation11 + $0xa8] ss:$16 sps:$4 sm:$0xff]  }
 0xee0   :  { %v7910_v32 = vpop.eup %7909 }
 0xee1   :  { %7913 = vrcp.f32 %v4303_v33  ;;  %v4310_v56 = vadd.f32 1.0, %v7910_v32  ;;  %v7993_v33 = vld [vmem:[#allocation11 + $0x84] ss:$16 sps:$4 sm:$0xff]   ;;  %v7995_v32 = vld [vmem:[#allocation11 + $0x80] ss:$16 sps:$4 sm:$0xff]  }
 0xee3   :  { %7915 = vrcp.f32 %v4310_v56  ;;  %v7999_v56 = vld [vmem:[#allocation11 + $0x60] ss:$16 sps:$4 sm:$0xff]  }
 0xeec   :  { %v7912_v48 = vpop.eup %7911 }
 0xeed   :  { %v4314_v41 = vmul.f32 %v7912_v48, %v7908_v54  ;;  %v7994_v54 = vld [vmem:[#allocation11 + $0x8c] ss:$16 sps:$4 sm:$0xff]   ;;  %v7996_v48 = vld [vmem:[#allocation11 + $0x88] ss:$16 sps:$4 sm:$0xff]  }
 0xeee   :  { %v7914_v34 = vpop.eup %7913 }
 0xeef   :  { %v4313_v22 = vmul.f32 %v7914_v34, %v10476_v18  ;;  %v7998_v34 = vld [vmem:[#allocation11 + $0x6c] ss:$16 sps:$4 sm:$0xff]  }
 0xef0   :  { %v7916_v13 = vpop.eup %7915 }
 0xef1   :  { %v10518_v26 = vadd.f32 %v4314_v41, %v4313_v22  ;;  %v7997_v41 = vld [vmem:[#allocation11 + $0x64] ss:$16 sps:$4 sm:$0xff]   ;;  %v8000_v22 = vld [vmem:[#allocation11 + $0x68] ss:$16 sps:$4 sm:$0xff]  }
 0xef3   :  { %7917 = vtanh.f32 %v10518_v26 }
 0xf00   :  { %v7918_v63 = vpop.eup %7917 }
 0xf01   :  { %v4317_v50 = vmul.f32 %v7918_v63, %v7916_v13  ;;  %v8002_v13 = vld [vmem:[#allocation11 + $0x4c] ss:$16 sps:$4 sm:$0xff]   ;;  %v8003_v63 = vld [vmem:[#allocation11 + $0x40] ss:$16 sps:$4 sm:$0xff]  }
 0xf03   :  { %v4322_v10 = vpack.c.bf16 %v4317_v50, %v4317_v50  ;;  %v8004_v50 = vld [vmem:[#allocation11 + $0x48] ss:$16 sps:$4 sm:$0xff]  }
 0xf05   :  { %4356 = vmatmul.mubr.bf16.vlgmr.msra.gmra.mxu0 %v4322_v10  ;;  %4397 = vmatmul.mubr.bf16.vlgmr.msra.gmra.mxu1 %v4322_v10  ;;  %v8005_v10 = vld [vmem:[#allocation11 + $0x24] ss:$16 sps:$4 sm:$0xff]  }
 0xf06   :  { %4439 = vmatpush1.bf16.msra.mxu0 %v10158_v49  ;;  %4480 = vmatpush1.bf16.msra.mxu1 %v10160_v15 }
 0xf07   :  { %4440 = vmatprep.subr.bf16.mxu0 %v10166_v7  ;;  %4481 = vmatprep.subr.bf16.mxu1 %v10168_v37  ;;  %v11749_v7 = vld [vmem:[#allocation165_spill] sm:$0xff] }
 0xf08   :  { %4470 = vmatprep.mubr.bf16.mxu0 %v11721_v27  ;;  %4511 = vmatprep.mubr.bf16.mxu1 %v11721_v27 }
 0xf0a   :  { %4441 = vmatpush1.bf16.msra.mxu0 %v10170_v29  ;;  %4482 = vmatpush1.bf16.msra.mxu1 %v10172_v53 }
 0xf0b   :  { %4442 = vmatprep.subr.bf16.mxu0 %v10178_v6  ;;  %4483 = vmatprep.subr.bf16.mxu1 %v10180_v28  ;;  %v11750_v28 = vld [vmem:[#allocation190_spill] sm:$0xff] }
 0xf0e   :  { %4443 = vmatpush1.bf16.msra.mxu0 %v10182_v21  ;;  %4484 = vmatpush1.bf16.msra.mxu1 %v10184_v20 }
 0xf0f   :  { %4444 = vmatprep.subr.bf16.mxu0 %v10190_v19  ;;  %4485 = vmatprep.subr.bf16.mxu1 %v10192_v62 }
 0xf12   :  { %4445 = vmatpush1.bf16.msra.mxu0 %v10194_v38  ;;  %4486 = vmatpush1.bf16.msra.mxu1 %v10196_v2 }
 0xf13   :  { %4446 = vmatprep.subr.bf16.mxu0 %v10202_v8  ;;  %4487 = vmatprep.subr.bf16.mxu1 %v10204_v25  ;;  %v11751_v8 = vld [vmem:[#allocation191_spill] sm:$0xff]  ;;  %v11752_v25 = vld [vmem:[#allocation166_spill] sm:$0xff] }
 0xf16   :  { %4447 = vmatpush1.bf16.msra.mxu0 %v10206_v57  ;;  %4488 = vmatpush1.bf16.msra.mxu1 %v10208_v31 }
 0xf17   :  { %4448 = vmatprep.subr.bf16.mxu0 %v10210_v39  ;;  %4489 = vmatprep.subr.bf16.mxu1 %v10212_v12 }
 0xf1a   :  { %4449 = vmatpush1.bf16.msra.mxu0 %v10218_v52  ;;  %4490 = vmatpush1.bf16.msra.mxu1 %v10220_v60 }
 0xf1b   :  { %4450 = vmatprep.subr.bf16.mxu0 %v10224_v44  ;;  %4491 = vmatprep.subr.bf16.mxu1 %v10226_v51 }
 0xf1e   :  { %4451 = vmatpush1.bf16.msra.mxu0 %v10230_v43  ;;  %4492 = vmatpush1.bf16.msra.mxu1 %v10232_v3 }
 0xf1f   :  { %4452 = vmatprep.subr.bf16.mxu0 %v10236_v5  ;;  %4493 = vmatprep.subr.bf16.mxu1 %v10238_v9 }
 0xf22   :  { %4453 = vmatpush1.bf16.msra.mxu0 %v10242_v59  ;;  %4494 = vmatpush1.bf16.msra.mxu1 %v10244_v42 }
 0xf23   :  { %4553 = vmatprep.subr.bf16.mxu0 %v10154_v0  ;;  %4594 = vmatprep.subr.bf16.mxu1 %v10156_v17 }
 0xfc5   :  { %v4357_v49 = vpop.f32.mrf.mxu0  ;;  %v4398_v15 = vpop.f32.mrf.mxu1 }
 0xfc6   :  { %v4405_v37 = vadd.f32 %v4357_v49, %v11749_v7  ;;  %v4407_v17 = vadd.f32 %v4398_v15, %v11752_v25  ;;  %v8006_v49 = vld [vmem:[#allocation11 + $0x2c] ss:$16 sps:$4 sm:$0xff]   ;;  %v8007_v15 = vld [vmem:[#allocation11 + $0x20] ss:$16 sps:$4 sm:$0xff]   ;;  %v8008_v7 = vld [vmem:[#allocation11 + $0x28] ss:$16 sps:$4 sm:$0xff]  }
 0xfc7   :  { %v4359_v29 = vpop.f32.mrf.mxu0  ;;  %v4400_v53 = vpop.f32.mrf.mxu1 }
 0xfc8   :  { %v7033_v6 = vmul.f32 -1.442695, %v4405_v37  ;;  %v4406_v21 = vadd.f32 %v4359_v29, %v11750_v28  ;;  %v4408_v0 = vadd.f32 %v4400_v53, %v11751_v8  ;;  %v7489_v37 = vld [vmem:[#allocation7 + $0x2e4] ss:$16 sps:$4 sm:$0xff]   ;;  %v7492_v29 = vld [vmem:[#allocation7 + $0x2ec] ss:$16 sps:$4 sm:$0xff]  }
 0xfc9   :  { %v4361_v20 = vpop.f32.mrf.mxu0  ;;  %v4402_v19 = vpop.f32.mrf.mxu1  ;;  %v11753_v28 = vld [vmem:[#allocation100_spill] sm:$0xff] }
 0xfca   :  { %7919 = vpow2.f32 %v7033_v6  ;;  %v7034_v62 = vmul.f32 -1.442695, %v4406_v21  ;;  %v7035_v57 = vmul.f32 -1.442695, %v4408_v0 }
 0xfcb   :  { %v4362_v38 = vpop.f32.mrf.mxu0  ;;  %v4403_v2 = vpop.f32.mrf.mxu1 }
 0xfcc   :  { %7921 = vpow2.f32 %v7034_v62  ;;  %v11754_v38 = vld [vmem:[#allocation102_spill] sm:$0xff] }
 0xfcd   :  { %7923 = vtanh.f32 %v4407_v17  ;;  %v11756_v17 = vld [vmem:[#allocation117_spill] sm:$0xff] }
 0xfce   :  { %7925 = vpow2.f32 %v7035_v57 }
 0xfd7   :  { %v7920_v31 = vpop.eup %7919 }
 0xfd8   :  { %v4412_v39 = vadd.f32 1.0, %v7920_v31 }
 0xfd9   :  { %v7922_v12 = vpop.eup %7921 }
 0xfda   :  { %7927 = vrcp.f32 %v4412_v39  ;;  %v4418_v52 = vadd.f32 1.0, %v7922_v12  ;;  %v7924_v60 = vpop.eup %7923 }
 0xfdb   :  { %v7926_v44 = vpop.eup %7925 }
 0xfdc   :  { %7929 = vrcp.f32 %v4418_v52  ;;  %v4425_v18 = vadd.f32 1.0, %v7926_v44 }
 0xfde   :  { %7931 = vrcp.f32 %v4425_v18 }
 0xfe7   :  { %v7928_v51 = vpop.eup %7927 }
 0xfe8   :  { %v4429_v43 = vmul.f32 %v7928_v51, %v7924_v60 }
 0xfe9   :  { %v7930_v3 = vpop.eup %7929 }
 0xfea   :  { %v4428_v30 = vmul.f32 %v7930_v3, %v10518_v26  ;;  %v8001_v26 = vld [vmem:[#allocation11 + $0x44] ss:$16 sps:$4 sm:$0xff]  }
 0xfeb   :  { %v7932_v58 = vpop.eup %7931 }
 0xfec   :  { %v10560_v40 = vadd.f32 %v4429_v43, %v4428_v30 }
 0xfee   :  { %7933 = vtanh.f32 %v10560_v40 }
 0xffb   :  { %v7934_v16 = vpop.eup %7933 }
 0xffc   :  { %v4432_v35 = vmul.f32 %v7934_v16, %v7932_v58 }
 0xffe   :  { %v4437_v23 = vpack.c.bf16 %v4432_v35, %v4432_v35 }
0x1000   :  { %4471 = vmatmul.mubr.bf16.vlgmr.msra.gmra.mxu0 %v4437_v23  ;;  %4512 = vmatmul.mubr.bf16.vlgmr.msra.gmra.mxu1 %v4437_v23 }
0x1001   :  { %4554 = vmatpush1.bf16.msra.mxu0 %v7983_v47  ;;  %4595 = vmatpush1.bf16.msra.mxu1 %v7984_v61  ;;  %v7487_v61 = vld [vmem:[#allocation7 + $0x2e0] ss:$16 sps:$4 sm:$0xff]  }
0x1002   :  { %4555 = vmatprep.subr.bf16.mxu0 %v7985_v45  ;;  %4596 = vmatprep.subr.bf16.mxu1 %v7986_v1  ;;  %v7490_v45 = vld [vmem:[#allocation7 + $0x2e8] ss:$16 sps:$4 sm:$0xff]  }
0x1003   :  { %4585 = vmatprep.mubr.bf16.mxu0 %v11721_v27  ;;  %4626 = vmatprep.mubr.bf16.mxu1 %v11721_v27 }
0x1005   :  { %4556 = vmatpush1.bf16.msra.mxu0 %v7987_v46  ;;  %4597 = vmatpush1.bf16.msra.mxu1 %v7988_v24  ;;  %v7495_v46 = vld [vmem:[#allocation7 + $0x2c4] ss:$16 sps:$4 sm:$0xff]   ;;  %v7498_v24 = vld [vmem:[#allocation7 + $0x2cc] ss:$16 sps:$4 sm:$0xff]  }
0x1006   :  { %4557 = vmatprep.subr.bf16.mxu0 %v7989_v36  ;;  %4598 = vmatprep.subr.bf16.mxu1 %v7990_v4  ;;  %v7493_v36 = vld [vmem:[#allocation7 + $0x2c0] ss:$16 sps:$4 sm:$0xff]   ;;  %v7496_v4 = vld [vmem:[#allocation7 + $0x2c8] ss:$16 sps:$4 sm:$0xff]  }
0x1009   :  { %4558 = vmatpush1.bf16.msra.mxu0 %v7991_v11  ;;  %4599 = vmatpush1.bf16.msra.mxu1 %v7992_v55  ;;  %v7501_v11 = vld [vmem:[#allocation7 + $0x2a4] ss:$16 sps:$4 sm:$0xff]   ;;  %v7504_v55 = vld [vmem:[#allocation7 + $0x2ac] ss:$16 sps:$4 sm:$0xff]  }
0x100a   :  { %4559 = vmatprep.subr.bf16.mxu0 %v7993_v33  ;;  %4600 = vmatprep.subr.bf16.mxu1 %v7994_v54  ;;  %v7499_v33 = vld [vmem:[#allocation7 + $0x2a0] ss:$16 sps:$4 sm:$0xff]   ;;  %v7502_v54 = vld [vmem:[#allocation7 + $0x2a8] ss:$16 sps:$4 sm:$0xff]  }
0x100d   :  { %4560 = vmatpush1.bf16.msra.mxu0 %v7995_v32  ;;  %4601 = vmatpush1.bf16.msra.mxu1 %v7996_v48  ;;  %v7507_v32 = vld [vmem:[#allocation7 + $0x284] ss:$16 sps:$4 sm:$0xff]   ;;  %v7510_v48 = vld [vmem:[#allocation7 + $0x28c] ss:$16 sps:$4 sm:$0xff]  }
0x100e   :  { %4561 = vmatprep.subr.bf16.mxu0 %v7997_v41  ;;  %4602 = vmatprep.subr.bf16.mxu1 %v7998_v34  ;;  %v7505_v41 = vld [vmem:[#allocation7 + $0x280] ss:$16 sps:$4 sm:$0xff]   ;;  %v7508_v34 = vld [vmem:[#allocation7 + $0x288] ss:$16 sps:$4 sm:$0xff]  }
0x1011   :  { %4562 = vmatpush1.bf16.msra.mxu0 %v7999_v56  ;;  %4603 = vmatpush1.bf16.msra.mxu1 %v8000_v22  ;;  %v7513_v56 = vld [vmem:[#allocation7 + $0x264] ss:$16 sps:$4 sm:$0xff]   ;;  %v7516_v22 = vld [vmem:[#allocation7 + $0x26c] ss:$16 sps:$4 sm:$0xff]  }
0x1012   :  { %4563 = vmatprep.subr.bf16.mxu0 %v8001_v26  ;;  %4604 = vmatprep.subr.bf16.mxu1 %v8002_v13  ;;  %v7511_v26 = vld [vmem:[#allocation7 + $0x260] ss:$16 sps:$4 sm:$0xff]   ;;  %v7514_v13 = vld [vmem:[#allocation7 + $0x268] ss:$16 sps:$4 sm:$0xff]  }
0x1015   :  { %4564 = vmatpush1.bf16.msra.mxu0 %v8003_v63  ;;  %4605 = vmatpush1.bf16.msra.mxu1 %v8004_v50  ;;  %v7519_v63 = vld [vmem:[#allocation7 + $0x244] ss:$16 sps:$4 sm:$0xff]   ;;  %v7522_v50 = vld [vmem:[#allocation7 + $0x24c] ss:$16 sps:$4 sm:$0xff]  }
0x1016   :  { %4565 = vmatprep.subr.bf16.mxu0 %v8005_v10  ;;  %4606 = vmatprep.subr.bf16.mxu1 %v8006_v49  ;;  %v7517_v10 = vld [vmem:[#allocation7 + $0x240] ss:$16 sps:$4 sm:$0xff]   ;;  %v7520_v49 = vld [vmem:[#allocation7 + $0x248] ss:$16 sps:$4 sm:$0xff]  }
0x1019   :  { %4566 = vmatpush1.bf16.msra.mxu0 %v8007_v15  ;;  %4607 = vmatpush1.bf16.msra.mxu1 %v8008_v7  ;;  %v7525_v15 = vld [vmem:[#allocation7 + $0x224] ss:$16 sps:$4 sm:$0xff]   ;;  %v7528_v7 = vld [vmem:[#allocation7 + $0x22c] ss:$16 sps:$4 sm:$0xff]  }
0x101a   :  { %4567 = vmatprep.subr.bf16.mxu0 %v10236_v5  ;;  %4608 = vmatprep.subr.bf16.mxu1 %v10238_v9 }
0x101d   :  { %4568 = vmatpush1.bf16.msra.mxu0 %v10242_v59  ;;  %4609 = vmatpush1.bf16.msra.mxu1 %v10244_v42  ;;  %v11755_v42 = vld [vmem:[#allocation119_spill] sm:$0xff] }
0x101e   :  { %5075 = vmatprep.subr.bf16.mxu0 %v7489_v37  ;;  %5116 = vmatprep.subr.bf16.mxu1 %v7492_v29  ;;  %v7523_v37 = vld [vmem:[#allocation7 + $0x220] ss:$16 sps:$4 sm:$0xff]   ;;  %v7526_v29 = vld [vmem:[#allocation7 + $0x228] ss:$16 sps:$4 sm:$0xff]  }
0x10c0   :  { %v4472_v53 = vpop.f32.mrf.mxu0  ;;  %v4513_v6 = vpop.f32.mrf.mxu1 }
0x10c1   :  { %v4520_v21 = vadd.f32 %v4472_v53, %v11753_v28  ;;  %v4522_v57 = vadd.f32 %v4513_v6, %v11756_v17  ;;  %v7531_v53 = vld [vmem:[#allocation7 + $0x204] ss:$16 sps:$4 sm:$0xff]   ;;  %v7534_v6 = vld [vmem:[#allocation7 + $0x20c] ss:$16 sps:$4 sm:$0xff]   ;;  %v7529_v28 = vld [vmem:[#allocation7 + $0x200] ss:$16 sps:$4 sm:$0xff]  }
0x10c2   :  { %v4474_v20 = vpop.f32.mrf.mxu0  ;;  %v4515_v19 = vpop.f32.mrf.mxu1  ;;  %v7555_v17 = vld [vmem:[#allocation7 + $0x384] ss:$16 sps:$4 sm:$0xff]  }
0x10c3   :  { %v7036_v62 = vmul.f32 -1.442695, %v4520_v21  ;;  %v4521_v2 = vadd.f32 %v4474_v20, %v11754_v38  ;;  %v4523_v25 = vadd.f32 %v4515_v19, %v11755_v42  ;;  %v7532_v21 = vld [vmem:[#allocation7 + $0x208] ss:$16 sps:$4 sm:$0xff]   ;;  %v7537_v20 = vld [vmem:[#allocation7 + $0x3e4] ss:$16 sps:$4 sm:$0xff]  }
0x10c4   :  { %v4476_v5 = vpop.f32.mrf.mxu0  ;;  %v4517_v8 = vpop.f32.mrf.mxu1  ;;  %v7540_v19 = vld [vmem:[#allocation7 + $0x3ec] ss:$16 sps:$4 sm:$0xff]   ;;  %v7538_v38 = vld [vmem:[#allocation7 + $0x3e8] ss:$16 sps:$4 sm:$0xff]   ;;  %v7547_v42 = vld [vmem:[#allocation7 + $0x3a0] ss:$16 sps:$4 sm:$0xff]  }
0x10c5   :  { %7935 = vpow2.f32 %v7036_v62  ;;  %v7037_v9 = vmul.f32 -1.442695, %v4521_v2  ;;  %v7038_v31 = vmul.f32 -1.442695, %v4523_v25  ;;  %v7535_v62 = vld [vmem:[#allocation7 + $0x3e0] ss:$16 sps:$4 sm:$0xff]  }
0x10c6   :  { %v4477_v59 = vpop.f32.mrf.mxu0  ;;  %v4518_v0 = vpop.f32.mrf.mxu1  ;;  %v7543_v2 = vld [vmem:[#allocation7 + $0x3c4] ss:$16 sps:$4 sm:$0xff]   ;;  %v7546_v5 = vld [vmem:[#allocation7 + $0x3cc] ss:$16 sps:$4 sm:$0xff]   ;;  %v7541_v8 = vld [vmem:[#allocation7 + $0x3c0] ss:$16 sps:$4 sm:$0xff]  }
0x10c7   :  { %7937 = vpow2.f32 %v7037_v9  ;;  %v7544_v9 = vld [vmem:[#allocation7 + $0x3c8] ss:$16 sps:$4 sm:$0xff]   ;;  %v7549_v59 = vld [vmem:[#allocation7 + $0x3a4] ss:$16 sps:$4 sm:$0xff]   ;;  %v7552_v0 = vld [vmem:[#allocation7 + $0x3ac] ss:$16 sps:$4 sm:$0xff]  }
0x10c8   :  { %7939 = vtanh.f32 %v4522_v57  ;;  %v7550_v25 = vld [vmem:[#allocation7 + $0x3a8] ss:$16 sps:$4 sm:$0xff]   ;;  %v7558_v57 = vld [vmem:[#allocation7 + $0x38c] ss:$16 sps:$4 sm:$0xff]  }
0x10c9   :  { %7941 = vpow2.f32 %v7038_v31  ;;  %v7553_v31 = vld [vmem:[#allocation7 + $0x380] ss:$16 sps:$4 sm:$0xff]  }
0x10d2   :  { %v7936_v39 = vpop.eup %7935 }
0x10d3   :  { %v4527_v12 = vadd.f32 1.0, %v7936_v39  ;;  %v7556_v39 = vld [vmem:[#allocation7 + $0x388] ss:$16 sps:$4 sm:$0xff]  }
0x10d4   :  { %v7938_v52 = vpop.eup %7937 }
0x10d5   :  { %7943 = vrcp.f32 %v4527_v12  ;;  %v4533_v60 = vadd.f32 1.0, %v7938_v52  ;;  %v7940_v44 = vpop.eup %7939  ;;  %v7561_v12 = vld [vmem:[#allocation7 + $0x364] ss:$16 sps:$4 sm:$0xff]   ;;  %v7564_v52 = vld [vmem:[#allocation7 + $0x36c] ss:$16 sps:$4 sm:$0xff]  }
0x10d6   :  { %v7942_v51 = vpop.eup %7941 }
0x10d7   :  { %7945 = vrcp.f32 %v4533_v60  ;;  %v4540_v30 = vadd.f32 1.0, %v7942_v51  ;;  %v7559_v60 = vld [vmem:[#allocation7 + $0x360] ss:$16 sps:$4 sm:$0xff]   ;;  %v7567_v51 = vld [vmem:[#allocation7 + $0x344] ss:$16 sps:$4 sm:$0xff]  }
0x10d9   :  { %7947 = vrcp.f32 %v4540_v30  ;;  %v7573_v30 = vld [vmem:[#allocation7 + $0x324] ss:$16 sps:$4 sm:$0xff]  }
0x10e2   :  { %v7944_v43 = vpop.eup %7943 }
0x10e3   :  { %v4544_v3 = vmul.f32 %v7944_v43, %v7940_v44  ;;  %v7562_v44 = vld [vmem:[#allocation7 + $0x368] ss:$16 sps:$4 sm:$0xff]   ;;  %v7570_v43 = vld [vmem:[#allocation7 + $0x34c] ss:$16 sps:$4 sm:$0xff]  }
0x10e4   :  { %v7946_v18 = vpop.eup %7945 }
0x10e5   :  { %v4543_v58 = vmul.f32 %v7946_v18, %v10560_v40  ;;  %v11757_v40 = vld [vmem:[#allocation154_spill] sm:$0xff] }
0x10e6   :  { %v7948_v35 = vpop.eup %7947  ;;  %v7568_v18 = vld [vmem:[#allocation7 + $0x348] ss:$16 sps:$4 sm:$0xff]  }
0x10e7   :  { %v10574_v16 = vadd.f32 %v4544_v3, %v4543_v58  ;;  %v7565_v3 = vld [vmem:[#allocation7 + $0x340] ss:$16 sps:$4 sm:$0xff]   ;;  %v7576_v58 = vld [vmem:[#allocation7 + $0x32c] ss:$16 sps:$4 sm:$0xff]  }
0x10e9   :  { %7949 = vtanh.f32 %v10574_v16 }
0x10f6   :  { %v7950_v23 = vpop.eup %7949 }
0x10f7   :  { %v4547_v47 = vmul.f32 %v7950_v23, %v7948_v35  ;;  %v7571_v35 = vld [vmem:[#allocation7 + $0x320] ss:$16 sps:$4 sm:$0xff]   ;;  %v7574_v23 = vld [vmem:[#allocation7 + $0x328] ss:$16 sps:$4 sm:$0xff]  }
0x10f9   :  { %v4552_v1 = vpack.c.bf16 %v4547_v47, %v4547_v47  ;;  %v7579_v47 = vld [vmem:[#allocation7 + $0x304] ss:$16 sps:$4 sm:$0xff]  }
0x10fb   :  { %4586 = vmatmul.mubr.bf16.vlgmr.msra.gmra.mxu0 %v4552_v1  ;;  %4627 = vmatmul.mubr.bf16.vlgmr.msra.gmra.mxu1 %v4552_v1  ;;  %v7580_v1 = vld [vmem:[#allocation7 + $0x308] ss:$16 sps:$4 sm:$0xff]  }
0x10fc   :  { %5076 = vmatpush1.bf16.msra.mxu0 %v7487_v61  ;;  %5117 = vmatpush1.bf16.msra.mxu1 %v7490_v45  ;;  %v7582_v61 = vld [vmem:[#allocation7 + $0x30c] ss:$16 sps:$4 sm:$0xff]   ;;  %v7577_v45 = vld [vmem:[#allocation7 + $0x300] ss:$16 sps:$4 sm:$0xff]  }
0x10fd   :  { %5107 = vmatprep.mubr.bf16.mxu0 %v11757_v40  ;;  %5148 = vmatprep.mubr.bf16.mxu1 %v11757_v40 }
0x10fe   :  { %5077 = vmatprep.subr.bf16.mxu0 %v7495_v46  ;;  %5118 = vmatprep.subr.bf16.mxu1 %v7498_v24  ;;  %v11758_v46 = vld [vmem:[#allocation158_spill] sm:$0xff] }
0x10ff   :  { %v4665_v24 = vpack.c.bf16 %v11758_v46, %v11758_v46 }
0x1100   :  { %5078 = vmatpush1.bf16.msra.mxu0 %v7493_v36  ;;  %5119 = vmatpush1.bf16.msra.mxu1 %v7496_v4 }
0x1101   :  { %5079 = vmatprep.subr.bf16.mxu0 %v7501_v11  ;;  %5120 = vmatprep.subr.bf16.mxu1 %v7504_v55 }
0x1104   :  { %5080 = vmatpush1.bf16.msra.mxu0 %v7499_v33  ;;  %5121 = vmatpush1.bf16.msra.mxu1 %v7502_v54 }
0x1105   :  { %5081 = vmatprep.subr.bf16.mxu0 %v7507_v32  ;;  %5122 = vmatprep.subr.bf16.mxu1 %v7510_v48 }
0x1108   :  { %5082 = vmatpush1.bf16.msra.mxu0 %v7505_v41  ;;  %5123 = vmatpush1.bf16.msra.mxu1 %v7508_v34 }
0x1109   :  { %5083 = vmatprep.subr.bf16.mxu0 %v7513_v56  ;;  %5124 = vmatprep.subr.bf16.mxu1 %v7516_v22 }
0x110c   :  { %5084 = vmatpush1.bf16.msra.mxu0 %v7511_v26  ;;  %5125 = vmatpush1.bf16.msra.mxu1 %v7514_v13 }
0x110d   :  { %5085 = vmatprep.subr.bf16.mxu0 %v7519_v63  ;;  %5126 = vmatprep.subr.bf16.mxu1 %v7522_v50 }
0x1110   :  { %5086 = vmatpush1.bf16.msra.mxu0 %v7517_v10  ;;  %5127 = vmatpush1.bf16.msra.mxu1 %v7520_v49 }
0x1111   :  { %5087 = vmatprep.subr.bf16.mxu0 %v7525_v15  ;;  %5128 = vmatprep.subr.bf16.mxu1 %v7528_v7 }
0x1114   :  { %5088 = vmatpush1.bf16.msra.mxu0 %v7523_v37  ;;  %5129 = vmatpush1.bf16.msra.mxu1 %v7526_v29 }
0x1115   :  { %5089 = vmatprep.subr.bf16.mxu0 %v7531_v53  ;;  %5130 = vmatprep.subr.bf16.mxu1 %v7534_v6 }
0x1118   :  { %5090 = vmatpush1.bf16.msra.mxu0 %v7529_v28  ;;  %5131 = vmatpush1.bf16.msra.mxu1 %v7532_v21 }
0x1119   :  { %5091 = vmatprep.subr.bf16.mxu0 %v7537_v20  ;;  %5132 = vmatprep.subr.bf16.mxu1 %v7540_v19 }
0x111c   :  { %5092 = vmatpush2.bf16.msra.mxu0 %v7535_v62  ;;  %5133 = vmatpush2.bf16.msra.mxu1 %v7538_v38 }
0x111d   :  { %5093 = vmatprep.subr.bf16.mxu0 %v7543_v2  ;;  %5134 = vmatprep.subr.bf16.mxu1 %v7546_v5 }
0x1120   :  { %5094 = vmatpush2.bf16.msra.mxu0 %v7541_v8  ;;  %5135 = vmatpush2.bf16.msra.mxu1 %v7544_v9 }
0x1121   :  { %5095 = vmatprep.subr.bf16.mxu0 %v7549_v59  ;;  %5136 = vmatprep.subr.bf16.mxu1 %v7552_v0 }
0x1124   :  { %5096 = vmatpush2.bf16.msra.mxu0 %v7547_v42  ;;  %5137 = vmatpush2.bf16.msra.mxu1 %v7550_v25 }
0x1125   :  { %5097 = vmatprep.subr.bf16.mxu0 %v7555_v17  ;;  %5138 = vmatprep.subr.bf16.mxu1 %v7558_v57 }
0x1128   :  { %5098 = vmatpush2.bf16.msra.mxu0 %v7553_v31  ;;  %5139 = vmatpush2.bf16.msra.mxu1 %v7556_v39 }
0x1129   :  { %5099 = vmatprep.subr.bf16.mxu0 %v7561_v12  ;;  %5140 = vmatprep.subr.bf16.mxu1 %v7564_v52 }
0x112c   :  { %5100 = vmatpush2.bf16.msra.mxu0 %v7559_v60  ;;  %5141 = vmatpush2.bf16.msra.mxu1 %v7562_v44 }
0x112d   :  { %5101 = vmatprep.subr.bf16.mxu0 %v7567_v51  ;;  %5142 = vmatprep.subr.bf16.mxu1 %v7570_v43 }
0x1130   :  { %5102 = vmatpush2.bf16.msra.mxu0 %v7565_v3  ;;  %5143 = vmatpush2.bf16.msra.mxu1 %v7568_v18 }
0x1131   :  { %5103 = vmatprep.subr.bf16.mxu0 %v7573_v30  ;;  %5144 = vmatprep.subr.bf16.mxu1 %v7576_v58 }
0x1134   :  { %5104 = vmatpush2.bf16.msra.mxu0 %v7571_v35  ;;  %5145 = vmatpush2.bf16.msra.mxu1 %v7574_v23 }
0x1135   :  { %5105 = vmatprep.subr.bf16.mxu0 %v7579_v47  ;;  %5146 = vmatprep.subr.bf16.mxu1 %v7582_v61 }
0x1138   :  { %5106 = vmatpush2.bf16.msra.mxu0 %v7577_v45  ;;  %5147 = vmatpush2.bf16.msra.mxu1 %v7580_v1 }
0x113b   :  { %5108 = vmatmul.mubr.bf16.vlgmr.msra.gmra.mxu0 %v4665_v24  ;;  %5149 = vmatmul.mubr.bf16.vlgmr.msra.gmra.mxu1 %v4665_v24 }
0x113c   :  { %8376 = shalt.err (!%p8373_p1)  }
0x113d   :  { %107 = dma.hbm_to_vmem [thread:$0]  %s10641_s7, 26624, %s105_s2, [#allocation6]  ;;  %v11759_v40 = vld [vmem:[#allocation159_spill] sm:$0xff]  ;;  %v11761_v33 = vld [vmem:[#allocation150_spill] sm:$0xff]  ;;  %v11763_v41 = vld [vmem:[#allocation132_spill] sm:$0xff] }
0x113e   :  { %v11760_v11 = vld [vmem:[#allocation151_spill] sm:$0xff]  ;;  %v3604_v54 = vadd.f32 %v11761_v33, %v10272_v14  ;;  %v11762_v32 = vld [vmem:[#allocation130_spill] sm:$0xff] }
0x113f   :  { %v3531_v55 = vadd.f32 %v11760_v11, %v11759_v40  ;;  %v4733_v42 = vld [vmem:[#allocation12 + $0x9] ss:$2 sm:$0xf]  ;;  %v11765_v57 = vld [vmem:[#allocation91_spill] sm:$0xff] }
0x1140   :  { %v11764_v25 = vld [vmem:[#allocation90_spill] sm:$0xff]  ;;  %v4742_v31 = vrot.slane %v4733_v42, %v11765_v57  ;;  %v11766_v35 = vld [vmem:[#allocation111_spill] sm:$0xff] }
0x1141   :  { %v4738_v17 = vrot.slane %v4733_v42, %v11764_v25  ;;  %v4750_v23 = vrot.slane %v4733_v42, %v11766_v35  ;;  %v11767_v61 = vld [vmem:[#allocation107_spill] sm:$0xff] }
0x1142   :  { %v4746_v45 = vrot.slane %v4733_v42, %v11767_v61 }
0x11bb   :  { %v4587_v36 = vpop.f32.mrf.mxu0  ;;  %v4628_v4 = vpop.f32.mrf.mxu1 }
0x11bc   :  { %v4635_v48 = vadd.f32 %v4587_v36, %v11762_v32  ;;  %v4637_v34 = vadd.f32 %v4628_v4, %v11763_v41 }
0x11bd   :  { %v4589_v56 = vpop.f32.mrf.mxu0  ;;  %v4630_v22 = vpop.f32.mrf.mxu1 }
0x11be   :  { %v7039_v26 = vmul.f32 -1.442695, %v4635_v48  ;;  %v4636_v13 = vadd.f32 %v4589_v56, %v3531_v55  ;;  %v4638_v63 = vadd.f32 %v4630_v22, %v3604_v54 }
0x11bf   :  { %v4591_v50 = vpop.f32.mrf.mxu0  ;;  %v4632_v10 = vpop.f32.mrf.mxu1 }
0x11c0   :  { %7951 = vpow2.f32 %v7039_v26  ;;  %v7040_v49 = vmul.f32 -1.442695, %v4636_v13  ;;  %v7041_v37 = vmul.f32 -1.442695, %v4638_v63 }
0x11c1   :  { %v4592_v15 = vpop.f32.mrf.mxu0  ;;  %v4633_v7 = vpop.f32.mrf.mxu1 }
0x11c2   :  { %7953 = vpow2.f32 %v7040_v49 }
0x11c3   :  { %7955 = vtanh.f32 %v4637_v34 }
0x11c4   :  { %7957 = vpow2.f32 %v7041_v37 }
0x11cd   :  { %v7952_v29 = vpop.eup %7951 }
0x11ce   :  { %v4642_v53 = vadd.f32 1.0, %v7952_v29 }
0x11cf   :  { %v7954_v14 = vpop.eup %7953 }
0x11d0   :  { %7959 = vrcp.f32 %v4642_v53  ;;  %v4648_v6 = vadd.f32 1.0, %v7954_v14  ;;  %v7956_v28 = vpop.eup %7955 }
0x11d1   :  { %v7958_v21 = vpop.eup %7957 }
0x11d2   :  { %7961 = vrcp.f32 %v4648_v6  ;;  %v4655_v38 = vadd.f32 1.0, %v7958_v21 }
0x11d4   :  { %7963 = vrcp.f32 %v4655_v38 }
0x11dd   :  { %v7960_v20 = vpop.eup %7959 }
0x11de   :  { %v4659_v19 = vmul.f32 %v7960_v20, %v7956_v28 }
0x11df   :  { %v7962_v62 = vpop.eup %7961 }
0x11e0   :  { %v4658_v2 = vmul.f32 %v7962_v62, %v10574_v16 }
0x11e1   :  { %v7964_v8 = vpop.eup %7963 }
0x11e2   :  { %v4660_v5 = vadd.f32 %v4659_v19, %v4658_v2 }
0x11e4   :  { %7965 = vtanh.f32 %v4660_v5 }
0x11f1   :  { %v7966_v9 = vpop.eup %7965 }
0x11f2   :  { %v10591_v59 = vmul.f32 %v7966_v9, %v7964_v8 }
0x11f4   :  { %v5181_v0 = vpack.c.bf16 %v10591_v59, %v10591_v59 }
0x11fb   :  { %v5109_v39 = vpop.f32.mrf.mxu0  ;;  %v5150_v12 = vpop.f32.mrf.mxu1 }
0x11fc   :  { %v5110_v52 = vadd.f32 %v5109_v39, %v4738_v17  ;;  %v5151_v24 = vadd.f32 %v5150_v12, %v4746_v45 }
0x11fd   :  { %v5111_v60 = vpop.f32.mrf.mxu0  ;;  %v5152_v16 = vpop.f32.mrf.mxu1 }
0x11fe   :  { %v7106_v44 = vmul.f32 -1.442695, %v5110_v52  ;;  %v5112_v51 = vadd.f32 %v5111_v60, %v4742_v31  ;;  %v5153_v47 = vadd.f32 %v5152_v16, %v4750_v23 }
0x11ff   :  { %v5113_v43 = vpop.f32.mrf.mxu0  ;;  %v5154_v3 = vpop.f32.mrf.mxu1 }
0x1200   :  { %7967 = vpow2.f32 %v7106_v44  ;;  %v7107_v18 = vmul.f32 -1.442695, %v5112_v51  ;;  %v7108_v1 = vmul.f32 -1.442695, %v5153_v47 }
0x1201   :  { %v5114_v30 = vpop.f32.mrf.mxu0  ;;  %v5155_v58 = vpop.f32.mrf.mxu1 }
0x1202   :  { %7969 = vpow2.f32 %v7107_v18 }
0x1203   :  { %7971 = vpow2.f32 %v7108_v1 }
0x120d   :  { %v7968_v46 = vpop.eup %7967 }
0x120e   :  { %v5160_v36 = vadd.f32 1.0, %v7968_v46 }
0x120f   :  { %v7970_v4 = vpop.eup %7969 }
0x1210   :  { %7973 = vrcp.f32 %v5160_v36  ;;  %v5166_v40 = vadd.f32 1.0, %v7970_v4  ;;  %v7972_v11 = vpop.eup %7971 }
0x1211   :  { %7975 = vtanh.f32 %v5151_v24  ;;  %v5173_v32 = vadd.f32 1.0, %v7972_v11 }
0x1212   :  { %7977 = vrcp.f32 %v5166_v40 }
0x1213   :  { %7979 = vrcp.f32 %v5173_v32 }
0x121d   :  { %v7974_v55 = vpop.eup %7973 }
0x121e   :  { %v7976_v33 = vpop.eup %7975 }
0x121f   :  { %v7978_v54 = vpop.eup %7977  ;;  %v5177_v41 = vmul.f32 %v7976_v33, %v7974_v55 }
0x1220   :  { %v5176_v48 = vmul.f32 0.0, %v7978_v54  ;;  %v7980_v56 = vpop.eup %7979 }
0x1222   :  { %v5178_v34 = vadd.f32 %v5177_v41, %v5176_v48 }
0x1224   :  { %7981 = vtanh.f32 %v5178_v34 }
0x1231   :  { %v7982_v22 = vpop.eup %7981 }
0x1232   :  { %v5180_v26 = vmul.f32 %v7982_v22, %v7980_v56 }
0x1234   :  { %v5182_v13 = vpack.c.bf16 %v5180_v26, %v5180_v26 }
0x1235   :  { %8383 = dma.done.wait [#allocation6], 26624 }
0x1236   :  { %8384 = vsyncadd [#allocation6], 4294940672  ;;  %5423 = vmatprep.mubr.bf16.mxu0 %v5182_v13  ;;  %v8009_v63 = vld [vmem:[#allocation5 + $0x74] ss:$8 sps:$4 sm:$0xff]   ;;  %v8011_v50 = vld [vmem:[#allocation5 + $0x70] ss:$8 sps:$4 sm:$0xff]  }
0x1237   :  { %5391 = vmatprep.subr.bf16.mxu0 %v8009_v63  ;;  %v8012_v10 = vld [vmem:[#allocation5 + $0x64] ss:$8 sps:$4 sm:$0xff]   ;;  %v8014_v49 = vld [vmem:[#allocation5 + $0x60] ss:$8 sps:$4 sm:$0xff]   ;;  %v8015_v15 = vld [vmem:[#allocation5 + $0x54] ss:$8 sps:$4 sm:$0xff]  }
0x1238   :  { %5392 = vmatpush1.bf16.msra.mxu0 %v8011_v50  ;;  %v8017_v7 = vld [vmem:[#allocation5 + $0x50] ss:$8 sps:$4 sm:$0xff]   ;;  %v8018_v37 = vld [vmem:[#allocation5 + $0x44] ss:$8 sps:$4 sm:$0xff]   ;;  %v8020_v29 = vld [vmem:[#allocation5 + $0x40] ss:$8 sps:$4 sm:$0xff]  }
0x1239   :  { %5393 = vmatprep.subr.bf16.mxu0 %v8012_v10  ;;  %v8021_v53 = vld [vmem:[#allocation5 + $0x34] ss:$8 sps:$4 sm:$0xff]   ;;  %v8023_v14 = vld [vmem:[#allocation5 + $0x30] ss:$8 sps:$4 sm:$0xff]   ;;  %v8024_v6 = vld [vmem:[#allocation5 + $0x24] ss:$8 sps:$4 sm:$0xff]  }
0x123a   :  { %v8026_v28 = vld [vmem:[#allocation5 + $0x20] ss:$8 sps:$4 sm:$0xff]   ;;  %v8027_v21 = vld [vmem:[#allocation5 + $0x14] ss:$8 sps:$4 sm:$0xff]   ;;  %v8029_v20 = vld [vmem:[#allocation5 + $0x10] ss:$8 sps:$4 sm:$0xff]  }
0x123b   :  { %v8030_v19 = vld [vmem:[#allocation5 + $0x4] ss:$8 sps:$4 sm:$0xff]   ;;  %v8032_v62 = vld [vmem:[#allocation5] ss:$8 sps:$4 sm:$0xff]   ;;  %v8033_v38 = vld [vmem:[#allocation5 + $0xf4] ss:$8 sps:$4 sm:$0xff]  }
0x123c   :  { %5394 = vmatpush1.bf16.msra.mxu0 %v8014_v49  ;;  %v8035_v2 = vld [vmem:[#allocation5 + $0xf0] ss:$8 sps:$4 sm:$0xff]   ;;  %v8036_v5 = vld [vmem:[#allocation5 + $0xe4] ss:$8 sps:$4 sm:$0xff]   ;;  %v8038_v8 = vld [vmem:[#allocation5 + $0xe0] ss:$8 sps:$4 sm:$0xff]  }
0x123d   :  { %5395 = vmatprep.subr.bf16.mxu0 %v8015_v15  ;;  %v8039_v9 = vld [vmem:[#allocation5 + $0xd4] ss:$8 sps:$4 sm:$0xff]   ;;  %v8041_v42 = vld [vmem:[#allocation5 + $0xd0] ss:$8 sps:$4 sm:$0xff]   ;;  %v8042_v39 = vld [vmem:[#allocation5 + $0xc4] ss:$8 sps:$4 sm:$0xff]  }
0x123e   :  { %v8073_v17 = vld [vmem:[#allocation5 + $0x174] ss:$8 sps:$4 sm:$0xff]   ;;  %v8075_v31 = vld [vmem:[#allocation5 + $0x170] ss:$8 sps:$4 sm:$0xff]   ;;  %v8076_v12 = vld [vmem:[#allocation5 + $0x164] ss:$8 sps:$4 sm:$0xff]  }
0x123f   :  { %5671 = vmatprep.subr.bf16.mxu1 %v8073_v17  ;;  %v8078_v52 = vld [vmem:[#allocation5 + $0x160] ss:$8 sps:$4 sm:$0xff]   ;;  %v8079_v60 = vld [vmem:[#allocation5 + $0x154] ss:$8 sps:$4 sm:$0xff]   ;;  %v8081_v51 = vld [vmem:[#allocation5 + $0x150] ss:$8 sps:$4 sm:$0xff]  }
0x1240   :  { %5396 = vmatpush1.bf16.msra.mxu0 %v8017_v7  ;;  %5672 = vmatpush1.bf16.msra.mxu1 %v8075_v31  ;;  %v8044_v16 = vld [vmem:[#allocation5 + $0xc0] ss:$8 sps:$4 sm:$0xff]   ;;  %v8045_v44 = vld [vmem:[#allocation5 + $0xb4] ss:$8 sps:$4 sm:$0xff]   ;;  %v8082_v43 = vld [vmem:[#allocation5 + $0x144] ss:$8 sps:$4 sm:$0xff]  }
0x1241   :  { %5397 = vmatprep.subr.bf16.mxu0 %v8018_v37  ;;  %5673 = vmatprep.subr.bf16.mxu1 %v8076_v12  ;;  %v8047_v3 = vld [vmem:[#allocation5 + $0xb0] ss:$8 sps:$4 sm:$0xff]   ;;  %v8048_v18 = vld [vmem:[#allocation5 + $0xa4] ss:$8 sps:$4 sm:$0xff]   ;;  %v8084_v30 = vld [vmem:[#allocation5 + $0x140] ss:$8 sps:$4 sm:$0xff]  }
0x1242   :  { %v8085_v58 = vld [vmem:[#allocation5 + $0x134] ss:$8 sps:$4 sm:$0xff]   ;;  %v8050_v35 = vld [vmem:[#allocation5 + $0xa0] ss:$8 sps:$4 sm:$0xff]   ;;  %v8053_v47 = vld [vmem:[#allocation5 + $0x90] ss:$8 sps:$4 sm:$0xff]  }
0x1243   :  { %v8051_v23 = vld [vmem:[#allocation5 + $0x94] ss:$8 sps:$4 sm:$0xff]   ;;  %v8087_v61 = vld [vmem:[#allocation5 + $0x130] ss:$8 sps:$4 sm:$0xff]   ;;  %v8088_v45 = vld [vmem:[#allocation5 + $0x124] ss:$8 sps:$4 sm:$0xff]  }
0x1244   :  { %5398 = vmatpush1.bf16.msra.mxu0 %v8020_v29  ;;  %5674 = vmatpush1.bf16.msra.mxu1 %v8078_v52  ;;  %v8054_v1 = vld [vmem:[#allocation5 + $0x84] ss:$8 sps:$4 sm:$0xff]   ;;  %v8090_v46 = vld [vmem:[#allocation5 + $0x120] ss:$8 sps:$4 sm:$0xff]   ;;  %v8091_v24 = vld [vmem:[#allocation5 + $0x114] ss:$8 sps:$4 sm:$0xff]  }
0x1245   :  { %5399 = vmatprep.subr.bf16.mxu0 %v8021_v53  ;;  %5675 = vmatprep.subr.bf16.mxu1 %v8079_v60  ;;  %v8056_v36 = vld [vmem:[#allocation5 + $0x80] ss:$8 sps:$4 sm:$0xff]   ;;  %v8057_v4 = vld [vmem:[#allocation5 + $0x2f0] ss:$8 sps:$4 sm:$0xff]   ;;  %v8094_v55 = vld [vmem:[#allocation5 + $0x104] ss:$8 sps:$4 sm:$0xff]  }
0x1246   :  { %v5715_v40 = vld [vmem:[%s10635_s1 + $0x8] sm:$0xff]  ;;  %v8093_v11 = vld [vmem:[#allocation5 + $0x110] ss:$8 sps:$4 sm:$0xff]   ;;  %v8097_v41 = vld [vmem:[#allocation5 + $0x1f4] ss:$8 sps:$4 sm:$0xff]   ;;  %vm6707_vm1 = vcmask 7168  }
0x1247   :  { %v8058_v33 = vld [vmem:[#allocation5 + $0x270] ss:$8 sps:$4 sm:$0xff]   ;;  %v8059_v54 = vld [vmem:[#allocation5 + $0x2e0] ss:$8 sps:$4 sm:$0xff]   ;;  %v5717_v32 = vpack.c.bf16 %v5715_v40, %v5715_v40  ;;  %v8100_v26 = vld [vmem:[#allocation5 + $0x1e4] ss:$8 sps:$4 sm:$0xff]  }
0x1248   :  { %5400 = vmatpush1.bf16.msra.mxu0 %v8023_v14  ;;  %5676 = vmatpush1.bf16.msra.mxu1 %v8081_v51  ;;  %v8096_v48 = vld [vmem:[#allocation5 + $0x100] ss:$8 sps:$4 sm:$0xff]   ;;  %v8061_v56 = vld [vmem:[#allocation5 + $0x2d0] ss:$8 sps:$4 sm:$0xff]   ;;  %v8103_v10 = vld [vmem:[#allocation5 + $0x1d4] ss:$8 sps:$4 sm:$0xff]  }
0x1249   :  { %5401 = vmatprep.subr.bf16.mxu0 %v8024_v6  ;;  %5677 = vmatprep.subr.bf16.mxu1 %v8082_v43  ;;  %v8060_v34 = vld [vmem:[#allocation5 + $0x260] ss:$8 sps:$4 sm:$0xff]   ;;  %v8099_v22 = vld [vmem:[#allocation5 + $0x1f0] ss:$8 sps:$4 sm:$0xff]   ;;  %v8109_v53 = vld [vmem:[#allocation5 + $0x1b4] ss:$8 sps:$4 sm:$0xff]  }
0x124a   :  { %v8062_v13 = vld [vmem:[#allocation5 + $0x250] ss:$8 sps:$4 sm:$0xff]   ;;  %v8063_v63 = vld [vmem:[#allocation5 + $0x2c0] ss:$8 sps:$4 sm:$0xff]   ;;  %v8123_v31 = vld [vmem:[#allocation5 + $0x374] ss:$8 sps:$4 sm:$0xff]  }
0x124b   :  { %v8102_v50 = vld [vmem:[#allocation5 + $0x1e0] ss:$8 sps:$4 sm:$0xff]   ;;  %v8065_v15 = vld [vmem:[#allocation5 + $0x2b0] ss:$8 sps:$4 sm:$0xff]   ;;  %v8147_v12 = vld [vmem:[#allocation5 + $0x3f4] ss:$8 sps:$4 sm:$0xff]  }
0x124c   :  { %5402 = vmatpush1.bf16.msra.mxu0 %v8026_v28  ;;  %5678 = vmatpush1.bf16.msra.mxu1 %v8084_v30  ;;  %v8064_v49 = vld [vmem:[#allocation5 + $0x240] ss:$8 sps:$4 sm:$0xff]   ;;  %v8105_v59 = vld [vmem:[#allocation5 + $0x1d0] ss:$8 sps:$4 sm:$0xff]   ;;  %v8150_v52 = vld [vmem:[#allocation5 + $0x3e4] ss:$8 sps:$4 sm:$0xff]  }
0x124d   :  { %5403 = vmatprep.subr.bf16.mxu0 %v8027_v21  ;;  %5679 = vmatprep.subr.bf16.mxu1 %v8085_v58  ;;  %v8066_v7 = vld [vmem:[#allocation5 + $0x230] ss:$8 sps:$4 sm:$0xff]   ;;  %v8067_v37 = vld [vmem:[#allocation5 + $0x2a0] ss:$8 sps:$4 sm:$0xff]   ;;  %v8156_v51 = vld [vmem:[#allocation5 + $0x3c4] ss:$8 sps:$4 sm:$0xff]  }
0x124e   :  { %v8108_v29 = vld [vmem:[#allocation5 + $0x1c0] ss:$8 sps:$4 sm:$0xff]   ;;  %v8069_v6 = vld [vmem:[#allocation5 + $0x290] ss:$8 sps:$4 sm:$0xff]   ;;  %v8162_v30 = vld [vmem:[#allocation5 + $0x3a4] ss:$8 sps:$4 sm:$0xff]  }
0x124f   :  { %v8068_v14 = vld [vmem:[#allocation5 + $0x220] ss:$8 sps:$4 sm:$0xff]   ;;  %v8111_v28 = vld [vmem:[#allocation5 + $0x1b0] ss:$8 sps:$4 sm:$0xff]   ;;  %v8192_v40 = vld [vmem:[#allocation5 + $0x444] ss:$8 sps:$4 sm:$0xff]  }
0x1250   :  { %5404 = vmatpush1.bf16.msra.mxu0 %v8029_v20  ;;  %5680 = vmatpush1.bf16.msra.mxu1 %v8087_v61  ;;  %v8070_v21 = vld [vmem:[#allocation5 + $0x210] ss:$8 sps:$4 sm:$0xff]   ;;  %v8071_v20 = vld [vmem:[#allocation5 + $0x280] ss:$8 sps:$4 sm:$0xff]  }
0x1251   :  { %5405 = vmatprep.subr.bf16.mxu0 %v8030_v19  ;;  %5681 = vmatprep.subr.bf16.mxu1 %v8088_v45  ;;  %v8072_v19 = vld [vmem:[#allocation5 + $0x200] ss:$8 sps:$4 sm:$0xff]   ;;  %v8174_v45 = vld [vmem:[#allocation5 + $0x474] ss:$8 sps:$4 sm:$0xff]  }
0x1252   :  { %v8120_v17 = vld [vmem:[#allocation5 + $0x180] ss:$8 sps:$4 sm:$0xff]  }
0x1253   :  { %v8148_v60 = vld [vmem:[#allocation5 + $0x3e0] ss:$8 sps:$4 sm:$0xff]  }
0x1254   :  { %5406 = vmatpush1.bf16.msra.mxu0 %v8032_v62  ;;  %5682 = vmatpush1.bf16.msra.mxu1 %v8090_v46  ;;  %v5714_v62 = vld [vmem:[%s10635_s1] sm:$0xff] }
0x1255   :  { %5407 = vmatprep.subr.bf16.mxu0 %v8033_v38  ;;  %5683 = vmatprep.subr.bf16.mxu1 %v8091_v24  ;;  %v5716_v38 = vpack.c.bf16 %v5714_v62, %v5714_v62  ;;  %v8154_v43 = vld [vmem:[#allocation5 + $0x3c0] ss:$8 sps:$4 sm:$0xff]   ;;  %v8180_v46 = vld [vmem:[#allocation5 + $0x464] ss:$8 sps:$4 sm:$0xff]  }
0x1256   :  { %v8160_v58 = vld [vmem:[#allocation5 + $0x3a0] ss:$8 sps:$4 sm:$0xff]   ;;  %v8126_v62 = vld [vmem:[#allocation5 + $0x364] ss:$8 sps:$4 sm:$0xff]  }
0x1257   :  { %v8166_v61 = vld [vmem:[#allocation5 + $0x380] ss:$8 sps:$4 sm:$0xff]  }
0x1258   :  { %5408 = vmatpush2.bf16.msra.mxu0 %v8035_v2  ;;  %5684 = vmatpush1.bf16.msra.mxu1 %v8093_v11  ;;  %v8112_v2 = vld [vmem:[#allocation5 + $0x1a4] ss:$8 sps:$4 sm:$0xff]   ;;  %v8178_v24 = vld [vmem:[#allocation5 + $0x460] ss:$8 sps:$4 sm:$0xff]  }
0x1259   :  { %5409 = vmatprep.subr.bf16.mxu0 %v8036_v5  ;;  %5685 = vmatprep.subr.bf16.mxu1 %v8094_v55  ;;  %v8114_v5 = vld [vmem:[#allocation5 + $0x1a0] ss:$8 sps:$4 sm:$0xff]   ;;  %v8198_v55 = vld [vmem:[#allocation5 + $0x434] ss:$8 sps:$4 sm:$0xff]  }
0x125a   :  { %v8190_v11 = vld [vmem:[#allocation5 + $0x440] ss:$8 sps:$4 sm:$0xff]  }
0x125c   :  { %5410 = vmatpush2.bf16.msra.mxu0 %v8038_v8  ;;  %5686 = vmatpush1.bf16.msra.mxu1 %v8096_v48  ;;  %v8115_v8 = vld [vmem:[#allocation5 + $0x194] ss:$8 sps:$4 sm:$0xff]   ;;  %v5219_v48 = vld [vmem:[#allocation14] ss:$8 sm:$0x3] }
0x125d   :  { %5411 = vmatprep.subr.bf16.mxu0 %v8039_v9  ;;  %5687 = vmatprep.subr.bf16.mxu1 %v8097_v41  ;;  %v8117_v9 = vld [vmem:[#allocation5 + $0x190] ss:$8 sps:$4 sm:$0xff]   ;;  %v5224_v41 = vrot.slane %v5219_v48, %v11764_v25 }
0x1260   :  { %5412 = vmatpush2.bf16.msra.mxu0 %v8041_v42  ;;  %5688 = vmatpush2.bf16.msra.mxu1 %v8099_v22  ;;  %v8118_v42 = vld [vmem:[#allocation5 + $0x184] ss:$8 sps:$4 sm:$0xff]  }
0x1261   :  { %5413 = vmatprep.subr.bf16.mxu0 %v8042_v39  ;;  %5689 = vmatprep.subr.bf16.mxu1 %v8100_v26  ;;  %v8145_v39 = vld [vmem:[#allocation5 + $0x3f0] ss:$8 sps:$4 sm:$0xff]  }
0x1264   :  { %5414 = vmatpush2.bf16.msra.mxu0 %v8044_v16  ;;  %5690 = vmatpush2.bf16.msra.mxu1 %v8102_v50  ;;  %v8153_v16 = vld [vmem:[#allocation5 + $0x3d4] ss:$8 sps:$4 sm:$0xff]  }
0x1265   :  { %5415 = vmatprep.subr.bf16.mxu0 %v8045_v44  ;;  %5691 = vmatprep.subr.bf16.mxu1 %v8103_v10  ;;  %v8151_v44 = vld [vmem:[#allocation5 + $0x3d0] ss:$8 sps:$4 sm:$0xff]  }
0x1268   :  { %5416 = vmatpush2.bf16.msra.mxu0 %v8047_v3  ;;  %5692 = vmatpush2.bf16.msra.mxu1 %v8105_v59  ;;  %v8159_v3 = vld [vmem:[#allocation5 + $0x3b4] ss:$8 sps:$4 sm:$0xff]  }
0x1269   :  { %5417 = vmatprep.subr.bf16.mxu0 %v8048_v18  ;;  %v8157_v18 = vld [vmem:[#allocation5 + $0x3b0] ss:$8 sps:$4 sm:$0xff]  }
0x126c   :  { %5418 = vmatpush2.bf16.msra.mxu0 %v8050_v35  ;;  %v8165_v35 = vld [vmem:[#allocation5 + $0x394] ss:$8 sps:$4 sm:$0xff]  }
0x126d   :  { %5419 = vmatprep.subr.bf16.mxu0 %v8051_v23  ;;  %v8163_v23 = vld [vmem:[#allocation5 + $0x390] ss:$8 sps:$4 sm:$0xff]  }
0x1270   :  { %5420 = vmatpush2.bf16.msra.mxu0 %v8053_v47  ;;  %v8168_v47 = vld [vmem:[#allocation5 + $0x384] ss:$8 sps:$4 sm:$0xff]  }
0x1271   :  { %5421 = vmatprep.subr.bf16.mxu0 %v8054_v1  ;;  %v8172_v1 = vld [vmem:[#allocation5 + $0x470] ss:$8 sps:$4 sm:$0xff]  }
0x1274   :  { %5422 = vmatpush2.bf16.msra.mxu0 %v8056_v36  ;;  %v8186_v36 = vld [vmem:[#allocation5 + $0x454] ss:$8 sps:$4 sm:$0xff]  }
0x1275   :  { %7286 = vmatprep.subr.bf16.mxu0 %v8057_v4  ;;  %v8184_v4 = vld [vmem:[#allocation5 + $0x450] ss:$8 sps:$4 sm:$0xff]  }
0x1277   :  { %5424 = vmatmul.mubr.bf16.vlgmr.msra.gmra.mxu0 %v5181_v0  ;;  %v8106_v0 = vld [vmem:[#allocation5 + $0x1c4] ss:$8 sps:$4 sm:$0xff]  }
0x1278   :  { %7287 = vmatpush3.bf16.msra.mxu0 %v8058_v33  ;;  %5879 = vmatprep.mubr.bf16.mxu0 %v5717_v32  ;;  %v8196_v33 = vld [vmem:[#allocation5 + $0x430] ss:$8 sps:$4 sm:$0xff]   ;;  %v8202_v32 = vld [vmem:[#allocation5 + $0x420] ss:$8 sps:$4 sm:$0xff]  }
0x1279   :  { %7288 = vmatprep.subr.bf16.mxu0 %v8059_v54  ;;  %5693 = vmatprep.subr.bf16.mxu1 %v8106_v0  ;;  %v8204_v54 = vld [vmem:[#allocation5 + $0x424] ss:$8 sps:$4 sm:$0xff]  }
0x127a   :  { %5694 = vmatpush2.bf16.msra.mxu1 %v8108_v29 }
0x127b   :  { %5695 = vmatprep.subr.bf16.mxu1 %v8109_v53 }
0x127c   :  { %7289 = vmatpush3.bf16.msra.mxu0 %v8060_v34  ;;  %v5435_v34 = vld [vmem:[#allocation14 + $0x1] ss:$8 sm:$0x3] }
0x127d   :  { %7290 = vmatprep.subr.bf16.mxu0 %v8061_v56  ;;  %v5228_v56 = vrot.slane %v5219_v48, %v11765_v57  ;;  %v8208_v48 = vld [vmem:[#allocation5 + $0x410] ss:$8 sps:$4 sm:$0xff]  }
0x127e   :  { %5696 = vmatpush2.bf16.msra.mxu1 %v8111_v28 }
0x127f   :  { %5697 = vmatprep.subr.bf16.mxu1 %v8112_v2  ;;  %v8129_v2 = vld [vmem:[#allocation5 + $0x354] ss:$8 sps:$4 sm:$0xff]  }
0x1280   :  { %7291 = vmatpush3.bf16.msra.mxu0 %v8062_v13  ;;  %v5440_v13 = vrot.slane %v5435_v34, %v11764_v25 }
0x1281   :  { %7292 = vmatprep.subr.bf16.mxu0 %v8063_v63  ;;  %v5450_v63 = vld [vmem:[#allocation14 + $0x2] ss:$8 sm:$0x3] }
0x1282   :  { %5698 = vmatpush2.bf16.msra.mxu1 %v8114_v5  ;;  %v5455_v59 = vrot.slane %v5450_v63, %v11764_v25  ;;  %v5459_v29 = vrot.slane %v5450_v63, %v11765_v57  ;;  %v8127_v5 = vld [vmem:[#allocation5 + $0x350] ss:$8 sps:$4 sm:$0xff]   ;;  %v8222_v63 = vld [vmem:[#allocation5 + $0x564] ss:$8 sps:$4 sm:$0xff]  }
0x1283   :  { %5699 = vmatprep.subr.bf16.mxu1 %v8115_v8  ;;  %v8132_v8 = vld [vmem:[#allocation5 + $0x344] ss:$8 sps:$4 sm:$0xff]  }
0x1284   :  { %7293 = vmatpush3.bf16.msra.mxu0 %v8064_v49 }
0x1285   :  { %7294 = vmatprep.subr.bf16.mxu0 %v8065_v15  ;;  %v5444_v15 = vrot.slane %v5435_v34, %v11765_v57  ;;  %v8211_v34 = vld [vmem:[#allocation5 + $0x480] ss:$8 sps:$4 sm:$0xff]  }
0x1286   :  { %5700 = vmatpush2.bf16.msra.mxu1 %v8117_v9  ;;  %v8130_v9 = vld [vmem:[#allocation5 + $0x340] ss:$8 sps:$4 sm:$0xff]  }
0x1287   :  { %5701 = vmatprep.subr.bf16.mxu1 %v8118_v42  ;;  %v8135_v42 = vld [vmem:[#allocation5 + $0x334] ss:$8 sps:$4 sm:$0xff]  }
0x1288   :  { %7295 = vmatpush3.bf16.msra.mxu0 %v8066_v7 }
0x1289   :  { %7296 = vmatprep.subr.bf16.mxu0 %v8067_v37 }
0x128a   :  { %5702 = vmatpush2.bf16.msra.mxu1 %v8120_v17  ;;  %v8133_v17 = vld [vmem:[#allocation5 + $0x330] ss:$8 sps:$4 sm:$0xff]  }
0x128b   :  { %5998 = vmatprep.subr.bf16.mxu1 %v8123_v31  ;;  %v8138_v31 = vld [vmem:[#allocation5 + $0x324] ss:$8 sps:$4 sm:$0xff]  }
0x128c   :  { %7297 = vmatpush3.bf16.msra.mxu0 %v8068_v14 }
0x128d   :  { %7298 = vmatprep.subr.bf16.mxu0 %v8069_v6 }
0x1290   :  { %7299 = vmatpush3.bf16.msra.mxu0 %v8070_v21 }
0x1291   :  { %7300 = vmatprep.subr.bf16.mxu0 %v8071_v20  ;;  %v8121_v20 = vld [vmem:[#allocation5 + $0x370] ss:$8 sps:$4 sm:$0xff]  }
0x1294   :  { %7301 = vmatpush3.bf16.msra.mxu0 %v8072_v19 }
0x1295   :  { %6442 = vmatprep.subr.bf16.mxu0 %v8147_v12 }
0x1297   :  { %5880 = vmatmul.mubr.bf16.vlgmr.msra.gmra.mxu0 %v5716_v38  ;;  %v8124_v38 = vld [vmem:[#allocation5 + $0x360] ss:$8 sps:$4 sm:$0xff]  }
0x1298   :  { %6443 = vmatpush1.bf16.msra.mxu0 %v8145_v39  ;;  %v8136_v39 = vld [vmem:[#allocation5 + $0x320] ss:$8 sps:$4 sm:$0xff]  }
0x1299   :  { %6444 = vmatprep.subr.bf16.mxu0 %v8150_v52  ;;  %v8141_v52 = vld [vmem:[#allocation5 + $0x314] ss:$8 sps:$4 sm:$0xff]  }
0x129c   :  { %6445 = vmatpush1.bf16.msra.mxu0 %v8148_v60 }
0x129d   :  { %6446 = vmatprep.subr.bf16.mxu0 %v8153_v16 }
0x12a0   :  { %6447 = vmatpush1.bf16.msra.mxu0 %v8151_v44  ;;  %v8139_v44 = vld [vmem:[#allocation5 + $0x310] ss:$8 sps:$4 sm:$0xff]  }
0x12a1   :  { %6448 = vmatprep.subr.bf16.mxu0 %v8156_v51 }
0x12a4   :  { %6449 = vmatpush1.bf16.msra.mxu0 %v8154_v43  ;;  %v8144_v43 = vld [vmem:[#allocation5 + $0x304] ss:$8 sps:$4 sm:$0xff]  }
0x12a5   :  { %6450 = vmatprep.subr.bf16.mxu0 %v8159_v3 }
0x12a8   :  { %6451 = vmatpush1.bf16.msra.mxu0 %v8157_v18 }
0x12a9   :  { %6452 = vmatprep.subr.bf16.mxu0 %v8162_v30  ;;  %v8142_v30 = vld [vmem:[#allocation5 + $0x300] ss:$8 sps:$4 sm:$0xff]  }
0x12ac   :  { %6453 = vmatpush1.bf16.msra.mxu0 %v8160_v58 }
0x12ad   :  { %6454 = vmatprep.subr.bf16.mxu0 %v8165_v35  ;;  %v8171_v35 = vld [vmem:[#allocation5 + $0x4f4] ss:$8 sps:$4 sm:$0xff]  }
0x12b0   :  { %6455 = vmatpush1.bf16.msra.mxu0 %v8163_v23  ;;  %v8169_v23 = vld [vmem:[#allocation5 + $0x4f0] ss:$8 sps:$4 sm:$0xff]  }
0x12b1   :  { %6456 = vmatprep.subr.bf16.mxu0 %v8168_v47 }
0x12b4   :  { %6457 = vmatpush1.bf16.msra.mxu0 %v8166_v61  ;;  %v8177_v61 = vld [vmem:[#allocation5 + $0x4e4] ss:$8 sps:$4 sm:$0xff]  }
0x12b5   :  { %6458 = vmatprep.subr.bf16.mxu0 %v8174_v45  ;;  %v8175_v45 = vld [vmem:[#allocation5 + $0x4e0] ss:$8 sps:$4 sm:$0xff]  }
0x12b8   :  { %6459 = vmatpush2.bf16.msra.mxu0 %v8172_v1  ;;  %v8183_v1 = vld [vmem:[#allocation5 + $0x4d4] ss:$8 sps:$4 sm:$0xff]  }
0x12b9   :  { %6460 = vmatprep.subr.bf16.mxu0 %v8180_v46  ;;  %v8181_v46 = vld [vmem:[#allocation5 + $0x4d0] ss:$8 sps:$4 sm:$0xff]  }
0x12bc   :  { %6461 = vmatpush2.bf16.msra.mxu0 %v8178_v24  ;;  %v8189_v24 = vld [vmem:[#allocation5 + $0x4c4] ss:$8 sps:$4 sm:$0xff]  }
0x12bd   :  { %6462 = vmatprep.subr.bf16.mxu0 %v8186_v36  ;;  %v8187_v36 = vld [vmem:[#allocation5 + $0x4c0] ss:$8 sps:$4 sm:$0xff]  }
0x12c0   :  { %6463 = vmatpush2.bf16.msra.mxu0 %v8184_v4  ;;  %v8195_v4 = vld [vmem:[#allocation5 + $0x4b4] ss:$8 sps:$4 sm:$0xff]  }
0x12c1   :  { %6464 = vmatprep.subr.bf16.mxu0 %v8192_v40  ;;  %v8193_v40 = vld [vmem:[#allocation5 + $0x4b0] ss:$8 sps:$4 sm:$0xff]  }
0x12c4   :  { %6465 = vmatpush2.bf16.msra.mxu0 %v8190_v11  ;;  %v8201_v11 = vld [vmem:[#allocation5 + $0x4a4] ss:$8 sps:$4 sm:$0xff]  }
0x12c5   :  { %6466 = vmatprep.subr.bf16.mxu0 %v8198_v55  ;;  %v8199_v55 = vld [vmem:[#allocation5 + $0x4a0] ss:$8 sps:$4 sm:$0xff]  }
0x12c8   :  { %6467 = vmatpush2.bf16.msra.mxu0 %v8196_v33  ;;  %v8207_v33 = vld [vmem:[#allocation5 + $0x494] ss:$8 sps:$4 sm:$0xff]  }
0x12c9   :  { %6468 = vmatprep.subr.bf16.mxu0 %v8204_v54  ;;  %v8205_v54 = vld [vmem:[#allocation5 + $0x490] ss:$8 sps:$4 sm:$0xff]  }
0x12cc   :  { %6469 = vmatpush2.bf16.msra.mxu0 %v8202_v32  ;;  %v8210_v32 = vld [vmem:[#allocation5 + $0x414] ss:$8 sps:$4 sm:$0xff]  }
0x12cd   :  { %6470 = vmatprep.subr.bf16.mxu0 %v8210_v32  ;;  %v8255_v32 = vld [vmem:[#allocation5 + $0x600] ss:$8 sps:$4 sm:$0xff]  }
0x12d0   :  { %6471 = vmatpush2.bf16.msra.mxu0 %v8208_v48  ;;  %v8256_v48 = vld [vmem:[#allocation5 + $0x580] ss:$8 sps:$4 sm:$0xff]  }
0x1337   :  { %v5425_v22 = vpop.f32.mrf.mxu0 }
0x1338   :  { %v5426_v26 = vadd.f32 %v5425_v22, %v5224_v41  ;;  %v8213_v41 = vld [vmem:[#allocation5 + $0x484] ss:$8 sps:$4 sm:$0xff]   ;;  %v8214_v22 = vld [vmem:[#allocation5 + $0x400] ss:$8 sps:$4 sm:$0xff]  }
0x1339   :  { %v5427_v50 = vpop.f32.mrf.mxu0 }
0x133a   :  { %v5432_v10 = vmax.f32 %v5426_v26, 0.0  ;;  %v5428_v49 = vadd.f32 %v5427_v50, %v5228_v56  ;;  %v8216_v56 = vld [vmem:[#allocation5 + $0x404] ss:$8 sps:$4 sm:$0xff]   ;;  %v8219_v26 = vld [vmem:[#allocation5 + $0x574] ss:$8 sps:$4 sm:$0xff]  }
0x133b   :  { %v5429_v0 = vpop.f32.mrf.mxu0  ;;  %6472 = vmatprep.subr.bf16.mxu0 %v8216_v56  ;;  %v8220_v50 = vld [vmem:[#allocation5 + $0x560] ss:$8 sps:$4 sm:$0xff]  }
0x133c   :  { %v5447_v7 = vmul.f32 %v5440_v13, %v5432_v10  ;;  %v5433_v37 = vmax.f32 %v5428_v49, 0.0  ;;  %6473 = vmatpush2.bf16.msra.mxu0 %v8214_v22  ;;  %v8217_v13 = vld [vmem:[#allocation5 + $0x570] ss:$8 sps:$4 sm:$0xff]   ;;  %v8225_v10 = vld [vmem:[#allocation5 + $0x554] ss:$8 sps:$4 sm:$0xff]  }
0x133d   :  { %v5430_v53 = vpop.f32.mrf.mxu0  ;;  %v8223_v49 = vld [vmem:[#allocation5 + $0x550] ss:$8 sps:$4 sm:$0xff]   ;;  %v8231_v0 = vld [vmem:[#allocation5 + $0x534] ss:$8 sps:$4 sm:$0xff]  }
0x133e   :  { %v5448_v14 = vmul.f32 %v5444_v15, %v5433_v37  ;;  %v10614_v6 = vadd.f32 %v5455_v59, %v5447_v7  ;;  %v8228_v15 = vld [vmem:[#allocation5 + $0x544] ss:$8 sps:$4 sm:$0xff]   ;;  %v8226_v59 = vld [vmem:[#allocation5 + $0x540] ss:$8 sps:$4 sm:$0xff]   ;;  %v8229_v7 = vld [vmem:[#allocation5 + $0x530] ss:$8 sps:$4 sm:$0xff]  }
0x133f   :  { %v8234_v37 = vld [vmem:[#allocation5 + $0x524] ss:$8 sps:$4 sm:$0xff]   ;;  %v8237_v53 = vld [vmem:[#allocation5 + $0x514] ss:$8 sps:$4 sm:$0xff]  }
0x1340   :  { %v10616_v28 = vadd.f32 %v5459_v29, %v5448_v14  ;;  %v5464_v19 = vpack.c.bf16 %v10614_v6, %v10614_v6  ;;  %v8232_v29 = vld [vmem:[#allocation5 + $0x520] ss:$8 sps:$4 sm:$0xff]   ;;  %v8235_v14 = vld [vmem:[#allocation5 + $0x510] ss:$8 sps:$4 sm:$0xff]  }
0x1342   :  { %v5465_v21 = vpack.c.bf16 %v10616_v28, %v10616_v28 }
0x1344   :  { %5703 = vmatprep.mubr.bf16.mxu1 %v5465_v21  ;;  %v8240_v21 = vld [vmem:[#allocation5 + $0x504] ss:$8 sps:$4 sm:$0xff]  }
0x1345   :  { %5704 = vmatmul.mubr.bf16.vlgmr.msra.gmra.mxu1 %v5464_v19  ;;  %v5499_v19 = vld [vmem:[#allocation14 + $0x3] ss:$8 sm:$0x3] }
0x1346   :  { %5999 = vmatpush1.bf16.msra.mxu1 %v8121_v20  ;;  %6030 = vmatprep.mubr.bf16.mxu1 %v11721_v27  ;;  %v5750_v27 = vld [vmem:[#allocation14 + $0x4] ss:$0 sm:$0xff]  ;;  %v8238_v20 = vld [vmem:[#allocation5 + $0x500] ss:$8 sps:$4 sm:$0xff]  }
0x1347   :  { %6000 = vmatprep.subr.bf16.mxu1 %v8126_v62  ;;  %v5504_v62 = vrot.slane %v5499_v19, %v11764_v25 }
0x134a   :  { %6001 = vmatpush1.bf16.msra.mxu1 %v8124_v38  ;;  %v5508_v38 = vrot.slane %v5499_v19, %v11765_v57 }
0x134b   :  { %6002 = vmatprep.subr.bf16.mxu1 %v8129_v2 }
0x134e   :  { %6003 = vmatpush1.bf16.msra.mxu1 %v8127_v5 }
0x134f   :  { %6004 = vmatprep.subr.bf16.mxu1 %v8132_v8 }
0x1352   :  { %6005 = vmatpush1.bf16.msra.mxu1 %v8130_v9 }
0x1353   :  { %6006 = vmatprep.subr.bf16.mxu1 %v8135_v42 }
0x1356   :  { %6007 = vmatpush1.bf16.msra.mxu1 %v8133_v17 }
0x1357   :  { %v7302_v12 = vpop.f32.mrf.mxu0  ;;  %6008 = vmatprep.subr.bf16.mxu1 %v8138_v31 }
0x1359   :  { %v7303_v60 = vpop.f32.mrf.mxu0 }
0x135a   :  { %v7304_v16 = vadd.f32 %v7303_v60, %v7302_v12  ;;  %6009 = vmatpush1.bf16.msra.mxu1 %v8136_v39 }
0x135b   :  { %v7305_v51 = vpop.f32.mrf.mxu0  ;;  %6010 = vmatprep.subr.bf16.mxu1 %v8141_v52 }
0x135c   :  { %v5882_v3 = vadd.f32 %v7304_v16, %v5750_v27  ;;  %v5906_v27 = vld [vmem:[#allocation14 + $0x5] ss:$8 sm:$0x3] }
0x135d   :  { %v7306_v18 = vpop.f32.mrf.mxu0  ;;  %v5911_v60 = vrot.slane %v5906_v27, %v11764_v25  ;;  %v5915_v16 = vrot.slane %v5906_v27, %v11765_v57 }
0x135e   :  { %6011 = vmatpush1.bf16.msra.mxu1 %v8139_v44  ;;  %v5887_v58 = vmax.f32 %v5882_v3, 0.0 }
0x135f   :  { %6012 = vmatprep.subr.bf16.mxu1 %v8144_v43 }
0x1360   :  { %v5888_v47 = vpack.c.bf16 %v5887_v58, %v5887_v58 }
0x1362   :  { %6013 = vmatpush1.bf16.msra.mxu1 %v8142_v30 }
0x1363   :  { %6483 = vmatprep.subr.bf16.mxu1 %v8171_v35 }
0x1365   :  { %6031 = vmatmul.mubr.bf16.vlgmr.msra.gmra.mxu1 %v5888_v47  ;;  %v8242_v47 = vld [vmem:[#allocation5 + $0x5f0] ss:$8 sps:$4 sm:$0xff]  }
0x1366   :  { %6484 = vmatpush1.bf16.msra.mxu1 %v8169_v23  ;;  %v8241_v23 = vld [vmem:[#allocation5 + $0x670] ss:$8 sps:$4 sm:$0xff]  }
0x1367   :  { %6485 = vmatprep.subr.bf16.mxu1 %v8177_v61  ;;  %v8243_v61 = vld [vmem:[#allocation5 + $0x660] ss:$8 sps:$4 sm:$0xff]   ;;  %7308 = vmatprep.subr.bf16.mxu0 %v8241_v23 }
0x136a   :  { %6486 = vmatpush1.bf16.msra.mxu1 %v8175_v45  ;;  %v8244_v45 = vld [vmem:[#allocation5 + $0x5e0] ss:$8 sps:$4 sm:$0xff]  }
0x136b   :  { %6487 = vmatprep.subr.bf16.mxu1 %v8183_v1  ;;  %v8245_v1 = vld [vmem:[#allocation5 + $0x650] ss:$8 sps:$4 sm:$0xff]  }
0x136e   :  { %6488 = vmatpush1.bf16.msra.mxu1 %v8181_v46  ;;  %v8246_v46 = vld [vmem:[#allocation5 + $0x5d0] ss:$8 sps:$4 sm:$0xff]  }
0x136f   :  { %6489 = vmatprep.subr.bf16.mxu1 %v8189_v24  ;;  %v8247_v24 = vld [vmem:[#allocation5 + $0x640] ss:$8 sps:$4 sm:$0xff]  }
0x1372   :  { %6490 = vmatpush1.bf16.msra.mxu1 %v8187_v36  ;;  %v8248_v36 = vld [vmem:[#allocation5 + $0x5c0] ss:$8 sps:$4 sm:$0xff]  }
0x1373   :  { %6491 = vmatprep.subr.bf16.mxu1 %v8195_v4  ;;  %v8249_v4 = vld [vmem:[#allocation5 + $0x630] ss:$8 sps:$4 sm:$0xff]  }
0x1376   :  { %6492 = vmatpush1.bf16.msra.mxu1 %v8193_v40  ;;  %v8250_v40 = vld [vmem:[#allocation5 + $0x5b0] ss:$8 sps:$4 sm:$0xff]  }
0x1377   :  { %6493 = vmatprep.subr.bf16.mxu1 %v8201_v11  ;;  %v8251_v11 = vld [vmem:[#allocation5 + $0x620] ss:$8 sps:$4 sm:$0xff]  }
0x137a   :  { %6494 = vmatpush1.bf16.msra.mxu1 %v8199_v55  ;;  %v8252_v55 = vld [vmem:[#allocation5 + $0x5a0] ss:$8 sps:$4 sm:$0xff]  }
0x137b   :  { %6495 = vmatprep.subr.bf16.mxu1 %v8207_v33  ;;  %v8253_v33 = vld [vmem:[#allocation5 + $0x610] ss:$8 sps:$4 sm:$0xff]  }
0x137e   :  { %6496 = vmatpush1.bf16.msra.mxu1 %v8205_v54  ;;  %v8254_v54 = vld [vmem:[#allocation5 + $0x590] ss:$8 sps:$4 sm:$0xff]  }
0x137f   :  { %6497 = vmatprep.subr.bf16.mxu1 %v8213_v41 }
0x1382   :  { %6498 = vmatpush1.bf16.msra.mxu1 %v8211_v34 }
0x1383   :  { %6499 = vmatprep.subr.bf16.mxu1 %v8219_v26  ;;  %v6110_v26 = vld [vmem:[#allocation14 + $0x6] ss:$8 sm:$0x3] }
0x1386   :  { %6500 = vmatpush2.bf16.msra.mxu1 %v8217_v13  ;;  %v6115_v13 = vrot.slane %v6110_v26, %v11764_v25 }
0x1387   :  { %6501 = vmatprep.subr.bf16.mxu1 %v8222_v63  ;;  %v6119_v63 = vrot.slane %v6110_v26, %v11765_v57 }
0x138a   :  { %6502 = vmatpush2.bf16.msra.mxu1 %v8220_v50 }
0x138b   :  { %6503 = vmatprep.subr.bf16.mxu1 %v8225_v10 }
0x138e   :  { %6504 = vmatpush2.bf16.msra.mxu1 %v8223_v49 }
0x138f   :  { %6505 = vmatprep.subr.bf16.mxu1 %v8228_v15 }
0x1392   :  { %6506 = vmatpush2.bf16.msra.mxu1 %v8226_v59 }
0x1393   :  { %6507 = vmatprep.subr.bf16.mxu1 %v8231_v0 }
0x1396   :  { %6508 = vmatpush2.bf16.msra.mxu1 %v8229_v7 }
0x1397   :  { %6509 = vmatprep.subr.bf16.mxu1 %v8234_v37 }
0x139a   :  { %6510 = vmatpush2.bf16.msra.mxu1 %v8232_v29 }
0x139b   :  { %6511 = vmatprep.subr.bf16.mxu1 %v8237_v53 }
0x139e   :  { %6512 = vmatpush2.bf16.msra.mxu1 %v8235_v14 }
0x139f   :  { %6513 = vmatprep.subr.bf16.mxu1 %v8240_v21 }
0x13a2   :  { %6514 = vmatpush2.bf16.msra.mxu1 %v8238_v20 }
0x1405   :  { %v5705_v2 = vpop.f32.mrf.mxu1 }
0x1406   :  { %v5706_v5 = vadd.f32 %v5705_v2, %v5504_v62  ;;  %v6560_v62 = vld [vmem:[#allocation14 + $0x7] ss:$0 sm:$0xff] }
0x1407   :  { %v5707_v8 = vpop.f32.mrf.mxu1 }
0x1408   :  { %v5708_v9 = vadd.f32 %v5707_v8, %v5508_v38  ;;  %v5712_v42 = vadd.f32 %v5706_v5, %v10614_v6  ;;  %v6698_v5 = vld [vmem:[#allocation14 + $0x11] ss:$0 sm:$0xff] }
0x1409   :  { %v5709_v17 = vpop.f32.mrf.mxu1 }
0x140a   :  { %v5713_v31 = vadd.f32 %v5708_v9, %v10616_v28  ;;  %v6041_v52 = vpack.c.bf16 %v5712_v42, %v5712_v42  ;;  %v6702_v42 = vld [vmem:[#allocation14 + $0x10] ss:$0 sm:$0xff] }
0x140b   :  { %v5710_v39 = vpop.f32.mrf.mxu1 }
0x140c   :  { %v6042_v12 = vpack.c.bf16 %v5713_v31, %v5713_v31 }
0x140e   :  { %6474 = vmatprep.mubr.bf16.mxu0 %v6042_v12 }
0x140f   :  { %6475 = vmatmul.mubr.bf16.vlgmr.msra.gmra.mxu0 %v6041_v52 }
0x1410   :  { %7309 = vmatpush3.bf16.msra.mxu0 %v8242_v47 }
0x1411   :  { %7310 = vmatprep.subr.bf16.mxu0 %v8243_v61 }
0x1414   :  { %7311 = vmatpush3.bf16.msra.mxu0 %v8244_v45 }
0x1415   :  { %7312 = vmatprep.subr.bf16.mxu0 %v8245_v1 }
0x1418   :  { %7313 = vmatpush3.bf16.msra.mxu0 %v8246_v46 }
0x1419   :  { %7314 = vmatprep.subr.bf16.mxu0 %v8247_v24 }
0x141c   :  { %7315 = vmatpush3.bf16.msra.mxu0 %v8248_v36 }
0x141d   :  { %7316 = vmatprep.subr.bf16.mxu0 %v8249_v4 }
0x1420   :  { %7317 = vmatpush3.bf16.msra.mxu0 %v8250_v40 }
0x1421   :  { %7318 = vmatprep.subr.bf16.mxu0 %v8251_v11 }
0x1424   :  { %7319 = vmatpush3.bf16.msra.mxu0 %v8252_v55 }
0x1425   :  { %v6032_v44 = vpop.f32.mrf.mxu1  ;;  %7320 = vmatprep.subr.bf16.mxu0 %v8253_v33 }
0x1426   :  { %v6033_v51 = vadd.f32 %v6032_v44, %v5911_v60 }
0x1427   :  { %v6034_v43 = vpop.f32.mrf.mxu1 }
0x1428   :  { %v6035_v3 = vadd.f32 %v6034_v43, %v5915_v16  ;;  %v6039_v18 = vmax.f32 %v6033_v51, 0.0  ;;  %7321 = vmatpush3.bf16.msra.mxu0 %v8254_v54 }
0x1429   :  { %v6036_v30 = vpop.f32.mrf.mxu1  ;;  %7322 = vmatprep.subr.bf16.mxu0 %v8255_v32 }
0x142a   :  { %v6040_v6 = vmax.f32 %v6035_v3, 0.0  ;;  %v6043_v28 = vpack.c.bf16 %v6039_v18, %v6039_v18 }
0x142b   :  { %v6037_v58 = vpop.f32.mrf.mxu1 }
0x142c   :  { %v6044_v35 = vpack.c.bf16 %v6040_v6, %v6040_v6  ;;  %7323 = vmatpush3.bf16.msra.mxu0 %v8256_v48 }
0x142e   :  { %6515 = vmatprep.mubr.bf16.mxu1 %v6044_v35 }
0x142f   :  { %6516 = vmatmul.mubr.bf16.vlgmr.msra.gmra.mxu1 %v6043_v28 }
0x14cf   :  { %v6476_v41 = vpop.f32.mrf.mxu0 }
0x14d0   :  { %v6477_v50 = vadd.f32 %v6476_v41, %v6115_v13 }
0x14d1   :  { %v6478_v34 = vpop.f32.mrf.mxu0 }
0x14d2   :  { %v6479_v49 = vadd.f32 %v6478_v34, %v6119_v63 }
0x14d3   :  { %v6480_v56 = vpop.f32.mrf.mxu0 }
0x14d5   :  { %v6481_v22 = vpop.f32.mrf.mxu0 }
0x14ef   :  { %v6517_v10 = vpop.f32.mrf.mxu1 }
0x14f0   :  { %v6518_v15 = vadd.f32 %v6517_v10, %v6477_v50 }
0x14f1   :  { %v6519_v59 = vpop.f32.mrf.mxu1 }
0x14f2   :  { %v6520_v0 = vadd.f32 %v6519_v59, %v6479_v49  ;;  %v6524_v7 = vmax.f32 %v6518_v15, 0.0 }
0x14f3   :  { %v6521_v37 = vpop.f32.mrf.mxu1 }
0x14f4   :  { %v6525_v29 = vmax.f32 %v6520_v0, 0.0  ;;  %v6526_v21 = vpack.c.bf16 %v6524_v7, %v6524_v7 }
0x14f5   :  { %v6522_v53 = vpop.f32.mrf.mxu1 }
0x14f6   :  { %v6527_v14 = vpack.c.bf16 %v6525_v29, %v6525_v29 }
0x14f8   :  { %6689 = vmatprep.mubr.bf16.mxu0 %v6527_v14 }
0x14f9   :  { %6690 = vmatmul.mubr.bf16.vlgmr.msra.gmra.mxu0 %v6526_v21 }
0x15b9   :  { %v7324_v20 = vpop.f32.mrf.mxu0 }
0x15bb   :  { %v7325_v19 = vpop.f32.mrf.mxu0 }
0x15bc   :  { %v7326_v25 = vadd.f32 %v7325_v19, %v7324_v20 }
0x15bd   :  { %v7327_v38 = vpop.f32.mrf.mxu0 }
0x15be   :  { %v6692_v57 = vadd.f32 %v7326_v25, %v6560_v62 }
0x15bf   :  { %v7328_v2 = vpop.f32.mrf.mxu0 }
0x15c0   :  { %v6697_v8 = vmax.f32 %v6692_v57, 0.0 }
0x15c2   :  { %v6699_v9 = vmul.f32 %v6698_v5, %v6697_v8 }
0x15c4   :  { %6700 = vadd.xlane.f32.xlu0 %v6699_v9 }
0x164d   :  { %v6701_v17 = vpop.xlane.xlu0 %6700 }
0x164e   :  { %v6703_v31 = vadd.f32 %v6702_v42, %v6701_v17 }
0x1650   :  { %v6704_v39 = vmax.f32 %v6703_v31, 0.0 }
0x1652   :  { %v6705_v12 = vmax.f32 %v6704_v39, 0.0 }
0x1654   :  { %v6706_v52 = vmin.f32 %v6705_v12, 1000.0 }
0x1656   :  { %6708 = vst.msk [vmem:[%s10643_s9] sm:$0xff] %vm6707_vm1, %v6706_v52 }
0x1657   :  { %6713 = vsyncpa [#allocation8], 1 }
0x1658   :  { %6714 = vsyncpa [#allocation10], 1 }
0x1659   :  { %6715 = vsyncpa [#allocation13], 1 }
0x165a   :  { %6716 = vsyncmov [#allocation6] }
0x165d   :  { %s6717_s24 = vpop.sfrf %6716 }
0x165e   :  { %p7285_p2 = scmp.ne.s32.totalorder %s6717_s24, 0 }
0x1660   :  { %6721 = shalt.err (%p7285_p2)  }

</bundles_post_ra>
